<compile_context>
chip_gen: v6e
topology: v6e:2x2x1
jax: 0.10.0
libtpu: 0.0.40
codegen_flags: <defaults>
</compile_context>

<pallas_src>
import jax
import jax.numpy as jnp
from jax.experimental import pallas as pl
from jax.experimental.pallas import tpu as pltpu

NUM_GROUPS = 8     # GroupNorm groups in DoubleConv_Up
COT_GROUPS = 4     # grouped conv inside CoTAttention.key_embed
KSIZE = 3          # CoTAttention kernel_size
EPS = 1e-5


def _round_up(x, m):
    return ((x + m - 1) // m) * m


# --------------------- batched K-tiled matmul (MXU) kernels ------------------

def _bmm_kernel(a_ref, b_ref, o_ref, acc_ref):
    @pl.when(pl.program_id(2) == 0)
    def _init():
        acc_ref[...] = jnp.zeros_like(acc_ref)

    acc_ref[...] += jnp.dot(a_ref[...], b_ref[...],
                            preferred_element_type=jnp.float32)

    @pl.when(pl.program_id(2) == pl.num_programs(2) - 1)
    def _fin():
        o_ref[...] = acc_ref[...].astype(o_ref.dtype)


def _bmm_bias_kernel(a_ref, b_ref, bias_ref, o_ref, acc_ref):
    @pl.when(pl.program_id(2) == 0)
    def _init():
        acc_ref[...] = jnp.zeros_like(acc_ref)

    acc_ref[...] += jnp.dot(a_ref[...], b_ref[...],
                            preferred_element_type=jnp.float32)

    @pl.when(pl.program_id(2) == pl.num_programs(2) - 1)
    def _fin():
        o_ref[...] = (acc_ref[...] + bias_ref[...]).astype(o_ref.dtype)


def pallas_batched_matmul(a, b, bias=None):
    """a: (G, M, K), b: (G, K, N) -> (G, M, N) float32.

    bf16 MXU inputs, f32 VMEM accumulator, optional fused bias (N,)."""
    G, M, K = a.shape
    _, _, N = b.shape
    a = a.astype(jnp.bfloat16)
    b = b.astype(jnp.bfloat16)

    # M tile: biggest that divides (or, failing that, 256 with padding).
    if M % 512 == 0 and M >= 512:
        TM = 512
    elif M % 256 == 0 and M >= 256:
        TM = 256
    elif M >= 256:
        TM = 256
    else:
        TM = _round_up(M, 8)
    Mp = _round_up(M, TM)

    # K tile: full K (no padding copy) when it fits comfortably, else 512.
    if K > 1024:
        TK = 512
        Kp = _round_up(K, TK)
    else:
        TK = K
        Kp = K

    if Mp != M or Kp != K:
        a = jnp.pad(a, ((0, 0), (0, Mp - M), (0, Kp - K)))
    if Kp != K:
        b = jnp.pad(b, ((0, 0), (0, Kp - K), (0, 0)))

    grid = (G, Mp // TM, Kp // TK)
    a_spec = pl.BlockSpec((None, TM, TK), lambda g, i, k: (g, i, k))
    b_spec = pl.BlockSpec((None, TK, N), lambda g, i, k: (g, k, 0))
    o_spec = pl.BlockSpec((None, TM, N), lambda g, i, k: (g, i, 0))
    cparams = pltpu.CompilerParams(
        dimension_semantics=("parallel", "parallel", "arbitrary"))

    if bias is None:
        out = pl.pallas_call(
            _bmm_kernel,
            out_shape=jax.ShapeDtypeStruct((G, Mp, N), jnp.float32),
            grid=grid,
            in_specs=[a_spec, b_spec],
            out_specs=o_spec,
            scratch_shapes=[pltpu.VMEM((TM, N), jnp.float32)],
            compiler_params=cparams,
        )(a, b)
    else:
        bias_arr = jnp.broadcast_to(
            bias.astype(jnp.float32)[None, None, :], (G, 1, N))
        out = pl.pallas_call(
            _bmm_bias_kernel,
            out_shape=jax.ShapeDtypeStruct((G, Mp, N), jnp.float32),
            grid=grid,
            in_specs=[a_spec, b_spec,
                      pl.BlockSpec((None, 1, N), lambda g, i, k: (g, 0, 0))],
            out_specs=o_spec,
            scratch_shapes=[pltpu.VMEM((TM, N), jnp.float32)],
            compiler_params=cparams,
        )(a, b, bias_arr)

    if Mp != M:
        out = out[:, :M, :]
    return out


def pallas_matmul(a, b, bias=None):
    """(M, K) x (K, N) -> (M, N) f32 via the batched kernel with G=1."""
    return pallas_batched_matmul(a[None], b[None], bias)[0]


# -------------------- CoT combine: softmax(att)*v + k1 kernel ----------------

def _softmax_combine_kernel(att_ref, v_ref, k1_ref, o_ref):
    a = att_ref[...]                                  # (S, TC) f32
    m = jnp.max(a, axis=0, keepdims=True)
    e = jnp.exp(a - m)
    s = jnp.sum(e, axis=0, keepdims=True)
    inv = pl.reciprocal(s, approx=True)               # EUP, frees the VPU
    o_ref[...] = e * inv * v_ref[...] + k1_ref[...]


def pallas_softmax_combine(att, v, k1):
    """att, v, k1: (N, S, C) f32; softmax over S; returns softmax*v + k1."""
    N, S, C = att.shape
    TC = 128 if C % 128 == 0 else C
    spec = pl.BlockSpec((None, S, TC), lambda n, c: (n, 0, c))
    return pl.pallas_call(
        _softmax_combine_kernel,
        out_shape=jax.ShapeDtypeStruct((N, S, C), jnp.float32),
        grid=(N, C // TC),
        in_specs=[spec, spec, spec],
        out_specs=spec,
        compiler_params=pltpu.CompilerParams(
            dimension_semantics=("parallel", "parallel")),
    )(att, v, k1)


# --------------------------- conv / norm helpers -----------------------------
# All activations are channels-last: (N, H, W, D, C).

def conv3x3_cl(x, weight, bias=None):
    """Conv3d k=3, stride 1, pad 1. weight: (Cout, Cin, 3, 3, 3) (PyTorch)."""
    N, H, W, D, Cin = x.shape
    Cout = weight.shape[0]
    xp = jnp.pad(x.astype(jnp.bfloat16),
                 ((0, 0), (1, 1), (1, 1), (1, 1), (0, 0)))
    taps = [xp[:, kh:kh + H, kw:kw + W, kd:kd + D, :]
            for kh in range(3) for kw in range(3) for kd in range(3)]
    p = jnp.concatenate(taps, axis=-1).reshape(N * H * W * D, 27 * Cin)
    wm = jnp.transpose(weight, (2, 3, 4, 1, 0)).reshape(27 * Cin, Cout)
    out = pallas_matmul(p, wm, bias)                  # (M, Cout) f32
    return out.reshape(N, H, W, D, Cout)


def conv3x3_grouped_cl(x, weight, groups):
    """Grouped Conv3d k=3, pad 1, no bias, as ONE pallas_call (grid over groups).
    weight: (Cout, Cin//groups, 3, 3, 3), Cout == Cin here."""
    N, H, W, D, Cin = x.shape
    Cout = weight.shape[0]
    cg = Cin // groups
    cog = Cout // groups
    M = N * H * W * D
    xp = jnp.pad(x.astype(jnp.bfloat16),
                 ((0, 0), (1, 1), (1, 1), (1, 1), (0, 0)))
    taps = [xp[:, kh:kh + H, kw:kw + W, kd:kd + D, :]
            for kh in range(3) for kw in range(3) for kd in range(3)]
    # one concat + one transpose instead of groups*27 slice/concat ops
    p = jnp.concatenate(taps, axis=-1).reshape(M, 27, groups, cg)
    a = jnp.transpose(p, (2, 0, 1, 3)).reshape(groups, M, 27 * cg)
    wg = weight.reshape(groups, cog, cg, 3, 3, 3)
    wm = jnp.transpose(wg, (0, 3, 4, 5, 2, 1)).reshape(groups, 27 * cg, cog)
    out = pallas_batched_matmul(a, wm)                # (G, M, cog) f32
    out = jnp.transpose(out, (1, 0, 2)).reshape(N, H, W, D, Cout)
    return out


def conv1x1_cl(x, weight, bias=None):
    """1x1x1 Conv3d. weight: (Cout, Cin)."""
    N, H, W, D, Cin = x.shape
    Cout = weight.shape[0]
    out = pallas_matmul(x.reshape(-1, Cin), weight.T, bias)
    return out.reshape(N, H, W, D, Cout)


def group_norm_cl(x, num_groups, gamma, beta):
    N, H, W, D, C = x.shape
    xg = x.reshape(N, H, W, D, num_groups, C // num_groups)
    mean = jnp.mean(xg, axis=(1, 2, 3, 5), keepdims=True)
    var = jnp.var(xg, axis=(1, 2, 3, 5), keepdims=True)
    xn = ((xg - mean) * jax.lax.rsqrt(var + EPS)).reshape(N, H, W, D, C)
    return xn * gamma + beta


def batch_norm_cl(x, gamma, beta):
    # training-mode BatchNorm3d forward (batch statistics, biased variance)
    # TODO(synk): running-stat update side effect of nn.BatchNorm3d not modeled
    mean = jnp.mean(x, axis=(0, 1, 2, 3), keepdims=True)
    var = jnp.var(x, axis=(0, 1, 2, 3), keepdims=True)
    return (x - mean) * jax.lax.rsqrt(var + EPS) * gamma + beta


def relu(x):
    return jnp.maximum(x, 0.0)


# ------------------------------ model forward --------------------------------

def cot_attention_cl(x, p):
    N, H, W, D, C = x.shape
    S = H * W * D
    # key_embed: grouped 3x3x3 conv -> BN -> ReLU
    k1 = relu(batch_norm_cl(conv3x3_grouped_cl(x, p["key_w"], COT_GROUPS),
                            p["bnk_g"], p["bnk_b"]))
    # value_embed: 1x1 conv -> BN
    v = batch_norm_cl(conv1x1_cl(x, p["val_w"]), p["bnv_g"], p["bnv_b"])
    # attention_embed on concat([k1, x]) along channels (bf16 intermediate)
    y = jnp.concatenate([k1.astype(jnp.bfloat16), x.astype(jnp.bfloat16)],
                        axis=-1)
    a = relu(batch_norm_cl(conv1x1_cl(y, p["att1_w"]), p["bna_g"], p["bna_b"]))
    # fold the mean over KSIZE*KSIZE into the att2 weights (mean is linear)
    mid = p["att1_w"].shape[0]
    w_avg = p["att2_w"].reshape(C, KSIZE * KSIZE, mid).mean(axis=1)   # (C, mid)
    b_avg = p["att2_b"].reshape(C, KSIZE * KSIZE).mean(axis=1)        # (C,)
    att = conv1x1_cl(a, w_avg, b_avg)                                  # (N,H,W,D,C)
    # k2 = softmax_S(att) * v ;  out = k1 + k2   (fused Pallas kernel)
    out = pallas_softmax_combine(att.reshape(N, S, C),
                                 v.reshape(N, S, C),
                                 k1.reshape(N, S, C))
    return out.reshape(N, H, W, D, C)


def double_conv_up_forward(x, p):
    """x: (N, Cin, H, W, D) PyTorch layout -> (N, Cout, H, W, D)."""
    x_cl = jnp.transpose(x, (0, 2, 3, 4, 1))                 # channels-last
    h = conv3x3_cl(x_cl, p["conv1_w"], p["conv1_b"])          # bias fused
    h = relu(group_norm_cl(h, NUM_GROUPS, p["gn1_g"], p["gn1_b"]))
    h = cot_attention_cl(h, p)
    h = relu(group_norm_cl(h, NUM_GROUPS, p["gn2_g"], p["gn2_b"]))
    return jnp.transpose(h, (0, 4, 1, 2, 3))                  # back to NCDHW


# ------------------------------ parameter init -------------------------------

def init_params(key, in_c, out_c):
    ks = jax.random.split(key, 8)
    c = out_c
    mid = 2 * c // 4
    p = {
        "conv1_w": jax.random.normal(ks[0], (c, in_c, 3, 3, 3), jnp.float32) * 0.1,
        "conv1_b": jax.random.normal(ks[1], (c,), jnp.float32) * 0.1,
        "gn1_g": jnp.ones((c,), jnp.float32), "gn1_b": jnp.zeros((c,), jnp.float32),
        "key_w": jax.random.normal(ks[2], (c, c // COT_GROUPS, 3, 3, 3), jnp.float32) * 0.1,
        "bnk_g": jnp.ones((c,), jnp.float32), "bnk_b": jnp.zeros((c,), jnp.float32),
        "val_w": jax.random.normal(ks[3], (c, c), jnp.float32) * 0.1,
        "bnv_g": jnp.ones((c,), jnp.float32), "bnv_b": jnp.zeros((c,), jnp.float32),
        "att1_w": jax.random.normal(ks[4], (mid, 2 * c), jnp.float32) * 0.1,
        "bna_g": jnp.ones((mid,), jnp.float32), "bna_b": jnp.zeros((mid,), jnp.float32),
        "att2_w": jax.random.normal(ks[5], (KSIZE * KSIZE * c, mid), jnp.float32) * 0.1,
        "att2_b": jax.random.normal(ks[6], (KSIZE * KSIZE * c,), jnp.float32) * 0.1,
        "gn2_g": jnp.ones((c,), jnp.float32), "gn2_b": jnp.zeros((c,), jnp.float32),
    }
    return p


if __name__ == "__main__":
    key = jax.random.PRNGKey(0)
    kx, kp = jax.random.split(key)
    N, Cin, Cout, H, W, D = 2, 4, 16, 8, 8, 8
    x = jax.random.normal(kx, (N, Cin, H, W, D), jnp.float32)
    params = init_params(kp, Cin, Cout)

    fwd = jax.jit(double_conv_up_forward)
    out = fwd(x, params)
    out = jax.block_until_ready(out)

    assert out.shape == (N, Cout, H, W, D), out.shape
    assert bool(jnp.all(jnp.isfinite(out)))
    print("KERNEL_OK")
</pallas_src>

<mosaic_0001>
module attributes {stable_mosaic.version = 11 : i64} {
  func.func @_bmm_bias_kernel(%arg0: i32, %arg1: i32, %arg2: i32, %arg3: memref<1x512x108xbf16, #tpu.memory_space<vmem>>, %arg4: memref<1x108x16xbf16, #tpu.memory_space<vmem>>, %arg5: memref<1x1x16xf32, #tpu.memory_space<vmem>>, %arg6: memref<1x512x16xf32, #tpu.memory_space<vmem>>, %arg7: memref<512x16xf32, #tpu.memory_space<vmem>>) attributes {dimension_semantics = [#tpu.dimension_semantics<parallel>, #tpu.dimension_semantics<parallel>, #tpu.dimension_semantics<arbitrary>], iteration_bounds = array<i64: 1, 2, 1>, scalar_prefetch = 0 : i64, scratch_operands = 1 : i64, tpu.core_type = #tpu.core_type<tc>, window_params = [{transform_indices = @transform_0, window_bounds = array<i64: 1, 512, 108>}, {transform_indices = @transform_1, window_bounds = array<i64: 1, 108, 16>}, {transform_indices = @transform_2, window_bounds = array<i64: 1, 1, 16>}, {transform_indices = @transform_3, window_bounds = array<i64: 1, 512, 16>}]} {
    %c0_i32 = arith.constant 0 : i32
    %0 = arith.cmpi eq, %arg2, %c0_i32 : i32
    %1 = arith.extui %0 : i1 to i32
    %c0_i32_0 = arith.constant 0 : i32
    %2 = arith.cmpi ne, %1, %c0_i32_0 : i32
    scf.if %2 {
      %cst_12 = arith.constant 0.000000e+00 : f32
      %14 = vector.broadcast %cst_12 : f32 to vector<512x16xf32>
      %c0_13 = arith.constant 0 : index
      %c0_14 = arith.constant 0 : index
      %15 = vector.load %arg7[%c0_13, %c0_14] : memref<512x16xf32, #tpu.memory_space<vmem>>, vector<512x16xf32>
      tpu.vector_store %arg7[%c0_13, %c0_14], %14 {strides = array<i32>} : memref<512x16xf32, #tpu.memory_space<vmem>>, vector<512x16xf32>,
    } else {
    }
    %c0 = arith.constant 0 : index
    %c0_1 = arith.constant 0 : index
    %3 = vector.load %arg7[%c0, %c0_1] : memref<512x16xf32, #tpu.memory_space<vmem>>, vector<512x16xf32>
    %c0_2 = arith.constant 0 : index
    %c0_3 = arith.constant 0 : index
    %c0_4 = arith.constant 0 : index
    %4 = vector.load %arg3[%c0_2, %c0_3, %c0_4] : memref<1x512x108xbf16, #tpu.memory_space<vmem>>, vector<1x512x108xbf16>
    %5 = vector.shape_cast %4 : vector<1x512x108xbf16> to vector<512x108xbf16>
    %c0_5 = arith.constant 0 : index
    %c0_6 = arith.constant 0 : index
    %c0_7 = arith.constant 0 : index
    %6 = vector.load %arg4[%c0_5, %c0_6, %c0_7] : memref<1x108x16xbf16, #tpu.memory_space<vmem>>, vector<1x108x16xbf16>
    %7 = vector.shape_cast %6 : vector<1x108x16xbf16> to vector<108x16xbf16>
    %cst = arith.constant dense<0.000000e+00> : vector<512x16xf32>
    %8 = tpu.matmul %5, %7, %cst {dimension_numbers = #tpu.dot_dimension_numbers<[1], [0], [0], [1], [0, 0, 1, 1], [], []>} : vector<512x108xbf16>, vector<108x16xbf16>, vector<512x16xf32> -> vector<512x16xf32>
    %9 = arith.addf %3, %8 : vector<512x16xf32>
    %c0_8 = arith.constant 0 : index
    %c0_9 = arith.constant 0 : index
    %10 = vector.load %arg7[%c0_8, %c0_9] : memref<512x16xf32, #tpu.memory_space<vmem>>, vector<512x16xf32>
    tpu.vector_store %arg7[%c0_8, %c0_9], %9 {strides = array<i32>} : memref<512x16xf32, #tpu.memory_space<vmem>>, vector<512x16xf32>,
    %c0_i32_10 = arith.constant 0 : i32
    %11 = arith.cmpi eq, %arg2, %c0_i32_10 : i32
    %12 = arith.extui %11 : i1 to i32
    %c0_i32_11 = arith.constant 0 : i32
    %13 = arith.cmpi ne, %12, %c0_i32_11 : i32
    scf.if %13 {
      %c0_12 = arith.constant 0 : index
      %c0_13 = arith.constant 0 : index
      %14 = vector.load %arg7[%c0_12, %c0_13] : memref<512x16xf32, #tpu.memory_space<vmem>>, vector<512x16xf32>
      %c0_14 = arith.constant 0 : index
      %c0_15 = arith.constant 0 : index
      %c0_16 = arith.constant 0 : index
      %15 = vector.load %arg5[%c0_14, %c0_15, %c0_16] : memref<1x1x16xf32, #tpu.memory_space<vmem>>, vector<1x1x16xf32>
      %16 = vector.shape_cast %15 : vector<1x1x16xf32> to vector<1x16xf32>
      %17 = vector.broadcast %16 : vector<1x16xf32> to vector<512x16xf32>
      %18 = arith.addf %14, %17 : vector<512x16xf32>
      %c0_17 = arith.constant 0 : index
      %c0_18 = arith.constant 0 : index
      %c0_19 = arith.constant 0 : index
      %19 = vector.load %arg6[%c0_17, %c0_18, %c0_19] : memref<1x512x16xf32, #tpu.memory_space<vmem>>, vector<1x512x16xf32>
      %20 = vector.shape_cast %19 : vector<1x512x16xf32> to vector<512x16xf32>
      %21 = vector.shape_cast %18 : vector<512x16xf32> to vector<1x512x16xf32>
      tpu.vector_store %arg6[%c0_17, %c0_18, %c0_19], %21 {strides = array<i32>} : memref<1x512x16xf32, #tpu.memory_space<vmem>>, vector<1x512x16xf32>,
    } else {
    }
    return
  }
  func.func @transform_0(%arg0: i32, %arg1: i32, %arg2: i32) -> (i32, i32, i32) {
    %c0_i32 = arith.constant 0 : i32
    return %arg0, %arg1, %arg2 : i32, i32, i32
  }
  func.func @transform_1(%arg0: i32, %arg1: i32, %arg2: i32) -> (i32, i32, i32) {
    %c0_i32 = arith.constant 0 : i32
    %c0_i32_0 = arith.constant 0 : i32
    return %arg0, %arg2, %c0_i32 : i32, i32, i32
  }
  func.func @transform_2(%arg0: i32, %arg1: i32, %arg2: i32) -> (i32, i32, i32) {
    %c0_i32 = arith.constant 0 : i32
    %c0_i32_0 = arith.constant 0 : i32
    %c0_i32_1 = arith.constant 0 : i32
    return %arg0, %c0_i32, %c0_i32_0 : i32, i32, i32
  }
  func.func @transform_3(%arg0: i32, %arg1: i32, %arg2: i32) -> (i32, i32, i32) {
    %c0_i32 = arith.constant 0 : i32
    %c0_i32_0 = arith.constant 0 : i32
    return %arg0, %arg1, %c0_i32 : i32, i32, i32
  }
}

module attributes {stable_mosaic.version = 11 : i64} {
  func.func @_bmm_kernel(%arg0: i32, %arg1: i32, %arg2: i32, %arg3: memref<1x512x108xbf16, #tpu.memory_space<vmem>>, %arg4: memref<1x108x4xbf16, #tpu.memory_space<vmem>>, %arg5: memref<1x512x4xf32, #tpu.memory_space<vmem>>, %arg6: memref<512x4xf32, #tpu.memory_space<vmem>>) attributes {dimension_semantics = [#tpu.dimension_semantics<parallel>, #tpu.dimension_semantics<parallel>, #tpu.dimension_semantics<arbitrary>], iteration_bounds = array<i64: 4, 2, 1>, scalar_prefetch = 0 : i64, scratch_operands = 1 : i64, tpu.core_type = #tpu.core_type<tc>, window_params = [{transform_indices = @transform_0, window_bounds = array<i64: 1, 512, 108>}, {transform_indices = @transform_1, window_bounds = array<i64: 1, 108, 4>}, {transform_indices = @transform_2, window_bounds = array<i64: 1, 512, 4>}]} {
    %c0_i32 = arith.constant 0 : i32
    %0 = arith.cmpi eq, %arg2, %c0_i32 : i32
    %1 = arith.extui %0 : i1 to i32
    %c0_i32_0 = arith.constant 0 : i32
    %2 = arith.cmpi ne, %1, %c0_i32_0 : i32
    scf.if %2 {
      %cst_12 = arith.constant 0.000000e+00 : f32
      %14 = vector.broadcast %cst_12 : f32 to vector<512x4xf32>
      %c0_13 = arith.constant 0 : index
      %c0_14 = arith.constant 0 : index
      %15 = vector.load %arg6[%c0_13, %c0_14] : memref<512x4xf32, #tpu.memory_space<vmem>>, vector<512x4xf32>
      tpu.vector_store %arg6[%c0_13, %c0_14], %14 {strides = array<i32>} : memref<512x4xf32, #tpu.memory_space<vmem>>, vector<512x4xf32>,
    } else {
    }
    %c0 = arith.constant 0 : index
    %c0_1 = arith.constant 0 : index
    %3 = vector.load %arg6[%c0, %c0_1] : memref<512x4xf32, #tpu.memory_space<vmem>>, vector<512x4xf32>
    %c0_2 = arith.constant 0 : index
    %c0_3 = arith.constant 0 : index
    %c0_4 = arith.constant 0 : index
    %4 = vector.load %arg3[%c0_2, %c0_3, %c0_4] : memref<1x512x108xbf16, #tpu.memory_space<vmem>>, vector<1x512x108xbf16>
    %5 = vector.shape_cast %4 : vector<1x512x108xbf16> to vector<512x108xbf16>
    %c0_5 = arith.constant 0 : index
    %c0_6 = arith.constant 0 : index
    %c0_7 = arith.constant 0 : index
    %6 = vector.load %arg4[%c0_5, %c0_6, %c0_7] : memref<1x108x4xbf16, #tpu.memory_space<vmem>>, vector<1x108x4xbf16>
    %7 = vector.shape_cast %6 : vector<1x108x4xbf16> to vector<108x4xbf16>
    %cst = arith.constant dense<0.000000e+00> : vector<512x4xf32>
    %8 = tpu.matmul %5, %7, %cst {dimension_numbers = #tpu.dot_dimension_numbers<[1], [0], [0], [1], [0, 0, 1, 1], [], []>} : vector<512x108xbf16>, vector<108x4xbf16>, vector<512x4xf32> -> vector<512x4xf32>
    %9 = arith.addf %3, %8 : vector<512x4xf32>
    %c0_8 = arith.constant 0 : index
    %c0_9 = arith.constant 0 : index
    %10 = vector.load %arg6[%c0_8, %c0_9] : memref<512x4xf32, #tpu.memory_space<vmem>>, vector<512x4xf32>
    tpu.vector_store %arg6[%c0_8, %c0_9], %9 {strides = array<i32>} : memref<512x4xf32, #tpu.memory_space<vmem>>, vector<512x4xf32>,
    %c0_i32_10 = arith.constant 0 : i32
    %11 = arith.cmpi eq, %arg2, %c0_i32_10 : i32
    %12 = arith.extui %11 : i1 to i32
    %c0_i32_11 = arith.constant 0 : i32
    %13 = arith.cmpi ne, %12, %c0_i32_11 : i32
    scf.if %13 {
      %c0_12 = arith.constant 0 : index
      %c0_13 = arith.constant 0 : index
      %14 = vector.load %arg6[%c0_12, %c0_13] : memref<512x4xf32, #tpu.memory_space<vmem>>, vector<512x4xf32>
      %c0_14 = arith.constant 0 : index
      %c0_15 = arith.constant 0 : index
      %c0_16 = arith.constant 0 : index
      %15 = vector.load %arg5[%c0_14, %c0_15, %c0_16] : memref<1x512x4xf32, #tpu.memory_space<vmem>>, vector<1x512x4xf32>
      %16 = vector.shape_cast %15 : vector<1x512x4xf32> to vector<512x4xf32>
      %17 = vector.shape_cast %14 : vector<512x4xf32> to vector<1x512x4xf32>
      tpu.vector_store %arg5[%c0_14, %c0_15, %c0_16], %17 {strides = array<i32>} : memref<1x512x4xf32, #tpu.memory_space<vmem>>, vector<1x512x4xf32>,
    } else {
    }
    return
  }
  func.func @transform_0(%arg0: i32, %arg1: i32, %arg2: i32) -> (i32, i32, i32) {
    %c0_i32 = arith.constant 0 : i32
    return %arg0, %arg1, %arg2 : i32, i32, i32
  }
  func.func @transform_1(%arg0: i32, %arg1: i32, %arg2: i32) -> (i32, i32, i32) {
    %c0_i32 = arith.constant 0 : i32
    %c0_i32_0 = arith.constant 0 : i32
    return %arg0, %arg2, %c0_i32 : i32, i32, i32
  }
  func.func @transform_2(%arg0: i32, %arg1: i32, %arg2: i32) -> (i32, i32, i32) {
    %c0_i32 = arith.constant 0 : i32
    %c0_i32_0 = arith.constant 0 : i32
    return %arg0, %arg1, %c0_i32 : i32, i32, i32
  }
}

module attributes {stable_mosaic.version = 11 : i64} {
  func.func @_bmm_kernel(%arg0: i32, %arg1: i32, %arg2: i32, %arg3: memref<1x512x16xbf16, #tpu.memory_space<vmem>>, %arg4: memref<1x16x16xbf16, #tpu.memory_space<vmem>>, %arg5: memref<1x512x16xf32, #tpu.memory_space<vmem>>, %arg6: memref<512x16xf32, #tpu.memory_space<vmem>>) attributes {dimension_semantics = [#tpu.dimension_semantics<parallel>, #tpu.dimension_semantics<parallel>, #tpu.dimension_semantics<arbitrary>], iteration_bounds = array<i64: 1, 2, 1>, scalar_prefetch = 0 : i64, scratch_operands = 1 : i64, tpu.core_type = #tpu.core_type<tc>, window_params = [{transform_indices = @transform_0, window_bounds = array<i64: 1, 512, 16>}, {transform_indices = @transform_1, window_bounds = array<i64: 1, 16, 16>}, {transform_indices = @transform_2, window_bounds = array<i64: 1, 512, 16>}]} {
    %c0_i32 = arith.constant 0 : i32
    %0 = arith.cmpi eq, %arg2, %c0_i32 : i32
    %1 = arith.extui %0 : i1 to i32
    %c0_i32_0 = arith.constant 0 : i32
    %2 = arith.cmpi ne, %1, %c0_i32_0 : i32
    scf.if %2 {
      %cst_12 = arith.constant 0.000000e+00 : f32
      %14 = vector.broadcast %cst_12 : f32 to vector<512x16xf32>
      %c0_13 = arith.constant 0 : index
      %c0_14 = arith.constant 0 : index
      %15 = vector.load %arg6[%c0_13, %c0_14] : memref<512x16xf32, #tpu.memory_space<vmem>>, vector<512x16xf32>
      tpu.vector_store %arg6[%c0_13, %c0_14], %14 {strides = array<i32>} : memref<512x16xf32, #tpu.memory_space<vmem>>, vector<512x16xf32>,
    } else {
    }
    %c0 = arith.constant 0 : index
    %c0_1 = arith.constant 0 : index
    %3 = vector.load %arg6[%c0, %c0_1] : memref<512x16xf32, #tpu.memory_space<vmem>>, vector<512x16xf32>
    %c0_2 = arith.constant 0 : index
    %c0_3 = arith.constant 0 : index
    %c0_4 = arith.constant 0 : index
    %4 = vector.load %arg3[%c0_2, %c0_3, %c0_4] : memref<1x512x16xbf16, #tpu.memory_space<vmem>>, vector<1x512x16xbf16>
    %5 = vector.shape_cast %4 : vector<1x512x16xbf16> to vector<512x16xbf16>
    %c0_5 = arith.constant 0 : index
    %c0_6 = arith.constant 0 : index
    %c0_7 = arith.constant 0 : index
    %6 = vector.load %arg4[%c0_5, %c0_6, %c0_7] : memref<1x16x16xbf16, #tpu.memory_space<vmem>>, vector<1x16x16xbf16>
    %7 = vector.shape_cast %6 : vector<1x16x16xbf16> to vector<16x16xbf16>
    %cst = arith.constant dense<0.000000e+00> : vector<512x16xf32>
    %8 = tpu.matmul %5, %7, %cst {dimension_numbers = #tpu.dot_dimension_numbers<[1], [0], [0], [1], [0, 0, 1, 1], [], []>} : vector<512x16xbf16>, vector<16x16xbf16>, vector<512x16xf32> -> vector<512x16xf32>
    %9 = arith.addf %3, %8 : vector<512x16xf32>
    %c0_8 = arith.constant 0 : index
    %c0_9 = arith.constant 0 : index
    %10 = vector.load %arg6[%c0_8, %c0_9] : memref<512x16xf32, #tpu.memory_space<vmem>>, vector<512x16xf32>
    tpu.vector_store %arg6[%c0_8, %c0_9], %9 {strides = array<i32>} : memref<512x16xf32, #tpu.memory_space<vmem>>, vector<512x16xf32>,
    %c0_i32_10 = arith.constant 0 : i32
    %11 = arith.cmpi eq, %arg2, %c0_i32_10 : i32
    %12 = arith.extui %11 : i1 to i32
    %c0_i32_11 = arith.constant 0 : i32
    %13 = arith.cmpi ne, %12, %c0_i32_11 : i32
    scf.if %13 {
      %c0_12 = arith.constant 0 : index
      %c0_13 = arith.constant 0 : index
      %14 = vector.load %arg6[%c0_12, %c0_13] : memref<512x16xf32, #tpu.memory_space<vmem>>, vector<512x16xf32>
      %c0_14 = arith.constant 0 : index
      %c0_15 = arith.constant 0 : index
      %c0_16 = arith.constant 0 : index
      %15 = vector.load %arg5[%c0_14, %c0_15, %c0_16] : memref<1x512x16xf32, #tpu.memory_space<vmem>>, vector<1x512x16xf32>
      %16 = vector.shape_cast %15 : vector<1x512x16xf32> to vector<512x16xf32>
      %17 = vector.shape_cast %14 : vector<512x16xf32> to vector<1x512x16xf32>
      tpu.vector_store %arg5[%c0_14, %c0_15, %c0_16], %17 {strides = array<i32>} : memref<1x512x16xf32, #tpu.memory_space<vmem>>, vector<1x512x16xf32>,
    } else {
    }
    return
  }
  func.func @transform_0(%arg0: i32, %arg1: i32, %arg2: i32) -> (i32, i32, i32) {
    %c0_i32 = arith.constant 0 : i32
    return %arg0, %arg1, %arg2 : i32, i32, i32
  }
  func.func @transform_1(%arg0: i32, %arg1: i32, %arg2: i32) -> (i32, i32, i32) {
    %c0_i32 = arith.constant 0 : i32
    %c0_i32_0 = arith.constant 0 : i32
    return %arg0, %arg2, %c0_i32 : i32, i32, i32
  }
  func.func @transform_2(%arg0: i32, %arg1: i32, %arg2: i32) -> (i32, i32, i32) {
    %c0_i32 = arith.constant 0 : i32
    %c0_i32_0 = arith.constant 0 : i32
    return %arg0, %arg1, %c0_i32 : i32, i32, i32
  }
}

module attributes {stable_mosaic.version = 11 : i64} {
  func.func @_bmm_kernel(%arg0: i32, %arg1: i32, %arg2: i32, %arg3: memref<1x512x32xbf16, #tpu.memory_space<vmem>>, %arg4: memref<1x32x8xbf16, #tpu.memory_space<vmem>>, %arg5: memref<1x512x8xf32, #tpu.memory_space<vmem>>, %arg6: memref<512x8xf32, #tpu.memory_space<vmem>>) attributes {dimension_semantics = [#tpu.dimension_semantics<parallel>, #tpu.dimension_semantics<parallel>, #tpu.dimension_semantics<arbitrary>], iteration_bounds = array<i64: 1, 2, 1>, scalar_prefetch = 0 : i64, scratch_operands = 1 : i64, tpu.core_type = #tpu.core_type<tc>, window_params = [{transform_indices = @transform_0, window_bounds = array<i64: 1, 512, 32>}, {transform_indices = @transform_1, window_bounds = array<i64: 1, 32, 8>}, {transform_indices = @transform_2, window_bounds = array<i64: 1, 512, 8>}]} {
    %c0_i32 = arith.constant 0 : i32
    %0 = arith.cmpi eq, %arg2, %c0_i32 : i32
    %1 = arith.extui %0 : i1 to i32
    %c0_i32_0 = arith.constant 0 : i32
    %2 = arith.cmpi ne, %1, %c0_i32_0 : i32
    scf.if %2 {
      %cst_12 = arith.constant 0.000000e+00 : f32
      %14 = vector.broadcast %cst_12 : f32 to vector<512x8xf32>
      %c0_13 = arith.constant 0 : index
      %c0_14 = arith.constant 0 : index
      %15 = vector.load %arg6[%c0_13, %c0_14] : memref<512x8xf32, #tpu.memory_space<vmem>>, vector<512x8xf32>
      tpu.vector_store %arg6[%c0_13, %c0_14], %14 {strides = array<i32>} : memref<512x8xf32, #tpu.memory_space<vmem>>, vector<512x8xf32>,
    } else {
    }
    %c0 = arith.constant 0 : index
    %c0_1 = arith.constant 0 : index
    %3 = vector.load %arg6[%c0, %c0_1] : memref<512x8xf32, #tpu.memory_space<vmem>>, vector<512x8xf32>
    %c0_2 = arith.constant 0 : index
    %c0_3 = arith.constant 0 : index
    %c0_4 = arith.constant 0 : index
    %4 = vector.load %arg3[%c0_2, %c0_3, %c0_4] : memref<1x512x32xbf16, #tpu.memory_space<vmem>>, vector<1x512x32xbf16>
    %5 = vector.shape_cast %4 : vector<1x512x32xbf16> to vector<512x32xbf16>
    %c0_5 = arith.constant 0 : index
    %c0_6 = arith.constant 0 : index
    %c0_7 = arith.constant 0 : index
    %6 = vector.load %arg4[%c0_5, %c0_6, %c0_7] : memref<1x32x8xbf16, #tpu.memory_space<vmem>>, vector<1x32x8xbf16>
    %7 = vector.shape_cast %6 : vector<1x32x8xbf16> to vector<32x8xbf16>
    %cst = arith.constant dense<0.000000e+00> : vector<512x8xf32>
    %8 = tpu.matmul %5, %7, %cst {dimension_numbers = #tpu.dot_dimension_numbers<[1], [0], [0], [1], [0, 0, 1, 1], [], []>} : vector<512x32xbf16>, vector<32x8xbf16>, vector<512x8xf32> -> vector<512x8xf32>
    %9 = arith.addf %3, %8 : vector<512x8xf32>
    %c0_8 = arith.constant 0 : index
    %c0_9 = arith.constant 0 : index
    %10 = vector.load %arg6[%c0_8, %c0_9] : memref<512x8xf32, #tpu.memory_space<vmem>>, vector<512x8xf32>
    tpu.vector_store %arg6[%c0_8, %c0_9], %9 {strides = array<i32>} : memref<512x8xf32, #tpu.memory_space<vmem>>, vector<512x8xf32>,
    %c0_i32_10 = arith.constant 0 : i32
    %11 = arith.cmpi eq, %arg2, %c0_i32_10 : i32
    %12 = arith.extui %11 : i1 to i32
    %c0_i32_11 = arith.constant 0 : i32
    %13 = arith.cmpi ne, %12, %c0_i32_11 : i32
    scf.if %13 {
      %c0_12 = arith.constant 0 : index
      %c0_13 = arith.constant 0 : index
      %14 = vector.load %arg6[%c0_12, %c0_13] : memref<512x8xf32, #tpu.memory_space<vmem>>, vector<512x8xf32>
      %c0_14 = arith.constant 0 : index
      %c0_15 = arith.constant 0 : index
      %c0_16 = arith.constant 0 : index
      %15 = vector.load %arg5[%c0_14, %c0_15, %c0_16] : memref<1x512x8xf32, #tpu.memory_space<vmem>>, vector<1x512x8xf32>
      %16 = vector.shape_cast %15 : vector<1x512x8xf32> to vector<512x8xf32>
      %17 = vector.shape_cast %14 : vector<512x8xf32> to vector<1x512x8xf32>
      tpu.vector_store %arg5[%c0_14, %c0_15, %c0_16], %17 {strides = array<i32>} : memref<1x512x8xf32, #tpu.memory_space<vmem>>, vector<1x512x8xf32>,
    } else {
    }
    return
  }
  func.func @transform_0(%arg0: i32, %arg1: i32, %arg2: i32) -> (i32, i32, i32) {
    %c0_i32 = arith.constant 0 : i32
    return %arg0, %arg1, %arg2 : i32, i32, i32
  }
  func.func @transform_1(%arg0: i32, %arg1: i32, %arg2: i32) -> (i32, i32, i32) {
    %c0_i32 = arith.constant 0 : i32
    %c0_i32_0 = arith.constant 0 : i32
    return %arg0, %arg2, %c0_i32 : i32, i32, i32
  }
  func.func @transform_2(%arg0: i32, %arg1: i32, %arg2: i32) -> (i32, i32, i32) {
    %c0_i32 = arith.constant 0 : i32
    %c0_i32_0 = arith.constant 0 : i32
    return %arg0, %arg1, %c0_i32 : i32, i32, i32
  }
}

module attributes {stable_mosaic.version = 11 : i64} {
  func.func @_softmax_combine_kernel(%arg0: i32, %arg1: i32, %arg2: memref<1x512x16xf32, #tpu.memory_space<vmem>>, %arg3: memref<1x512x16xf32, #tpu.memory_space<vmem>>, %arg4: memref<1x512x16xf32, #tpu.memory_space<vmem>>, %arg5: memref<1x512x16xf32, #tpu.memory_space<vmem>>) attributes {dimension_semantics = [#tpu.dimension_semantics<parallel>, #tpu.dimension_semantics<parallel>], iteration_bounds = array<i64: 2, 1>, scalar_prefetch = 0 : i64, scratch_operands = 0 : i64, tpu.core_type = #tpu.core_type<tc>, window_params = [{transform_indices = @transform_0, window_bounds = array<i64: 1, 512, 16>}, {transform_indices = @transform_1, window_bounds = array<i64: 1, 512, 16>}, {transform_indices = @transform_2, window_bounds = array<i64: 1, 512, 16>}, {transform_indices = @transform_3, window_bounds = array<i64: 1, 512, 16>}]} {
    %c0 = arith.constant 0 : index
    %c0_0 = arith.constant 0 : index
    %c0_1 = arith.constant 0 : index
    %0 = vector.load %arg2[%c0, %c0_0, %c0_1] : memref<1x512x16xf32, #tpu.memory_space<vmem>>, vector<1x512x16xf32>
    %1 = vector.shape_cast %0 : vector<1x512x16xf32> to vector<512x16xf32>
    %cst = arith.constant dense<0xFF800000> : vector<16xf32>
    %2 = vector.multi_reduction <maximumf>, %1, %cst [0] : vector<512x16xf32> to vector<16xf32>
    %3 = vector.shape_cast %2 : vector<16xf32> to vector<1x16xf32>
    %4 = vector.broadcast %3 : vector<1x16xf32> to vector<512x16xf32>
    %5 = arith.subf %1, %4 : vector<512x16xf32>
    %6 = math.exp %5 : vector<512x16xf32>
    %cst_2 = arith.constant dense<0.000000e+00> : vector<16xf32>
    %7 = vector.multi_reduction <add>, %6, %cst_2 [0] : vector<512x16xf32> to vector<16xf32>
    %8 = vector.shape_cast %7 : vector<16xf32> to vector<1x16xf32>
    %9 = tpu.reciprocal %8 {approx = true} : vector<1x16xf32> -> vector<1x16xf32>
    %10 = vector.broadcast %9 : vector<1x16xf32> to vector<512x16xf32>
    %11 = arith.mulf %6, %10 : vector<512x16xf32>
    %c0_3 = arith.constant 0 : index
    %c0_4 = arith.constant 0 : index
    %c0_5 = arith.constant 0 : index
    %12 = vector.load %arg3[%c0_3, %c0_4, %c0_5] : memref<1x512x16xf32, #tpu.memory_space<vmem>>, vector<1x512x16xf32>
    %13 = vector.shape_cast %12 : vector<1x512x16xf32> to vector<512x16xf32>
    %14 = arith.mulf %11, %13 : vector<512x16xf32>
    %c0_6 = arith.constant 0 : index
    %c0_7 = arith.constant 0 : index
    %c0_8 = arith.constant 0 : index
    %15 = vector.load %arg4[%c0_6, %c0_7, %c0_8] : memref<1x512x16xf32, #tpu.memory_space<vmem>>, vector<1x512x16xf32>
    %16 = vector.shape_cast %15 : vector<1x512x16xf32> to vector<512x16xf32>
    %17 = arith.addf %14, %16 : vector<512x16xf32>
    %c0_9 = arith.constant 0 : index
    %c0_10 = arith.constant 0 : index
    %c0_11 = arith.constant 0 : index
    %18 = vector.load %arg5[%c0_9, %c0_10, %c0_11] : memref<1x512x16xf32, #tpu.memory_space<vmem>>, vector<1x512x16xf32>
    %19 = vector.shape_cast %18 : vector<1x512x16xf32> to vector<512x16xf32>
    %20 = vector.shape_cast %17 : vector<512x16xf32> to vector<1x512x16xf32>
    tpu.vector_store %arg5[%c0_9, %c0_10, %c0_11], %20 {strides = array<i32>} : memref<1x512x16xf32, #tpu.memory_space<vmem>>, vector<1x512x16xf32>,
    return
  }
  func.func @transform_0(%arg0: i32, %arg1: i32) -> (i32, i32, i32) {
    %c0_i32 = arith.constant 0 : i32
    %c0_i32_0 = arith.constant 0 : i32
    return %arg0, %c0_i32, %arg1 : i32, i32, i32
  }
  func.func @transform_1(%arg0: i32, %arg1: i32) -> (i32, i32, i32) {
    %c0_i32 = arith.constant 0 : i32
    %c0_i32_0 = arith.constant 0 : i32
    return %arg0, %c0_i32, %arg1 : i32, i32, i32
  }
  func.func @transform_2(%arg0: i32, %arg1: i32) -> (i32, i32, i32) {
    %c0_i32 = arith.constant 0 : i32
    %c0_i32_0 = arith.constant 0 : i32
    return %arg0, %c0_i32, %arg1 : i32, i32, i32
  }
  func.func @transform_3(%arg0: i32, %arg1: i32) -> (i32, i32, i32) {
    %c0_i32 = arith.constant 0 : i32
    %c0_i32_0 = arith.constant 0 : i32
    return %arg0, %c0_i32, %arg1 : i32, i32, i32
  }
}

module attributes {stable_mosaic.version = 11 : i64} {
  func.func @_bmm_bias_kernel(%arg0: i32, %arg1: i32, %arg2: i32, %arg3: memref<1x512x8xbf16, #tpu.memory_space<vmem>>, %arg4: memref<1x8x16xbf16, #tpu.memory_space<vmem>>, %arg5: memref<1x1x16xf32, #tpu.memory_space<vmem>>, %arg6: memref<1x512x16xf32, #tpu.memory_space<vmem>>, %arg7: memref<512x16xf32, #tpu.memory_space<vmem>>) attributes {dimension_semantics = [#tpu.dimension_semantics<parallel>, #tpu.dimension_semantics<parallel>, #tpu.dimension_semantics<arbitrary>], iteration_bounds = array<i64: 1, 2, 1>, scalar_prefetch = 0 : i64, scratch_operands = 1 : i64, tpu.core_type = #tpu.core_type<tc>, window_params = [{transform_indices = @transform_0, window_bounds = array<i64: 1, 512, 8>}, {transform_indices = @transform_1, window_bounds = array<i64: 1, 8, 16>}, {transform_indices = @transform_2, window_bounds = array<i64: 1, 1, 16>}, {transform_indices = @transform_3, window_bounds = array<i64: 1, 512, 16>}]} {
    %c0_i32 = arith.constant 0 : i32
    %0 = arith.cmpi eq, %arg2, %c0_i32 : i32
    %1 = arith.extui %0 : i1 to i32
    %c0_i32_0 = arith.constant 0 : i32
    %2 = arith.cmpi ne, %1, %c0_i32_0 : i32
    scf.if %2 {
      %cst_12 = arith.constant 0.000000e+00 : f32
      %14 = vector.broadcast %cst_12 : f32 to vector<512x16xf32>
      %c0_13 = arith.constant 0 : index
      %c0_14 = arith.constant 0 : index
      %15 = vector.load %arg7[%c0_13, %c0_14] : memref<512x16xf32, #tpu.memory_space<vmem>>, vector<512x16xf32>
      tpu.vector_store %arg7[%c0_13, %c0_14], %14 {strides = array<i32>} : memref<512x16xf32, #tpu.memory_space<vmem>>, vector<512x16xf32>,
    } else {
    }
    %c0 = arith.constant 0 : index
    %c0_1 = arith.constant 0 : index
    %3 = vector.load %arg7[%c0, %c0_1] : memref<512x16xf32, #tpu.memory_space<vmem>>, vector<512x16xf32>
    %c0_2 = arith.constant 0 : index
    %c0_3 = arith.constant 0 : index
    %c0_4 = arith.constant 0 : index
    %4 = vector.load %arg3[%c0_2, %c0_3, %c0_4] : memref<1x512x8xbf16, #tpu.memory_space<vmem>>, vector<1x512x8xbf16>
    %5 = vector.shape_cast %4 : vector<1x512x8xbf16> to vector<512x8xbf16>
    %c0_5 = arith.constant 0 : index
    %c0_6 = arith.constant 0 : index
    %c0_7 = arith.constant 0 : index
    %6 = vector.load %arg4[%c0_5, %c0_6, %c0_7] : memref<1x8x16xbf16, #tpu.memory_space<vmem>>, vector<1x8x16xbf16>
    %7 = vector.shape_cast %6 : vector<1x8x16xbf16> to vector<8x16xbf16>
    %cst = arith.constant dense<0.000000e+00> : vector<512x16xf32>
    %8 = tpu.matmul %5, %7, %cst {dimension_numbers = #tpu.dot_dimension_numbers<[1], [0], [0], [1], [0, 0, 1, 1], [], []>} : vector<512x8xbf16>, vector<8x16xbf16>, vector<512x16xf32> -> vector<512x16xf32>
    %9 = arith.addf %3, %8 : vector<512x16xf32>
    %c0_8 = arith.constant 0 : index
    %c0_9 = arith.constant 0 : index
    %10 = vector.load %arg7[%c0_8, %c0_9] : memref<512x16xf32, #tpu.memory_space<vmem>>, vector<512x16xf32>
    tpu.vector_store %arg7[%c0_8, %c0_9], %9 {strides = array<i32>} : memref<512x16xf32, #tpu.memory_space<vmem>>, vector<512x16xf32>,
    %c0_i32_10 = arith.constant 0 : i32
    %11 = arith.cmpi eq, %arg2, %c0_i32_10 : i32
    %12 = arith.extui %11 : i1 to i32
    %c0_i32_11 = arith.constant 0 : i32
    %13 = arith.cmpi ne, %12, %c0_i32_11 : i32
    scf.if %13 {
      %c0_12 = arith.constant 0 : index
      %c0_13 = arith.constant 0 : index
      %14 = vector.load %arg7[%c0_12, %c0_13] : memref<512x16xf32, #tpu.memory_space<vmem>>, vector<512x16xf32>
      %c0_14 = arith.constant 0 : index
      %c0_15 = arith.constant 0 : index
      %c0_16 = arith.constant 0 : index
      %15 = vector.load %arg5[%c0_14, %c0_15, %c0_16] : memref<1x1x16xf32, #tpu.memory_space<vmem>>, vector<1x1x16xf32>
      %16 = vector.shape_cast %15 : vector<1x1x16xf32> to vector<1x16xf32>
      %17 = vector.broadcast %16 : vector<1x16xf32> to vector<512x16xf32>
      %18 = arith.addf %14, %17 : vector<512x16xf32>
      %c0_17 = arith.constant 0 : index
      %c0_18 = arith.constant 0 : index
      %c0_19 = arith.constant 0 : index
      %19 = vector.load %arg6[%c0_17, %c0_18, %c0_19] : memref<1x512x16xf32, #tpu.memory_space<vmem>>, vector<1x512x16xf32>
      %20 = vector.shape_cast %19 : vector<1x512x16xf32> to vector<512x16xf32>
      %21 = vector.shape_cast %18 : vector<512x16xf32> to vector<1x512x16xf32>
      tpu.vector_store %arg6[%c0_17, %c0_18, %c0_19], %21 {strides = array<i32>} : memref<1x512x16xf32, #tpu.memory_space<vmem>>, vector<1x512x16xf32>,
    } else {
    }
    return
  }
  func.func @transform_0(%arg0: i32, %arg1: i32, %arg2: i32) -> (i32, i32, i32) {
    %c0_i32 = arith.constant 0 : i32
    return %arg0, %arg1, %arg2 : i32, i32, i32
  }
  func.func @transform_1(%arg0: i32, %arg1: i32, %arg2: i32) -> (i32, i32, i32) {
    %c0_i32 = arith.constant 0 : i32
    %c0_i32_0 = arith.constant 0 : i32
    return %arg0, %arg2, %c0_i32 : i32, i32, i32
  }
  func.func @transform_2(%arg0: i32, %arg1: i32, %arg2: i32) -> (i32, i32, i32) {
    %c0_i32 = arith.constant 0 : i32
    %c0_i32_0 = arith.constant 0 : i32
    %c0_i32_1 = arith.constant 0 : i32
    return %arg0, %c0_i32, %c0_i32_0 : i32, i32, i32
  }
  func.func @transform_3(%arg0: i32, %arg1: i32, %arg2: i32) -> (i32, i32, i32) {
    %c0_i32 = arith.constant 0 : i32
    %c0_i32_0 = arith.constant 0 : i32
    return %arg0, %arg1, %c0_i32 : i32, i32, i32
  }
}

</mosaic_0001>

<bundles_post_ra>
// kernel: squeeze.4
= control target key start
LH: loop header
LB: loop body
LE: loop exit
PB: predicated region body
PF: predicated region fallthrough
CT: control target
= control target key end

     0   :  { %s4751_s10 = smov 120   ;;  %s4753_s11 = smov 104   ;;  %vm3_vm0 = vcmask 64512   ;;  %s9848_s0 = inlined_call_operand.vmem [shape: f32[1,1024,16], index: 0, kind: input, shape index: {}]   ;;  %s9849_s1 = inlined_call_operand.vmem [shape: f32[2,8,8,8,8,2], index: 1, kind: output, shape index: {}]  }
   0x1   :  { %v4779_v0 = vld.sshfl [vmem:[%s9848_s0 + $0x10] sm:$0xff pattern:$0xb3a29180]   ;;  %v4784_v1 = vld.sshfl [vmem:[%s9848_s0] sm:$0xff pattern:$0xb3a29180]  }
   0x2   :  { %331 = vrot.lane.b32.xlu1 %v4779_v0, %s4751_s10  ;;  %305 = vrot.lane.b32.xlu0 %v4784_v1, %s4751_s10  ;;  %v4791_v2 = vld.sshfl [vmem:[%s9848_s0 + $0x14] sm:$0xff pattern:$0xb3a29180]   ;;  %v4796_v3 = vld.sshfl [vmem:[%s9848_s0 + $0x4] sm:$0xff pattern:$0xb3a29180]  }
   0x3   :  { %v4803_v4 = vld.sshfl [vmem:[%s9848_s0 + $0x24] sm:$0xff pattern:$0xb3a29180]   ;;  %v4808_v5 = vld.sshfl [vmem:[%s9848_s0 + $0x20] sm:$0xff pattern:$0xb3a29180]  }
   0x4   :  { %v4815_v6 = vld.sshfl [vmem:[%s9848_s0 + $0x34] sm:$0xff pattern:$0xb3a29180]   ;;  %v4820_v7 = vld.sshfl [vmem:[%s9848_s0 + $0x30] sm:$0xff pattern:$0xb3a29180]  }
   0x5   :  { %v4827_v8 = vld.sshfl [vmem:[%s9848_s0 + $0x44] sm:$0xff pattern:$0xb3a29180]   ;;  %v4832_v9 = vld.sshfl [vmem:[%s9848_s0 + $0x40] sm:$0xff pattern:$0xb3a29180]  }
   0x6   :  { %344 = vrot.lane.b32.xlu1 %v4791_v2, %s4751_s10  ;;  %318 = vrot.lane.b32.xlu0 %v4796_v3, %s4751_s10  ;;  %v4839_v10 = vld.sshfl [vmem:[%s9848_s0 + $0x54] sm:$0xff pattern:$0xb3a29180]   ;;  %v4844_v11 = vld.sshfl [vmem:[%s9848_s0 + $0x50] sm:$0xff pattern:$0xb3a29180]  }
   0x7   :  { %v4851_v12 = vld.sshfl [vmem:[%s9848_s0 + $0x64] sm:$0xff pattern:$0xb3a29180]   ;;  %v4856_v13 = vld.sshfl [vmem:[%s9848_s0 + $0x60] sm:$0xff pattern:$0xb3a29180]  }
   0x8   :  { %v4863_v14 = vld.sshfl [vmem:[%s9848_s0 + $0x74] sm:$0xff pattern:$0xb3a29180]   ;;  %v4868_v15 = vld.sshfl [vmem:[%s9848_s0 + $0x70] sm:$0xff pattern:$0xb3a29180]  }
   0x9   :  { %s4754_s12 = smov 96   ;;  %s4755_s20 = smov 88  }
   0xa   :  { %370 = vrot.lane.b32.xlu1 %v4803_v4, %s4751_s10  ;;  %357 = vrot.lane.b32.xlu0 %v4808_v5, %s4751_s10  ;;  %s4756_s6 = smov 80   ;;  %s4757_s23 = smov 72  }
   0xb   :  { %s4759_s30 = smov 56   ;;  %s4760_s17 = smov 48  }
   0xc   :  { %s4763_s8 = smov 24   ;;  %s4764_s27 = smov 16  }
   0xd   :  { %s4765_s14 = smov 8  }
   0xe   :  { %396 = vrot.lane.b32.xlu1 %v4815_v6, %s4751_s10  ;;  %383 = vrot.lane.b32.xlu0 %v4820_v7, %s4751_s10 }
  0x12   :  { %422 = vrot.lane.b32.xlu1 %v4827_v8, %s4751_s10  ;;  %409 = vrot.lane.b32.xlu0 %v4832_v9, %s4751_s10 }
  0x16   :  { %448 = vrot.lane.b32.xlu1 %v4839_v10, %s4751_s10  ;;  %435 = vrot.lane.b32.xlu0 %v4844_v11, %s4751_s10 }
  0x1a   :  { %474 = vrot.lane.b32.xlu1 %v4851_v12, %s4751_s10  ;;  %461 = vrot.lane.b32.xlu0 %v4856_v13, %s4751_s10 }
  0x1e   :  { %500 = vrot.lane.b32.xlu1 %v4863_v14, %s4751_s10  ;;  %487 = vrot.lane.b32.xlu0 %v4868_v15, %s4751_s10  ;;  %s4752_s10 = smov 112  }
  0x22   :  { %525 = vrot.lane.b32.xlu1 %v4796_v3, %s4752_s10  ;;  %512 = vrot.lane.b32.xlu0 %v4784_v1, %s4752_s10 }
  0x26   :  { %551 = vrot.lane.b32.xlu1 %v4791_v2, %s4752_s10  ;;  %538 = vrot.lane.b32.xlu0 %v4779_v0, %s4752_s10 }
  0x2a   :  { %577 = vrot.lane.b32.xlu1 %v4803_v4, %s4752_s10  ;;  %564 = vrot.lane.b32.xlu0 %v4808_v5, %s4752_s10 }
  0x2e   :  { %603 = vrot.lane.b32.xlu1 %v4815_v6, %s4752_s10  ;;  %590 = vrot.lane.b32.xlu0 %v4820_v7, %s4752_s10 }
  0x32   :  { %629 = vrot.lane.b32.xlu1 %v4827_v8, %s4752_s10  ;;  %616 = vrot.lane.b32.xlu0 %v4832_v9, %s4752_s10 }
  0x36   :  { %655 = vrot.lane.b32.xlu1 %v4839_v10, %s4752_s10  ;;  %642 = vrot.lane.b32.xlu0 %v4844_v11, %s4752_s10 }
  0x3a   :  { %681 = vrot.lane.b32.xlu1 %v4851_v12, %s4752_s10  ;;  %668 = vrot.lane.b32.xlu0 %v4856_v13, %s4752_s10 }
  0x3e   :  { %707 = vrot.lane.b32.xlu1 %v4863_v14, %s4752_s10  ;;  %694 = vrot.lane.b32.xlu0 %v4868_v15, %s4752_s10 }
  0x42   :  { %732 = vrot.lane.b32.xlu1 %v4796_v3, %s4753_s11  ;;  %719 = vrot.lane.b32.xlu0 %v4784_v1, %s4753_s11 }
  0x46   :  { %758 = vrot.lane.b32.xlu1 %v4791_v2, %s4753_s11  ;;  %745 = vrot.lane.b32.xlu0 %v4779_v0, %s4753_s11 }
  0x4a   :  { %784 = vrot.lane.b32.xlu1 %v4803_v4, %s4753_s11  ;;  %771 = vrot.lane.b32.xlu0 %v4808_v5, %s4753_s11 }
  0x4e   :  { %810 = vrot.lane.b32.xlu1 %v4815_v6, %s4753_s11  ;;  %797 = vrot.lane.b32.xlu0 %v4820_v7, %s4753_s11 }
  0x52   :  { %836 = vrot.lane.b32.xlu1 %v4827_v8, %s4753_s11  ;;  %823 = vrot.lane.b32.xlu0 %v4832_v9, %s4753_s11 }
  0x56   :  { %862 = vrot.lane.b32.xlu1 %v4839_v10, %s4753_s11  ;;  %849 = vrot.lane.b32.xlu0 %v4844_v11, %s4753_s11 }
  0x5a   :  { %888 = vrot.lane.b32.xlu1 %v4851_v12, %s4753_s11  ;;  %875 = vrot.lane.b32.xlu0 %v4856_v13, %s4753_s11 }
  0x5e   :  { %914 = vrot.lane.b32.xlu1 %v4863_v14, %s4753_s11  ;;  %901 = vrot.lane.b32.xlu0 %v4868_v15, %s4753_s11  ;;  %s4758_s11 = smov 64  }
  0x62   :  { %939 = vrot.lane.b32.xlu1 %v4796_v3, %s4754_s12  ;;  %926 = vrot.lane.b32.xlu0 %v4784_v1, %s4754_s12 }
  0x66   :  { %965 = vrot.lane.b32.xlu1 %v4791_v2, %s4754_s12  ;;  %952 = vrot.lane.b32.xlu0 %v4779_v0, %s4754_s12 }
  0x6a   :  { %991 = vrot.lane.b32.xlu1 %v4803_v4, %s4754_s12  ;;  %978 = vrot.lane.b32.xlu0 %v4808_v5, %s4754_s12 }
  0x6e   :  { %1017 = vrot.lane.b32.xlu1 %v4815_v6, %s4754_s12  ;;  %1004 = vrot.lane.b32.xlu0 %v4820_v7, %s4754_s12 }
  0x72   :  { %1043 = vrot.lane.b32.xlu1 %v4827_v8, %s4754_s12  ;;  %1030 = vrot.lane.b32.xlu0 %v4832_v9, %s4754_s12 }
  0x74   :  { %v332_v16 = vpop.permute.xlu1 %331   ;;  %v306_v17 = vpop.permute.xlu0 %305  }
  0x75   :  { %3561 = vst.msk [vmem:[%s9849_s1 + $0x21] ss:$16 sm:$0x3] %vm3_vm0, %v332_v16   ;;  %3562 = vst.msk [vmem:[%s9849_s1 + $0x81] ss:$16 sm:$0xc] %vm3_vm0, %v332_v16  }
  0x76   :  { %3563 = vst.msk [vmem:[%s9849_s1 + $0xe1] ss:$16 sm:$0x30] %vm3_vm0, %v332_v16   ;;  %3564 = vst.msk [vmem:[%s9849_s1 + $0x141] ss:$16 sm:$0xc0] %vm3_vm0, %v332_v16   ;;  %1069 = vrot.lane.b32.xlu1 %v4839_v10, %s4754_s12  ;;  %1056 = vrot.lane.b32.xlu0 %v4844_v11, %s4754_s12 }
  0x77   :  { %3551 = vst.msk [vmem:[%s9849_s1 + $0x1] ss:$16 sm:$0x3] %vm3_vm0, %v306_v17   ;;  %3552 = vst.msk [vmem:[%s9849_s1 + $0x61] ss:$16 sm:$0xc] %vm3_vm0, %v306_v17  }
  0x78   :  { %3553 = vst.msk [vmem:[%s9849_s1 + $0xc1] ss:$16 sm:$0x30] %vm3_vm0, %v306_v17   ;;  %3554 = vst.msk [vmem:[%s9849_s1 + $0x121] ss:$16 sm:$0xc0] %vm3_vm0, %v306_v17   ;;  %v345_v18 = vpop.permute.xlu1 %344   ;;  %v319_v19 = vpop.permute.xlu0 %318  }
  0x79   :  { %3566 = vst.msk [vmem:[%s9849_s1 + $0x221] ss:$16 sm:$0x3] %vm3_vm0, %v345_v18   ;;  %3567 = vst.msk [vmem:[%s9849_s1 + $0x281] ss:$16 sm:$0xc] %vm3_vm0, %v345_v18  }
  0x7a   :  { %3568 = vst.msk [vmem:[%s9849_s1 + $0x2e1] ss:$16 sm:$0x30] %vm3_vm0, %v345_v18   ;;  %3569 = vst.msk [vmem:[%s9849_s1 + $0x341] ss:$16 sm:$0xc0] %vm3_vm0, %v345_v18   ;;  %1095 = vrot.lane.b32.xlu1 %v4851_v12, %s4754_s12  ;;  %1082 = vrot.lane.b32.xlu0 %v4856_v13, %s4754_s12 }
  0x7b   :  { %3556 = vst.msk [vmem:[%s9849_s1 + $0x201] ss:$16 sm:$0x3] %vm3_vm0, %v319_v19   ;;  %3557 = vst.msk [vmem:[%s9849_s1 + $0x261] ss:$16 sm:$0xc] %vm3_vm0, %v319_v19  }
  0x7c   :  { %3558 = vst.msk [vmem:[%s9849_s1 + $0x2c1] ss:$16 sm:$0x30] %vm3_vm0, %v319_v19   ;;  %3559 = vst.msk [vmem:[%s9849_s1 + $0x321] ss:$16 sm:$0xc0] %vm3_vm0, %v319_v19   ;;  %v371_v20 = vpop.permute.xlu1 %370   ;;  %v358_v21 = vpop.permute.xlu0 %357  }
  0x7d   :  { %3576 = vst.msk [vmem:[%s9849_s1 + $0x241] ss:$16 sm:$0x3] %vm3_vm0, %v371_v20   ;;  %3577 = vst.msk [vmem:[%s9849_s1 + $0x2a1] ss:$16 sm:$0xc] %vm3_vm0, %v371_v20  }
  0x7e   :  { %3578 = vst.msk [vmem:[%s9849_s1 + $0x301] ss:$16 sm:$0x30] %vm3_vm0, %v371_v20   ;;  %3579 = vst.msk [vmem:[%s9849_s1 + $0x361] ss:$16 sm:$0xc0] %vm3_vm0, %v371_v20   ;;  %1121 = vrot.lane.b32.xlu1 %v4863_v14, %s4754_s12  ;;  %1108 = vrot.lane.b32.xlu0 %v4868_v15, %s4754_s12 }
  0x7f   :  { %3571 = vst.msk [vmem:[%s9849_s1 + $0x41] ss:$16 sm:$0x3] %vm3_vm0, %v358_v21   ;;  %3572 = vst.msk [vmem:[%s9849_s1 + $0xa1] ss:$16 sm:$0xc] %vm3_vm0, %v358_v21  }
  0x80   :  { %3573 = vst.msk [vmem:[%s9849_s1 + $0x101] ss:$16 sm:$0x30] %vm3_vm0, %v358_v21   ;;  %3574 = vst.msk [vmem:[%s9849_s1 + $0x161] ss:$16 sm:$0xc0] %vm3_vm0, %v358_v21   ;;  %v397_v22 = vpop.permute.xlu1 %396   ;;  %v384_v23 = vpop.permute.xlu0 %383  }
  0x81   :  { %3586 = vst.msk [vmem:[%s9849_s1 + $0x261] ss:$16 sm:$0x3] %vm3_vm0, %v397_v22   ;;  %3587 = vst.msk [vmem:[%s9849_s1 + $0x2c1] ss:$16 sm:$0xc] %vm3_vm0, %v397_v22  }
  0x82   :  { %3588 = vst.msk [vmem:[%s9849_s1 + $0x321] ss:$16 sm:$0x30] %vm3_vm0, %v397_v22   ;;  %3589 = vst.msk [vmem:[%s9849_s1 + $0x381] ss:$16 sm:$0xc0] %vm3_vm0, %v397_v22   ;;  %1146 = vrot.lane.b32.xlu1 %v4796_v3, %s4755_s20  ;;  %1133 = vrot.lane.b32.xlu0 %v4784_v1, %s4755_s20 }
  0x83   :  { %3581 = vst.msk [vmem:[%s9849_s1 + $0x61] ss:$16 sm:$0x3] %vm3_vm0, %v384_v23   ;;  %3582 = vst.msk [vmem:[%s9849_s1 + $0xc1] ss:$16 sm:$0xc] %vm3_vm0, %v384_v23  }
  0x84   :  { %3583 = vst.msk [vmem:[%s9849_s1 + $0x121] ss:$16 sm:$0x30] %vm3_vm0, %v384_v23   ;;  %3584 = vst.msk [vmem:[%s9849_s1 + $0x181] ss:$16 sm:$0xc0] %vm3_vm0, %v384_v23   ;;  %v423_v24 = vpop.permute.xlu1 %422   ;;  %v410_v25 = vpop.permute.xlu0 %409  }
  0x85   :  { %3596 = vst.msk [vmem:[%s9849_s1 + $0x601] ss:$16 sm:$0x3] %vm3_vm0, %v423_v24   ;;  %3597 = vst.msk [vmem:[%s9849_s1 + $0x661] ss:$16 sm:$0xc] %vm3_vm0, %v423_v24  }
  0x86   :  { %3598 = vst.msk [vmem:[%s9849_s1 + $0x6c1] ss:$16 sm:$0x30] %vm3_vm0, %v423_v24   ;;  %3599 = vst.msk [vmem:[%s9849_s1 + $0x721] ss:$16 sm:$0xc0] %vm3_vm0, %v423_v24   ;;  %1172 = vrot.lane.b32.xlu1 %v4791_v2, %s4755_s20  ;;  %1159 = vrot.lane.b32.xlu0 %v4779_v0, %s4755_s20 }
  0x87   :  { %3591 = vst.msk [vmem:[%s9849_s1 + $0x401] ss:$16 sm:$0x3] %vm3_vm0, %v410_v25   ;;  %3592 = vst.msk [vmem:[%s9849_s1 + $0x461] ss:$16 sm:$0xc] %vm3_vm0, %v410_v25  }
  0x88   :  { %3593 = vst.msk [vmem:[%s9849_s1 + $0x4c1] ss:$16 sm:$0x30] %vm3_vm0, %v410_v25   ;;  %3594 = vst.msk [vmem:[%s9849_s1 + $0x521] ss:$16 sm:$0xc0] %vm3_vm0, %v410_v25   ;;  %v449_v26 = vpop.permute.xlu1 %448   ;;  %v436_v27 = vpop.permute.xlu0 %435  }
  0x89   :  { %3606 = vst.msk [vmem:[%s9849_s1 + $0x621] ss:$16 sm:$0x3] %vm3_vm0, %v449_v26   ;;  %3607 = vst.msk [vmem:[%s9849_s1 + $0x681] ss:$16 sm:$0xc] %vm3_vm0, %v449_v26  }
  0x8a   :  { %3608 = vst.msk [vmem:[%s9849_s1 + $0x6e1] ss:$16 sm:$0x30] %vm3_vm0, %v449_v26   ;;  %3609 = vst.msk [vmem:[%s9849_s1 + $0x741] ss:$16 sm:$0xc0] %vm3_vm0, %v449_v26   ;;  %1198 = vrot.lane.b32.xlu1 %v4803_v4, %s4755_s20  ;;  %1185 = vrot.lane.b32.xlu0 %v4808_v5, %s4755_s20 }
  0x8b   :  { %3601 = vst.msk [vmem:[%s9849_s1 + $0x421] ss:$16 sm:$0x3] %vm3_vm0, %v436_v27   ;;  %3602 = vst.msk [vmem:[%s9849_s1 + $0x481] ss:$16 sm:$0xc] %vm3_vm0, %v436_v27  }
  0x8c   :  { %3603 = vst.msk [vmem:[%s9849_s1 + $0x4e1] ss:$16 sm:$0x30] %vm3_vm0, %v436_v27   ;;  %3604 = vst.msk [vmem:[%s9849_s1 + $0x541] ss:$16 sm:$0xc0] %vm3_vm0, %v436_v27   ;;  %v475_v28 = vpop.permute.xlu1 %474   ;;  %v462_v29 = vpop.permute.xlu0 %461  }
  0x8d   :  { %3616 = vst.msk [vmem:[%s9849_s1 + $0x641] ss:$16 sm:$0x3] %vm3_vm0, %v475_v28   ;;  %3617 = vst.msk [vmem:[%s9849_s1 + $0x6a1] ss:$16 sm:$0xc] %vm3_vm0, %v475_v28  }
  0x8e   :  { %3618 = vst.msk [vmem:[%s9849_s1 + $0x701] ss:$16 sm:$0x30] %vm3_vm0, %v475_v28   ;;  %3619 = vst.msk [vmem:[%s9849_s1 + $0x761] ss:$16 sm:$0xc0] %vm3_vm0, %v475_v28   ;;  %1224 = vrot.lane.b32.xlu1 %v4815_v6, %s4755_s20  ;;  %1211 = vrot.lane.b32.xlu0 %v4820_v7, %s4755_s20 }
  0x8f   :  { %3611 = vst.msk [vmem:[%s9849_s1 + $0x441] ss:$16 sm:$0x3] %vm3_vm0, %v462_v29   ;;  %3612 = vst.msk [vmem:[%s9849_s1 + $0x4a1] ss:$16 sm:$0xc] %vm3_vm0, %v462_v29  }
  0x90   :  { %3613 = vst.msk [vmem:[%s9849_s1 + $0x501] ss:$16 sm:$0x30] %vm3_vm0, %v462_v29   ;;  %3614 = vst.msk [vmem:[%s9849_s1 + $0x561] ss:$16 sm:$0xc0] %vm3_vm0, %v462_v29   ;;  %v501_v30 = vpop.permute.xlu1 %500   ;;  %v488_v31 = vpop.permute.xlu0 %487  }
  0x91   :  { %3626 = vst.msk [vmem:[%s9849_s1 + $0x661] ss:$16 sm:$0x3] %vm3_vm0, %v501_v30   ;;  %3627 = vst.msk [vmem:[%s9849_s1 + $0x6c1] ss:$16 sm:$0xc] %vm3_vm0, %v501_v30  }
  0x92   :  { %3628 = vst.msk [vmem:[%s9849_s1 + $0x721] ss:$16 sm:$0x30] %vm3_vm0, %v501_v30   ;;  %3629 = vst.msk [vmem:[%s9849_s1 + $0x781] ss:$16 sm:$0xc0] %vm3_vm0, %v501_v30   ;;  %1250 = vrot.lane.b32.xlu1 %v4827_v8, %s4755_s20  ;;  %1237 = vrot.lane.b32.xlu0 %v4832_v9, %s4755_s20 }
  0x93   :  { %3621 = vst.msk [vmem:[%s9849_s1 + $0x461] ss:$16 sm:$0x3] %vm3_vm0, %v488_v31   ;;  %3622 = vst.msk [vmem:[%s9849_s1 + $0x4c1] ss:$16 sm:$0xc] %vm3_vm0, %v488_v31  }
  0x94   :  { %3623 = vst.msk [vmem:[%s9849_s1 + $0x521] ss:$16 sm:$0x30] %vm3_vm0, %v488_v31   ;;  %3624 = vst.msk [vmem:[%s9849_s1 + $0x581] ss:$16 sm:$0xc0] %vm3_vm0, %v488_v31   ;;  %v526_v32 = vpop.permute.xlu1 %525   ;;  %v513_v33 = vpop.permute.xlu0 %512  }
  0x95   :  { %3635 = vst.msk [vmem:[%s9849_s1 + $0x202] ss:$16 sm:$0x3] %vm3_vm0, %v526_v32   ;;  %3636 = vst.msk [vmem:[%s9849_s1 + $0x262] ss:$16 sm:$0xc] %vm3_vm0, %v526_v32  }
  0x96   :  { %3637 = vst.msk [vmem:[%s9849_s1 + $0x2c2] ss:$16 sm:$0x30] %vm3_vm0, %v526_v32   ;;  %3638 = vst.msk [vmem:[%s9849_s1 + $0x322] ss:$16 sm:$0xc0] %vm3_vm0, %v526_v32   ;;  %1276 = vrot.lane.b32.xlu1 %v4839_v10, %s4755_s20  ;;  %1263 = vrot.lane.b32.xlu0 %v4844_v11, %s4755_s20 }
  0x97   :  { %3630 = vst.msk [vmem:[%s9849_s1 + $0x2] ss:$16 sm:$0x3] %vm3_vm0, %v513_v33   ;;  %3631 = vst.msk [vmem:[%s9849_s1 + $0x62] ss:$16 sm:$0xc] %vm3_vm0, %v513_v33  }
  0x98   :  { %3632 = vst.msk [vmem:[%s9849_s1 + $0xc2] ss:$16 sm:$0x30] %vm3_vm0, %v513_v33   ;;  %3633 = vst.msk [vmem:[%s9849_s1 + $0x122] ss:$16 sm:$0xc0] %vm3_vm0, %v513_v33   ;;  %v552_v34 = vpop.permute.xlu1 %551   ;;  %v539_v35 = vpop.permute.xlu0 %538  }
  0x99   :  { %3645 = vst.msk [vmem:[%s9849_s1 + $0x222] ss:$16 sm:$0x3] %vm3_vm0, %v552_v34   ;;  %3646 = vst.msk [vmem:[%s9849_s1 + $0x282] ss:$16 sm:$0xc] %vm3_vm0, %v552_v34  }
  0x9a   :  { %3647 = vst.msk [vmem:[%s9849_s1 + $0x2e2] ss:$16 sm:$0x30] %vm3_vm0, %v552_v34   ;;  %3648 = vst.msk [vmem:[%s9849_s1 + $0x342] ss:$16 sm:$0xc0] %vm3_vm0, %v552_v34   ;;  %1302 = vrot.lane.b32.xlu1 %v4851_v12, %s4755_s20  ;;  %1289 = vrot.lane.b32.xlu0 %v4856_v13, %s4755_s20 }
  0x9b   :  { %3640 = vst.msk [vmem:[%s9849_s1 + $0x22] ss:$16 sm:$0x3] %vm3_vm0, %v539_v35   ;;  %3641 = vst.msk [vmem:[%s9849_s1 + $0x82] ss:$16 sm:$0xc] %vm3_vm0, %v539_v35  }
  0x9c   :  { %3642 = vst.msk [vmem:[%s9849_s1 + $0xe2] ss:$16 sm:$0x30] %vm3_vm0, %v539_v35   ;;  %3643 = vst.msk [vmem:[%s9849_s1 + $0x142] ss:$16 sm:$0xc0] %vm3_vm0, %v539_v35   ;;  %v578_v36 = vpop.permute.xlu1 %577   ;;  %v565_v37 = vpop.permute.xlu0 %564  }
  0x9d   :  { %3655 = vst.msk [vmem:[%s9849_s1 + $0x242] ss:$16 sm:$0x3] %vm3_vm0, %v578_v36   ;;  %3656 = vst.msk [vmem:[%s9849_s1 + $0x2a2] ss:$16 sm:$0xc] %vm3_vm0, %v578_v36  }
  0x9e   :  { %3657 = vst.msk [vmem:[%s9849_s1 + $0x302] ss:$16 sm:$0x30] %vm3_vm0, %v578_v36   ;;  %3658 = vst.msk [vmem:[%s9849_s1 + $0x362] ss:$16 sm:$0xc0] %vm3_vm0, %v578_v36   ;;  %1328 = vrot.lane.b32.xlu1 %v4863_v14, %s4755_s20  ;;  %1315 = vrot.lane.b32.xlu0 %v4868_v15, %s4755_s20 }
  0x9f   :  { %3650 = vst.msk [vmem:[%s9849_s1 + $0x42] ss:$16 sm:$0x3] %vm3_vm0, %v565_v37   ;;  %3651 = vst.msk [vmem:[%s9849_s1 + $0xa2] ss:$16 sm:$0xc] %vm3_vm0, %v565_v37  }
  0xa0   :  { %3652 = vst.msk [vmem:[%s9849_s1 + $0x102] ss:$16 sm:$0x30] %vm3_vm0, %v565_v37   ;;  %3653 = vst.msk [vmem:[%s9849_s1 + $0x162] ss:$16 sm:$0xc0] %vm3_vm0, %v565_v37   ;;  %v604_v38 = vpop.permute.xlu1 %603   ;;  %v591_v39 = vpop.permute.xlu0 %590  }
  0xa1   :  { %3665 = vst.msk [vmem:[%s9849_s1 + $0x262] ss:$16 sm:$0x3] %vm3_vm0, %v604_v38   ;;  %3666 = vst.msk [vmem:[%s9849_s1 + $0x2c2] ss:$16 sm:$0xc] %vm3_vm0, %v604_v38  }
  0xa2   :  { %3667 = vst.msk [vmem:[%s9849_s1 + $0x322] ss:$16 sm:$0x30] %vm3_vm0, %v604_v38   ;;  %3668 = vst.msk [vmem:[%s9849_s1 + $0x382] ss:$16 sm:$0xc0] %vm3_vm0, %v604_v38   ;;  %1353 = vrot.lane.b32.xlu1 %v4796_v3, %s4756_s6  ;;  %1340 = vrot.lane.b32.xlu0 %v4784_v1, %s4756_s6 }
  0xa3   :  { %3660 = vst.msk [vmem:[%s9849_s1 + $0x62] ss:$16 sm:$0x3] %vm3_vm0, %v591_v39   ;;  %3661 = vst.msk [vmem:[%s9849_s1 + $0xc2] ss:$16 sm:$0xc] %vm3_vm0, %v591_v39  }
  0xa4   :  { %3662 = vst.msk [vmem:[%s9849_s1 + $0x122] ss:$16 sm:$0x30] %vm3_vm0, %v591_v39   ;;  %3663 = vst.msk [vmem:[%s9849_s1 + $0x182] ss:$16 sm:$0xc0] %vm3_vm0, %v591_v39   ;;  %v630_v40 = vpop.permute.xlu1 %629   ;;  %v617_v41 = vpop.permute.xlu0 %616  }
  0xa5   :  { %3675 = vst.msk [vmem:[%s9849_s1 + $0x602] ss:$16 sm:$0x3] %vm3_vm0, %v630_v40   ;;  %3676 = vst.msk [vmem:[%s9849_s1 + $0x662] ss:$16 sm:$0xc] %vm3_vm0, %v630_v40  }
  0xa6   :  { %3677 = vst.msk [vmem:[%s9849_s1 + $0x6c2] ss:$16 sm:$0x30] %vm3_vm0, %v630_v40   ;;  %3678 = vst.msk [vmem:[%s9849_s1 + $0x722] ss:$16 sm:$0xc0] %vm3_vm0, %v630_v40   ;;  %1379 = vrot.lane.b32.xlu1 %v4791_v2, %s4756_s6  ;;  %1366 = vrot.lane.b32.xlu0 %v4779_v0, %s4756_s6 }
  0xa7   :  { %3670 = vst.msk [vmem:[%s9849_s1 + $0x402] ss:$16 sm:$0x3] %vm3_vm0, %v617_v41   ;;  %3671 = vst.msk [vmem:[%s9849_s1 + $0x462] ss:$16 sm:$0xc] %vm3_vm0, %v617_v41  }
  0xa8   :  { %3672 = vst.msk [vmem:[%s9849_s1 + $0x4c2] ss:$16 sm:$0x30] %vm3_vm0, %v617_v41   ;;  %3673 = vst.msk [vmem:[%s9849_s1 + $0x522] ss:$16 sm:$0xc0] %vm3_vm0, %v617_v41   ;;  %v656_v42 = vpop.permute.xlu1 %655   ;;  %v643_v43 = vpop.permute.xlu0 %642  }
  0xa9   :  { %3685 = vst.msk [vmem:[%s9849_s1 + $0x622] ss:$16 sm:$0x3] %vm3_vm0, %v656_v42   ;;  %3686 = vst.msk [vmem:[%s9849_s1 + $0x682] ss:$16 sm:$0xc] %vm3_vm0, %v656_v42  }
  0xaa   :  { %3687 = vst.msk [vmem:[%s9849_s1 + $0x6e2] ss:$16 sm:$0x30] %vm3_vm0, %v656_v42   ;;  %3688 = vst.msk [vmem:[%s9849_s1 + $0x742] ss:$16 sm:$0xc0] %vm3_vm0, %v656_v42   ;;  %1405 = vrot.lane.b32.xlu1 %v4803_v4, %s4756_s6  ;;  %1392 = vrot.lane.b32.xlu0 %v4808_v5, %s4756_s6 }
  0xab   :  { %3680 = vst.msk [vmem:[%s9849_s1 + $0x422] ss:$16 sm:$0x3] %vm3_vm0, %v643_v43   ;;  %3681 = vst.msk [vmem:[%s9849_s1 + $0x482] ss:$16 sm:$0xc] %vm3_vm0, %v643_v43  }
  0xac   :  { %3682 = vst.msk [vmem:[%s9849_s1 + $0x4e2] ss:$16 sm:$0x30] %vm3_vm0, %v643_v43   ;;  %3683 = vst.msk [vmem:[%s9849_s1 + $0x542] ss:$16 sm:$0xc0] %vm3_vm0, %v643_v43   ;;  %v682_v44 = vpop.permute.xlu1 %681   ;;  %v669_v45 = vpop.permute.xlu0 %668  }
  0xad   :  { %3695 = vst.msk [vmem:[%s9849_s1 + $0x642] ss:$16 sm:$0x3] %vm3_vm0, %v682_v44   ;;  %3696 = vst.msk [vmem:[%s9849_s1 + $0x6a2] ss:$16 sm:$0xc] %vm3_vm0, %v682_v44  }
  0xae   :  { %3697 = vst.msk [vmem:[%s9849_s1 + $0x702] ss:$16 sm:$0x30] %vm3_vm0, %v682_v44   ;;  %3698 = vst.msk [vmem:[%s9849_s1 + $0x762] ss:$16 sm:$0xc0] %vm3_vm0, %v682_v44   ;;  %1431 = vrot.lane.b32.xlu1 %v4815_v6, %s4756_s6  ;;  %1418 = vrot.lane.b32.xlu0 %v4820_v7, %s4756_s6 }
  0xaf   :  { %3690 = vst.msk [vmem:[%s9849_s1 + $0x442] ss:$16 sm:$0x3] %vm3_vm0, %v669_v45   ;;  %3691 = vst.msk [vmem:[%s9849_s1 + $0x4a2] ss:$16 sm:$0xc] %vm3_vm0, %v669_v45  }
  0xb0   :  { %3692 = vst.msk [vmem:[%s9849_s1 + $0x502] ss:$16 sm:$0x30] %vm3_vm0, %v669_v45   ;;  %3693 = vst.msk [vmem:[%s9849_s1 + $0x562] ss:$16 sm:$0xc0] %vm3_vm0, %v669_v45   ;;  %v708_v46 = vpop.permute.xlu1 %707   ;;  %v695_v47 = vpop.permute.xlu0 %694  }
  0xb1   :  { %3705 = vst.msk [vmem:[%s9849_s1 + $0x662] ss:$16 sm:$0x3] %vm3_vm0, %v708_v46   ;;  %3706 = vst.msk [vmem:[%s9849_s1 + $0x6c2] ss:$16 sm:$0xc] %vm3_vm0, %v708_v46  }
  0xb2   :  { %3707 = vst.msk [vmem:[%s9849_s1 + $0x722] ss:$16 sm:$0x30] %vm3_vm0, %v708_v46   ;;  %3708 = vst.msk [vmem:[%s9849_s1 + $0x782] ss:$16 sm:$0xc0] %vm3_vm0, %v708_v46   ;;  %1457 = vrot.lane.b32.xlu1 %v4827_v8, %s4756_s6  ;;  %1444 = vrot.lane.b32.xlu0 %v4832_v9, %s4756_s6 }
  0xb3   :  { %3700 = vst.msk [vmem:[%s9849_s1 + $0x462] ss:$16 sm:$0x3] %vm3_vm0, %v695_v47   ;;  %3701 = vst.msk [vmem:[%s9849_s1 + $0x4c2] ss:$16 sm:$0xc] %vm3_vm0, %v695_v47  }
  0xb4   :  { %3702 = vst.msk [vmem:[%s9849_s1 + $0x522] ss:$16 sm:$0x30] %vm3_vm0, %v695_v47   ;;  %3703 = vst.msk [vmem:[%s9849_s1 + $0x582] ss:$16 sm:$0xc0] %vm3_vm0, %v695_v47   ;;  %v733_v48 = vpop.permute.xlu1 %732   ;;  %v720_v49 = vpop.permute.xlu0 %719  }
  0xb5   :  { %3714 = vst.msk [vmem:[%s9849_s1 + $0x203] ss:$16 sm:$0x3] %vm3_vm0, %v733_v48   ;;  %3715 = vst.msk [vmem:[%s9849_s1 + $0x263] ss:$16 sm:$0xc] %vm3_vm0, %v733_v48  }
  0xb6   :  { %3716 = vst.msk [vmem:[%s9849_s1 + $0x2c3] ss:$16 sm:$0x30] %vm3_vm0, %v733_v48   ;;  %3717 = vst.msk [vmem:[%s9849_s1 + $0x323] ss:$16 sm:$0xc0] %vm3_vm0, %v733_v48   ;;  %1483 = vrot.lane.b32.xlu1 %v4839_v10, %s4756_s6  ;;  %1470 = vrot.lane.b32.xlu0 %v4844_v11, %s4756_s6 }
  0xb7   :  { %3709 = vst.msk [vmem:[%s9849_s1 + $0x3] ss:$16 sm:$0x3] %vm3_vm0, %v720_v49   ;;  %3710 = vst.msk [vmem:[%s9849_s1 + $0x63] ss:$16 sm:$0xc] %vm3_vm0, %v720_v49  }
  0xb8   :  { %3711 = vst.msk [vmem:[%s9849_s1 + $0xc3] ss:$16 sm:$0x30] %vm3_vm0, %v720_v49   ;;  %3712 = vst.msk [vmem:[%s9849_s1 + $0x123] ss:$16 sm:$0xc0] %vm3_vm0, %v720_v49   ;;  %v759_v50 = vpop.permute.xlu1 %758   ;;  %v746_v51 = vpop.permute.xlu0 %745  }
  0xb9   :  { %3724 = vst.msk [vmem:[%s9849_s1 + $0x223] ss:$16 sm:$0x3] %vm3_vm0, %v759_v50   ;;  %3725 = vst.msk [vmem:[%s9849_s1 + $0x283] ss:$16 sm:$0xc] %vm3_vm0, %v759_v50  }
  0xba   :  { %3726 = vst.msk [vmem:[%s9849_s1 + $0x2e3] ss:$16 sm:$0x30] %vm3_vm0, %v759_v50   ;;  %3727 = vst.msk [vmem:[%s9849_s1 + $0x343] ss:$16 sm:$0xc0] %vm3_vm0, %v759_v50   ;;  %1509 = vrot.lane.b32.xlu1 %v4851_v12, %s4756_s6  ;;  %1496 = vrot.lane.b32.xlu0 %v4856_v13, %s4756_s6 }
  0xbb   :  { %3719 = vst.msk [vmem:[%s9849_s1 + $0x23] ss:$16 sm:$0x3] %vm3_vm0, %v746_v51   ;;  %3720 = vst.msk [vmem:[%s9849_s1 + $0x83] ss:$16 sm:$0xc] %vm3_vm0, %v746_v51  }
  0xbc   :  { %3721 = vst.msk [vmem:[%s9849_s1 + $0xe3] ss:$16 sm:$0x30] %vm3_vm0, %v746_v51   ;;  %3722 = vst.msk [vmem:[%s9849_s1 + $0x143] ss:$16 sm:$0xc0] %vm3_vm0, %v746_v51   ;;  %v785_v52 = vpop.permute.xlu1 %784   ;;  %v772_v53 = vpop.permute.xlu0 %771  }
  0xbd   :  { %3734 = vst.msk [vmem:[%s9849_s1 + $0x243] ss:$16 sm:$0x3] %vm3_vm0, %v785_v52   ;;  %3735 = vst.msk [vmem:[%s9849_s1 + $0x2a3] ss:$16 sm:$0xc] %vm3_vm0, %v785_v52  }
  0xbe   :  { %3736 = vst.msk [vmem:[%s9849_s1 + $0x303] ss:$16 sm:$0x30] %vm3_vm0, %v785_v52   ;;  %3737 = vst.msk [vmem:[%s9849_s1 + $0x363] ss:$16 sm:$0xc0] %vm3_vm0, %v785_v52   ;;  %1535 = vrot.lane.b32.xlu1 %v4863_v14, %s4756_s6  ;;  %1522 = vrot.lane.b32.xlu0 %v4868_v15, %s4756_s6 }
  0xbf   :  { %3729 = vst.msk [vmem:[%s9849_s1 + $0x43] ss:$16 sm:$0x3] %vm3_vm0, %v772_v53   ;;  %3730 = vst.msk [vmem:[%s9849_s1 + $0xa3] ss:$16 sm:$0xc] %vm3_vm0, %v772_v53  }
  0xc0   :  { %3731 = vst.msk [vmem:[%s9849_s1 + $0x103] ss:$16 sm:$0x30] %vm3_vm0, %v772_v53   ;;  %3732 = vst.msk [vmem:[%s9849_s1 + $0x163] ss:$16 sm:$0xc0] %vm3_vm0, %v772_v53   ;;  %v811_v54 = vpop.permute.xlu1 %810   ;;  %v798_v55 = vpop.permute.xlu0 %797  }
  0xc1   :  { %3744 = vst.msk [vmem:[%s9849_s1 + $0x263] ss:$16 sm:$0x3] %vm3_vm0, %v811_v54   ;;  %3745 = vst.msk [vmem:[%s9849_s1 + $0x2c3] ss:$16 sm:$0xc] %vm3_vm0, %v811_v54  }
  0xc2   :  { %3746 = vst.msk [vmem:[%s9849_s1 + $0x323] ss:$16 sm:$0x30] %vm3_vm0, %v811_v54   ;;  %3747 = vst.msk [vmem:[%s9849_s1 + $0x383] ss:$16 sm:$0xc0] %vm3_vm0, %v811_v54   ;;  %1560 = vrot.lane.b32.xlu1 %v4796_v3, %s4757_s23  ;;  %1547 = vrot.lane.b32.xlu0 %v4784_v1, %s4757_s23 }
  0xc3   :  { %3739 = vst.msk [vmem:[%s9849_s1 + $0x63] ss:$16 sm:$0x3] %vm3_vm0, %v798_v55   ;;  %3740 = vst.msk [vmem:[%s9849_s1 + $0xc3] ss:$16 sm:$0xc] %vm3_vm0, %v798_v55  }
  0xc4   :  { %3741 = vst.msk [vmem:[%s9849_s1 + $0x123] ss:$16 sm:$0x30] %vm3_vm0, %v798_v55   ;;  %3742 = vst.msk [vmem:[%s9849_s1 + $0x183] ss:$16 sm:$0xc0] %vm3_vm0, %v798_v55   ;;  %v837_v56 = vpop.permute.xlu1 %836   ;;  %v824_v57 = vpop.permute.xlu0 %823  }
  0xc5   :  { %3754 = vst.msk [vmem:[%s9849_s1 + $0x603] ss:$16 sm:$0x3] %vm3_vm0, %v837_v56   ;;  %3755 = vst.msk [vmem:[%s9849_s1 + $0x663] ss:$16 sm:$0xc] %vm3_vm0, %v837_v56  }
  0xc6   :  { %3756 = vst.msk [vmem:[%s9849_s1 + $0x6c3] ss:$16 sm:$0x30] %vm3_vm0, %v837_v56   ;;  %3757 = vst.msk [vmem:[%s9849_s1 + $0x723] ss:$16 sm:$0xc0] %vm3_vm0, %v837_v56   ;;  %1586 = vrot.lane.b32.xlu1 %v4791_v2, %s4757_s23  ;;  %1573 = vrot.lane.b32.xlu0 %v4779_v0, %s4757_s23 }
  0xc7   :  { %3749 = vst.msk [vmem:[%s9849_s1 + $0x403] ss:$16 sm:$0x3] %vm3_vm0, %v824_v57   ;;  %3750 = vst.msk [vmem:[%s9849_s1 + $0x463] ss:$16 sm:$0xc] %vm3_vm0, %v824_v57  }
  0xc8   :  { %3751 = vst.msk [vmem:[%s9849_s1 + $0x4c3] ss:$16 sm:$0x30] %vm3_vm0, %v824_v57   ;;  %3752 = vst.msk [vmem:[%s9849_s1 + $0x523] ss:$16 sm:$0xc0] %vm3_vm0, %v824_v57   ;;  %v863_v58 = vpop.permute.xlu1 %862   ;;  %v850_v59 = vpop.permute.xlu0 %849  }
  0xc9   :  { %3764 = vst.msk [vmem:[%s9849_s1 + $0x623] ss:$16 sm:$0x3] %vm3_vm0, %v863_v58   ;;  %3765 = vst.msk [vmem:[%s9849_s1 + $0x683] ss:$16 sm:$0xc] %vm3_vm0, %v863_v58  }
  0xca   :  { %3766 = vst.msk [vmem:[%s9849_s1 + $0x6e3] ss:$16 sm:$0x30] %vm3_vm0, %v863_v58   ;;  %3767 = vst.msk [vmem:[%s9849_s1 + $0x743] ss:$16 sm:$0xc0] %vm3_vm0, %v863_v58   ;;  %1612 = vrot.lane.b32.xlu1 %v4803_v4, %s4757_s23  ;;  %1599 = vrot.lane.b32.xlu0 %v4808_v5, %s4757_s23 }
  0xcb   :  { %3759 = vst.msk [vmem:[%s9849_s1 + $0x423] ss:$16 sm:$0x3] %vm3_vm0, %v850_v59   ;;  %3760 = vst.msk [vmem:[%s9849_s1 + $0x483] ss:$16 sm:$0xc] %vm3_vm0, %v850_v59  }
  0xcc   :  { %3761 = vst.msk [vmem:[%s9849_s1 + $0x4e3] ss:$16 sm:$0x30] %vm3_vm0, %v850_v59   ;;  %3762 = vst.msk [vmem:[%s9849_s1 + $0x543] ss:$16 sm:$0xc0] %vm3_vm0, %v850_v59   ;;  %v889_v60 = vpop.permute.xlu1 %888   ;;  %v876_v61 = vpop.permute.xlu0 %875  }
  0xcd   :  { %3774 = vst.msk [vmem:[%s9849_s1 + $0x643] ss:$16 sm:$0x3] %vm3_vm0, %v889_v60   ;;  %3775 = vst.msk [vmem:[%s9849_s1 + $0x6a3] ss:$16 sm:$0xc] %vm3_vm0, %v889_v60  }
  0xce   :  { %3776 = vst.msk [vmem:[%s9849_s1 + $0x703] ss:$16 sm:$0x30] %vm3_vm0, %v889_v60   ;;  %3777 = vst.msk [vmem:[%s9849_s1 + $0x763] ss:$16 sm:$0xc0] %vm3_vm0, %v889_v60   ;;  %1638 = vrot.lane.b32.xlu1 %v4815_v6, %s4757_s23  ;;  %1625 = vrot.lane.b32.xlu0 %v4820_v7, %s4757_s23 }
  0xcf   :  { %3769 = vst.msk [vmem:[%s9849_s1 + $0x443] ss:$16 sm:$0x3] %vm3_vm0, %v876_v61   ;;  %3770 = vst.msk [vmem:[%s9849_s1 + $0x4a3] ss:$16 sm:$0xc] %vm3_vm0, %v876_v61  }
  0xd0   :  { %3771 = vst.msk [vmem:[%s9849_s1 + $0x503] ss:$16 sm:$0x30] %vm3_vm0, %v876_v61   ;;  %3772 = vst.msk [vmem:[%s9849_s1 + $0x563] ss:$16 sm:$0xc0] %vm3_vm0, %v876_v61   ;;  %v915_v62 = vpop.permute.xlu1 %914   ;;  %v902_v63 = vpop.permute.xlu0 %901  }
  0xd1   :  { %3784 = vst.msk [vmem:[%s9849_s1 + $0x663] ss:$16 sm:$0x3] %vm3_vm0, %v915_v62   ;;  %3785 = vst.msk [vmem:[%s9849_s1 + $0x6c3] ss:$16 sm:$0xc] %vm3_vm0, %v915_v62  }
  0xd2   :  { %3786 = vst.msk [vmem:[%s9849_s1 + $0x723] ss:$16 sm:$0x30] %vm3_vm0, %v915_v62   ;;  %3787 = vst.msk [vmem:[%s9849_s1 + $0x783] ss:$16 sm:$0xc0] %vm3_vm0, %v915_v62   ;;  %1664 = vrot.lane.b32.xlu1 %v4827_v8, %s4757_s23  ;;  %1651 = vrot.lane.b32.xlu0 %v4832_v9, %s4757_s23 }
  0xd3   :  { %3779 = vst.msk [vmem:[%s9849_s1 + $0x463] ss:$16 sm:$0x3] %vm3_vm0, %v902_v63   ;;  %3780 = vst.msk [vmem:[%s9849_s1 + $0x4c3] ss:$16 sm:$0xc] %vm3_vm0, %v902_v63  }
  0xd4   :  { %3781 = vst.msk [vmem:[%s9849_s1 + $0x523] ss:$16 sm:$0x30] %vm3_vm0, %v902_v63   ;;  %3782 = vst.msk [vmem:[%s9849_s1 + $0x583] ss:$16 sm:$0xc0] %vm3_vm0, %v902_v63   ;;  %v940_v0 = vpop.permute.xlu1 %939   ;;  %v927_v1 = vpop.permute.xlu0 %926  }
  0xd5   :  { %3793 = vst.msk [vmem:[%s9849_s1 + $0x204] ss:$16 sm:$0x3] %vm3_vm0, %v940_v0   ;;  %3794 = vst.msk [vmem:[%s9849_s1 + $0x264] ss:$16 sm:$0xc] %vm3_vm0, %v940_v0  }
  0xd6   :  { %3795 = vst.msk [vmem:[%s9849_s1 + $0x2c4] ss:$16 sm:$0x30] %vm3_vm0, %v940_v0   ;;  %3796 = vst.msk [vmem:[%s9849_s1 + $0x324] ss:$16 sm:$0xc0] %vm3_vm0, %v940_v0   ;;  %1690 = vrot.lane.b32.xlu1 %v4839_v10, %s4757_s23  ;;  %1677 = vrot.lane.b32.xlu0 %v4844_v11, %s4757_s23 }
  0xd7   :  { %3788 = vst.msk [vmem:[%s9849_s1 + $0x4] ss:$16 sm:$0x3] %vm3_vm0, %v927_v1   ;;  %3789 = vst.msk [vmem:[%s9849_s1 + $0x64] ss:$16 sm:$0xc] %vm3_vm0, %v927_v1  }
  0xd8   :  { %3790 = vst.msk [vmem:[%s9849_s1 + $0xc4] ss:$16 sm:$0x30] %vm3_vm0, %v927_v1   ;;  %3791 = vst.msk [vmem:[%s9849_s1 + $0x124] ss:$16 sm:$0xc0] %vm3_vm0, %v927_v1   ;;  %v966_v2 = vpop.permute.xlu1 %965   ;;  %v953_v4 = vpop.permute.xlu0 %952  }
  0xd9   :  { %3803 = vst.msk [vmem:[%s9849_s1 + $0x224] ss:$16 sm:$0x3] %vm3_vm0, %v966_v2   ;;  %3804 = vst.msk [vmem:[%s9849_s1 + $0x284] ss:$16 sm:$0xc] %vm3_vm0, %v966_v2  }
  0xda   :  { %3805 = vst.msk [vmem:[%s9849_s1 + $0x2e4] ss:$16 sm:$0x30] %vm3_vm0, %v966_v2   ;;  %3806 = vst.msk [vmem:[%s9849_s1 + $0x344] ss:$16 sm:$0xc0] %vm3_vm0, %v966_v2   ;;  %1716 = vrot.lane.b32.xlu1 %v4851_v12, %s4757_s23  ;;  %1703 = vrot.lane.b32.xlu0 %v4856_v13, %s4757_s23 }
  0xdb   :  { %3798 = vst.msk [vmem:[%s9849_s1 + $0x24] ss:$16 sm:$0x3] %vm3_vm0, %v953_v4   ;;  %3799 = vst.msk [vmem:[%s9849_s1 + $0x84] ss:$16 sm:$0xc] %vm3_vm0, %v953_v4  }
  0xdc   :  { %3800 = vst.msk [vmem:[%s9849_s1 + $0xe4] ss:$16 sm:$0x30] %vm3_vm0, %v953_v4   ;;  %3801 = vst.msk [vmem:[%s9849_s1 + $0x144] ss:$16 sm:$0xc0] %vm3_vm0, %v953_v4   ;;  %v992_v5 = vpop.permute.xlu1 %991   ;;  %v979_v6 = vpop.permute.xlu0 %978  }
  0xdd   :  { %3813 = vst.msk [vmem:[%s9849_s1 + $0x244] ss:$16 sm:$0x3] %vm3_vm0, %v992_v5   ;;  %3814 = vst.msk [vmem:[%s9849_s1 + $0x2a4] ss:$16 sm:$0xc] %vm3_vm0, %v992_v5  }
  0xde   :  { %3815 = vst.msk [vmem:[%s9849_s1 + $0x304] ss:$16 sm:$0x30] %vm3_vm0, %v992_v5   ;;  %3816 = vst.msk [vmem:[%s9849_s1 + $0x364] ss:$16 sm:$0xc0] %vm3_vm0, %v992_v5   ;;  %1742 = vrot.lane.b32.xlu1 %v4863_v14, %s4757_s23  ;;  %1729 = vrot.lane.b32.xlu0 %v4868_v15, %s4757_s23 }
  0xdf   :  { %3808 = vst.msk [vmem:[%s9849_s1 + $0x44] ss:$16 sm:$0x3] %vm3_vm0, %v979_v6   ;;  %3809 = vst.msk [vmem:[%s9849_s1 + $0xa4] ss:$16 sm:$0xc] %vm3_vm0, %v979_v6  }
  0xe0   :  { %3810 = vst.msk [vmem:[%s9849_s1 + $0x104] ss:$16 sm:$0x30] %vm3_vm0, %v979_v6   ;;  %3811 = vst.msk [vmem:[%s9849_s1 + $0x164] ss:$16 sm:$0xc0] %vm3_vm0, %v979_v6   ;;  %v1018_v8 = vpop.permute.xlu1 %1017   ;;  %v1005_v9 = vpop.permute.xlu0 %1004  }
  0xe1   :  { %v5899_v7 = vld.sshfl [vmem:[%s9848_s0] sm:$0xff pattern:$0xb3a29180]   ;;  %3823 = vst.msk [vmem:[%s9849_s1 + $0x264] ss:$16 sm:$0x3] %vm3_vm0, %v1018_v8  }
  0xe2   :  { %3824 = vst.msk [vmem:[%s9849_s1 + $0x2c4] ss:$16 sm:$0xc] %vm3_vm0, %v1018_v8   ;;  %3825 = vst.msk [vmem:[%s9849_s1 + $0x324] ss:$16 sm:$0x30] %vm3_vm0, %v1018_v8   ;;  %1767 = vrot.lane.b32.xlu1 %v4796_v3, %s4758_s11  ;;  %1754 = vrot.lane.b32.xlu0 %v5899_v7, %s4758_s11 }
  0xe3   :  { %3826 = vst.msk [vmem:[%s9849_s1 + $0x384] ss:$16 sm:$0xc0] %vm3_vm0, %v1018_v8   ;;  %3818 = vst.msk [vmem:[%s9849_s1 + $0x64] ss:$16 sm:$0x3] %vm3_vm0, %v1005_v9  }
  0xe4   :  { %3819 = vst.msk [vmem:[%s9849_s1 + $0xc4] ss:$16 sm:$0xc] %vm3_vm0, %v1005_v9   ;;  %3820 = vst.msk [vmem:[%s9849_s1 + $0x124] ss:$16 sm:$0x30] %vm3_vm0, %v1005_v9   ;;  %v1044_v11 = vpop.permute.xlu1 %1043   ;;  %v1031_v12 = vpop.permute.xlu0 %1030  }
  0xe5   :  { %3821 = vst.msk [vmem:[%s9849_s1 + $0x184] ss:$16 sm:$0xc0] %vm3_vm0, %v1005_v9   ;;  %v5940_v3 = vld.sshfl [vmem:[%s9848_s0 + $0x14] sm:$0xff pattern:$0xb3a29180]  }
  0xe6   :  { %v5945_v10 = vld.sshfl [vmem:[%s9848_s0 + $0x10] sm:$0xff pattern:$0xb3a29180]   ;;  %3833 = vst.msk [vmem:[%s9849_s1 + $0x604] ss:$16 sm:$0x3] %vm3_vm0, %v1044_v11   ;;  %1793 = vrot.lane.b32.xlu1 %v5940_v3, %s4758_s11 }
  0xe7   :  { %3834 = vst.msk [vmem:[%s9849_s1 + $0x664] ss:$16 sm:$0xc] %vm3_vm0, %v1044_v11   ;;  %3835 = vst.msk [vmem:[%s9849_s1 + $0x6c4] ss:$16 sm:$0x30] %vm3_vm0, %v1044_v11   ;;  %1780 = vrot.lane.b32.xlu0 %v5945_v10, %s4758_s11 }
  0xe8   :  { %3836 = vst.msk [vmem:[%s9849_s1 + $0x724] ss:$16 sm:$0xc0] %vm3_vm0, %v1044_v11   ;;  %3828 = vst.msk [vmem:[%s9849_s1 + $0x404] ss:$16 sm:$0x3] %vm3_vm0, %v1031_v12   ;;  %v1070_v15 = vpop.permute.xlu1 %1069   ;;  %v1057_v16 = vpop.permute.xlu0 %1056  }
  0xe9   :  { %3829 = vst.msk [vmem:[%s9849_s1 + $0x464] ss:$16 sm:$0xc] %vm3_vm0, %v1031_v12   ;;  %3830 = vst.msk [vmem:[%s9849_s1 + $0x4c4] ss:$16 sm:$0x30] %vm3_vm0, %v1031_v12  }
  0xea   :  { %3831 = vst.msk [vmem:[%s9849_s1 + $0x524] ss:$16 sm:$0xc0] %vm3_vm0, %v1031_v12   ;;  %v5986_v13 = vld.sshfl [vmem:[%s9848_s0 + $0x24] sm:$0xff pattern:$0xb3a29180]  }
  0xeb   :  { %v5991_v14 = vld.sshfl [vmem:[%s9848_s0 + $0x20] sm:$0xff pattern:$0xb3a29180]   ;;  %3843 = vst.msk [vmem:[%s9849_s1 + $0x624] ss:$16 sm:$0x3] %vm3_vm0, %v1070_v15   ;;  %1819 = vrot.lane.b32.xlu1 %v5986_v13, %s4758_s11 }
  0xec   :  { %3844 = vst.msk [vmem:[%s9849_s1 + $0x684] ss:$16 sm:$0xc] %vm3_vm0, %v1070_v15   ;;  %3845 = vst.msk [vmem:[%s9849_s1 + $0x6e4] ss:$16 sm:$0x30] %vm3_vm0, %v1070_v15   ;;  %1806 = vrot.lane.b32.xlu0 %v5991_v14, %s4758_s11  ;;  %v1096_v19 = vpop.permute.xlu1 %1095   ;;  %v1083_v20 = vpop.permute.xlu0 %1082  }
  0xed   :  { %3846 = vst.msk [vmem:[%s9849_s1 + $0x744] ss:$16 sm:$0xc0] %vm3_vm0, %v1070_v15   ;;  %3838 = vst.msk [vmem:[%s9849_s1 + $0x424] ss:$16 sm:$0x3] %vm3_vm0, %v1057_v16  }
  0xee   :  { %3839 = vst.msk [vmem:[%s9849_s1 + $0x484] ss:$16 sm:$0xc] %vm3_vm0, %v1057_v16   ;;  %3840 = vst.msk [vmem:[%s9849_s1 + $0x4e4] ss:$16 sm:$0x30] %vm3_vm0, %v1057_v16  }
  0xef   :  { %3841 = vst.msk [vmem:[%s9849_s1 + $0x544] ss:$16 sm:$0xc0] %vm3_vm0, %v1057_v16   ;;  %v6032_v17 = vld.sshfl [vmem:[%s9848_s0 + $0x34] sm:$0xff pattern:$0xb3a29180]  }
  0xf0   :  { %v6037_v18 = vld.sshfl [vmem:[%s9848_s0 + $0x30] sm:$0xff pattern:$0xb3a29180]   ;;  %3853 = vst.msk [vmem:[%s9849_s1 + $0x644] ss:$16 sm:$0x3] %vm3_vm0, %v1096_v19   ;;  %1845 = vrot.lane.b32.xlu1 %v6032_v17, %s4758_s11  ;;  %v1122_v23 = vpop.permute.xlu1 %1121   ;;  %v1109_v24 = vpop.permute.xlu0 %1108  }
  0xf1   :  { %3854 = vst.msk [vmem:[%s9849_s1 + $0x6a4] ss:$16 sm:$0xc] %vm3_vm0, %v1096_v19   ;;  %3855 = vst.msk [vmem:[%s9849_s1 + $0x704] ss:$16 sm:$0x30] %vm3_vm0, %v1096_v19   ;;  %1832 = vrot.lane.b32.xlu0 %v6037_v18, %s4758_s11 }
  0xf2   :  { %3856 = vst.msk [vmem:[%s9849_s1 + $0x764] ss:$16 sm:$0xc0] %vm3_vm0, %v1096_v19   ;;  %3848 = vst.msk [vmem:[%s9849_s1 + $0x444] ss:$16 sm:$0x3] %vm3_vm0, %v1083_v20  }
  0xf3   :  { %3849 = vst.msk [vmem:[%s9849_s1 + $0x4a4] ss:$16 sm:$0xc] %vm3_vm0, %v1083_v20   ;;  %3850 = vst.msk [vmem:[%s9849_s1 + $0x504] ss:$16 sm:$0x30] %vm3_vm0, %v1083_v20  }
  0xf4   :  { %3851 = vst.msk [vmem:[%s9849_s1 + $0x564] ss:$16 sm:$0xc0] %vm3_vm0, %v1083_v20   ;;  %v6078_v21 = vld.sshfl [vmem:[%s9848_s0 + $0x44] sm:$0xff pattern:$0xb3a29180]   ;;  %v1147_v27 = vpop.permute.xlu1 %1146   ;;  %v1134_v28 = vpop.permute.xlu0 %1133  }
  0xf5   :  { %v6083_v22 = vld.sshfl [vmem:[%s9848_s0 + $0x40] sm:$0xff pattern:$0xb3a29180]   ;;  %3863 = vst.msk [vmem:[%s9849_s1 + $0x664] ss:$16 sm:$0x3] %vm3_vm0, %v1122_v23   ;;  %1871 = vrot.lane.b32.xlu1 %v6078_v21, %s4758_s11 }
  0xf6   :  { %3864 = vst.msk [vmem:[%s9849_s1 + $0x6c4] ss:$16 sm:$0xc] %vm3_vm0, %v1122_v23   ;;  %3865 = vst.msk [vmem:[%s9849_s1 + $0x724] ss:$16 sm:$0x30] %vm3_vm0, %v1122_v23   ;;  %1858 = vrot.lane.b32.xlu0 %v6083_v22, %s4758_s11 }
  0xf7   :  { %3866 = vst.msk [vmem:[%s9849_s1 + $0x784] ss:$16 sm:$0xc0] %vm3_vm0, %v1122_v23   ;;  %3858 = vst.msk [vmem:[%s9849_s1 + $0x464] ss:$16 sm:$0x3] %vm3_vm0, %v1109_v24  }
  0xf8   :  { %3859 = vst.msk [vmem:[%s9849_s1 + $0x4c4] ss:$16 sm:$0xc] %vm3_vm0, %v1109_v24   ;;  %3860 = vst.msk [vmem:[%s9849_s1 + $0x524] ss:$16 sm:$0x30] %vm3_vm0, %v1109_v24   ;;  %v1173_v31 = vpop.permute.xlu1 %1172   ;;  %v1160_v32 = vpop.permute.xlu0 %1159  }
  0xf9   :  { %3861 = vst.msk [vmem:[%s9849_s1 + $0x584] ss:$16 sm:$0xc0] %vm3_vm0, %v1109_v24   ;;  %v6124_v25 = vld.sshfl [vmem:[%s9848_s0 + $0x54] sm:$0xff pattern:$0xb3a29180]  }
  0xfa   :  { %v6129_v26 = vld.sshfl [vmem:[%s9848_s0 + $0x50] sm:$0xff pattern:$0xb3a29180]   ;;  %3872 = vst.msk [vmem:[%s9849_s1 + $0x205] ss:$16 sm:$0x3] %vm3_vm0, %v1147_v27   ;;  %1897 = vrot.lane.b32.xlu1 %v6124_v25, %s4758_s11 }
  0xfb   :  { %3873 = vst.msk [vmem:[%s9849_s1 + $0x265] ss:$16 sm:$0xc] %vm3_vm0, %v1147_v27   ;;  %3874 = vst.msk [vmem:[%s9849_s1 + $0x2c5] ss:$16 sm:$0x30] %vm3_vm0, %v1147_v27   ;;  %1884 = vrot.lane.b32.xlu0 %v6129_v26, %s4758_s11 }
  0xfc   :  { %3875 = vst.msk [vmem:[%s9849_s1 + $0x325] ss:$16 sm:$0xc0] %vm3_vm0, %v1147_v27   ;;  %3867 = vst.msk [vmem:[%s9849_s1 + $0x5] ss:$16 sm:$0x3] %vm3_vm0, %v1134_v28   ;;  %v1199_v35 = vpop.permute.xlu1 %1198   ;;  %v1186_v36 = vpop.permute.xlu0 %1185  }
  0xfd   :  { %3868 = vst.msk [vmem:[%s9849_s1 + $0x65] ss:$16 sm:$0xc] %vm3_vm0, %v1134_v28   ;;  %3869 = vst.msk [vmem:[%s9849_s1 + $0xc5] ss:$16 sm:$0x30] %vm3_vm0, %v1134_v28  }
  0xfe   :  { %3870 = vst.msk [vmem:[%s9849_s1 + $0x125] ss:$16 sm:$0xc0] %vm3_vm0, %v1134_v28   ;;  %v6170_v29 = vld.sshfl [vmem:[%s9848_s0 + $0x64] sm:$0xff pattern:$0xb3a29180]  }
  0xff   :  { %v6175_v30 = vld.sshfl [vmem:[%s9848_s0 + $0x60] sm:$0xff pattern:$0xb3a29180]   ;;  %3882 = vst.msk [vmem:[%s9849_s1 + $0x225] ss:$16 sm:$0x3] %vm3_vm0, %v1173_v31   ;;  %1923 = vrot.lane.b32.xlu1 %v6170_v29, %s4758_s11 }
 0x100   :  { %3883 = vst.msk [vmem:[%s9849_s1 + $0x285] ss:$16 sm:$0xc] %vm3_vm0, %v1173_v31   ;;  %3884 = vst.msk [vmem:[%s9849_s1 + $0x2e5] ss:$16 sm:$0x30] %vm3_vm0, %v1173_v31   ;;  %1910 = vrot.lane.b32.xlu0 %v6175_v30, %s4758_s11  ;;  %v1225_v38 = vpop.permute.xlu1 %1224   ;;  %v1212_v39 = vpop.permute.xlu0 %1211  }
 0x101   :  { %3885 = vst.msk [vmem:[%s9849_s1 + $0x345] ss:$16 sm:$0xc0] %vm3_vm0, %v1173_v31   ;;  %3877 = vst.msk [vmem:[%s9849_s1 + $0x25] ss:$16 sm:$0x3] %vm3_vm0, %v1160_v32  }
 0x102   :  { %3878 = vst.msk [vmem:[%s9849_s1 + $0x85] ss:$16 sm:$0xc] %vm3_vm0, %v1160_v32   ;;  %3879 = vst.msk [vmem:[%s9849_s1 + $0xe5] ss:$16 sm:$0x30] %vm3_vm0, %v1160_v32  }
 0x103   :  { %3880 = vst.msk [vmem:[%s9849_s1 + $0x145] ss:$16 sm:$0xc0] %vm3_vm0, %v1160_v32   ;;  %v6216_v33 = vld.sshfl [vmem:[%s9848_s0 + $0x74] sm:$0xff pattern:$0xb3a29180]  }
 0x104   :  { %v6221_v34 = vld.sshfl [vmem:[%s9848_s0 + $0x70] sm:$0xff pattern:$0xb3a29180]   ;;  %3892 = vst.msk [vmem:[%s9849_s1 + $0x245] ss:$16 sm:$0x3] %vm3_vm0, %v1199_v35   ;;  %1949 = vrot.lane.b32.xlu1 %v6216_v33, %s4758_s11  ;;  %v1251_v40 = vpop.permute.xlu1 %1250   ;;  %v1238_v41 = vpop.permute.xlu0 %1237  }
 0x105   :  { %3893 = vst.msk [vmem:[%s9849_s1 + $0x2a5] ss:$16 sm:$0xc] %vm3_vm0, %v1199_v35   ;;  %3894 = vst.msk [vmem:[%s9849_s1 + $0x305] ss:$16 sm:$0x30] %vm3_vm0, %v1199_v35   ;;  %1936 = vrot.lane.b32.xlu0 %v6221_v34, %s4758_s11 }
 0x106   :  { %3895 = vst.msk [vmem:[%s9849_s1 + $0x365] ss:$16 sm:$0xc0] %vm3_vm0, %v1199_v35   ;;  %3887 = vst.msk [vmem:[%s9849_s1 + $0x45] ss:$16 sm:$0x3] %vm3_vm0, %v1186_v36  }
 0x107   :  { %3888 = vst.msk [vmem:[%s9849_s1 + $0xa5] ss:$16 sm:$0xc] %vm3_vm0, %v1186_v36   ;;  %3889 = vst.msk [vmem:[%s9849_s1 + $0x105] ss:$16 sm:$0x30] %vm3_vm0, %v1186_v36  }
 0x108   :  { %3890 = vst.msk [vmem:[%s9849_s1 + $0x165] ss:$16 sm:$0xc0] %vm3_vm0, %v1186_v36   ;;  %v6262_v37 = vld.sshfl [vmem:[%s9848_s0 + $0x4] sm:$0xff pattern:$0xb3a29180]   ;;  %v1277_v42 = vpop.permute.xlu1 %1276   ;;  %v1264_v43 = vpop.permute.xlu0 %1263  }
 0x109   :  { %3902 = vst.msk [vmem:[%s9849_s1 + $0x265] ss:$16 sm:$0x3] %vm3_vm0, %v1225_v38   ;;  %3903 = vst.msk [vmem:[%s9849_s1 + $0x2c5] ss:$16 sm:$0xc] %vm3_vm0, %v1225_v38   ;;  %1974 = vrot.lane.b32.xlu1 %v6262_v37, %s4759_s30  ;;  %1961 = vrot.lane.b32.xlu0 %v5899_v7, %s4759_s30 }
 0x10a   :  { %3904 = vst.msk [vmem:[%s9849_s1 + $0x325] ss:$16 sm:$0x30] %vm3_vm0, %v1225_v38   ;;  %3905 = vst.msk [vmem:[%s9849_s1 + $0x385] ss:$16 sm:$0xc0] %vm3_vm0, %v1225_v38  }
 0x10b   :  { %3897 = vst.msk [vmem:[%s9849_s1 + $0x65] ss:$16 sm:$0x3] %vm3_vm0, %v1212_v39   ;;  %3898 = vst.msk [vmem:[%s9849_s1 + $0xc5] ss:$16 sm:$0xc] %vm3_vm0, %v1212_v39  }
 0x10c   :  { %3899 = vst.msk [vmem:[%s9849_s1 + $0x125] ss:$16 sm:$0x30] %vm3_vm0, %v1212_v39   ;;  %3900 = vst.msk [vmem:[%s9849_s1 + $0x185] ss:$16 sm:$0xc0] %vm3_vm0, %v1212_v39   ;;  %v1303_v44 = vpop.permute.xlu1 %1302   ;;  %v1290_v45 = vpop.permute.xlu0 %1289  }
 0x10d   :  { %3912 = vst.msk [vmem:[%s9849_s1 + $0x605] ss:$16 sm:$0x3] %vm3_vm0, %v1251_v40   ;;  %3913 = vst.msk [vmem:[%s9849_s1 + $0x665] ss:$16 sm:$0xc] %vm3_vm0, %v1251_v40   ;;  %2000 = vrot.lane.b32.xlu1 %v5940_v3, %s4759_s30  ;;  %1987 = vrot.lane.b32.xlu0 %v5945_v10, %s4759_s30 }
 0x10e   :  { %3914 = vst.msk [vmem:[%s9849_s1 + $0x6c5] ss:$16 sm:$0x30] %vm3_vm0, %v1251_v40   ;;  %3915 = vst.msk [vmem:[%s9849_s1 + $0x725] ss:$16 sm:$0xc0] %vm3_vm0, %v1251_v40  }
 0x10f   :  { %3907 = vst.msk [vmem:[%s9849_s1 + $0x405] ss:$16 sm:$0x3] %vm3_vm0, %v1238_v41   ;;  %3908 = vst.msk [vmem:[%s9849_s1 + $0x465] ss:$16 sm:$0xc] %vm3_vm0, %v1238_v41  }
 0x110   :  { %3909 = vst.msk [vmem:[%s9849_s1 + $0x4c5] ss:$16 sm:$0x30] %vm3_vm0, %v1238_v41   ;;  %3910 = vst.msk [vmem:[%s9849_s1 + $0x525] ss:$16 sm:$0xc0] %vm3_vm0, %v1238_v41   ;;  %v1329_v46 = vpop.permute.xlu1 %1328   ;;  %v1316_v47 = vpop.permute.xlu0 %1315  }
 0x111   :  { %3922 = vst.msk [vmem:[%s9849_s1 + $0x625] ss:$16 sm:$0x3] %vm3_vm0, %v1277_v42   ;;  %3923 = vst.msk [vmem:[%s9849_s1 + $0x685] ss:$16 sm:$0xc] %vm3_vm0, %v1277_v42   ;;  %2026 = vrot.lane.b32.xlu1 %v5986_v13, %s4759_s30  ;;  %2013 = vrot.lane.b32.xlu0 %v5991_v14, %s4759_s30 }
 0x112   :  { %3924 = vst.msk [vmem:[%s9849_s1 + $0x6e5] ss:$16 sm:$0x30] %vm3_vm0, %v1277_v42   ;;  %3925 = vst.msk [vmem:[%s9849_s1 + $0x745] ss:$16 sm:$0xc0] %vm3_vm0, %v1277_v42  }
 0x113   :  { %3917 = vst.msk [vmem:[%s9849_s1 + $0x425] ss:$16 sm:$0x3] %vm3_vm0, %v1264_v43   ;;  %3918 = vst.msk [vmem:[%s9849_s1 + $0x485] ss:$16 sm:$0xc] %vm3_vm0, %v1264_v43  }
 0x114   :  { %3919 = vst.msk [vmem:[%s9849_s1 + $0x4e5] ss:$16 sm:$0x30] %vm3_vm0, %v1264_v43   ;;  %3920 = vst.msk [vmem:[%s9849_s1 + $0x545] ss:$16 sm:$0xc0] %vm3_vm0, %v1264_v43   ;;  %v1354_v48 = vpop.permute.xlu1 %1353   ;;  %v1341_v49 = vpop.permute.xlu0 %1340  }
 0x115   :  { %3932 = vst.msk [vmem:[%s9849_s1 + $0x645] ss:$16 sm:$0x3] %vm3_vm0, %v1303_v44   ;;  %3933 = vst.msk [vmem:[%s9849_s1 + $0x6a5] ss:$16 sm:$0xc] %vm3_vm0, %v1303_v44   ;;  %2052 = vrot.lane.b32.xlu1 %v6032_v17, %s4759_s30  ;;  %2039 = vrot.lane.b32.xlu0 %v6037_v18, %s4759_s30 }
 0x116   :  { %3934 = vst.msk [vmem:[%s9849_s1 + $0x705] ss:$16 sm:$0x30] %vm3_vm0, %v1303_v44   ;;  %3935 = vst.msk [vmem:[%s9849_s1 + $0x765] ss:$16 sm:$0xc0] %vm3_vm0, %v1303_v44  }
 0x117   :  { %3927 = vst.msk [vmem:[%s9849_s1 + $0x445] ss:$16 sm:$0x3] %vm3_vm0, %v1290_v45   ;;  %3928 = vst.msk [vmem:[%s9849_s1 + $0x4a5] ss:$16 sm:$0xc] %vm3_vm0, %v1290_v45  }
 0x118   :  { %3929 = vst.msk [vmem:[%s9849_s1 + $0x505] ss:$16 sm:$0x30] %vm3_vm0, %v1290_v45   ;;  %3930 = vst.msk [vmem:[%s9849_s1 + $0x565] ss:$16 sm:$0xc0] %vm3_vm0, %v1290_v45   ;;  %v1380_v50 = vpop.permute.xlu1 %1379   ;;  %v1367_v51 = vpop.permute.xlu0 %1366  }
 0x119   :  { %3942 = vst.msk [vmem:[%s9849_s1 + $0x665] ss:$16 sm:$0x3] %vm3_vm0, %v1329_v46   ;;  %3943 = vst.msk [vmem:[%s9849_s1 + $0x6c5] ss:$16 sm:$0xc] %vm3_vm0, %v1329_v46   ;;  %2078 = vrot.lane.b32.xlu1 %v6078_v21, %s4759_s30  ;;  %2065 = vrot.lane.b32.xlu0 %v6083_v22, %s4759_s30 }
 0x11a   :  { %3944 = vst.msk [vmem:[%s9849_s1 + $0x725] ss:$16 sm:$0x30] %vm3_vm0, %v1329_v46   ;;  %3945 = vst.msk [vmem:[%s9849_s1 + $0x785] ss:$16 sm:$0xc0] %vm3_vm0, %v1329_v46  }
 0x11b   :  { %3937 = vst.msk [vmem:[%s9849_s1 + $0x465] ss:$16 sm:$0x3] %vm3_vm0, %v1316_v47   ;;  %3938 = vst.msk [vmem:[%s9849_s1 + $0x4c5] ss:$16 sm:$0xc] %vm3_vm0, %v1316_v47  }
 0x11c   :  { %3939 = vst.msk [vmem:[%s9849_s1 + $0x525] ss:$16 sm:$0x30] %vm3_vm0, %v1316_v47   ;;  %3940 = vst.msk [vmem:[%s9849_s1 + $0x585] ss:$16 sm:$0xc0] %vm3_vm0, %v1316_v47   ;;  %v1406_v52 = vpop.permute.xlu1 %1405   ;;  %v1393_v53 = vpop.permute.xlu0 %1392  }
 0x11d   :  { %3951 = vst.msk [vmem:[%s9849_s1 + $0x206] ss:$16 sm:$0x3] %vm3_vm0, %v1354_v48   ;;  %3952 = vst.msk [vmem:[%s9849_s1 + $0x266] ss:$16 sm:$0xc] %vm3_vm0, %v1354_v48   ;;  %2104 = vrot.lane.b32.xlu1 %v6124_v25, %s4759_s30  ;;  %2091 = vrot.lane.b32.xlu0 %v6129_v26, %s4759_s30 }
 0x11e   :  { %3953 = vst.msk [vmem:[%s9849_s1 + $0x2c6] ss:$16 sm:$0x30] %vm3_vm0, %v1354_v48   ;;  %3954 = vst.msk [vmem:[%s9849_s1 + $0x326] ss:$16 sm:$0xc0] %vm3_vm0, %v1354_v48  }
 0x11f   :  { %3946 = vst.msk [vmem:[%s9849_s1 + $0x6] ss:$16 sm:$0x3] %vm3_vm0, %v1341_v49   ;;  %3947 = vst.msk [vmem:[%s9849_s1 + $0x66] ss:$16 sm:$0xc] %vm3_vm0, %v1341_v49  }
 0x120   :  { %3948 = vst.msk [vmem:[%s9849_s1 + $0xc6] ss:$16 sm:$0x30] %vm3_vm0, %v1341_v49   ;;  %3949 = vst.msk [vmem:[%s9849_s1 + $0x126] ss:$16 sm:$0xc0] %vm3_vm0, %v1341_v49   ;;  %v1432_v54 = vpop.permute.xlu1 %1431   ;;  %v1419_v55 = vpop.permute.xlu0 %1418  }
 0x121   :  { %3961 = vst.msk [vmem:[%s9849_s1 + $0x226] ss:$16 sm:$0x3] %vm3_vm0, %v1380_v50   ;;  %3962 = vst.msk [vmem:[%s9849_s1 + $0x286] ss:$16 sm:$0xc] %vm3_vm0, %v1380_v50   ;;  %2130 = vrot.lane.b32.xlu1 %v6170_v29, %s4759_s30  ;;  %2117 = vrot.lane.b32.xlu0 %v6175_v30, %s4759_s30 }
 0x122   :  { %3963 = vst.msk [vmem:[%s9849_s1 + $0x2e6] ss:$16 sm:$0x30] %vm3_vm0, %v1380_v50   ;;  %3964 = vst.msk [vmem:[%s9849_s1 + $0x346] ss:$16 sm:$0xc0] %vm3_vm0, %v1380_v50  }
 0x123   :  { %3956 = vst.msk [vmem:[%s9849_s1 + $0x26] ss:$16 sm:$0x3] %vm3_vm0, %v1367_v51   ;;  %3957 = vst.msk [vmem:[%s9849_s1 + $0x86] ss:$16 sm:$0xc] %vm3_vm0, %v1367_v51  }
 0x124   :  { %3958 = vst.msk [vmem:[%s9849_s1 + $0xe6] ss:$16 sm:$0x30] %vm3_vm0, %v1367_v51   ;;  %3959 = vst.msk [vmem:[%s9849_s1 + $0x146] ss:$16 sm:$0xc0] %vm3_vm0, %v1367_v51   ;;  %v1458_v56 = vpop.permute.xlu1 %1457   ;;  %v1445_v57 = vpop.permute.xlu0 %1444  }
 0x125   :  { %3971 = vst.msk [vmem:[%s9849_s1 + $0x246] ss:$16 sm:$0x3] %vm3_vm0, %v1406_v52   ;;  %3972 = vst.msk [vmem:[%s9849_s1 + $0x2a6] ss:$16 sm:$0xc] %vm3_vm0, %v1406_v52   ;;  %2156 = vrot.lane.b32.xlu1 %v6216_v33, %s4759_s30  ;;  %2143 = vrot.lane.b32.xlu0 %v6221_v34, %s4759_s30 }
 0x126   :  { %3973 = vst.msk [vmem:[%s9849_s1 + $0x306] ss:$16 sm:$0x30] %vm3_vm0, %v1406_v52   ;;  %3974 = vst.msk [vmem:[%s9849_s1 + $0x366] ss:$16 sm:$0xc0] %vm3_vm0, %v1406_v52  }
 0x127   :  { %3966 = vst.msk [vmem:[%s9849_s1 + $0x46] ss:$16 sm:$0x3] %vm3_vm0, %v1393_v53   ;;  %3967 = vst.msk [vmem:[%s9849_s1 + $0xa6] ss:$16 sm:$0xc] %vm3_vm0, %v1393_v53  }
 0x128   :  { %3968 = vst.msk [vmem:[%s9849_s1 + $0x106] ss:$16 sm:$0x30] %vm3_vm0, %v1393_v53   ;;  %3969 = vst.msk [vmem:[%s9849_s1 + $0x166] ss:$16 sm:$0xc0] %vm3_vm0, %v1393_v53   ;;  %v1484_v58 = vpop.permute.xlu1 %1483   ;;  %v1471_v59 = vpop.permute.xlu0 %1470  }
 0x129   :  { %3981 = vst.msk [vmem:[%s9849_s1 + $0x266] ss:$16 sm:$0x3] %vm3_vm0, %v1432_v54   ;;  %3982 = vst.msk [vmem:[%s9849_s1 + $0x2c6] ss:$16 sm:$0xc] %vm3_vm0, %v1432_v54   ;;  %2181 = vrot.lane.b32.xlu1 %v6262_v37, %s4760_s17  ;;  %2168 = vrot.lane.b32.xlu0 %v5899_v7, %s4760_s17 }
 0x12a   :  { %3983 = vst.msk [vmem:[%s9849_s1 + $0x326] ss:$16 sm:$0x30] %vm3_vm0, %v1432_v54   ;;  %3984 = vst.msk [vmem:[%s9849_s1 + $0x386] ss:$16 sm:$0xc0] %vm3_vm0, %v1432_v54  }
 0x12b   :  { %3976 = vst.msk [vmem:[%s9849_s1 + $0x66] ss:$16 sm:$0x3] %vm3_vm0, %v1419_v55   ;;  %3977 = vst.msk [vmem:[%s9849_s1 + $0xc6] ss:$16 sm:$0xc] %vm3_vm0, %v1419_v55  }
 0x12c   :  { %3978 = vst.msk [vmem:[%s9849_s1 + $0x126] ss:$16 sm:$0x30] %vm3_vm0, %v1419_v55   ;;  %3979 = vst.msk [vmem:[%s9849_s1 + $0x186] ss:$16 sm:$0xc0] %vm3_vm0, %v1419_v55   ;;  %v1510_v60 = vpop.permute.xlu1 %1509   ;;  %v1497_v61 = vpop.permute.xlu0 %1496  }
 0x12d   :  { %3991 = vst.msk [vmem:[%s9849_s1 + $0x606] ss:$16 sm:$0x3] %vm3_vm0, %v1458_v56   ;;  %3992 = vst.msk [vmem:[%s9849_s1 + $0x666] ss:$16 sm:$0xc] %vm3_vm0, %v1458_v56   ;;  %2207 = vrot.lane.b32.xlu1 %v5940_v3, %s4760_s17  ;;  %2194 = vrot.lane.b32.xlu0 %v5945_v10, %s4760_s17 }
 0x12e   :  { %3993 = vst.msk [vmem:[%s9849_s1 + $0x6c6] ss:$16 sm:$0x30] %vm3_vm0, %v1458_v56   ;;  %3994 = vst.msk [vmem:[%s9849_s1 + $0x726] ss:$16 sm:$0xc0] %vm3_vm0, %v1458_v56  }
 0x12f   :  { %3986 = vst.msk [vmem:[%s9849_s1 + $0x406] ss:$16 sm:$0x3] %vm3_vm0, %v1445_v57   ;;  %3987 = vst.msk [vmem:[%s9849_s1 + $0x466] ss:$16 sm:$0xc] %vm3_vm0, %v1445_v57  }
 0x130   :  { %3988 = vst.msk [vmem:[%s9849_s1 + $0x4c6] ss:$16 sm:$0x30] %vm3_vm0, %v1445_v57   ;;  %3989 = vst.msk [vmem:[%s9849_s1 + $0x526] ss:$16 sm:$0xc0] %vm3_vm0, %v1445_v57   ;;  %v1536_v62 = vpop.permute.xlu1 %1535   ;;  %v1523_v63 = vpop.permute.xlu0 %1522  }
 0x131   :  { %4001 = vst.msk [vmem:[%s9849_s1 + $0x626] ss:$16 sm:$0x3] %vm3_vm0, %v1484_v58   ;;  %4002 = vst.msk [vmem:[%s9849_s1 + $0x686] ss:$16 sm:$0xc] %vm3_vm0, %v1484_v58   ;;  %2233 = vrot.lane.b32.xlu1 %v5986_v13, %s4760_s17  ;;  %2220 = vrot.lane.b32.xlu0 %v5991_v14, %s4760_s17 }
 0x132   :  { %4003 = vst.msk [vmem:[%s9849_s1 + $0x6e6] ss:$16 sm:$0x30] %vm3_vm0, %v1484_v58   ;;  %4004 = vst.msk [vmem:[%s9849_s1 + $0x746] ss:$16 sm:$0xc0] %vm3_vm0, %v1484_v58  }
 0x133   :  { %3996 = vst.msk [vmem:[%s9849_s1 + $0x426] ss:$16 sm:$0x3] %vm3_vm0, %v1471_v59   ;;  %3997 = vst.msk [vmem:[%s9849_s1 + $0x486] ss:$16 sm:$0xc] %vm3_vm0, %v1471_v59  }
 0x134   :  { %3998 = vst.msk [vmem:[%s9849_s1 + $0x4e6] ss:$16 sm:$0x30] %vm3_vm0, %v1471_v59   ;;  %3999 = vst.msk [vmem:[%s9849_s1 + $0x546] ss:$16 sm:$0xc0] %vm3_vm0, %v1471_v59   ;;  %v1561_v0 = vpop.permute.xlu1 %1560   ;;  %v1548_v1 = vpop.permute.xlu0 %1547  }
 0x135   :  { %4011 = vst.msk [vmem:[%s9849_s1 + $0x646] ss:$16 sm:$0x3] %vm3_vm0, %v1510_v60   ;;  %4012 = vst.msk [vmem:[%s9849_s1 + $0x6a6] ss:$16 sm:$0xc] %vm3_vm0, %v1510_v60   ;;  %2259 = vrot.lane.b32.xlu1 %v6032_v17, %s4760_s17  ;;  %2246 = vrot.lane.b32.xlu0 %v6037_v18, %s4760_s17 }
 0x136   :  { %4013 = vst.msk [vmem:[%s9849_s1 + $0x706] ss:$16 sm:$0x30] %vm3_vm0, %v1510_v60   ;;  %4014 = vst.msk [vmem:[%s9849_s1 + $0x766] ss:$16 sm:$0xc0] %vm3_vm0, %v1510_v60  }
 0x137   :  { %4006 = vst.msk [vmem:[%s9849_s1 + $0x446] ss:$16 sm:$0x3] %vm3_vm0, %v1497_v61   ;;  %4007 = vst.msk [vmem:[%s9849_s1 + $0x4a6] ss:$16 sm:$0xc] %vm3_vm0, %v1497_v61  }
 0x138   :  { %4008 = vst.msk [vmem:[%s9849_s1 + $0x506] ss:$16 sm:$0x30] %vm3_vm0, %v1497_v61   ;;  %4009 = vst.msk [vmem:[%s9849_s1 + $0x566] ss:$16 sm:$0xc0] %vm3_vm0, %v1497_v61   ;;  %v1587_v2 = vpop.permute.xlu1 %1586   ;;  %v1574_v4 = vpop.permute.xlu0 %1573  }
 0x139   :  { %4021 = vst.msk [vmem:[%s9849_s1 + $0x666] ss:$16 sm:$0x3] %vm3_vm0, %v1536_v62   ;;  %4022 = vst.msk [vmem:[%s9849_s1 + $0x6c6] ss:$16 sm:$0xc] %vm3_vm0, %v1536_v62   ;;  %2285 = vrot.lane.b32.xlu1 %v6078_v21, %s4760_s17  ;;  %2272 = vrot.lane.b32.xlu0 %v6083_v22, %s4760_s17 }
 0x13a   :  { %4023 = vst.msk [vmem:[%s9849_s1 + $0x726] ss:$16 sm:$0x30] %vm3_vm0, %v1536_v62   ;;  %4024 = vst.msk [vmem:[%s9849_s1 + $0x786] ss:$16 sm:$0xc0] %vm3_vm0, %v1536_v62  }
 0x13b   :  { %4016 = vst.msk [vmem:[%s9849_s1 + $0x466] ss:$16 sm:$0x3] %vm3_vm0, %v1523_v63   ;;  %4017 = vst.msk [vmem:[%s9849_s1 + $0x4c6] ss:$16 sm:$0xc] %vm3_vm0, %v1523_v63  }
 0x13c   :  { %4018 = vst.msk [vmem:[%s9849_s1 + $0x526] ss:$16 sm:$0x30] %vm3_vm0, %v1523_v63   ;;  %4019 = vst.msk [vmem:[%s9849_s1 + $0x586] ss:$16 sm:$0xc0] %vm3_vm0, %v1523_v63   ;;  %v1613_v5 = vpop.permute.xlu1 %1612   ;;  %v1600_v6 = vpop.permute.xlu0 %1599  }
 0x13d   :  { %4030 = vst.msk [vmem:[%s9849_s1 + $0x207] ss:$16 sm:$0x3] %vm3_vm0, %v1561_v0   ;;  %4031 = vst.msk [vmem:[%s9849_s1 + $0x267] ss:$16 sm:$0xc] %vm3_vm0, %v1561_v0   ;;  %2311 = vrot.lane.b32.xlu1 %v6124_v25, %s4760_s17  ;;  %2298 = vrot.lane.b32.xlu0 %v6129_v26, %s4760_s17 }
 0x13e   :  { %4032 = vst.msk [vmem:[%s9849_s1 + $0x2c7] ss:$16 sm:$0x30] %vm3_vm0, %v1561_v0   ;;  %4033 = vst.msk [vmem:[%s9849_s1 + $0x327] ss:$16 sm:$0xc0] %vm3_vm0, %v1561_v0  }
 0x13f   :  { %4025 = vst.msk [vmem:[%s9849_s1 + $0x7] ss:$16 sm:$0x3] %vm3_vm0, %v1548_v1   ;;  %4026 = vst.msk [vmem:[%s9849_s1 + $0x67] ss:$16 sm:$0xc] %vm3_vm0, %v1548_v1  }
 0x140   :  { %4027 = vst.msk [vmem:[%s9849_s1 + $0xc7] ss:$16 sm:$0x30] %vm3_vm0, %v1548_v1   ;;  %4028 = vst.msk [vmem:[%s9849_s1 + $0x127] ss:$16 sm:$0xc0] %vm3_vm0, %v1548_v1   ;;  %v1639_v8 = vpop.permute.xlu1 %1638   ;;  %v1626_v9 = vpop.permute.xlu0 %1625  }
 0x141   :  { %4040 = vst.msk [vmem:[%s9849_s1 + $0x227] ss:$16 sm:$0x3] %vm3_vm0, %v1587_v2   ;;  %4041 = vst.msk [vmem:[%s9849_s1 + $0x287] ss:$16 sm:$0xc] %vm3_vm0, %v1587_v2   ;;  %2337 = vrot.lane.b32.xlu1 %v6170_v29, %s4760_s17  ;;  %2324 = vrot.lane.b32.xlu0 %v6175_v30, %s4760_s17 }
 0x142   :  { %4042 = vst.msk [vmem:[%s9849_s1 + $0x2e7] ss:$16 sm:$0x30] %vm3_vm0, %v1587_v2   ;;  %4043 = vst.msk [vmem:[%s9849_s1 + $0x347] ss:$16 sm:$0xc0] %vm3_vm0, %v1587_v2  }
 0x143   :  { %4035 = vst.msk [vmem:[%s9849_s1 + $0x27] ss:$16 sm:$0x3] %vm3_vm0, %v1574_v4   ;;  %4036 = vst.msk [vmem:[%s9849_s1 + $0x87] ss:$16 sm:$0xc] %vm3_vm0, %v1574_v4  }
 0x144   :  { %4037 = vst.msk [vmem:[%s9849_s1 + $0xe7] ss:$16 sm:$0x30] %vm3_vm0, %v1574_v4   ;;  %4038 = vst.msk [vmem:[%s9849_s1 + $0x147] ss:$16 sm:$0xc0] %vm3_vm0, %v1574_v4   ;;  %v1665_v11 = vpop.permute.xlu1 %1664   ;;  %v1652_v12 = vpop.permute.xlu0 %1651  }
 0x145   :  { %4050 = vst.msk [vmem:[%s9849_s1 + $0x247] ss:$16 sm:$0x3] %vm3_vm0, %v1613_v5   ;;  %4051 = vst.msk [vmem:[%s9849_s1 + $0x2a7] ss:$16 sm:$0xc] %vm3_vm0, %v1613_v5   ;;  %2363 = vrot.lane.b32.xlu1 %v6216_v33, %s4760_s17  ;;  %2350 = vrot.lane.b32.xlu0 %v6221_v34, %s4760_s17 }
 0x146   :  { %4052 = vst.msk [vmem:[%s9849_s1 + $0x307] ss:$16 sm:$0x30] %vm3_vm0, %v1613_v5   ;;  %4053 = vst.msk [vmem:[%s9849_s1 + $0x367] ss:$16 sm:$0xc0] %vm3_vm0, %v1613_v5  }
 0x147   :  { %4045 = vst.msk [vmem:[%s9849_s1 + $0x47] ss:$16 sm:$0x3] %vm3_vm0, %v1600_v6   ;;  %4046 = vst.msk [vmem:[%s9849_s1 + $0xa7] ss:$16 sm:$0xc] %vm3_vm0, %v1600_v6  }
 0x148   :  { %4047 = vst.msk [vmem:[%s9849_s1 + $0x107] ss:$16 sm:$0x30] %vm3_vm0, %v1600_v6   ;;  %4048 = vst.msk [vmem:[%s9849_s1 + $0x167] ss:$16 sm:$0xc0] %vm3_vm0, %v1600_v6   ;;  %v1691_v15 = vpop.permute.xlu1 %1690   ;;  %v1678_v16 = vpop.permute.xlu0 %1677  }
 0x149   :  { %4060 = vst.msk [vmem:[%s9849_s1 + $0x267] ss:$16 sm:$0x3] %vm3_vm0, %v1639_v8   ;;  %4061 = vst.msk [vmem:[%s9849_s1 + $0x2c7] ss:$16 sm:$0xc] %vm3_vm0, %v1639_v8  }
 0x14a   :  { %4062 = vst.msk [vmem:[%s9849_s1 + $0x327] ss:$16 sm:$0x30] %vm3_vm0, %v1639_v8   ;;  %4063 = vst.msk [vmem:[%s9849_s1 + $0x387] ss:$16 sm:$0xc0] %vm3_vm0, %v1639_v8  }
 0x14b   :  { %4055 = vst.msk [vmem:[%s9849_s1 + $0x67] ss:$16 sm:$0x3] %vm3_vm0, %v1626_v9   ;;  %4056 = vst.msk [vmem:[%s9849_s1 + $0xc7] ss:$16 sm:$0xc] %vm3_vm0, %v1626_v9  }
 0x14c   :  { %4057 = vst.msk [vmem:[%s9849_s1 + $0x127] ss:$16 sm:$0x30] %vm3_vm0, %v1626_v9   ;;  %4058 = vst.msk [vmem:[%s9849_s1 + $0x187] ss:$16 sm:$0xc0] %vm3_vm0, %v1626_v9   ;;  %v1717_v19 = vpop.permute.xlu1 %1716   ;;  %v1704_v20 = vpop.permute.xlu0 %1703  }
 0x14d   :  { %s4761_s12 = smov 40   ;;  %4070 = vst.msk [vmem:[%s9849_s1 + $0x607] ss:$16 sm:$0x3] %vm3_vm0, %v1665_v11   ;;  %s4762_s20 = smov 32  }
 0x14e   :  { %2388 = vrot.lane.b32.xlu1 %v6262_v37, %s4761_s12  ;;  %2375 = vrot.lane.b32.xlu0 %v5899_v7, %s4761_s12  ;;  %4071 = vst.msk [vmem:[%s9849_s1 + $0x667] ss:$16 sm:$0xc] %vm3_vm0, %v1665_v11   ;;  %4072 = vst.msk [vmem:[%s9849_s1 + $0x6c7] ss:$16 sm:$0x30] %vm3_vm0, %v1665_v11  }
 0x14f   :  { %4073 = vst.msk [vmem:[%s9849_s1 + $0x727] ss:$16 sm:$0xc0] %vm3_vm0, %v1665_v11   ;;  %4065 = vst.msk [vmem:[%s9849_s1 + $0x407] ss:$16 sm:$0x3] %vm3_vm0, %v1652_v12  }
 0x150   :  { %4066 = vst.msk [vmem:[%s9849_s1 + $0x467] ss:$16 sm:$0xc] %vm3_vm0, %v1652_v12   ;;  %4067 = vst.msk [vmem:[%s9849_s1 + $0x4c7] ss:$16 sm:$0x30] %vm3_vm0, %v1652_v12   ;;  %v1743_v23 = vpop.permute.xlu1 %1742   ;;  %v1730_v24 = vpop.permute.xlu0 %1729  }
 0x151   :  { %4068 = vst.msk [vmem:[%s9849_s1 + $0x527] ss:$16 sm:$0xc0] %vm3_vm0, %v1652_v12   ;;  %4080 = vst.msk [vmem:[%s9849_s1 + $0x627] ss:$16 sm:$0x3] %vm3_vm0, %v1691_v15  }
 0x152   :  { %2414 = vrot.lane.b32.xlu1 %v5940_v3, %s4761_s12  ;;  %2401 = vrot.lane.b32.xlu0 %v5945_v10, %s4761_s12  ;;  %4081 = vst.msk [vmem:[%s9849_s1 + $0x687] ss:$16 sm:$0xc] %vm3_vm0, %v1691_v15   ;;  %4082 = vst.msk [vmem:[%s9849_s1 + $0x6e7] ss:$16 sm:$0x30] %vm3_vm0, %v1691_v15  }
 0x153   :  { %4083 = vst.msk [vmem:[%s9849_s1 + $0x747] ss:$16 sm:$0xc0] %vm3_vm0, %v1691_v15   ;;  %4075 = vst.msk [vmem:[%s9849_s1 + $0x427] ss:$16 sm:$0x3] %vm3_vm0, %v1678_v16  }
 0x154   :  { %4076 = vst.msk [vmem:[%s9849_s1 + $0x487] ss:$16 sm:$0xc] %vm3_vm0, %v1678_v16   ;;  %4077 = vst.msk [vmem:[%s9849_s1 + $0x4e7] ss:$16 sm:$0x30] %vm3_vm0, %v1678_v16   ;;  %v1768_v27 = vpop.permute.xlu1 %1767   ;;  %v1755_v28 = vpop.permute.xlu0 %1754  }
 0x155   :  { %4078 = vst.msk [vmem:[%s9849_s1 + $0x547] ss:$16 sm:$0xc0] %vm3_vm0, %v1678_v16   ;;  %4090 = vst.msk [vmem:[%s9849_s1 + $0x647] ss:$16 sm:$0x3] %vm3_vm0, %v1717_v19  }
 0x156   :  { %2440 = vrot.lane.b32.xlu1 %v5986_v13, %s4761_s12  ;;  %2427 = vrot.lane.b32.xlu0 %v5991_v14, %s4761_s12  ;;  %4091 = vst.msk [vmem:[%s9849_s1 + $0x6a7] ss:$16 sm:$0xc] %vm3_vm0, %v1717_v19   ;;  %4092 = vst.msk [vmem:[%s9849_s1 + $0x707] ss:$16 sm:$0x30] %vm3_vm0, %v1717_v19  }
 0x157   :  { %4093 = vst.msk [vmem:[%s9849_s1 + $0x767] ss:$16 sm:$0xc0] %vm3_vm0, %v1717_v19   ;;  %4085 = vst.msk [vmem:[%s9849_s1 + $0x447] ss:$16 sm:$0x3] %vm3_vm0, %v1704_v20  }
 0x158   :  { %4086 = vst.msk [vmem:[%s9849_s1 + $0x4a7] ss:$16 sm:$0xc] %vm3_vm0, %v1704_v20   ;;  %4087 = vst.msk [vmem:[%s9849_s1 + $0x507] ss:$16 sm:$0x30] %vm3_vm0, %v1704_v20   ;;  %v1794_v31 = vpop.permute.xlu1 %1793  }
 0x159   :  { %4088 = vst.msk [vmem:[%s9849_s1 + $0x567] ss:$16 sm:$0xc0] %vm3_vm0, %v1704_v20   ;;  %4100 = vst.msk [vmem:[%s9849_s1 + $0x667] ss:$16 sm:$0x3] %vm3_vm0, %v1743_v23   ;;  %v1781_v32 = vpop.permute.xlu0 %1780  }
 0x15a   :  { %2466 = vrot.lane.b32.xlu1 %v6032_v17, %s4761_s12  ;;  %2453 = vrot.lane.b32.xlu0 %v6037_v18, %s4761_s12  ;;  %4101 = vst.msk [vmem:[%s9849_s1 + $0x6c7] ss:$16 sm:$0xc] %vm3_vm0, %v1743_v23   ;;  %4102 = vst.msk [vmem:[%s9849_s1 + $0x727] ss:$16 sm:$0x30] %vm3_vm0, %v1743_v23  }
 0x15b   :  { %4103 = vst.msk [vmem:[%s9849_s1 + $0x787] ss:$16 sm:$0xc0] %vm3_vm0, %v1743_v23   ;;  %4095 = vst.msk [vmem:[%s9849_s1 + $0x467] ss:$16 sm:$0x3] %vm3_vm0, %v1730_v24  }
 0x15c   :  { %4096 = vst.msk [vmem:[%s9849_s1 + $0x4c7] ss:$16 sm:$0xc] %vm3_vm0, %v1730_v24   ;;  %4097 = vst.msk [vmem:[%s9849_s1 + $0x527] ss:$16 sm:$0x30] %vm3_vm0, %v1730_v24  }
 0x15d   :  { %4098 = vst.msk [vmem:[%s9849_s1 + $0x587] ss:$16 sm:$0xc0] %vm3_vm0, %v1730_v24   ;;  %4109 = vst.msk [vmem:[%s9849_s1 + $0x208] ss:$16 sm:$0x3] %vm3_vm0, %v1768_v27   ;;  %v1820_v35 = vpop.permute.xlu1 %1819  }
 0x15e   :  { %2492 = vrot.lane.b32.xlu1 %v6078_v21, %s4761_s12  ;;  %2479 = vrot.lane.b32.xlu0 %v6083_v22, %s4761_s12  ;;  %4110 = vst.msk [vmem:[%s9849_s1 + $0x268] ss:$16 sm:$0xc] %vm3_vm0, %v1768_v27   ;;  %4111 = vst.msk [vmem:[%s9849_s1 + $0x2c8] ss:$16 sm:$0x30] %vm3_vm0, %v1768_v27   ;;  %v1807_v36 = vpop.permute.xlu0 %1806  }
 0x15f   :  { %4112 = vst.msk [vmem:[%s9849_s1 + $0x328] ss:$16 sm:$0xc0] %vm3_vm0, %v1768_v27   ;;  %4104 = vst.msk [vmem:[%s9849_s1 + $0x8] ss:$16 sm:$0x3] %vm3_vm0, %v1755_v28  }
 0x160   :  { %4105 = vst.msk [vmem:[%s9849_s1 + $0x68] ss:$16 sm:$0xc] %vm3_vm0, %v1755_v28   ;;  %4106 = vst.msk [vmem:[%s9849_s1 + $0xc8] ss:$16 sm:$0x30] %vm3_vm0, %v1755_v28  }
 0x161   :  { %4107 = vst.msk [vmem:[%s9849_s1 + $0x128] ss:$16 sm:$0xc0] %vm3_vm0, %v1755_v28   ;;  %4119 = vst.msk [vmem:[%s9849_s1 + $0x228] ss:$16 sm:$0x3] %vm3_vm0, %v1794_v31  }
 0x162   :  { %2518 = vrot.lane.b32.xlu1 %v6124_v25, %s4761_s12  ;;  %2505 = vrot.lane.b32.xlu0 %v6129_v26, %s4761_s12  ;;  %4120 = vst.msk [vmem:[%s9849_s1 + $0x288] ss:$16 sm:$0xc] %vm3_vm0, %v1794_v31   ;;  %4121 = vst.msk [vmem:[%s9849_s1 + $0x2e8] ss:$16 sm:$0x30] %vm3_vm0, %v1794_v31   ;;  %v1846_v38 = vpop.permute.xlu1 %1845  }
 0x163   :  { %4122 = vst.msk [vmem:[%s9849_s1 + $0x348] ss:$16 sm:$0xc0] %vm3_vm0, %v1794_v31   ;;  %4114 = vst.msk [vmem:[%s9849_s1 + $0x28] ss:$16 sm:$0x3] %vm3_vm0, %v1781_v32   ;;  %v1833_v39 = vpop.permute.xlu0 %1832  }
 0x164   :  { %4115 = vst.msk [vmem:[%s9849_s1 + $0x88] ss:$16 sm:$0xc] %vm3_vm0, %v1781_v32   ;;  %4116 = vst.msk [vmem:[%s9849_s1 + $0xe8] ss:$16 sm:$0x30] %vm3_vm0, %v1781_v32  }
 0x165   :  { %4117 = vst.msk [vmem:[%s9849_s1 + $0x148] ss:$16 sm:$0xc0] %vm3_vm0, %v1781_v32   ;;  %4129 = vst.msk [vmem:[%s9849_s1 + $0x248] ss:$16 sm:$0x3] %vm3_vm0, %v1820_v35  }
 0x166   :  { %2544 = vrot.lane.b32.xlu1 %v6170_v29, %s4761_s12  ;;  %2531 = vrot.lane.b32.xlu0 %v6175_v30, %s4761_s12  ;;  %4130 = vst.msk [vmem:[%s9849_s1 + $0x2a8] ss:$16 sm:$0xc] %vm3_vm0, %v1820_v35   ;;  %4131 = vst.msk [vmem:[%s9849_s1 + $0x308] ss:$16 sm:$0x30] %vm3_vm0, %v1820_v35  }
 0x167   :  { %4132 = vst.msk [vmem:[%s9849_s1 + $0x368] ss:$16 sm:$0xc0] %vm3_vm0, %v1820_v35   ;;  %4124 = vst.msk [vmem:[%s9849_s1 + $0x48] ss:$16 sm:$0x3] %vm3_vm0, %v1807_v36  }
 0x168   :  { %4125 = vst.msk [vmem:[%s9849_s1 + $0xa8] ss:$16 sm:$0xc] %vm3_vm0, %v1807_v36   ;;  %4126 = vst.msk [vmem:[%s9849_s1 + $0x108] ss:$16 sm:$0x30] %vm3_vm0, %v1807_v36   ;;  %v1859_v40 = vpop.permute.xlu0 %1858  }
 0x169   :  { %4127 = vst.msk [vmem:[%s9849_s1 + $0x168] ss:$16 sm:$0xc0] %vm3_vm0, %v1807_v36   ;;  %4139 = vst.msk [vmem:[%s9849_s1 + $0x268] ss:$16 sm:$0x3] %vm3_vm0, %v1846_v38  }
 0x16a   :  { %2570 = vrot.lane.b32.xlu1 %v6216_v33, %s4761_s12  ;;  %2557 = vrot.lane.b32.xlu0 %v6221_v34, %s4761_s12  ;;  %4140 = vst.msk [vmem:[%s9849_s1 + $0x2c8] ss:$16 sm:$0xc] %vm3_vm0, %v1846_v38   ;;  %4141 = vst.msk [vmem:[%s9849_s1 + $0x328] ss:$16 sm:$0x30] %vm3_vm0, %v1846_v38  }
 0x16b   :  { %4142 = vst.msk [vmem:[%s9849_s1 + $0x388] ss:$16 sm:$0xc0] %vm3_vm0, %v1846_v38   ;;  %4134 = vst.msk [vmem:[%s9849_s1 + $0x68] ss:$16 sm:$0x3] %vm3_vm0, %v1833_v39  }
 0x16c   :  { %4135 = vst.msk [vmem:[%s9849_s1 + $0xc8] ss:$16 sm:$0xc] %vm3_vm0, %v1833_v39   ;;  %4136 = vst.msk [vmem:[%s9849_s1 + $0x128] ss:$16 sm:$0x30] %vm3_vm0, %v1833_v39  }
 0x16d   :  { %4137 = vst.msk [vmem:[%s9849_s1 + $0x188] ss:$16 sm:$0xc0] %vm3_vm0, %v1833_v39   ;;  %4144 = vst.msk [vmem:[%s9849_s1 + $0x408] ss:$16 sm:$0x3] %vm3_vm0, %v1859_v40  }
 0x16e   :  { %2595 = vrot.lane.b32.xlu1 %v6262_v37, %s4762_s20  ;;  %2582 = vrot.lane.b32.xlu0 %v5899_v7, %s4762_s20  ;;  %v1872_v7 = vpop.permute.xlu1 %1871   ;;  %4145 = vst.msk [vmem:[%s9849_s1 + $0x468] ss:$16 sm:$0xc] %vm3_vm0, %v1859_v40   ;;  %4146 = vst.msk [vmem:[%s9849_s1 + $0x4c8] ss:$16 sm:$0x30] %vm3_vm0, %v1859_v40  }
 0x16f   :  { %4149 = vst.msk [vmem:[%s9849_s1 + $0x608] ss:$16 sm:$0x3] %vm3_vm0, %v1872_v7   ;;  %4150 = vst.msk [vmem:[%s9849_s1 + $0x668] ss:$16 sm:$0xc] %vm3_vm0, %v1872_v7  }
 0x170   :  { %4151 = vst.msk [vmem:[%s9849_s1 + $0x6c8] ss:$16 sm:$0x30] %vm3_vm0, %v1872_v7   ;;  %4152 = vst.msk [vmem:[%s9849_s1 + $0x728] ss:$16 sm:$0xc0] %vm3_vm0, %v1872_v7  }
 0x171   :  { %4147 = vst.msk [vmem:[%s9849_s1 + $0x528] ss:$16 sm:$0xc0] %vm3_vm0, %v1859_v40   ;;  %v7465_v42 = vld.sshfl [vmem:[%s9848_s0 + $0x10] sm:$0xff pattern:$0xb3a29180]  }
 0x172   :  { %2621 = vrot.lane.b32.xlu1 %v5940_v3, %s4762_s20  ;;  %2608 = vrot.lane.b32.xlu0 %v5945_v10, %s4762_s20  ;;  %v1898_v3 = vpop.permute.xlu1 %1897   ;;  %v1885_v10 = vpop.permute.xlu0 %1884   ;;  %v7506_v45 = vld.sshfl [vmem:[%s9848_s0 + $0x24] sm:$0xff pattern:$0xb3a29180]   ;;  %v7511_v46 = vld.sshfl [vmem:[%s9848_s0 + $0x20] sm:$0xff pattern:$0xb3a29180]  }
 0x173   :  { %4159 = vst.msk [vmem:[%s9849_s1 + $0x628] ss:$16 sm:$0x3] %vm3_vm0, %v1898_v3   ;;  %4160 = vst.msk [vmem:[%s9849_s1 + $0x688] ss:$16 sm:$0xc] %vm3_vm0, %v1898_v3  }
 0x174   :  { %4161 = vst.msk [vmem:[%s9849_s1 + $0x6e8] ss:$16 sm:$0x30] %vm3_vm0, %v1898_v3   ;;  %4162 = vst.msk [vmem:[%s9849_s1 + $0x748] ss:$16 sm:$0xc0] %vm3_vm0, %v1898_v3  }
 0x175   :  { %4154 = vst.msk [vmem:[%s9849_s1 + $0x428] ss:$16 sm:$0x3] %vm3_vm0, %v1885_v10   ;;  %4155 = vst.msk [vmem:[%s9849_s1 + $0x488] ss:$16 sm:$0xc] %vm3_vm0, %v1885_v10  }
 0x176   :  { %4156 = vst.msk [vmem:[%s9849_s1 + $0x4e8] ss:$16 sm:$0x30] %vm3_vm0, %v1885_v10   ;;  %4157 = vst.msk [vmem:[%s9849_s1 + $0x548] ss:$16 sm:$0xc0] %vm3_vm0, %v1885_v10   ;;  %2647 = vrot.lane.b32.xlu1 %v5986_v13, %s4762_s20  ;;  %2634 = vrot.lane.b32.xlu0 %v5991_v14, %s4762_s20  ;;  %v1924_v13 = vpop.permute.xlu1 %1923   ;;  %v1911_v14 = vpop.permute.xlu0 %1910  }
 0x177   :  { %4169 = vst.msk [vmem:[%s9849_s1 + $0x648] ss:$16 sm:$0x3] %vm3_vm0, %v1924_v13   ;;  %4170 = vst.msk [vmem:[%s9849_s1 + $0x6a8] ss:$16 sm:$0xc] %vm3_vm0, %v1924_v13  }
 0x178   :  { %4171 = vst.msk [vmem:[%s9849_s1 + $0x708] ss:$16 sm:$0x30] %vm3_vm0, %v1924_v13   ;;  %4172 = vst.msk [vmem:[%s9849_s1 + $0x768] ss:$16 sm:$0xc0] %vm3_vm0, %v1924_v13  }
 0x179   :  { %4164 = vst.msk [vmem:[%s9849_s1 + $0x448] ss:$16 sm:$0x3] %vm3_vm0, %v1911_v14   ;;  %4165 = vst.msk [vmem:[%s9849_s1 + $0x4a8] ss:$16 sm:$0xc] %vm3_vm0, %v1911_v14  }
 0x17a   :  { %4166 = vst.msk [vmem:[%s9849_s1 + $0x508] ss:$16 sm:$0x30] %vm3_vm0, %v1911_v14   ;;  %4167 = vst.msk [vmem:[%s9849_s1 + $0x568] ss:$16 sm:$0xc0] %vm3_vm0, %v1911_v14   ;;  %2673 = vrot.lane.b32.xlu1 %v6032_v17, %s4762_s20  ;;  %2660 = vrot.lane.b32.xlu0 %v6037_v18, %s4762_s20  ;;  %v1950_v17 = vpop.permute.xlu1 %1949   ;;  %v1937_v18 = vpop.permute.xlu0 %1936  }
 0x17b   :  { %4179 = vst.msk [vmem:[%s9849_s1 + $0x668] ss:$16 sm:$0x3] %vm3_vm0, %v1950_v17   ;;  %4180 = vst.msk [vmem:[%s9849_s1 + $0x6c8] ss:$16 sm:$0xc] %vm3_vm0, %v1950_v17  }
 0x17c   :  { %4181 = vst.msk [vmem:[%s9849_s1 + $0x728] ss:$16 sm:$0x30] %vm3_vm0, %v1950_v17   ;;  %4182 = vst.msk [vmem:[%s9849_s1 + $0x788] ss:$16 sm:$0xc0] %vm3_vm0, %v1950_v17  }
 0x17d   :  { %4174 = vst.msk [vmem:[%s9849_s1 + $0x468] ss:$16 sm:$0x3] %vm3_vm0, %v1937_v18   ;;  %4175 = vst.msk [vmem:[%s9849_s1 + $0x4c8] ss:$16 sm:$0xc] %vm3_vm0, %v1937_v18  }
 0x17e   :  { %4176 = vst.msk [vmem:[%s9849_s1 + $0x528] ss:$16 sm:$0x30] %vm3_vm0, %v1937_v18   ;;  %4177 = vst.msk [vmem:[%s9849_s1 + $0x588] ss:$16 sm:$0xc0] %vm3_vm0, %v1937_v18   ;;  %2699 = vrot.lane.b32.xlu1 %v6078_v21, %s4762_s20  ;;  %2686 = vrot.lane.b32.xlu0 %v6083_v22, %s4762_s20  ;;  %v1975_v21 = vpop.permute.xlu1 %1974   ;;  %v1962_v22 = vpop.permute.xlu0 %1961  }
 0x17f   :  { %4188 = vst.msk [vmem:[%s9849_s1 + $0x209] ss:$16 sm:$0x3] %vm3_vm0, %v1975_v21   ;;  %4189 = vst.msk [vmem:[%s9849_s1 + $0x269] ss:$16 sm:$0xc] %vm3_vm0, %v1975_v21  }
 0x180   :  { %4190 = vst.msk [vmem:[%s9849_s1 + $0x2c9] ss:$16 sm:$0x30] %vm3_vm0, %v1975_v21   ;;  %4191 = vst.msk [vmem:[%s9849_s1 + $0x329] ss:$16 sm:$0xc0] %vm3_vm0, %v1975_v21  }
 0x181   :  { %4183 = vst.msk [vmem:[%s9849_s1 + $0x9] ss:$16 sm:$0x3] %vm3_vm0, %v1962_v22   ;;  %4184 = vst.msk [vmem:[%s9849_s1 + $0x69] ss:$16 sm:$0xc] %vm3_vm0, %v1962_v22  }
 0x182   :  { %4185 = vst.msk [vmem:[%s9849_s1 + $0xc9] ss:$16 sm:$0x30] %vm3_vm0, %v1962_v22   ;;  %4186 = vst.msk [vmem:[%s9849_s1 + $0x129] ss:$16 sm:$0xc0] %vm3_vm0, %v1962_v22   ;;  %2725 = vrot.lane.b32.xlu1 %v6124_v25, %s4762_s20  ;;  %2712 = vrot.lane.b32.xlu0 %v6129_v26, %s4762_s20  ;;  %v2001_v25 = vpop.permute.xlu1 %2000   ;;  %v1988_v26 = vpop.permute.xlu0 %1987  }
 0x183   :  { %4198 = vst.msk [vmem:[%s9849_s1 + $0x229] ss:$16 sm:$0x3] %vm3_vm0, %v2001_v25   ;;  %4199 = vst.msk [vmem:[%s9849_s1 + $0x289] ss:$16 sm:$0xc] %vm3_vm0, %v2001_v25  }
 0x184   :  { %4200 = vst.msk [vmem:[%s9849_s1 + $0x2e9] ss:$16 sm:$0x30] %vm3_vm0, %v2001_v25   ;;  %4201 = vst.msk [vmem:[%s9849_s1 + $0x349] ss:$16 sm:$0xc0] %vm3_vm0, %v2001_v25  }
 0x185   :  { %4193 = vst.msk [vmem:[%s9849_s1 + $0x29] ss:$16 sm:$0x3] %vm3_vm0, %v1988_v26   ;;  %4194 = vst.msk [vmem:[%s9849_s1 + $0x89] ss:$16 sm:$0xc] %vm3_vm0, %v1988_v26  }
 0x186   :  { %4195 = vst.msk [vmem:[%s9849_s1 + $0xe9] ss:$16 sm:$0x30] %vm3_vm0, %v1988_v26   ;;  %4196 = vst.msk [vmem:[%s9849_s1 + $0x149] ss:$16 sm:$0xc0] %vm3_vm0, %v1988_v26   ;;  %2751 = vrot.lane.b32.xlu1 %v6170_v29, %s4762_s20  ;;  %2738 = vrot.lane.b32.xlu0 %v6175_v30, %s4762_s20  ;;  %v2027_v29 = vpop.permute.xlu1 %2026   ;;  %v2014_v30 = vpop.permute.xlu0 %2013  }
 0x187   :  { %4208 = vst.msk [vmem:[%s9849_s1 + $0x249] ss:$16 sm:$0x3] %vm3_vm0, %v2027_v29   ;;  %4209 = vst.msk [vmem:[%s9849_s1 + $0x2a9] ss:$16 sm:$0xc] %vm3_vm0, %v2027_v29  }
 0x188   :  { %4210 = vst.msk [vmem:[%s9849_s1 + $0x309] ss:$16 sm:$0x30] %vm3_vm0, %v2027_v29   ;;  %4211 = vst.msk [vmem:[%s9849_s1 + $0x369] ss:$16 sm:$0xc0] %vm3_vm0, %v2027_v29  }
 0x189   :  { %4203 = vst.msk [vmem:[%s9849_s1 + $0x49] ss:$16 sm:$0x3] %vm3_vm0, %v2014_v30   ;;  %4204 = vst.msk [vmem:[%s9849_s1 + $0xa9] ss:$16 sm:$0xc] %vm3_vm0, %v2014_v30  }
 0x18a   :  { %4205 = vst.msk [vmem:[%s9849_s1 + $0x109] ss:$16 sm:$0x30] %vm3_vm0, %v2014_v30   ;;  %4206 = vst.msk [vmem:[%s9849_s1 + $0x169] ss:$16 sm:$0xc0] %vm3_vm0, %v2014_v30   ;;  %2777 = vrot.lane.b32.xlu1 %v6216_v33, %s4762_s20  ;;  %2764 = vrot.lane.b32.xlu0 %v6221_v34, %s4762_s20  ;;  %v2053_v34 = vpop.permute.xlu1 %2052   ;;  %v2040_v41 = vpop.permute.xlu0 %2039  }
 0x18b   :  { %v7419_v33 = vld.sshfl [vmem:[%s9848_s0] sm:$0xff pattern:$0xb3a29180]   ;;  %4218 = vst.msk [vmem:[%s9849_s1 + $0x269] ss:$16 sm:$0x3] %vm3_vm0, %v2053_v34  }
 0x18c   :  { %4219 = vst.msk [vmem:[%s9849_s1 + $0x2c9] ss:$16 sm:$0xc] %vm3_vm0, %v2053_v34   ;;  %4220 = vst.msk [vmem:[%s9849_s1 + $0x329] ss:$16 sm:$0x30] %vm3_vm0, %v2053_v34  }
 0x18d   :  { %4221 = vst.msk [vmem:[%s9849_s1 + $0x389] ss:$16 sm:$0xc0] %vm3_vm0, %v2053_v34   ;;  %4213 = vst.msk [vmem:[%s9849_s1 + $0x69] ss:$16 sm:$0x3] %vm3_vm0, %v2040_v41  }
 0x18e   :  { %4214 = vst.msk [vmem:[%s9849_s1 + $0xc9] ss:$16 sm:$0xc] %vm3_vm0, %v2040_v41   ;;  %4215 = vst.msk [vmem:[%s9849_s1 + $0x129] ss:$16 sm:$0x30] %vm3_vm0, %v2040_v41   ;;  %2802 = vrot.lane.b32.xlu1 %v6262_v37, %s4763_s8  ;;  %2789 = vrot.lane.b32.xlu0 %v7419_v33, %s4763_s8  ;;  %v2079_v43 = vpop.permute.xlu1 %2078   ;;  %v2066_v44 = vpop.permute.xlu0 %2065  }
 0x18f   :  { %4216 = vst.msk [vmem:[%s9849_s1 + $0x189] ss:$16 sm:$0xc0] %vm3_vm0, %v2040_v41   ;;  %v7460_v37 = vld.sshfl [vmem:[%s9848_s0 + $0x14] sm:$0xff pattern:$0xb3a29180]  }
 0x190   :  { %4228 = vst.msk [vmem:[%s9849_s1 + $0x609] ss:$16 sm:$0x3] %vm3_vm0, %v2079_v43   ;;  %4229 = vst.msk [vmem:[%s9849_s1 + $0x669] ss:$16 sm:$0xc] %vm3_vm0, %v2079_v43  }
 0x191   :  { %4230 = vst.msk [vmem:[%s9849_s1 + $0x6c9] ss:$16 sm:$0x30] %vm3_vm0, %v2079_v43   ;;  %4231 = vst.msk [vmem:[%s9849_s1 + $0x729] ss:$16 sm:$0xc0] %vm3_vm0, %v2079_v43  }
 0x192   :  { %4223 = vst.msk [vmem:[%s9849_s1 + $0x409] ss:$16 sm:$0x3] %vm3_vm0, %v2066_v44   ;;  %4224 = vst.msk [vmem:[%s9849_s1 + $0x469] ss:$16 sm:$0xc] %vm3_vm0, %v2066_v44   ;;  %2828 = vrot.lane.b32.xlu1 %v7460_v37, %s4763_s8  ;;  %2815 = vrot.lane.b32.xlu0 %v7465_v42, %s4763_s8  ;;  %v2105_v47 = vpop.permute.xlu1 %2104   ;;  %v2092_v48 = vpop.permute.xlu0 %2091  }
 0x193   :  { %4225 = vst.msk [vmem:[%s9849_s1 + $0x4c9] ss:$16 sm:$0x30] %vm3_vm0, %v2066_v44   ;;  %4226 = vst.msk [vmem:[%s9849_s1 + $0x529] ss:$16 sm:$0xc0] %vm3_vm0, %v2066_v44  }
 0x194   :  { %4238 = vst.msk [vmem:[%s9849_s1 + $0x629] ss:$16 sm:$0x3] %vm3_vm0, %v2105_v47   ;;  %4239 = vst.msk [vmem:[%s9849_s1 + $0x689] ss:$16 sm:$0xc] %vm3_vm0, %v2105_v47  }
 0x195   :  { %4240 = vst.msk [vmem:[%s9849_s1 + $0x6e9] ss:$16 sm:$0x30] %vm3_vm0, %v2105_v47   ;;  %4241 = vst.msk [vmem:[%s9849_s1 + $0x749] ss:$16 sm:$0xc0] %vm3_vm0, %v2105_v47  }
 0x196   :  { %4233 = vst.msk [vmem:[%s9849_s1 + $0x429] ss:$16 sm:$0x3] %vm3_vm0, %v2092_v48   ;;  %4234 = vst.msk [vmem:[%s9849_s1 + $0x489] ss:$16 sm:$0xc] %vm3_vm0, %v2092_v48   ;;  %2854 = vrot.lane.b32.xlu1 %v7506_v45, %s4763_s8  ;;  %2841 = vrot.lane.b32.xlu0 %v7511_v46, %s4763_s8  ;;  %v2131_v51 = vpop.permute.xlu1 %2130   ;;  %v2118_v52 = vpop.permute.xlu0 %2117  }
 0x197   :  { %4235 = vst.msk [vmem:[%s9849_s1 + $0x4e9] ss:$16 sm:$0x30] %vm3_vm0, %v2092_v48   ;;  %4236 = vst.msk [vmem:[%s9849_s1 + $0x549] ss:$16 sm:$0xc0] %vm3_vm0, %v2092_v48  }
 0x198   :  { %v7552_v49 = vld.sshfl [vmem:[%s9848_s0 + $0x34] sm:$0xff pattern:$0xb3a29180]   ;;  %v7557_v50 = vld.sshfl [vmem:[%s9848_s0 + $0x30] sm:$0xff pattern:$0xb3a29180]  }
 0x199   :  { %4248 = vst.msk [vmem:[%s9849_s1 + $0x649] ss:$16 sm:$0x3] %vm3_vm0, %v2131_v51   ;;  %4249 = vst.msk [vmem:[%s9849_s1 + $0x6a9] ss:$16 sm:$0xc] %vm3_vm0, %v2131_v51  }
 0x19a   :  { %4250 = vst.msk [vmem:[%s9849_s1 + $0x709] ss:$16 sm:$0x30] %vm3_vm0, %v2131_v51   ;;  %4251 = vst.msk [vmem:[%s9849_s1 + $0x769] ss:$16 sm:$0xc0] %vm3_vm0, %v2131_v51   ;;  %2880 = vrot.lane.b32.xlu1 %v7552_v49, %s4763_s8  ;;  %2867 = vrot.lane.b32.xlu0 %v7557_v50, %s4763_s8  ;;  %v2157_v55 = vpop.permute.xlu1 %2156   ;;  %v2144_v56 = vpop.permute.xlu0 %2143  }
 0x19b   :  { %4243 = vst.msk [vmem:[%s9849_s1 + $0x449] ss:$16 sm:$0x3] %vm3_vm0, %v2118_v52   ;;  %4244 = vst.msk [vmem:[%s9849_s1 + $0x4a9] ss:$16 sm:$0xc] %vm3_vm0, %v2118_v52  }
 0x19c   :  { %4245 = vst.msk [vmem:[%s9849_s1 + $0x509] ss:$16 sm:$0x30] %vm3_vm0, %v2118_v52   ;;  %4246 = vst.msk [vmem:[%s9849_s1 + $0x569] ss:$16 sm:$0xc0] %vm3_vm0, %v2118_v52  }
 0x19d   :  { %v7598_v53 = vld.sshfl [vmem:[%s9848_s0 + $0x44] sm:$0xff pattern:$0xb3a29180]   ;;  %v7603_v54 = vld.sshfl [vmem:[%s9848_s0 + $0x40] sm:$0xff pattern:$0xb3a29180]  }
 0x19e   :  { %4258 = vst.msk [vmem:[%s9849_s1 + $0x669] ss:$16 sm:$0x3] %vm3_vm0, %v2157_v55   ;;  %4259 = vst.msk [vmem:[%s9849_s1 + $0x6c9] ss:$16 sm:$0xc] %vm3_vm0, %v2157_v55   ;;  %2906 = vrot.lane.b32.xlu1 %v7598_v53, %s4763_s8  ;;  %2893 = vrot.lane.b32.xlu0 %v7603_v54, %s4763_s8  ;;  %v2182_v59 = vpop.permute.xlu1 %2181   ;;  %v2169_v60 = vpop.permute.xlu0 %2168  }
 0x19f   :  { %4260 = vst.msk [vmem:[%s9849_s1 + $0x729] ss:$16 sm:$0x30] %vm3_vm0, %v2157_v55   ;;  %4261 = vst.msk [vmem:[%s9849_s1 + $0x789] ss:$16 sm:$0xc0] %vm3_vm0, %v2157_v55  }
 0x1a0   :  { %4253 = vst.msk [vmem:[%s9849_s1 + $0x469] ss:$16 sm:$0x3] %vm3_vm0, %v2144_v56   ;;  %4254 = vst.msk [vmem:[%s9849_s1 + $0x4c9] ss:$16 sm:$0xc] %vm3_vm0, %v2144_v56  }
 0x1a1   :  { %4255 = vst.msk [vmem:[%s9849_s1 + $0x529] ss:$16 sm:$0x30] %vm3_vm0, %v2144_v56   ;;  %4256 = vst.msk [vmem:[%s9849_s1 + $0x589] ss:$16 sm:$0xc0] %vm3_vm0, %v2144_v56  }
 0x1a2   :  { %v7644_v57 = vld.sshfl [vmem:[%s9848_s0 + $0x54] sm:$0xff pattern:$0xb3a29180]   ;;  %v7649_v58 = vld.sshfl [vmem:[%s9848_s0 + $0x50] sm:$0xff pattern:$0xb3a29180]   ;;  %v2208_v63 = vpop.permute.xlu1 %2207   ;;  %v2195_v0 = vpop.permute.xlu0 %2194  }
 0x1a3   :  { %4267 = vst.msk [vmem:[%s9849_s1 + $0x20a] ss:$16 sm:$0x3] %vm3_vm0, %v2182_v59   ;;  %4268 = vst.msk [vmem:[%s9849_s1 + $0x26a] ss:$16 sm:$0xc] %vm3_vm0, %v2182_v59   ;;  %2932 = vrot.lane.b32.xlu1 %v7644_v57, %s4763_s8  ;;  %2919 = vrot.lane.b32.xlu0 %v7649_v58, %s4763_s8 }
 0x1a4   :  { %4269 = vst.msk [vmem:[%s9849_s1 + $0x2ca] ss:$16 sm:$0x30] %vm3_vm0, %v2182_v59   ;;  %4270 = vst.msk [vmem:[%s9849_s1 + $0x32a] ss:$16 sm:$0xc0] %vm3_vm0, %v2182_v59  }
 0x1a5   :  { %4262 = vst.msk [vmem:[%s9849_s1 + $0xa] ss:$16 sm:$0x3] %vm3_vm0, %v2169_v60   ;;  %4263 = vst.msk [vmem:[%s9849_s1 + $0x6a] ss:$16 sm:$0xc] %vm3_vm0, %v2169_v60  }
 0x1a6   :  { %4264 = vst.msk [vmem:[%s9849_s1 + $0xca] ss:$16 sm:$0x30] %vm3_vm0, %v2169_v60   ;;  %4265 = vst.msk [vmem:[%s9849_s1 + $0x12a] ss:$16 sm:$0xc0] %vm3_vm0, %v2169_v60   ;;  %v2234_v4 = vpop.permute.xlu1 %2233   ;;  %v2221_v5 = vpop.permute.xlu0 %2220  }
 0x1a7   :  { %v7690_v61 = vld.sshfl [vmem:[%s9848_s0 + $0x64] sm:$0xff pattern:$0xb3a29180]   ;;  %v7695_v62 = vld.sshfl [vmem:[%s9848_s0 + $0x60] sm:$0xff pattern:$0xb3a29180]  }
 0x1a8   :  { %4277 = vst.msk [vmem:[%s9849_s1 + $0x22a] ss:$16 sm:$0x3] %vm3_vm0, %v2208_v63   ;;  %4278 = vst.msk [vmem:[%s9849_s1 + $0x28a] ss:$16 sm:$0xc] %vm3_vm0, %v2208_v63   ;;  %2958 = vrot.lane.b32.xlu1 %v7690_v61, %s4763_s8  ;;  %2945 = vrot.lane.b32.xlu0 %v7695_v62, %s4763_s8 }
 0x1a9   :  { %4279 = vst.msk [vmem:[%s9849_s1 + $0x2ea] ss:$16 sm:$0x30] %vm3_vm0, %v2208_v63   ;;  %4280 = vst.msk [vmem:[%s9849_s1 + $0x34a] ss:$16 sm:$0xc0] %vm3_vm0, %v2208_v63  }
 0x1aa   :  { %4272 = vst.msk [vmem:[%s9849_s1 + $0x2a] ss:$16 sm:$0x3] %vm3_vm0, %v2195_v0   ;;  %4273 = vst.msk [vmem:[%s9849_s1 + $0x8a] ss:$16 sm:$0xc] %vm3_vm0, %v2195_v0   ;;  %v2260_v8 = vpop.permute.xlu1 %2259   ;;  %v2247_v9 = vpop.permute.xlu0 %2246  }
 0x1ab   :  { %4274 = vst.msk [vmem:[%s9849_s1 + $0xea] ss:$16 sm:$0x30] %vm3_vm0, %v2195_v0   ;;  %4275 = vst.msk [vmem:[%s9849_s1 + $0x14a] ss:$16 sm:$0xc0] %vm3_vm0, %v2195_v0  }
 0x1ac   :  { %v7736_v1 = vld.sshfl [vmem:[%s9848_s0 + $0x74] sm:$0xff pattern:$0xb3a29180]   ;;  %v7741_v2 = vld.sshfl [vmem:[%s9848_s0 + $0x70] sm:$0xff pattern:$0xb3a29180]  }
 0x1ad   :  { %4287 = vst.msk [vmem:[%s9849_s1 + $0x24a] ss:$16 sm:$0x3] %vm3_vm0, %v2234_v4   ;;  %4288 = vst.msk [vmem:[%s9849_s1 + $0x2aa] ss:$16 sm:$0xc] %vm3_vm0, %v2234_v4   ;;  %2984 = vrot.lane.b32.xlu1 %v7736_v1, %s4763_s8  ;;  %2971 = vrot.lane.b32.xlu0 %v7741_v2, %s4763_s8 }
 0x1ae   :  { %4289 = vst.msk [vmem:[%s9849_s1 + $0x30a] ss:$16 sm:$0x30] %vm3_vm0, %v2234_v4   ;;  %4290 = vst.msk [vmem:[%s9849_s1 + $0x36a] ss:$16 sm:$0xc0] %vm3_vm0, %v2234_v4   ;;  %v2286_v11 = vpop.permute.xlu1 %2285   ;;  %v2273_v12 = vpop.permute.xlu0 %2272  }
 0x1af   :  { %4282 = vst.msk [vmem:[%s9849_s1 + $0x4a] ss:$16 sm:$0x3] %vm3_vm0, %v2221_v5   ;;  %4283 = vst.msk [vmem:[%s9849_s1 + $0xaa] ss:$16 sm:$0xc] %vm3_vm0, %v2221_v5  }
 0x1b0   :  { %4284 = vst.msk [vmem:[%s9849_s1 + $0x10a] ss:$16 sm:$0x30] %vm3_vm0, %v2221_v5   ;;  %4285 = vst.msk [vmem:[%s9849_s1 + $0x16a] ss:$16 sm:$0xc0] %vm3_vm0, %v2221_v5  }
 0x1b1   :  { %v7782_v6 = vld.sshfl [vmem:[%s9848_s0 + $0x4] sm:$0xff pattern:$0xb3a29180]   ;;  %4297 = vst.msk [vmem:[%s9849_s1 + $0x26a] ss:$16 sm:$0x3] %vm3_vm0, %v2260_v8   ;;  %2996 = vrot.lane.b32.xlu0 %v7419_v33, %s4764_s27 }
 0x1b2   :  { %4298 = vst.msk [vmem:[%s9849_s1 + $0x2ca] ss:$16 sm:$0xc] %vm3_vm0, %v2260_v8   ;;  %4299 = vst.msk [vmem:[%s9849_s1 + $0x32a] ss:$16 sm:$0x30] %vm3_vm0, %v2260_v8   ;;  %3009 = vrot.lane.b32.xlu1 %v7782_v6, %s4764_s27  ;;  %v2312_v15 = vpop.permute.xlu1 %2311   ;;  %v2299_v16 = vpop.permute.xlu0 %2298  }
 0x1b3   :  { %4300 = vst.msk [vmem:[%s9849_s1 + $0x38a] ss:$16 sm:$0xc0] %vm3_vm0, %v2260_v8   ;;  %4292 = vst.msk [vmem:[%s9849_s1 + $0x6a] ss:$16 sm:$0x3] %vm3_vm0, %v2247_v9  }
 0x1b4   :  { %4293 = vst.msk [vmem:[%s9849_s1 + $0xca] ss:$16 sm:$0xc] %vm3_vm0, %v2247_v9   ;;  %4294 = vst.msk [vmem:[%s9849_s1 + $0x12a] ss:$16 sm:$0x30] %vm3_vm0, %v2247_v9  }
 0x1b5   :  { %4295 = vst.msk [vmem:[%s9849_s1 + $0x18a] ss:$16 sm:$0xc0] %vm3_vm0, %v2247_v9   ;;  %4307 = vst.msk [vmem:[%s9849_s1 + $0x60a] ss:$16 sm:$0x3] %vm3_vm0, %v2286_v11   ;;  %3022 = vrot.lane.b32.xlu0 %v7465_v42, %s4764_s27 }
 0x1b6   :  { %4308 = vst.msk [vmem:[%s9849_s1 + $0x66a] ss:$16 sm:$0xc] %vm3_vm0, %v2286_v11   ;;  %4309 = vst.msk [vmem:[%s9849_s1 + $0x6ca] ss:$16 sm:$0x30] %vm3_vm0, %v2286_v11   ;;  %3035 = vrot.lane.b32.xlu1 %v7460_v37, %s4764_s27  ;;  %v2338_v19 = vpop.permute.xlu1 %2337   ;;  %v2325_v20 = vpop.permute.xlu0 %2324  }
 0x1b7   :  { %4310 = vst.msk [vmem:[%s9849_s1 + $0x72a] ss:$16 sm:$0xc0] %vm3_vm0, %v2286_v11   ;;  %4302 = vst.msk [vmem:[%s9849_s1 + $0x40a] ss:$16 sm:$0x3] %vm3_vm0, %v2273_v12  }
 0x1b8   :  { %4303 = vst.msk [vmem:[%s9849_s1 + $0x46a] ss:$16 sm:$0xc] %vm3_vm0, %v2273_v12   ;;  %4304 = vst.msk [vmem:[%s9849_s1 + $0x4ca] ss:$16 sm:$0x30] %vm3_vm0, %v2273_v12  }
 0x1b9   :  { %4305 = vst.msk [vmem:[%s9849_s1 + $0x52a] ss:$16 sm:$0xc0] %vm3_vm0, %v2273_v12   ;;  %4317 = vst.msk [vmem:[%s9849_s1 + $0x62a] ss:$16 sm:$0x3] %vm3_vm0, %v2312_v15   ;;  %3048 = vrot.lane.b32.xlu0 %v7511_v46, %s4764_s27 }
 0x1ba   :  { %4318 = vst.msk [vmem:[%s9849_s1 + $0x68a] ss:$16 sm:$0xc] %vm3_vm0, %v2312_v15   ;;  %4319 = vst.msk [vmem:[%s9849_s1 + $0x6ea] ss:$16 sm:$0x30] %vm3_vm0, %v2312_v15   ;;  %3061 = vrot.lane.b32.xlu1 %v7506_v45, %s4764_s27  ;;  %v2364_v23 = vpop.permute.xlu1 %2363   ;;  %v2351_v24 = vpop.permute.xlu0 %2350  }
 0x1bb   :  { %4320 = vst.msk [vmem:[%s9849_s1 + $0x74a] ss:$16 sm:$0xc0] %vm3_vm0, %v2312_v15   ;;  %4312 = vst.msk [vmem:[%s9849_s1 + $0x42a] ss:$16 sm:$0x3] %vm3_vm0, %v2299_v16  }
 0x1bc   :  { %4313 = vst.msk [vmem:[%s9849_s1 + $0x48a] ss:$16 sm:$0xc] %vm3_vm0, %v2299_v16   ;;  %4314 = vst.msk [vmem:[%s9849_s1 + $0x4ea] ss:$16 sm:$0x30] %vm3_vm0, %v2299_v16  }
 0x1bd   :  { %4315 = vst.msk [vmem:[%s9849_s1 + $0x54a] ss:$16 sm:$0xc0] %vm3_vm0, %v2299_v16   ;;  %4327 = vst.msk [vmem:[%s9849_s1 + $0x64a] ss:$16 sm:$0x3] %vm3_vm0, %v2338_v19   ;;  %3074 = vrot.lane.b32.xlu0 %v7557_v50, %s4764_s27 }
 0x1be   :  { %4328 = vst.msk [vmem:[%s9849_s1 + $0x6aa] ss:$16 sm:$0xc] %vm3_vm0, %v2338_v19   ;;  %4329 = vst.msk [vmem:[%s9849_s1 + $0x70a] ss:$16 sm:$0x30] %vm3_vm0, %v2338_v19   ;;  %3087 = vrot.lane.b32.xlu1 %v7552_v49, %s4764_s27 }
 0x1bf   :  { %4330 = vst.msk [vmem:[%s9849_s1 + $0x76a] ss:$16 sm:$0xc0] %vm3_vm0, %v2338_v19   ;;  %4322 = vst.msk [vmem:[%s9849_s1 + $0x44a] ss:$16 sm:$0x3] %vm3_vm0, %v2325_v20  }
 0x1c0   :  { %4323 = vst.msk [vmem:[%s9849_s1 + $0x4aa] ss:$16 sm:$0xc] %vm3_vm0, %v2325_v20   ;;  %4324 = vst.msk [vmem:[%s9849_s1 + $0x50a] ss:$16 sm:$0x30] %vm3_vm0, %v2325_v20   ;;  %v2389_v27 = vpop.permute.xlu1 %2388   ;;  %v2376_v28 = vpop.permute.xlu0 %2375  }
 0x1c1   :  { %4325 = vst.msk [vmem:[%s9849_s1 + $0x56a] ss:$16 sm:$0xc0] %vm3_vm0, %v2325_v20   ;;  %4337 = vst.msk [vmem:[%s9849_s1 + $0x66a] ss:$16 sm:$0x3] %vm3_vm0, %v2364_v23   ;;  %3100 = vrot.lane.b32.xlu0 %v7603_v54, %s4764_s27 }
 0x1c2   :  { %4338 = vst.msk [vmem:[%s9849_s1 + $0x6ca] ss:$16 sm:$0xc] %vm3_vm0, %v2364_v23   ;;  %4339 = vst.msk [vmem:[%s9849_s1 + $0x72a] ss:$16 sm:$0x30] %vm3_vm0, %v2364_v23   ;;  %3113 = vrot.lane.b32.xlu1 %v7598_v53, %s4764_s27 }
 0x1c3   :  { %4340 = vst.msk [vmem:[%s9849_s1 + $0x78a] ss:$16 sm:$0xc0] %vm3_vm0, %v2364_v23   ;;  %4332 = vst.msk [vmem:[%s9849_s1 + $0x46a] ss:$16 sm:$0x3] %vm3_vm0, %v2351_v24  }
 0x1c4   :  { %4333 = vst.msk [vmem:[%s9849_s1 + $0x4ca] ss:$16 sm:$0xc] %vm3_vm0, %v2351_v24   ;;  %4334 = vst.msk [vmem:[%s9849_s1 + $0x52a] ss:$16 sm:$0x30] %vm3_vm0, %v2351_v24   ;;  %v2415_v31 = vpop.permute.xlu1 %2414   ;;  %v2402_v32 = vpop.permute.xlu0 %2401  }
 0x1c5   :  { %4335 = vst.msk [vmem:[%s9849_s1 + $0x58a] ss:$16 sm:$0xc0] %vm3_vm0, %v2351_v24   ;;  %4346 = vst.msk [vmem:[%s9849_s1 + $0x20b] ss:$16 sm:$0x3] %vm3_vm0, %v2389_v27   ;;  %3126 = vrot.lane.b32.xlu0 %v7649_v58, %s4764_s27 }
 0x1c6   :  { %4347 = vst.msk [vmem:[%s9849_s1 + $0x26b] ss:$16 sm:$0xc] %vm3_vm0, %v2389_v27   ;;  %4348 = vst.msk [vmem:[%s9849_s1 + $0x2cb] ss:$16 sm:$0x30] %vm3_vm0, %v2389_v27   ;;  %3139 = vrot.lane.b32.xlu1 %v7644_v57, %s4764_s27 }
 0x1c7   :  { %4349 = vst.msk [vmem:[%s9849_s1 + $0x32b] ss:$16 sm:$0xc0] %vm3_vm0, %v2389_v27   ;;  %4341 = vst.msk [vmem:[%s9849_s1 + $0xb] ss:$16 sm:$0x3] %vm3_vm0, %v2376_v28  }
 0x1c8   :  { %4342 = vst.msk [vmem:[%s9849_s1 + $0x6b] ss:$16 sm:$0xc] %vm3_vm0, %v2376_v28   ;;  %4343 = vst.msk [vmem:[%s9849_s1 + $0xcb] ss:$16 sm:$0x30] %vm3_vm0, %v2376_v28   ;;  %v2441_v35 = vpop.permute.xlu1 %2440   ;;  %v2428_v36 = vpop.permute.xlu0 %2427  }
 0x1c9   :  { %4344 = vst.msk [vmem:[%s9849_s1 + $0x12b] ss:$16 sm:$0xc0] %vm3_vm0, %v2376_v28   ;;  %4356 = vst.msk [vmem:[%s9849_s1 + $0x22b] ss:$16 sm:$0x3] %vm3_vm0, %v2415_v31   ;;  %3152 = vrot.lane.b32.xlu0 %v7695_v62, %s4764_s27 }
 0x1ca   :  { %4357 = vst.msk [vmem:[%s9849_s1 + $0x28b] ss:$16 sm:$0xc] %vm3_vm0, %v2415_v31   ;;  %4358 = vst.msk [vmem:[%s9849_s1 + $0x2eb] ss:$16 sm:$0x30] %vm3_vm0, %v2415_v31   ;;  %3165 = vrot.lane.b32.xlu1 %v7690_v61, %s4764_s27 }
 0x1cb   :  { %4359 = vst.msk [vmem:[%s9849_s1 + $0x34b] ss:$16 sm:$0xc0] %vm3_vm0, %v2415_v31   ;;  %4351 = vst.msk [vmem:[%s9849_s1 + $0x2b] ss:$16 sm:$0x3] %vm3_vm0, %v2402_v32  }
 0x1cc   :  { %4352 = vst.msk [vmem:[%s9849_s1 + $0x8b] ss:$16 sm:$0xc] %vm3_vm0, %v2402_v32   ;;  %4353 = vst.msk [vmem:[%s9849_s1 + $0xeb] ss:$16 sm:$0x30] %vm3_vm0, %v2402_v32   ;;  %v2467_v38 = vpop.permute.xlu1 %2466   ;;  %v2454_v39 = vpop.permute.xlu0 %2453  }
 0x1cd   :  { %4354 = vst.msk [vmem:[%s9849_s1 + $0x14b] ss:$16 sm:$0xc0] %vm3_vm0, %v2402_v32   ;;  %4366 = vst.msk [vmem:[%s9849_s1 + $0x24b] ss:$16 sm:$0x3] %vm3_vm0, %v2441_v35   ;;  %3178 = vrot.lane.b32.xlu0 %v7741_v2, %s4764_s27 }
 0x1ce   :  { %4367 = vst.msk [vmem:[%s9849_s1 + $0x2ab] ss:$16 sm:$0xc] %vm3_vm0, %v2441_v35   ;;  %4368 = vst.msk [vmem:[%s9849_s1 + $0x30b] ss:$16 sm:$0x30] %vm3_vm0, %v2441_v35   ;;  %3191 = vrot.lane.b32.xlu1 %v7736_v1, %s4764_s27 }
 0x1cf   :  { %4369 = vst.msk [vmem:[%s9849_s1 + $0x36b] ss:$16 sm:$0xc0] %vm3_vm0, %v2441_v35   ;;  %4361 = vst.msk [vmem:[%s9849_s1 + $0x4b] ss:$16 sm:$0x3] %vm3_vm0, %v2428_v36  }
 0x1d0   :  { %4362 = vst.msk [vmem:[%s9849_s1 + $0xab] ss:$16 sm:$0xc] %vm3_vm0, %v2428_v36   ;;  %4363 = vst.msk [vmem:[%s9849_s1 + $0x10b] ss:$16 sm:$0x30] %vm3_vm0, %v2428_v36   ;;  %v2493_v7 = vpop.permute.xlu1 %2492   ;;  %v2480_v40 = vpop.permute.xlu0 %2479  }
 0x1d1   :  { %4364 = vst.msk [vmem:[%s9849_s1 + $0x16b] ss:$16 sm:$0xc0] %vm3_vm0, %v2428_v36   ;;  %4376 = vst.msk [vmem:[%s9849_s1 + $0x26b] ss:$16 sm:$0x3] %vm3_vm0, %v2467_v38   ;;  %3203 = vrot.lane.b32.xlu0 %v7419_v33, %s4765_s14 }
 0x1d2   :  { %4377 = vst.msk [vmem:[%s9849_s1 + $0x2cb] ss:$16 sm:$0xc] %vm3_vm0, %v2467_v38   ;;  %4378 = vst.msk [vmem:[%s9849_s1 + $0x32b] ss:$16 sm:$0x30] %vm3_vm0, %v2467_v38   ;;  %3216 = vrot.lane.b32.xlu1 %v7782_v6, %s4765_s14 }
 0x1d3   :  { %4379 = vst.msk [vmem:[%s9849_s1 + $0x38b] ss:$16 sm:$0xc0] %vm3_vm0, %v2467_v38   ;;  %4371 = vst.msk [vmem:[%s9849_s1 + $0x6b] ss:$16 sm:$0x3] %vm3_vm0, %v2454_v39  }
 0x1d4   :  { %4372 = vst.msk [vmem:[%s9849_s1 + $0xcb] ss:$16 sm:$0xc] %vm3_vm0, %v2454_v39   ;;  %4373 = vst.msk [vmem:[%s9849_s1 + $0x12b] ss:$16 sm:$0x30] %vm3_vm0, %v2454_v39   ;;  %v2519_v3 = vpop.permute.xlu1 %2518   ;;  %v2506_v10 = vpop.permute.xlu0 %2505  }
 0x1d5   :  { %4374 = vst.msk [vmem:[%s9849_s1 + $0x18b] ss:$16 sm:$0xc0] %vm3_vm0, %v2454_v39   ;;  %4386 = vst.msk [vmem:[%s9849_s1 + $0x60b] ss:$16 sm:$0x3] %vm3_vm0, %v2493_v7   ;;  %3229 = vrot.lane.b32.xlu0 %v7465_v42, %s4765_s14 }
 0x1d6   :  { %4387 = vst.msk [vmem:[%s9849_s1 + $0x66b] ss:$16 sm:$0xc] %vm3_vm0, %v2493_v7   ;;  %4388 = vst.msk [vmem:[%s9849_s1 + $0x6cb] ss:$16 sm:$0x30] %vm3_vm0, %v2493_v7   ;;  %3242 = vrot.lane.b32.xlu1 %v7460_v37, %s4765_s14 }
 0x1d7   :  { %4389 = vst.msk [vmem:[%s9849_s1 + $0x72b] ss:$16 sm:$0xc0] %vm3_vm0, %v2493_v7   ;;  %4381 = vst.msk [vmem:[%s9849_s1 + $0x40b] ss:$16 sm:$0x3] %vm3_vm0, %v2480_v40  }
 0x1d8   :  { %4382 = vst.msk [vmem:[%s9849_s1 + $0x46b] ss:$16 sm:$0xc] %vm3_vm0, %v2480_v40   ;;  %4383 = vst.msk [vmem:[%s9849_s1 + $0x4cb] ss:$16 sm:$0x30] %vm3_vm0, %v2480_v40   ;;  %v2545_v13 = vpop.permute.xlu1 %2544   ;;  %v2532_v14 = vpop.permute.xlu0 %2531  }
 0x1d9   :  { %4384 = vst.msk [vmem:[%s9849_s1 + $0x52b] ss:$16 sm:$0xc0] %vm3_vm0, %v2480_v40   ;;  %4396 = vst.msk [vmem:[%s9849_s1 + $0x62b] ss:$16 sm:$0x3] %vm3_vm0, %v2519_v3   ;;  %3255 = vrot.lane.b32.xlu0 %v7511_v46, %s4765_s14 }
 0x1da   :  { %4397 = vst.msk [vmem:[%s9849_s1 + $0x68b] ss:$16 sm:$0xc] %vm3_vm0, %v2519_v3   ;;  %4398 = vst.msk [vmem:[%s9849_s1 + $0x6eb] ss:$16 sm:$0x30] %vm3_vm0, %v2519_v3   ;;  %3268 = vrot.lane.b32.xlu1 %v7506_v45, %s4765_s14 }
 0x1db   :  { %4399 = vst.msk [vmem:[%s9849_s1 + $0x74b] ss:$16 sm:$0xc0] %vm3_vm0, %v2519_v3   ;;  %4391 = vst.msk [vmem:[%s9849_s1 + $0x42b] ss:$16 sm:$0x3] %vm3_vm0, %v2506_v10  }
 0x1dc   :  { %4392 = vst.msk [vmem:[%s9849_s1 + $0x48b] ss:$16 sm:$0xc] %vm3_vm0, %v2506_v10   ;;  %4393 = vst.msk [vmem:[%s9849_s1 + $0x4eb] ss:$16 sm:$0x30] %vm3_vm0, %v2506_v10   ;;  %v2571_v17 = vpop.permute.xlu1 %2570   ;;  %v2558_v18 = vpop.permute.xlu0 %2557  }
 0x1dd   :  { %4394 = vst.msk [vmem:[%s9849_s1 + $0x54b] ss:$16 sm:$0xc0] %vm3_vm0, %v2506_v10   ;;  %4406 = vst.msk [vmem:[%s9849_s1 + $0x64b] ss:$16 sm:$0x3] %vm3_vm0, %v2545_v13   ;;  %3281 = vrot.lane.b32.xlu0 %v7557_v50, %s4765_s14 }
 0x1de   :  { %4407 = vst.msk [vmem:[%s9849_s1 + $0x6ab] ss:$16 sm:$0xc] %vm3_vm0, %v2545_v13   ;;  %4408 = vst.msk [vmem:[%s9849_s1 + $0x70b] ss:$16 sm:$0x30] %vm3_vm0, %v2545_v13   ;;  %3294 = vrot.lane.b32.xlu1 %v7552_v49, %s4765_s14 }
 0x1df   :  { %4409 = vst.msk [vmem:[%s9849_s1 + $0x76b] ss:$16 sm:$0xc0] %vm3_vm0, %v2545_v13   ;;  %4401 = vst.msk [vmem:[%s9849_s1 + $0x44b] ss:$16 sm:$0x3] %vm3_vm0, %v2532_v14  }
 0x1e0   :  { %4402 = vst.msk [vmem:[%s9849_s1 + $0x4ab] ss:$16 sm:$0xc] %vm3_vm0, %v2532_v14   ;;  %4403 = vst.msk [vmem:[%s9849_s1 + $0x50b] ss:$16 sm:$0x30] %vm3_vm0, %v2532_v14   ;;  %v2596_v43 = vpop.permute.xlu1 %2595   ;;  %v2583_v44 = vpop.permute.xlu0 %2582  }
 0x1e1   :  { %4404 = vst.msk [vmem:[%s9849_s1 + $0x56b] ss:$16 sm:$0xc0] %vm3_vm0, %v2532_v14   ;;  %v2_v21 = vld [vmem:[%s9848_s0] sm:$0xff]   ;;  %v3416_v22 = vld [vmem:[%s9848_s0 + $0x8] sm:$0xff]   ;;  %v3425_v25 = vld [vmem:[%s9848_s0 + $0x10] sm:$0xff]  }
 0x1e2   :  { %4416 = vst.msk [vmem:[%s9849_s1 + $0x66b] ss:$16 sm:$0x3] %vm3_vm0, %v2571_v17   ;;  %4417 = vst.msk [vmem:[%s9849_s1 + $0x6cb] ss:$16 sm:$0xc] %vm3_vm0, %v2571_v17   ;;  %3320 = vrot.lane.b32.xlu1 %v7598_v53, %s4765_s14  ;;  %3307 = vrot.lane.b32.xlu0 %v7603_v54, %s4765_s14 }
 0x1e3   :  { %4418 = vst.msk [vmem:[%s9849_s1 + $0x72b] ss:$16 sm:$0x30] %vm3_vm0, %v2571_v17   ;;  %4419 = vst.msk [vmem:[%s9849_s1 + $0x78b] ss:$16 sm:$0xc0] %vm3_vm0, %v2571_v17  }
 0x1e4   :  { %4411 = vst.msk [vmem:[%s9849_s1 + $0x46b] ss:$16 sm:$0x3] %vm3_vm0, %v2558_v18   ;;  %4412 = vst.msk [vmem:[%s9849_s1 + $0x4cb] ss:$16 sm:$0xc] %vm3_vm0, %v2558_v18   ;;  %v2622_v50 = vpop.permute.xlu1 %2621   ;;  %v2609_v51 = vpop.permute.xlu0 %2608  }
 0x1e5   :  { %4413 = vst.msk [vmem:[%s9849_s1 + $0x52b] ss:$16 sm:$0x30] %vm3_vm0, %v2558_v18   ;;  %4414 = vst.msk [vmem:[%s9849_s1 + $0x58b] ss:$16 sm:$0xc0] %vm3_vm0, %v2558_v18  }
 0x1e6   :  { %4 = vst.msk [vmem:[%s9849_s1] sm:$0x1] %vm3_vm0, %v2_v21   ;;  %3409 = vst.msk [vmem:[%s9849_s1 + $0x7f] sm:$0x2] %vm3_vm0, %v2_v21   ;;  %v3434_v26 = vld [vmem:[%s9848_s0 + $0x18] sm:$0xff]   ;;  %v3443_v29 = vld [vmem:[%s9848_s0 + $0x20] sm:$0xff]  }
 0x1e7   :  { %3410 = vst.msk [vmem:[%s9849_s1 + $0xfe] sm:$0x4] %vm3_vm0, %v2_v21   ;;  %3411 = vst.msk [vmem:[%s9849_s1 + $0x17d] sm:$0x8] %vm3_vm0, %v2_v21   ;;  %v3452_v30 = vld [vmem:[%s9848_s0 + $0x28] sm:$0xff]   ;;  %v3461_v33 = vld [vmem:[%s9848_s0 + $0x30] sm:$0xff]  }
 0x1e8   :  { %3412 = vst.msk [vmem:[%s9849_s1 + $0x1fc] sm:$0x10] %vm3_vm0, %v2_v21   ;;  %3413 = vst.msk [vmem:[%s9849_s1 + $0x27b] sm:$0x20] %vm3_vm0, %v2_v21   ;;  %v3470_v34 = vld [vmem:[%s9848_s0 + $0x38] sm:$0xff]   ;;  %v3479_v41 = vld [vmem:[%s9848_s0 + $0x40] sm:$0xff]   ;;  %v2648_v52 = vpop.permute.xlu1 %2647   ;;  %v2635_v53 = vpop.permute.xlu0 %2634  }
 0x1e9   :  { %3414 = vst.msk [vmem:[%s9849_s1 + $0x2fa] sm:$0x40] %vm3_vm0, %v2_v21   ;;  %3415 = vst.msk [vmem:[%s9849_s1 + $0x379] sm:$0x80] %vm3_vm0, %v2_v21   ;;  %v3488_v37 = vld [vmem:[%s9848_s0 + $0x48] sm:$0xff]   ;;  %v3497_v42 = vld [vmem:[%s9848_s0 + $0x50] sm:$0xff]  }
 0x1ea   :  { %3417 = vst.msk [vmem:[%s9849_s1 + $0x10] sm:$0x1] %vm3_vm0, %v3416_v22   ;;  %3418 = vst.msk [vmem:[%s9849_s1 + $0x8f] sm:$0x2] %vm3_vm0, %v3416_v22   ;;  %v3506_v45 = vld [vmem:[%s9848_s0 + $0x58] sm:$0xff]   ;;  %v3515_v46 = vld [vmem:[%s9848_s0 + $0x60] sm:$0xff]  }
 0x1eb   :  { %3419 = vst.msk [vmem:[%s9849_s1 + $0x10e] sm:$0x4] %vm3_vm0, %v3416_v22   ;;  %3420 = vst.msk [vmem:[%s9849_s1 + $0x18d] sm:$0x8] %vm3_vm0, %v3416_v22   ;;  %v3524_v47 = vld [vmem:[%s9848_s0 + $0x68] sm:$0xff]   ;;  %v3533_v48 = vld [vmem:[%s9848_s0 + $0x70] sm:$0xff]  }
 0x1ec   :  { %3421 = vst.msk [vmem:[%s9849_s1 + $0x20c] sm:$0x10] %vm3_vm0, %v3416_v22   ;;  %3422 = vst.msk [vmem:[%s9849_s1 + $0x28b] sm:$0x20] %vm3_vm0, %v3416_v22   ;;  %v3542_v49 = vld [vmem:[%s9848_s0 + $0x78] sm:$0xff]   ;;  %3346 = vrot.lane.b32.xlu1 %v7644_v57, %s4765_s14  ;;  %v2674_v54 = vpop.permute.xlu1 %2673   ;;  %v2661_v55 = vpop.permute.xlu0 %2660  }
 0x1ed   :  { %3423 = vst.msk [vmem:[%s9849_s1 + $0x30a] sm:$0x40] %vm3_vm0, %v3416_v22   ;;  %3424 = vst.msk [vmem:[%s9849_s1 + $0x389] sm:$0x80] %vm3_vm0, %v3416_v22   ;;  %3333 = vrot.lane.b32.xlu0 %v7649_v58, %s4765_s14 }
 0x1ee   :  { %3426 = vst.msk [vmem:[%s9849_s1 + $0x20] sm:$0x1] %vm3_vm0, %v3425_v25   ;;  %3427 = vst.msk [vmem:[%s9849_s1 + $0x9f] sm:$0x2] %vm3_vm0, %v3425_v25  }
 0x1ef   :  { %3428 = vst.msk [vmem:[%s9849_s1 + $0x11e] sm:$0x4] %vm3_vm0, %v3425_v25   ;;  %3429 = vst.msk [vmem:[%s9849_s1 + $0x19d] sm:$0x8] %vm3_vm0, %v3425_v25  }
 0x1f0   :  { %3430 = vst.msk [vmem:[%s9849_s1 + $0x21c] sm:$0x10] %vm3_vm0, %v3425_v25   ;;  %3431 = vst.msk [vmem:[%s9849_s1 + $0x29b] sm:$0x20] %vm3_vm0, %v3425_v25   ;;  %3372 = vrot.lane.b32.xlu1 %v7690_v61, %s4765_s14  ;;  %v2700_v56 = vpop.permute.xlu1 %2699   ;;  %v2687_v57 = vpop.permute.xlu0 %2686  }
 0x1f1   :  { %3432 = vst.msk [vmem:[%s9849_s1 + $0x31a] sm:$0x40] %vm3_vm0, %v3425_v25   ;;  %3433 = vst.msk [vmem:[%s9849_s1 + $0x399] sm:$0x80] %vm3_vm0, %v3425_v25   ;;  %3359 = vrot.lane.b32.xlu0 %v7695_v62, %s4765_s14 }
 0x1f2   :  { %3435 = vst.msk [vmem:[%s9849_s1 + $0x30] sm:$0x1] %vm3_vm0, %v3434_v26   ;;  %3436 = vst.msk [vmem:[%s9849_s1 + $0xaf] sm:$0x2] %vm3_vm0, %v3434_v26  }
 0x1f3   :  { %3437 = vst.msk [vmem:[%s9849_s1 + $0x12e] sm:$0x4] %vm3_vm0, %v3434_v26   ;;  %3438 = vst.msk [vmem:[%s9849_s1 + $0x1ad] sm:$0x8] %vm3_vm0, %v3434_v26  }
 0x1f4   :  { %3439 = vst.msk [vmem:[%s9849_s1 + $0x22c] sm:$0x10] %vm3_vm0, %v3434_v26   ;;  %3440 = vst.msk [vmem:[%s9849_s1 + $0x2ab] sm:$0x20] %vm3_vm0, %v3434_v26   ;;  %3398 = vrot.lane.b32.xlu1 %v7736_v1, %s4765_s14  ;;  %v2726_v58 = vpop.permute.xlu1 %2725   ;;  %v2713_v59 = vpop.permute.xlu0 %2712  }
 0x1f5   :  { %3441 = vst.msk [vmem:[%s9849_s1 + $0x32a] sm:$0x40] %vm3_vm0, %v3434_v26   ;;  %3442 = vst.msk [vmem:[%s9849_s1 + $0x3a9] sm:$0x80] %vm3_vm0, %v3434_v26   ;;  %3385 = vrot.lane.b32.xlu0 %v7741_v2, %s4765_s14 }
 0x1f6   :  { %3444 = vst.msk [vmem:[%s9849_s1 + $0x40] sm:$0x1] %vm3_vm0, %v3443_v29   ;;  %3445 = vst.msk [vmem:[%s9849_s1 + $0xbf] sm:$0x2] %vm3_vm0, %v3443_v29  }
 0x1f7   :  { %3446 = vst.msk [vmem:[%s9849_s1 + $0x13e] sm:$0x4] %vm3_vm0, %v3443_v29   ;;  %3447 = vst.msk [vmem:[%s9849_s1 + $0x1bd] sm:$0x8] %vm3_vm0, %v3443_v29  }
 0x1f8   :  { %3448 = vst.msk [vmem:[%s9849_s1 + $0x23c] sm:$0x10] %vm3_vm0, %v3443_v29   ;;  %3449 = vst.msk [vmem:[%s9849_s1 + $0x2bb] sm:$0x20] %vm3_vm0, %v3443_v29   ;;  %v2752_v60 = vpop.permute.xlu1 %2751   ;;  %v2739_v61 = vpop.permute.xlu0 %2738  }
 0x1f9   :  { %3450 = vst.msk [vmem:[%s9849_s1 + $0x33a] sm:$0x40] %vm3_vm0, %v3443_v29   ;;  %3451 = vst.msk [vmem:[%s9849_s1 + $0x3b9] sm:$0x80] %vm3_vm0, %v3443_v29  }
 0x1fa   :  { %3453 = vst.msk [vmem:[%s9849_s1 + $0x50] sm:$0x1] %vm3_vm0, %v3452_v30   ;;  %3454 = vst.msk [vmem:[%s9849_s1 + $0xcf] sm:$0x2] %vm3_vm0, %v3452_v30  }
 0x1fb   :  { %3455 = vst.msk [vmem:[%s9849_s1 + $0x14e] sm:$0x4] %vm3_vm0, %v3452_v30   ;;  %3456 = vst.msk [vmem:[%s9849_s1 + $0x1cd] sm:$0x8] %vm3_vm0, %v3452_v30  }
 0x1fc   :  { %3457 = vst.msk [vmem:[%s9849_s1 + $0x24c] sm:$0x10] %vm3_vm0, %v3452_v30   ;;  %3458 = vst.msk [vmem:[%s9849_s1 + $0x2cb] sm:$0x20] %vm3_vm0, %v3452_v30   ;;  %v2778_v62 = vpop.permute.xlu1 %2777   ;;  %v2765_v63 = vpop.permute.xlu0 %2764  }
 0x1fd   :  { %3459 = vst.msk [vmem:[%s9849_s1 + $0x34a] sm:$0x40] %vm3_vm0, %v3452_v30   ;;  %3460 = vst.msk [vmem:[%s9849_s1 + $0x3c9] sm:$0x80] %vm3_vm0, %v3452_v30  }
 0x1fe   :  { %3462 = vst.msk [vmem:[%s9849_s1 + $0x60] sm:$0x1] %vm3_vm0, %v3461_v33   ;;  %3463 = vst.msk [vmem:[%s9849_s1 + $0xdf] sm:$0x2] %vm3_vm0, %v3461_v33  }
 0x1ff   :  { %3464 = vst.msk [vmem:[%s9849_s1 + $0x15e] sm:$0x4] %vm3_vm0, %v3461_v33   ;;  %3465 = vst.msk [vmem:[%s9849_s1 + $0x1dd] sm:$0x8] %vm3_vm0, %v3461_v33  }
 0x200   :  { %3466 = vst.msk [vmem:[%s9849_s1 + $0x25c] sm:$0x10] %vm3_vm0, %v3461_v33   ;;  %3467 = vst.msk [vmem:[%s9849_s1 + $0x2db] sm:$0x20] %vm3_vm0, %v3461_v33   ;;  %v2803_v0 = vpop.permute.xlu1 %2802   ;;  %v2790_v1 = vpop.permute.xlu0 %2789  }
 0x201   :  { %3468 = vst.msk [vmem:[%s9849_s1 + $0x35a] sm:$0x40] %vm3_vm0, %v3461_v33   ;;  %3469 = vst.msk [vmem:[%s9849_s1 + $0x3d9] sm:$0x80] %vm3_vm0, %v3461_v33  }
 0x202   :  { %3471 = vst.msk [vmem:[%s9849_s1 + $0x70] sm:$0x1] %vm3_vm0, %v3470_v34   ;;  %3472 = vst.msk [vmem:[%s9849_s1 + $0xef] sm:$0x2] %vm3_vm0, %v3470_v34  }
 0x203   :  { %3473 = vst.msk [vmem:[%s9849_s1 + $0x16e] sm:$0x4] %vm3_vm0, %v3470_v34   ;;  %3474 = vst.msk [vmem:[%s9849_s1 + $0x1ed] sm:$0x8] %vm3_vm0, %v3470_v34  }
 0x204   :  { %3475 = vst.msk [vmem:[%s9849_s1 + $0x26c] sm:$0x10] %vm3_vm0, %v3470_v34   ;;  %3476 = vst.msk [vmem:[%s9849_s1 + $0x2eb] sm:$0x20] %vm3_vm0, %v3470_v34   ;;  %v2829_v2 = vpop.permute.xlu1 %2828   ;;  %v2816_v4 = vpop.permute.xlu0 %2815  }
 0x205   :  { %3477 = vst.msk [vmem:[%s9849_s1 + $0x36a] sm:$0x40] %vm3_vm0, %v3470_v34   ;;  %3478 = vst.msk [vmem:[%s9849_s1 + $0x3e9] sm:$0x80] %vm3_vm0, %v3470_v34  }
 0x206   :  { %3480 = vst.msk [vmem:[%s9849_s1 + $0x400] sm:$0x1] %vm3_vm0, %v3479_v41   ;;  %3481 = vst.msk [vmem:[%s9849_s1 + $0x47f] sm:$0x2] %vm3_vm0, %v3479_v41  }
 0x207   :  { %3482 = vst.msk [vmem:[%s9849_s1 + $0x4fe] sm:$0x4] %vm3_vm0, %v3479_v41   ;;  %3483 = vst.msk [vmem:[%s9849_s1 + $0x57d] sm:$0x8] %vm3_vm0, %v3479_v41  }
 0x208   :  { %3484 = vst.msk [vmem:[%s9849_s1 + $0x5fc] sm:$0x10] %vm3_vm0, %v3479_v41   ;;  %3485 = vst.msk [vmem:[%s9849_s1 + $0x67b] sm:$0x20] %vm3_vm0, %v3479_v41   ;;  %v2855_v5 = vpop.permute.xlu1 %2854   ;;  %v2842_v6 = vpop.permute.xlu0 %2841  }
 0x209   :  { %3486 = vst.msk [vmem:[%s9849_s1 + $0x6fa] sm:$0x40] %vm3_vm0, %v3479_v41   ;;  %3487 = vst.msk [vmem:[%s9849_s1 + $0x779] sm:$0x80] %vm3_vm0, %v3479_v41  }
 0x20a   :  { %3489 = vst.msk [vmem:[%s9849_s1 + $0x410] sm:$0x1] %vm3_vm0, %v3488_v37   ;;  %3490 = vst.msk [vmem:[%s9849_s1 + $0x48f] sm:$0x2] %vm3_vm0, %v3488_v37  }
 0x20b   :  { %3491 = vst.msk [vmem:[%s9849_s1 + $0x50e] sm:$0x4] %vm3_vm0, %v3488_v37   ;;  %3492 = vst.msk [vmem:[%s9849_s1 + $0x58d] sm:$0x8] %vm3_vm0, %v3488_v37  }
 0x20c   :  { %3493 = vst.msk [vmem:[%s9849_s1 + $0x60c] sm:$0x10] %vm3_vm0, %v3488_v37   ;;  %3494 = vst.msk [vmem:[%s9849_s1 + $0x68b] sm:$0x20] %vm3_vm0, %v3488_v37   ;;  %v2881_v8 = vpop.permute.xlu1 %2880   ;;  %v2868_v9 = vpop.permute.xlu0 %2867  }
 0x20d   :  { %3495 = vst.msk [vmem:[%s9849_s1 + $0x70a] sm:$0x40] %vm3_vm0, %v3488_v37   ;;  %3496 = vst.msk [vmem:[%s9849_s1 + $0x789] sm:$0x80] %vm3_vm0, %v3488_v37  }
 0x20e   :  { %3498 = vst.msk [vmem:[%s9849_s1 + $0x420] sm:$0x1] %vm3_vm0, %v3497_v42   ;;  %3499 = vst.msk [vmem:[%s9849_s1 + $0x49f] sm:$0x2] %vm3_vm0, %v3497_v42  }
 0x20f   :  { %3500 = vst.msk [vmem:[%s9849_s1 + $0x51e] sm:$0x4] %vm3_vm0, %v3497_v42   ;;  %3501 = vst.msk [vmem:[%s9849_s1 + $0x59d] sm:$0x8] %vm3_vm0, %v3497_v42  }
 0x210   :  { %3502 = vst.msk [vmem:[%s9849_s1 + $0x61c] sm:$0x10] %vm3_vm0, %v3497_v42   ;;  %3503 = vst.msk [vmem:[%s9849_s1 + $0x69b] sm:$0x20] %vm3_vm0, %v3497_v42   ;;  %v2907_v11 = vpop.permute.xlu1 %2906   ;;  %v2894_v12 = vpop.permute.xlu0 %2893  }
 0x211   :  { %3504 = vst.msk [vmem:[%s9849_s1 + $0x71a] sm:$0x40] %vm3_vm0, %v3497_v42   ;;  %3505 = vst.msk [vmem:[%s9849_s1 + $0x799] sm:$0x80] %vm3_vm0, %v3497_v42  }
 0x212   :  { %4425 = vst.msk [vmem:[%s9849_s1 + $0x20c] ss:$16 sm:$0x3] %vm3_vm0, %v2596_v43   ;;  %4426 = vst.msk [vmem:[%s9849_s1 + $0x26c] ss:$16 sm:$0xc] %vm3_vm0, %v2596_v43  }
 0x213   :  { %4427 = vst.msk [vmem:[%s9849_s1 + $0x2cc] ss:$16 sm:$0x30] %vm3_vm0, %v2596_v43   ;;  %4428 = vst.msk [vmem:[%s9849_s1 + $0x32c] ss:$16 sm:$0xc0] %vm3_vm0, %v2596_v43  }
 0x214   :  { %4420 = vst.msk [vmem:[%s9849_s1 + $0xc] ss:$16 sm:$0x3] %vm3_vm0, %v2583_v44   ;;  %4421 = vst.msk [vmem:[%s9849_s1 + $0x6c] ss:$16 sm:$0xc] %vm3_vm0, %v2583_v44  }
 0x215   :  { %4422 = vst.msk [vmem:[%s9849_s1 + $0xcc] ss:$16 sm:$0x30] %vm3_vm0, %v2583_v44   ;;  %4423 = vst.msk [vmem:[%s9849_s1 + $0x12c] ss:$16 sm:$0xc0] %vm3_vm0, %v2583_v44   ;;  %v2933_v15 = vpop.permute.xlu1 %2932   ;;  %v2920_v16 = vpop.permute.xlu0 %2919  }
 0x216   :  { %3507 = vst.msk [vmem:[%s9849_s1 + $0x430] sm:$0x1] %vm3_vm0, %v3506_v45   ;;  %3508 = vst.msk [vmem:[%s9849_s1 + $0x4af] sm:$0x2] %vm3_vm0, %v3506_v45  }
 0x217   :  { %3509 = vst.msk [vmem:[%s9849_s1 + $0x52e] sm:$0x4] %vm3_vm0, %v3506_v45   ;;  %3510 = vst.msk [vmem:[%s9849_s1 + $0x5ad] sm:$0x8] %vm3_vm0, %v3506_v45  }
 0x218   :  { %3511 = vst.msk [vmem:[%s9849_s1 + $0x62c] sm:$0x10] %vm3_vm0, %v3506_v45   ;;  %3512 = vst.msk [vmem:[%s9849_s1 + $0x6ab] sm:$0x20] %vm3_vm0, %v3506_v45  }
 0x219   :  { %3513 = vst.msk [vmem:[%s9849_s1 + $0x72a] sm:$0x40] %vm3_vm0, %v3506_v45   ;;  %3514 = vst.msk [vmem:[%s9849_s1 + $0x7a9] sm:$0x80] %vm3_vm0, %v3506_v45  }
 0x21a   :  { %3516 = vst.msk [vmem:[%s9849_s1 + $0x440] sm:$0x1] %vm3_vm0, %v3515_v46   ;;  %3517 = vst.msk [vmem:[%s9849_s1 + $0x4bf] sm:$0x2] %vm3_vm0, %v3515_v46   ;;  %v2959_v19 = vpop.permute.xlu1 %2958   ;;  %v2946_v20 = vpop.permute.xlu0 %2945  }
 0x21b   :  { %3518 = vst.msk [vmem:[%s9849_s1 + $0x53e] sm:$0x4] %vm3_vm0, %v3515_v46   ;;  %3519 = vst.msk [vmem:[%s9849_s1 + $0x5bd] sm:$0x8] %vm3_vm0, %v3515_v46  }
 0x21c   :  { %3520 = vst.msk [vmem:[%s9849_s1 + $0x63c] sm:$0x10] %vm3_vm0, %v3515_v46   ;;  %3521 = vst.msk [vmem:[%s9849_s1 + $0x6bb] sm:$0x20] %vm3_vm0, %v3515_v46  }
 0x21d   :  { %3522 = vst.msk [vmem:[%s9849_s1 + $0x73a] sm:$0x40] %vm3_vm0, %v3515_v46   ;;  %3523 = vst.msk [vmem:[%s9849_s1 + $0x7b9] sm:$0x80] %vm3_vm0, %v3515_v46  }
 0x21e   :  { %3525 = vst.msk [vmem:[%s9849_s1 + $0x450] sm:$0x1] %vm3_vm0, %v3524_v47   ;;  %3526 = vst.msk [vmem:[%s9849_s1 + $0x4cf] sm:$0x2] %vm3_vm0, %v3524_v47  }
 0x21f   :  { %3527 = vst.msk [vmem:[%s9849_s1 + $0x54e] sm:$0x4] %vm3_vm0, %v3524_v47   ;;  %3528 = vst.msk [vmem:[%s9849_s1 + $0x5cd] sm:$0x8] %vm3_vm0, %v3524_v47   ;;  %v2985_v23 = vpop.permute.xlu1 %2984   ;;  %v2972_v24 = vpop.permute.xlu0 %2971  }
 0x220   :  { %3529 = vst.msk [vmem:[%s9849_s1 + $0x64c] sm:$0x10] %vm3_vm0, %v3524_v47   ;;  %3530 = vst.msk [vmem:[%s9849_s1 + $0x6cb] sm:$0x20] %vm3_vm0, %v3524_v47  }
 0x221   :  { %3531 = vst.msk [vmem:[%s9849_s1 + $0x74a] sm:$0x40] %vm3_vm0, %v3524_v47   ;;  %3532 = vst.msk [vmem:[%s9849_s1 + $0x7c9] sm:$0x80] %vm3_vm0, %v3524_v47  }
 0x222   :  { %3534 = vst.msk [vmem:[%s9849_s1 + $0x460] sm:$0x1] %vm3_vm0, %v3533_v48   ;;  %3535 = vst.msk [vmem:[%s9849_s1 + $0x4df] sm:$0x2] %vm3_vm0, %v3533_v48  }
 0x223   :  { %3536 = vst.msk [vmem:[%s9849_s1 + $0x55e] sm:$0x4] %vm3_vm0, %v3533_v48   ;;  %3537 = vst.msk [vmem:[%s9849_s1 + $0x5dd] sm:$0x8] %vm3_vm0, %v3533_v48   ;;  %v2997_v28 = vpop.permute.xlu0 %2996  }
 0x224   :  { %3538 = vst.msk [vmem:[%s9849_s1 + $0x65c] sm:$0x10] %vm3_vm0, %v3533_v48   ;;  %3539 = vst.msk [vmem:[%s9849_s1 + $0x6db] sm:$0x20] %vm3_vm0, %v3533_v48   ;;  %v3010_v27 = vpop.permute.xlu1 %3009  }
 0x225   :  { %3540 = vst.msk [vmem:[%s9849_s1 + $0x75a] sm:$0x40] %vm3_vm0, %v3533_v48   ;;  %3541 = vst.msk [vmem:[%s9849_s1 + $0x7d9] sm:$0x80] %vm3_vm0, %v3533_v48  }
 0x226   :  { %3543 = vst.msk [vmem:[%s9849_s1 + $0x470] sm:$0x1] %vm3_vm0, %v3542_v49   ;;  %3544 = vst.msk [vmem:[%s9849_s1 + $0x4ef] sm:$0x2] %vm3_vm0, %v3542_v49  }
 0x227   :  { %3545 = vst.msk [vmem:[%s9849_s1 + $0x56e] sm:$0x4] %vm3_vm0, %v3542_v49   ;;  %3546 = vst.msk [vmem:[%s9849_s1 + $0x5ed] sm:$0x8] %vm3_vm0, %v3542_v49   ;;  %v3023_v32 = vpop.permute.xlu0 %3022  }
 0x228   :  { %3547 = vst.msk [vmem:[%s9849_s1 + $0x66c] sm:$0x10] %vm3_vm0, %v3542_v49   ;;  %3548 = vst.msk [vmem:[%s9849_s1 + $0x6eb] sm:$0x20] %vm3_vm0, %v3542_v49   ;;  %v3036_v31 = vpop.permute.xlu1 %3035  }
 0x229   :  { %3549 = vst.msk [vmem:[%s9849_s1 + $0x76a] sm:$0x40] %vm3_vm0, %v3542_v49   ;;  %3550 = vst.msk [vmem:[%s9849_s1 + $0x7e9] sm:$0x80] %vm3_vm0, %v3542_v49  }
 0x22a   :  { %4435 = vst.msk [vmem:[%s9849_s1 + $0x22c] ss:$16 sm:$0x3] %vm3_vm0, %v2622_v50   ;;  %4436 = vst.msk [vmem:[%s9849_s1 + $0x28c] ss:$16 sm:$0xc] %vm3_vm0, %v2622_v50  }
 0x22b   :  { %4437 = vst.msk [vmem:[%s9849_s1 + $0x2ec] ss:$16 sm:$0x30] %vm3_vm0, %v2622_v50   ;;  %4438 = vst.msk [vmem:[%s9849_s1 + $0x34c] ss:$16 sm:$0xc0] %vm3_vm0, %v2622_v50   ;;  %v3049_v36 = vpop.permute.xlu0 %3048  }
 0x22c   :  { %4430 = vst.msk [vmem:[%s9849_s1 + $0x2c] ss:$16 sm:$0x3] %vm3_vm0, %v2609_v51   ;;  %4431 = vst.msk [vmem:[%s9849_s1 + $0x8c] ss:$16 sm:$0xc] %vm3_vm0, %v2609_v51   ;;  %v3062_v35 = vpop.permute.xlu1 %3061  }
 0x22d   :  { %4432 = vst.msk [vmem:[%s9849_s1 + $0xec] ss:$16 sm:$0x30] %vm3_vm0, %v2609_v51   ;;  %4433 = vst.msk [vmem:[%s9849_s1 + $0x14c] ss:$16 sm:$0xc0] %vm3_vm0, %v2609_v51  }
 0x22e   :  { %4445 = vst.msk [vmem:[%s9849_s1 + $0x24c] ss:$16 sm:$0x3] %vm3_vm0, %v2648_v52   ;;  %4446 = vst.msk [vmem:[%s9849_s1 + $0x2ac] ss:$16 sm:$0xc] %vm3_vm0, %v2648_v52  }
 0x22f   :  { %4447 = vst.msk [vmem:[%s9849_s1 + $0x30c] ss:$16 sm:$0x30] %vm3_vm0, %v2648_v52   ;;  %4448 = vst.msk [vmem:[%s9849_s1 + $0x36c] ss:$16 sm:$0xc0] %vm3_vm0, %v2648_v52   ;;  %v3075_v39 = vpop.permute.xlu0 %3074  }
 0x230   :  { %4440 = vst.msk [vmem:[%s9849_s1 + $0x4c] ss:$16 sm:$0x3] %vm3_vm0, %v2635_v53   ;;  %4441 = vst.msk [vmem:[%s9849_s1 + $0xac] ss:$16 sm:$0xc] %vm3_vm0, %v2635_v53   ;;  %v3088_v38 = vpop.permute.xlu1 %3087  }
 0x231   :  { %4442 = vst.msk [vmem:[%s9849_s1 + $0x10c] ss:$16 sm:$0x30] %vm3_vm0, %v2635_v53   ;;  %4443 = vst.msk [vmem:[%s9849_s1 + $0x16c] ss:$16 sm:$0xc0] %vm3_vm0, %v2635_v53  }
 0x232   :  { %4455 = vst.msk [vmem:[%s9849_s1 + $0x26c] ss:$16 sm:$0x3] %vm3_vm0, %v2674_v54   ;;  %4456 = vst.msk [vmem:[%s9849_s1 + $0x2cc] ss:$16 sm:$0xc] %vm3_vm0, %v2674_v54  }
 0x233   :  { %4457 = vst.msk [vmem:[%s9849_s1 + $0x32c] ss:$16 sm:$0x30] %vm3_vm0, %v2674_v54   ;;  %4458 = vst.msk [vmem:[%s9849_s1 + $0x38c] ss:$16 sm:$0xc0] %vm3_vm0, %v2674_v54   ;;  %v3101_v40 = vpop.permute.xlu0 %3100  }
 0x234   :  { %4450 = vst.msk [vmem:[%s9849_s1 + $0x6c] ss:$16 sm:$0x3] %vm3_vm0, %v2661_v55   ;;  %4451 = vst.msk [vmem:[%s9849_s1 + $0xcc] ss:$16 sm:$0xc] %vm3_vm0, %v2661_v55   ;;  %v3114_v7 = vpop.permute.xlu1 %3113  }
 0x235   :  { %4452 = vst.msk [vmem:[%s9849_s1 + $0x12c] ss:$16 sm:$0x30] %vm3_vm0, %v2661_v55   ;;  %4453 = vst.msk [vmem:[%s9849_s1 + $0x18c] ss:$16 sm:$0xc0] %vm3_vm0, %v2661_v55  }
 0x236   :  { %4465 = vst.msk [vmem:[%s9849_s1 + $0x60c] ss:$16 sm:$0x3] %vm3_vm0, %v2700_v56   ;;  %4466 = vst.msk [vmem:[%s9849_s1 + $0x66c] ss:$16 sm:$0xc] %vm3_vm0, %v2700_v56  }
 0x237   :  { %4467 = vst.msk [vmem:[%s9849_s1 + $0x6cc] ss:$16 sm:$0x30] %vm3_vm0, %v2700_v56   ;;  %4468 = vst.msk [vmem:[%s9849_s1 + $0x72c] ss:$16 sm:$0xc0] %vm3_vm0, %v2700_v56   ;;  %v3127_v10 = vpop.permute.xlu0 %3126  }
 0x238   :  { %4460 = vst.msk [vmem:[%s9849_s1 + $0x40c] ss:$16 sm:$0x3] %vm3_vm0, %v2687_v57   ;;  %4461 = vst.msk [vmem:[%s9849_s1 + $0x46c] ss:$16 sm:$0xc] %vm3_vm0, %v2687_v57   ;;  %v3140_v3 = vpop.permute.xlu1 %3139  }
 0x239   :  { %4462 = vst.msk [vmem:[%s9849_s1 + $0x4cc] ss:$16 sm:$0x30] %vm3_vm0, %v2687_v57   ;;  %4463 = vst.msk [vmem:[%s9849_s1 + $0x52c] ss:$16 sm:$0xc0] %vm3_vm0, %v2687_v57  }
 0x23a   :  { %4475 = vst.msk [vmem:[%s9849_s1 + $0x62c] ss:$16 sm:$0x3] %vm3_vm0, %v2726_v58   ;;  %4476 = vst.msk [vmem:[%s9849_s1 + $0x68c] ss:$16 sm:$0xc] %vm3_vm0, %v2726_v58  }
 0x23b   :  { %4477 = vst.msk [vmem:[%s9849_s1 + $0x6ec] ss:$16 sm:$0x30] %vm3_vm0, %v2726_v58   ;;  %4478 = vst.msk [vmem:[%s9849_s1 + $0x74c] ss:$16 sm:$0xc0] %vm3_vm0, %v2726_v58   ;;  %v3153_v14 = vpop.permute.xlu0 %3152  }
 0x23c   :  { %4470 = vst.msk [vmem:[%s9849_s1 + $0x42c] ss:$16 sm:$0x3] %vm3_vm0, %v2713_v59   ;;  %4471 = vst.msk [vmem:[%s9849_s1 + $0x48c] ss:$16 sm:$0xc] %vm3_vm0, %v2713_v59   ;;  %v3166_v13 = vpop.permute.xlu1 %3165  }
 0x23d   :  { %4472 = vst.msk [vmem:[%s9849_s1 + $0x4ec] ss:$16 sm:$0x30] %vm3_vm0, %v2713_v59   ;;  %4473 = vst.msk [vmem:[%s9849_s1 + $0x54c] ss:$16 sm:$0xc0] %vm3_vm0, %v2713_v59  }
 0x23e   :  { %4485 = vst.msk [vmem:[%s9849_s1 + $0x64c] ss:$16 sm:$0x3] %vm3_vm0, %v2752_v60   ;;  %4486 = vst.msk [vmem:[%s9849_s1 + $0x6ac] ss:$16 sm:$0xc] %vm3_vm0, %v2752_v60  }
 0x23f   :  { %4487 = vst.msk [vmem:[%s9849_s1 + $0x70c] ss:$16 sm:$0x30] %vm3_vm0, %v2752_v60   ;;  %4488 = vst.msk [vmem:[%s9849_s1 + $0x76c] ss:$16 sm:$0xc0] %vm3_vm0, %v2752_v60   ;;  %v3179_v18 = vpop.permute.xlu0 %3178  }
 0x240   :  { %4480 = vst.msk [vmem:[%s9849_s1 + $0x44c] ss:$16 sm:$0x3] %vm3_vm0, %v2739_v61   ;;  %4481 = vst.msk [vmem:[%s9849_s1 + $0x4ac] ss:$16 sm:$0xc] %vm3_vm0, %v2739_v61   ;;  %v3192_v17 = vpop.permute.xlu1 %3191  }
 0x241   :  { %4482 = vst.msk [vmem:[%s9849_s1 + $0x50c] ss:$16 sm:$0x30] %vm3_vm0, %v2739_v61   ;;  %4483 = vst.msk [vmem:[%s9849_s1 + $0x56c] ss:$16 sm:$0xc0] %vm3_vm0, %v2739_v61  }
 0x242   :  { %4495 = vst.msk [vmem:[%s9849_s1 + $0x66c] ss:$16 sm:$0x3] %vm3_vm0, %v2778_v62   ;;  %4496 = vst.msk [vmem:[%s9849_s1 + $0x6cc] ss:$16 sm:$0xc] %vm3_vm0, %v2778_v62  }
 0x243   :  { %4497 = vst.msk [vmem:[%s9849_s1 + $0x72c] ss:$16 sm:$0x30] %vm3_vm0, %v2778_v62   ;;  %4498 = vst.msk [vmem:[%s9849_s1 + $0x78c] ss:$16 sm:$0xc0] %vm3_vm0, %v2778_v62   ;;  %v3204_v22 = vpop.permute.xlu0 %3203  }
 0x244   :  { %4490 = vst.msk [vmem:[%s9849_s1 + $0x46c] ss:$16 sm:$0x3] %vm3_vm0, %v2765_v63   ;;  %4491 = vst.msk [vmem:[%s9849_s1 + $0x4cc] ss:$16 sm:$0xc] %vm3_vm0, %v2765_v63   ;;  %v3217_v21 = vpop.permute.xlu1 %3216  }
 0x245   :  { %4492 = vst.msk [vmem:[%s9849_s1 + $0x52c] ss:$16 sm:$0x30] %vm3_vm0, %v2765_v63   ;;  %4493 = vst.msk [vmem:[%s9849_s1 + $0x58c] ss:$16 sm:$0xc0] %vm3_vm0, %v2765_v63  }
 0x246   :  { %4504 = vst.msk [vmem:[%s9849_s1 + $0x20d] ss:$16 sm:$0x3] %vm3_vm0, %v2803_v0   ;;  %4505 = vst.msk [vmem:[%s9849_s1 + $0x26d] ss:$16 sm:$0xc] %vm3_vm0, %v2803_v0  }
 0x247   :  { %4506 = vst.msk [vmem:[%s9849_s1 + $0x2cd] ss:$16 sm:$0x30] %vm3_vm0, %v2803_v0   ;;  %4507 = vst.msk [vmem:[%s9849_s1 + $0x32d] ss:$16 sm:$0xc0] %vm3_vm0, %v2803_v0   ;;  %v3230_v26 = vpop.permute.xlu0 %3229  }
 0x248   :  { %4499 = vst.msk [vmem:[%s9849_s1 + $0xd] ss:$16 sm:$0x3] %vm3_vm0, %v2790_v1   ;;  %4500 = vst.msk [vmem:[%s9849_s1 + $0x6d] ss:$16 sm:$0xc] %vm3_vm0, %v2790_v1   ;;  %v3243_v25 = vpop.permute.xlu1 %3242  }
 0x249   :  { %4501 = vst.msk [vmem:[%s9849_s1 + $0xcd] ss:$16 sm:$0x30] %vm3_vm0, %v2790_v1   ;;  %4502 = vst.msk [vmem:[%s9849_s1 + $0x12d] ss:$16 sm:$0xc0] %vm3_vm0, %v2790_v1  }
 0x24a   :  { %4514 = vst.msk [vmem:[%s9849_s1 + $0x22d] ss:$16 sm:$0x3] %vm3_vm0, %v2829_v2   ;;  %4515 = vst.msk [vmem:[%s9849_s1 + $0x28d] ss:$16 sm:$0xc] %vm3_vm0, %v2829_v2  }
 0x24b   :  { %4516 = vst.msk [vmem:[%s9849_s1 + $0x2ed] ss:$16 sm:$0x30] %vm3_vm0, %v2829_v2   ;;  %4517 = vst.msk [vmem:[%s9849_s1 + $0x34d] ss:$16 sm:$0xc0] %vm3_vm0, %v2829_v2   ;;  %v3256_v30 = vpop.permute.xlu0 %3255  }
 0x24c   :  { %4509 = vst.msk [vmem:[%s9849_s1 + $0x2d] ss:$16 sm:$0x3] %vm3_vm0, %v2816_v4   ;;  %4510 = vst.msk [vmem:[%s9849_s1 + $0x8d] ss:$16 sm:$0xc] %vm3_vm0, %v2816_v4   ;;  %v3269_v29 = vpop.permute.xlu1 %3268  }
 0x24d   :  { %4511 = vst.msk [vmem:[%s9849_s1 + $0xed] ss:$16 sm:$0x30] %vm3_vm0, %v2816_v4   ;;  %4512 = vst.msk [vmem:[%s9849_s1 + $0x14d] ss:$16 sm:$0xc0] %vm3_vm0, %v2816_v4  }
 0x24e   :  { %4524 = vst.msk [vmem:[%s9849_s1 + $0x24d] ss:$16 sm:$0x3] %vm3_vm0, %v2855_v5   ;;  %4525 = vst.msk [vmem:[%s9849_s1 + $0x2ad] ss:$16 sm:$0xc] %vm3_vm0, %v2855_v5  }
 0x24f   :  { %4526 = vst.msk [vmem:[%s9849_s1 + $0x30d] ss:$16 sm:$0x30] %vm3_vm0, %v2855_v5   ;;  %4527 = vst.msk [vmem:[%s9849_s1 + $0x36d] ss:$16 sm:$0xc0] %vm3_vm0, %v2855_v5   ;;  %v3282_v34 = vpop.permute.xlu0 %3281  }
 0x250   :  { %4519 = vst.msk [vmem:[%s9849_s1 + $0x4d] ss:$16 sm:$0x3] %vm3_vm0, %v2842_v6   ;;  %4520 = vst.msk [vmem:[%s9849_s1 + $0xad] ss:$16 sm:$0xc] %vm3_vm0, %v2842_v6   ;;  %v3295_v33 = vpop.permute.xlu1 %3294  }
 0x251   :  { %4521 = vst.msk [vmem:[%s9849_s1 + $0x10d] ss:$16 sm:$0x30] %vm3_vm0, %v2842_v6   ;;  %4522 = vst.msk [vmem:[%s9849_s1 + $0x16d] ss:$16 sm:$0xc0] %vm3_vm0, %v2842_v6  }
 0x252   :  { %4534 = vst.msk [vmem:[%s9849_s1 + $0x26d] ss:$16 sm:$0x3] %vm3_vm0, %v2881_v8   ;;  %4535 = vst.msk [vmem:[%s9849_s1 + $0x2cd] ss:$16 sm:$0xc] %vm3_vm0, %v2881_v8  }
 0x253   :  { %4536 = vst.msk [vmem:[%s9849_s1 + $0x32d] ss:$16 sm:$0x30] %vm3_vm0, %v2881_v8   ;;  %4537 = vst.msk [vmem:[%s9849_s1 + $0x38d] ss:$16 sm:$0xc0] %vm3_vm0, %v2881_v8  }
 0x254   :  { %4529 = vst.msk [vmem:[%s9849_s1 + $0x6d] ss:$16 sm:$0x3] %vm3_vm0, %v2868_v9   ;;  %4530 = vst.msk [vmem:[%s9849_s1 + $0xcd] ss:$16 sm:$0xc] %vm3_vm0, %v2868_v9   ;;  %v3321_v41 = vpop.permute.xlu1 %3320   ;;  %v3308_v37 = vpop.permute.xlu0 %3307  }
 0x255   :  { %4531 = vst.msk [vmem:[%s9849_s1 + $0x12d] ss:$16 sm:$0x30] %vm3_vm0, %v2868_v9   ;;  %4532 = vst.msk [vmem:[%s9849_s1 + $0x18d] ss:$16 sm:$0xc0] %vm3_vm0, %v2868_v9  }
 0x256   :  { %4544 = vst.msk [vmem:[%s9849_s1 + $0x60d] ss:$16 sm:$0x3] %vm3_vm0, %v2907_v11   ;;  %4545 = vst.msk [vmem:[%s9849_s1 + $0x66d] ss:$16 sm:$0xc] %vm3_vm0, %v2907_v11  }
 0x257   :  { %4546 = vst.msk [vmem:[%s9849_s1 + $0x6cd] ss:$16 sm:$0x30] %vm3_vm0, %v2907_v11   ;;  %4547 = vst.msk [vmem:[%s9849_s1 + $0x72d] ss:$16 sm:$0xc0] %vm3_vm0, %v2907_v11  }
 0x258   :  { %4539 = vst.msk [vmem:[%s9849_s1 + $0x40d] ss:$16 sm:$0x3] %vm3_vm0, %v2894_v12   ;;  %4540 = vst.msk [vmem:[%s9849_s1 + $0x46d] ss:$16 sm:$0xc] %vm3_vm0, %v2894_v12  }
 0x259   :  { %4541 = vst.msk [vmem:[%s9849_s1 + $0x4cd] ss:$16 sm:$0x30] %vm3_vm0, %v2894_v12   ;;  %4542 = vst.msk [vmem:[%s9849_s1 + $0x52d] ss:$16 sm:$0xc0] %vm3_vm0, %v2894_v12  }
 0x25a   :  { %4554 = vst.msk [vmem:[%s9849_s1 + $0x62d] ss:$16 sm:$0x3] %vm3_vm0, %v2933_v15   ;;  %4555 = vst.msk [vmem:[%s9849_s1 + $0x68d] ss:$16 sm:$0xc] %vm3_vm0, %v2933_v15  }
 0x25b   :  { %4556 = vst.msk [vmem:[%s9849_s1 + $0x6ed] ss:$16 sm:$0x30] %vm3_vm0, %v2933_v15   ;;  %4557 = vst.msk [vmem:[%s9849_s1 + $0x74d] ss:$16 sm:$0xc0] %vm3_vm0, %v2933_v15  }
 0x25c   :  { %4549 = vst.msk [vmem:[%s9849_s1 + $0x42d] ss:$16 sm:$0x3] %vm3_vm0, %v2920_v16   ;;  %4550 = vst.msk [vmem:[%s9849_s1 + $0x48d] ss:$16 sm:$0xc] %vm3_vm0, %v2920_v16  }
 0x25d   :  { %4551 = vst.msk [vmem:[%s9849_s1 + $0x4ed] ss:$16 sm:$0x30] %vm3_vm0, %v2920_v16   ;;  %4552 = vst.msk [vmem:[%s9849_s1 + $0x54d] ss:$16 sm:$0xc0] %vm3_vm0, %v2920_v16  }
 0x25e   :  { %4564 = vst.msk [vmem:[%s9849_s1 + $0x64d] ss:$16 sm:$0x3] %vm3_vm0, %v2959_v19   ;;  %4565 = vst.msk [vmem:[%s9849_s1 + $0x6ad] ss:$16 sm:$0xc] %vm3_vm0, %v2959_v19   ;;  %v3347_v42 = vpop.permute.xlu1 %3346  }
 0x25f   :  { %4566 = vst.msk [vmem:[%s9849_s1 + $0x70d] ss:$16 sm:$0x30] %vm3_vm0, %v2959_v19   ;;  %4567 = vst.msk [vmem:[%s9849_s1 + $0x76d] ss:$16 sm:$0xc0] %vm3_vm0, %v2959_v19   ;;  %v3334_v43 = vpop.permute.xlu0 %3333  }
 0x260   :  { %4559 = vst.msk [vmem:[%s9849_s1 + $0x44d] ss:$16 sm:$0x3] %vm3_vm0, %v2946_v20   ;;  %4560 = vst.msk [vmem:[%s9849_s1 + $0x4ad] ss:$16 sm:$0xc] %vm3_vm0, %v2946_v20  }
 0x261   :  { %4561 = vst.msk [vmem:[%s9849_s1 + $0x50d] ss:$16 sm:$0x30] %vm3_vm0, %v2946_v20   ;;  %4562 = vst.msk [vmem:[%s9849_s1 + $0x56d] ss:$16 sm:$0xc0] %vm3_vm0, %v2946_v20  }
 0x262   :  { %4574 = vst.msk [vmem:[%s9849_s1 + $0x66d] ss:$16 sm:$0x3] %vm3_vm0, %v2985_v23   ;;  %4575 = vst.msk [vmem:[%s9849_s1 + $0x6cd] ss:$16 sm:$0xc] %vm3_vm0, %v2985_v23   ;;  %v3373_v44 = vpop.permute.xlu1 %3372  }
 0x263   :  { %4576 = vst.msk [vmem:[%s9849_s1 + $0x72d] ss:$16 sm:$0x30] %vm3_vm0, %v2985_v23   ;;  %4577 = vst.msk [vmem:[%s9849_s1 + $0x78d] ss:$16 sm:$0xc0] %vm3_vm0, %v2985_v23   ;;  %v3360_v45 = vpop.permute.xlu0 %3359  }
 0x264   :  { %4569 = vst.msk [vmem:[%s9849_s1 + $0x46d] ss:$16 sm:$0x3] %vm3_vm0, %v2972_v24   ;;  %4570 = vst.msk [vmem:[%s9849_s1 + $0x4cd] ss:$16 sm:$0xc] %vm3_vm0, %v2972_v24  }
 0x265   :  { %4571 = vst.msk [vmem:[%s9849_s1 + $0x52d] ss:$16 sm:$0x30] %vm3_vm0, %v2972_v24   ;;  %4572 = vst.msk [vmem:[%s9849_s1 + $0x58d] ss:$16 sm:$0xc0] %vm3_vm0, %v2972_v24  }
 0x266   :  { %4583 = vst.msk [vmem:[%s9849_s1 + $0x20e] ss:$16 sm:$0x3] %vm3_vm0, %v3010_v27   ;;  %4584 = vst.msk [vmem:[%s9849_s1 + $0x26e] ss:$16 sm:$0xc] %vm3_vm0, %v3010_v27   ;;  %v3399_v46 = vpop.permute.xlu1 %3398  }
 0x267   :  { %4585 = vst.msk [vmem:[%s9849_s1 + $0x2ce] ss:$16 sm:$0x30] %vm3_vm0, %v3010_v27   ;;  %4586 = vst.msk [vmem:[%s9849_s1 + $0x32e] ss:$16 sm:$0xc0] %vm3_vm0, %v3010_v27   ;;  %v3386_v47 = vpop.permute.xlu0 %3385  }
 0x268   :  { %4578 = vst.msk [vmem:[%s9849_s1 + $0xe] ss:$16 sm:$0x3] %vm3_vm0, %v2997_v28   ;;  %4579 = vst.msk [vmem:[%s9849_s1 + $0x6e] ss:$16 sm:$0xc] %vm3_vm0, %v2997_v28  }
 0x269   :  { %4580 = vst.msk [vmem:[%s9849_s1 + $0xce] ss:$16 sm:$0x30] %vm3_vm0, %v2997_v28   ;;  %4581 = vst.msk [vmem:[%s9849_s1 + $0x12e] ss:$16 sm:$0xc0] %vm3_vm0, %v2997_v28  }
 0x26a   :  { %4593 = vst.msk [vmem:[%s9849_s1 + $0x22e] ss:$16 sm:$0x3] %vm3_vm0, %v3036_v31   ;;  %4594 = vst.msk [vmem:[%s9849_s1 + $0x28e] ss:$16 sm:$0xc] %vm3_vm0, %v3036_v31  }
 0x26b   :  { %4595 = vst.msk [vmem:[%s9849_s1 + $0x2ee] ss:$16 sm:$0x30] %vm3_vm0, %v3036_v31   ;;  %4596 = vst.msk [vmem:[%s9849_s1 + $0x34e] ss:$16 sm:$0xc0] %vm3_vm0, %v3036_v31  }
 0x26c   :  { %4588 = vst.msk [vmem:[%s9849_s1 + $0x2e] ss:$16 sm:$0x3] %vm3_vm0, %v3023_v32   ;;  %4589 = vst.msk [vmem:[%s9849_s1 + $0x8e] ss:$16 sm:$0xc] %vm3_vm0, %v3023_v32  }
 0x26d   :  { %4590 = vst.msk [vmem:[%s9849_s1 + $0xee] ss:$16 sm:$0x30] %vm3_vm0, %v3023_v32   ;;  %4591 = vst.msk [vmem:[%s9849_s1 + $0x14e] ss:$16 sm:$0xc0] %vm3_vm0, %v3023_v32  }
 0x26e   :  { %4603 = vst.msk [vmem:[%s9849_s1 + $0x24e] ss:$16 sm:$0x3] %vm3_vm0, %v3062_v35   ;;  %4604 = vst.msk [vmem:[%s9849_s1 + $0x2ae] ss:$16 sm:$0xc] %vm3_vm0, %v3062_v35  }
 0x26f   :  { %4605 = vst.msk [vmem:[%s9849_s1 + $0x30e] ss:$16 sm:$0x30] %vm3_vm0, %v3062_v35   ;;  %4606 = vst.msk [vmem:[%s9849_s1 + $0x36e] ss:$16 sm:$0xc0] %vm3_vm0, %v3062_v35  }
 0x270   :  { %4598 = vst.msk [vmem:[%s9849_s1 + $0x4e] ss:$16 sm:$0x3] %vm3_vm0, %v3049_v36   ;;  %4599 = vst.msk [vmem:[%s9849_s1 + $0xae] ss:$16 sm:$0xc] %vm3_vm0, %v3049_v36  }
 0x271   :  { %4600 = vst.msk [vmem:[%s9849_s1 + $0x10e] ss:$16 sm:$0x30] %vm3_vm0, %v3049_v36   ;;  %4601 = vst.msk [vmem:[%s9849_s1 + $0x16e] ss:$16 sm:$0xc0] %vm3_vm0, %v3049_v36  }
 0x272   :  { %4613 = vst.msk [vmem:[%s9849_s1 + $0x26e] ss:$16 sm:$0x3] %vm3_vm0, %v3088_v38   ;;  %4614 = vst.msk [vmem:[%s9849_s1 + $0x2ce] ss:$16 sm:$0xc] %vm3_vm0, %v3088_v38  }
 0x273   :  { %4615 = vst.msk [vmem:[%s9849_s1 + $0x32e] ss:$16 sm:$0x30] %vm3_vm0, %v3088_v38   ;;  %4616 = vst.msk [vmem:[%s9849_s1 + $0x38e] ss:$16 sm:$0xc0] %vm3_vm0, %v3088_v38  }
 0x274   :  { %4608 = vst.msk [vmem:[%s9849_s1 + $0x6e] ss:$16 sm:$0x3] %vm3_vm0, %v3075_v39   ;;  %4609 = vst.msk [vmem:[%s9849_s1 + $0xce] ss:$16 sm:$0xc] %vm3_vm0, %v3075_v39  }
 0x275   :  { %4610 = vst.msk [vmem:[%s9849_s1 + $0x12e] ss:$16 sm:$0x30] %vm3_vm0, %v3075_v39   ;;  %4611 = vst.msk [vmem:[%s9849_s1 + $0x18e] ss:$16 sm:$0xc0] %vm3_vm0, %v3075_v39  }
 0x276   :  { %4623 = vst.msk [vmem:[%s9849_s1 + $0x60e] ss:$16 sm:$0x3] %vm3_vm0, %v3114_v7   ;;  %4624 = vst.msk [vmem:[%s9849_s1 + $0x66e] ss:$16 sm:$0xc] %vm3_vm0, %v3114_v7  }
 0x277   :  { %4625 = vst.msk [vmem:[%s9849_s1 + $0x6ce] ss:$16 sm:$0x30] %vm3_vm0, %v3114_v7   ;;  %4626 = vst.msk [vmem:[%s9849_s1 + $0x72e] ss:$16 sm:$0xc0] %vm3_vm0, %v3114_v7  }
 0x278   :  { %4618 = vst.msk [vmem:[%s9849_s1 + $0x40e] ss:$16 sm:$0x3] %vm3_vm0, %v3101_v40   ;;  %4619 = vst.msk [vmem:[%s9849_s1 + $0x46e] ss:$16 sm:$0xc] %vm3_vm0, %v3101_v40  }
 0x279   :  { %4620 = vst.msk [vmem:[%s9849_s1 + $0x4ce] ss:$16 sm:$0x30] %vm3_vm0, %v3101_v40   ;;  %4621 = vst.msk [vmem:[%s9849_s1 + $0x52e] ss:$16 sm:$0xc0] %vm3_vm0, %v3101_v40  }
 0x27a   :  { %4633 = vst.msk [vmem:[%s9849_s1 + $0x62e] ss:$16 sm:$0x3] %vm3_vm0, %v3140_v3   ;;  %4634 = vst.msk [vmem:[%s9849_s1 + $0x68e] ss:$16 sm:$0xc] %vm3_vm0, %v3140_v3  }
 0x27b   :  { %4635 = vst.msk [vmem:[%s9849_s1 + $0x6ee] ss:$16 sm:$0x30] %vm3_vm0, %v3140_v3   ;;  %4636 = vst.msk [vmem:[%s9849_s1 + $0x74e] ss:$16 sm:$0xc0] %vm3_vm0, %v3140_v3  }
 0x27c   :  { %4628 = vst.msk [vmem:[%s9849_s1 + $0x42e] ss:$16 sm:$0x3] %vm3_vm0, %v3127_v10   ;;  %4629 = vst.msk [vmem:[%s9849_s1 + $0x48e] ss:$16 sm:$0xc] %vm3_vm0, %v3127_v10  }
 0x27d   :  { %4630 = vst.msk [vmem:[%s9849_s1 + $0x4ee] ss:$16 sm:$0x30] %vm3_vm0, %v3127_v10   ;;  %4631 = vst.msk [vmem:[%s9849_s1 + $0x54e] ss:$16 sm:$0xc0] %vm3_vm0, %v3127_v10  }
 0x27e   :  { %4643 = vst.msk [vmem:[%s9849_s1 + $0x64e] ss:$16 sm:$0x3] %vm3_vm0, %v3166_v13   ;;  %4644 = vst.msk [vmem:[%s9849_s1 + $0x6ae] ss:$16 sm:$0xc] %vm3_vm0, %v3166_v13  }
 0x27f   :  { %4645 = vst.msk [vmem:[%s9849_s1 + $0x70e] ss:$16 sm:$0x30] %vm3_vm0, %v3166_v13   ;;  %4646 = vst.msk [vmem:[%s9849_s1 + $0x76e] ss:$16 sm:$0xc0] %vm3_vm0, %v3166_v13  }
 0x280   :  { %4638 = vst.msk [vmem:[%s9849_s1 + $0x44e] ss:$16 sm:$0x3] %vm3_vm0, %v3153_v14   ;;  %4639 = vst.msk [vmem:[%s9849_s1 + $0x4ae] ss:$16 sm:$0xc] %vm3_vm0, %v3153_v14  }
 0x281   :  { %4640 = vst.msk [vmem:[%s9849_s1 + $0x50e] ss:$16 sm:$0x30] %vm3_vm0, %v3153_v14   ;;  %4641 = vst.msk [vmem:[%s9849_s1 + $0x56e] ss:$16 sm:$0xc0] %vm3_vm0, %v3153_v14  }
 0x282   :  { %4653 = vst.msk [vmem:[%s9849_s1 + $0x66e] ss:$16 sm:$0x3] %vm3_vm0, %v3192_v17   ;;  %4654 = vst.msk [vmem:[%s9849_s1 + $0x6ce] ss:$16 sm:$0xc] %vm3_vm0, %v3192_v17  }
 0x283   :  { %4655 = vst.msk [vmem:[%s9849_s1 + $0x72e] ss:$16 sm:$0x30] %vm3_vm0, %v3192_v17   ;;  %4656 = vst.msk [vmem:[%s9849_s1 + $0x78e] ss:$16 sm:$0xc0] %vm3_vm0, %v3192_v17  }
 0x284   :  { %4648 = vst.msk [vmem:[%s9849_s1 + $0x46e] ss:$16 sm:$0x3] %vm3_vm0, %v3179_v18   ;;  %4649 = vst.msk [vmem:[%s9849_s1 + $0x4ce] ss:$16 sm:$0xc] %vm3_vm0, %v3179_v18  }
 0x285   :  { %4650 = vst.msk [vmem:[%s9849_s1 + $0x52e] ss:$16 sm:$0x30] %vm3_vm0, %v3179_v18   ;;  %4651 = vst.msk [vmem:[%s9849_s1 + $0x58e] ss:$16 sm:$0xc0] %vm3_vm0, %v3179_v18  }
 0x286   :  { %4662 = vst.msk [vmem:[%s9849_s1 + $0x20f] ss:$16 sm:$0x3] %vm3_vm0, %v3217_v21   ;;  %4663 = vst.msk [vmem:[%s9849_s1 + $0x26f] ss:$16 sm:$0xc] %vm3_vm0, %v3217_v21  }
 0x287   :  { %4664 = vst.msk [vmem:[%s9849_s1 + $0x2cf] ss:$16 sm:$0x30] %vm3_vm0, %v3217_v21   ;;  %4665 = vst.msk [vmem:[%s9849_s1 + $0x32f] ss:$16 sm:$0xc0] %vm3_vm0, %v3217_v21  }
 0x288   :  { %4657 = vst.msk [vmem:[%s9849_s1 + $0xf] ss:$16 sm:$0x3] %vm3_vm0, %v3204_v22   ;;  %4658 = vst.msk [vmem:[%s9849_s1 + $0x6f] ss:$16 sm:$0xc] %vm3_vm0, %v3204_v22  }
 0x289   :  { %4659 = vst.msk [vmem:[%s9849_s1 + $0xcf] ss:$16 sm:$0x30] %vm3_vm0, %v3204_v22   ;;  %4660 = vst.msk [vmem:[%s9849_s1 + $0x12f] ss:$16 sm:$0xc0] %vm3_vm0, %v3204_v22  }
 0x28a   :  { %4672 = vst.msk [vmem:[%s9849_s1 + $0x22f] ss:$16 sm:$0x3] %vm3_vm0, %v3243_v25   ;;  %4673 = vst.msk [vmem:[%s9849_s1 + $0x28f] ss:$16 sm:$0xc] %vm3_vm0, %v3243_v25  }
 0x28b   :  { %4674 = vst.msk [vmem:[%s9849_s1 + $0x2ef] ss:$16 sm:$0x30] %vm3_vm0, %v3243_v25   ;;  %4675 = vst.msk [vmem:[%s9849_s1 + $0x34f] ss:$16 sm:$0xc0] %vm3_vm0, %v3243_v25  }
 0x28c   :  { %4667 = vst.msk [vmem:[%s9849_s1 + $0x2f] ss:$16 sm:$0x3] %vm3_vm0, %v3230_v26   ;;  %4668 = vst.msk [vmem:[%s9849_s1 + $0x8f] ss:$16 sm:$0xc] %vm3_vm0, %v3230_v26  }
 0x28d   :  { %4669 = vst.msk [vmem:[%s9849_s1 + $0xef] ss:$16 sm:$0x30] %vm3_vm0, %v3230_v26   ;;  %4670 = vst.msk [vmem:[%s9849_s1 + $0x14f] ss:$16 sm:$0xc0] %vm3_vm0, %v3230_v26  }
 0x28e   :  { %4682 = vst.msk [vmem:[%s9849_s1 + $0x24f] ss:$16 sm:$0x3] %vm3_vm0, %v3269_v29   ;;  %4683 = vst.msk [vmem:[%s9849_s1 + $0x2af] ss:$16 sm:$0xc] %vm3_vm0, %v3269_v29  }
 0x28f   :  { %4684 = vst.msk [vmem:[%s9849_s1 + $0x30f] ss:$16 sm:$0x30] %vm3_vm0, %v3269_v29   ;;  %4685 = vst.msk [vmem:[%s9849_s1 + $0x36f] ss:$16 sm:$0xc0] %vm3_vm0, %v3269_v29  }
 0x290   :  { %4677 = vst.msk [vmem:[%s9849_s1 + $0x4f] ss:$16 sm:$0x3] %vm3_vm0, %v3256_v30   ;;  %4678 = vst.msk [vmem:[%s9849_s1 + $0xaf] ss:$16 sm:$0xc] %vm3_vm0, %v3256_v30  }
 0x291   :  { %4679 = vst.msk [vmem:[%s9849_s1 + $0x10f] ss:$16 sm:$0x30] %vm3_vm0, %v3256_v30   ;;  %4680 = vst.msk [vmem:[%s9849_s1 + $0x16f] ss:$16 sm:$0xc0] %vm3_vm0, %v3256_v30  }
 0x292   :  { %4692 = vst.msk [vmem:[%s9849_s1 + $0x26f] ss:$16 sm:$0x3] %vm3_vm0, %v3295_v33   ;;  %4693 = vst.msk [vmem:[%s9849_s1 + $0x2cf] ss:$16 sm:$0xc] %vm3_vm0, %v3295_v33  }
 0x293   :  { %4694 = vst.msk [vmem:[%s9849_s1 + $0x32f] ss:$16 sm:$0x30] %vm3_vm0, %v3295_v33   ;;  %4695 = vst.msk [vmem:[%s9849_s1 + $0x38f] ss:$16 sm:$0xc0] %vm3_vm0, %v3295_v33  }
 0x294   :  { %4687 = vst.msk [vmem:[%s9849_s1 + $0x6f] ss:$16 sm:$0x3] %vm3_vm0, %v3282_v34   ;;  %4688 = vst.msk [vmem:[%s9849_s1 + $0xcf] ss:$16 sm:$0xc] %vm3_vm0, %v3282_v34  }
 0x295   :  { %4689 = vst.msk [vmem:[%s9849_s1 + $0x12f] ss:$16 sm:$0x30] %vm3_vm0, %v3282_v34   ;;  %4690 = vst.msk [vmem:[%s9849_s1 + $0x18f] ss:$16 sm:$0xc0] %vm3_vm0, %v3282_v34  }
 0x296   :  { %4702 = vst.msk [vmem:[%s9849_s1 + $0x60f] ss:$16 sm:$0x3] %vm3_vm0, %v3321_v41   ;;  %4703 = vst.msk [vmem:[%s9849_s1 + $0x66f] ss:$16 sm:$0xc] %vm3_vm0, %v3321_v41  }
 0x297   :  { %4704 = vst.msk [vmem:[%s9849_s1 + $0x6cf] ss:$16 sm:$0x30] %vm3_vm0, %v3321_v41   ;;  %4705 = vst.msk [vmem:[%s9849_s1 + $0x72f] ss:$16 sm:$0xc0] %vm3_vm0, %v3321_v41  }
 0x298   :  { %4697 = vst.msk [vmem:[%s9849_s1 + $0x40f] ss:$16 sm:$0x3] %vm3_vm0, %v3308_v37   ;;  %4698 = vst.msk [vmem:[%s9849_s1 + $0x46f] ss:$16 sm:$0xc] %vm3_vm0, %v3308_v37  }
 0x299   :  { %4699 = vst.msk [vmem:[%s9849_s1 + $0x4cf] ss:$16 sm:$0x30] %vm3_vm0, %v3308_v37   ;;  %4700 = vst.msk [vmem:[%s9849_s1 + $0x52f] ss:$16 sm:$0xc0] %vm3_vm0, %v3308_v37  }
 0x29a   :  { %4712 = vst.msk [vmem:[%s9849_s1 + $0x62f] ss:$16 sm:$0x3] %vm3_vm0, %v3347_v42   ;;  %4713 = vst.msk [vmem:[%s9849_s1 + $0x68f] ss:$16 sm:$0xc] %vm3_vm0, %v3347_v42  }
 0x29b   :  { %4714 = vst.msk [vmem:[%s9849_s1 + $0x6ef] ss:$16 sm:$0x30] %vm3_vm0, %v3347_v42   ;;  %4715 = vst.msk [vmem:[%s9849_s1 + $0x74f] ss:$16 sm:$0xc0] %vm3_vm0, %v3347_v42  }
 0x29c   :  { %4707 = vst.msk [vmem:[%s9849_s1 + $0x42f] ss:$16 sm:$0x3] %vm3_vm0, %v3334_v43   ;;  %4708 = vst.msk [vmem:[%s9849_s1 + $0x48f] ss:$16 sm:$0xc] %vm3_vm0, %v3334_v43  }
 0x29d   :  { %4709 = vst.msk [vmem:[%s9849_s1 + $0x4ef] ss:$16 sm:$0x30] %vm3_vm0, %v3334_v43   ;;  %4710 = vst.msk [vmem:[%s9849_s1 + $0x54f] ss:$16 sm:$0xc0] %vm3_vm0, %v3334_v43  }
 0x29e   :  { %4722 = vst.msk [vmem:[%s9849_s1 + $0x64f] ss:$16 sm:$0x3] %vm3_vm0, %v3373_v44   ;;  %4723 = vst.msk [vmem:[%s9849_s1 + $0x6af] ss:$16 sm:$0xc] %vm3_vm0, %v3373_v44  }
 0x29f   :  { %4724 = vst.msk [vmem:[%s9849_s1 + $0x70f] ss:$16 sm:$0x30] %vm3_vm0, %v3373_v44   ;;  %4725 = vst.msk [vmem:[%s9849_s1 + $0x76f] ss:$16 sm:$0xc0] %vm3_vm0, %v3373_v44  }
 0x2a0   :  { %4717 = vst.msk [vmem:[%s9849_s1 + $0x44f] ss:$16 sm:$0x3] %vm3_vm0, %v3360_v45   ;;  %4718 = vst.msk [vmem:[%s9849_s1 + $0x4af] ss:$16 sm:$0xc] %vm3_vm0, %v3360_v45  }
 0x2a1   :  { %4719 = vst.msk [vmem:[%s9849_s1 + $0x50f] ss:$16 sm:$0x30] %vm3_vm0, %v3360_v45   ;;  %4720 = vst.msk [vmem:[%s9849_s1 + $0x56f] ss:$16 sm:$0xc0] %vm3_vm0, %v3360_v45  }
 0x2a2   :  { %4732 = vst.msk [vmem:[%s9849_s1 + $0x66f] ss:$16 sm:$0x3] %vm3_vm0, %v3399_v46   ;;  %4733 = vst.msk [vmem:[%s9849_s1 + $0x6cf] ss:$16 sm:$0xc] %vm3_vm0, %v3399_v46  }
 0x2a3   :  { %4734 = vst.msk [vmem:[%s9849_s1 + $0x72f] ss:$16 sm:$0x30] %vm3_vm0, %v3399_v46   ;;  %4735 = vst.msk [vmem:[%s9849_s1 + $0x78f] ss:$16 sm:$0xc0] %vm3_vm0, %v3399_v46  }
 0x2a4   :  { %4727 = vst.msk [vmem:[%s9849_s1 + $0x46f] ss:$16 sm:$0x3] %vm3_vm0, %v3386_v47   ;;  %4728 = vst.msk [vmem:[%s9849_s1 + $0x4cf] ss:$16 sm:$0xc] %vm3_vm0, %v3386_v47  }
 0x2a5   :  { %4729 = vst.msk [vmem:[%s9849_s1 + $0x52f] ss:$16 sm:$0x30] %vm3_vm0, %v3386_v47   ;;  %4730 = vst.msk [vmem:[%s9849_s1 + $0x58f] ss:$16 sm:$0xc0] %vm3_vm0, %v3386_v47  }

// kernel: double_conv_up_forward.6
= control target key start
LH: loop header
LB: loop body
LE: loop exit
PB: predicated region body
PF: predicated region fallthrough
CT: control target
= control target key end

     0   :  { %s1865_s12 = smov 0   ;;  %s1867_s13 = smov 0   ;;  %s2394_s0 = inlined_call_operand.vmem [shape: bf16[1,1024,108], index: 0, kind: input, shape index: {}]   ;;  %s2395_s1 = inlined_call_operand.vmem [shape: bf16[1,108,16], index: 1, kind: input, shape index: {}]   ;;  %s2396_s2 = inlined_call_operand.vmem [shape: f32[1,1,16], index: 2, kind: input, shape index: {}]   ;;  %s2397_s3 = inlined_call_operand.vmem [shape: f32[1,1024,16], index: 3, kind: output, shape index: {}]  }
   0x1   :  { %s1869_s14 = smov 0  }
   0x2 LB: > { %s28_s15 = sadd.s32 1, %s1838_s13  ;;  %p1544_p0 = scmp.ge.s32.totalorder %s1842_s14, 1  ;;  %s1842_s14 = sphi %s1869_s14, %s13_s14   ;;  %s1838_s13 = sphi %s1867_s13, %s2399_s13   ;;  %s1834_s12 = sphi %s1865_s12, %s2398_s12  }
   0x3   : > { %p30_p1 = scmp.ge.s32.totalorder %s28_s15, 2  ;;  %p195_p2 = scmp.lt.s32.totalorder %s1842_s14, 3 }
   0x5   : > { %s2401_s15 = smov (%p30_p1, %s28_s15), 0  ;;  %p196_p3 = pnand %p1544_p0, %p195_p2 }
   0x6   : > { %s1545_s20 = sshll.u32 (!%p196_p3), %s1834_s12, 6 }
   0x7   : > { %199 = sbr.rel (%p196_p3) target bundleno = 310 (0x136), region = 32  ;;  %p245_p4 = scmp.lt.s32.totalorder (!%p196_p3), %s1545_s20, 127 }
   0xc   : > { %v1781_v0 = vld [vmem:[%s2395_s1 + $0x30] sm:$0x3f]   ;;  %vm788_vm0 = vcmask 1045504   ;;  %v1782_v1 = vld [vmem:[%s2395_s1 + $0x28] sm:$0xff]   ;;  %v1892_v3 = vld [vmem:[%s2395_s1 + $0x20] sm:$0xff]   ;;  %s2403_s20 = smov (!%p245_p4, %s1545_s20), 127 }
   0xd   : > { %1754 = vmatprep.subr.msk.bf16.mxu0 %vm788_vm0, %v1781_v0  ;;  %1755 = vmatprep.subr.msk.bf16.mxu1 %vm788_vm0, %v1781_v0  ;;  %v790_v2 = vsel %vm788_vm0, %v1781_v0, 0  ;;  %vm283_vm1 = vcmask 130048   ;;  %v1901_v4 = vld [vmem:[%s2395_s1 + $0x18] sm:$0xff]   ;;  %s1546_s25 = sshll.u32 %s2403_s20, 2  ;;  %v1844_v5 = vmov 0.0   ;;  %vm691_vm2 = vcmask 883712  }
   0xe   : > { %1663 = vmatpush3.bf16.msra.mxu0 %v790_v2  ;;  %1747 = vmatpush3.bf16.msra.mxu1 %v790_v2  ;;  %286 = vst.msk [vmem:[#allocation2 + $0x10] sm:$0xff] %vm283_vm1, %v1844_v5  ;;  %284 = vst.msk [vmem:[#allocation2] sm:$0xff] %vm283_vm1, %v1844_v5  ;;  %s2037_s28 = scalar_lea.vmem %s2394_s0, %s1546_s25  ;;  %v1785_v8 = vld [vmem:[%s2395_s1 + $0x10] sm:$0xff]   ;;  %v1786_v9 = vld [vmem:[%s2395_s1 + $0x8] sm:$0xff]   ;;  %s1548_s8 = sshll.u32 %s2403_s20, 3 }
   0xf   : > { %1664 = vmatprep.subr.bf16.mxu0 %v1782_v1  ;;  %1741 = vmatprep.subr.bf16.mxu1 %v1782_v1  ;;  %285 = vst.msk [vmem:[#allocation2 + $0x8] sm:$0xff] %vm283_vm1, %v1844_v5  ;;  %287 = vst.msk [vmem:[#allocation2 + $0x18] sm:$0xff] %vm283_vm1, %v1844_v5  ;;  %v1788_v6 = vld [vmem:[%s2037_s28] sm:$0xff]   ;;  %v1790_v11 = vld [vmem:[%s2037_s28 + $0x8] sm:$0xff]   ;;  %s2135_s16 = scalar_lea.vmem %s2397_s3, %s1548_s8 }
  0x10   : > { %288 = vst.msk [vmem:[#allocation2 + $0x20] sm:$0xff] %vm283_vm1, %v1844_v5  ;;  %289 = vst.msk [vmem:[#allocation2 + $0x28] sm:$0xff] %vm283_vm1, %v1844_v5  ;;  %v1789_v7 = vld [vmem:[%s2037_s28 + $0x80] sm:$0xff]   ;;  %1676 = vmatprep.mubr.msk.bf16.mxu0 %vm691_vm2, %v1788_v6  ;;  %v1791_v12 = vld [vmem:[%s2037_s28 + $0x88] sm:$0xff]  }
  0x11   : > { %290 = vst.msk [vmem:[#allocation2 + $0x30] sm:$0xff] %vm283_vm1, %v1844_v5  ;;  %291 = vst.msk [vmem:[#allocation2 + $0x38] sm:$0xff] %vm283_vm1, %v1844_v5  ;;  %1708 = vmatprep.mubr.msk.bf16.mxu1 %vm691_vm2, %v1789_v7  ;;  %v1787_v10 = vld [vmem:[%s2395_s1] sm:$0xff]   ;;  %v1792_v13 = vld [vmem:[%s2037_s28 + $0x10] sm:$0xff]  }
  0x12   : > { %1665 = vmatpush3.bf16.msra.mxu0 %v1782_v1  ;;  %1748 = vmatpush3.bf16.msra.mxu1 %v1782_v1  ;;  %292 = vst.msk [vmem:[#allocation2 + $0x40] sm:$0xff] %vm283_vm1, %v1844_v5  ;;  %293 = vst.msk [vmem:[#allocation2 + $0x48] sm:$0xff] %vm283_vm1, %v1844_v5  ;;  %v1793_v14 = vld [vmem:[%s2037_s28 + $0x90] sm:$0xff]   ;;  %v1794_v15 = vld [vmem:[%s2037_s28 + $0x18] sm:$0xff]  }
  0x13   : > { %1666 = vmatprep.subr.bf16.mxu0 %v1892_v3  ;;  %1742 = vmatprep.subr.bf16.mxu1 %v1892_v3  ;;  %294 = vst.msk [vmem:[#allocation2 + $0x50] sm:$0xff] %vm283_vm1, %v1844_v5  ;;  %295 = vst.msk [vmem:[#allocation2 + $0x58] sm:$0xff] %vm283_vm1, %v1844_v5  ;;  %v1795_v16 = vld [vmem:[%s2037_s28 + $0x98] sm:$0xff]   ;;  %v1796_v17 = vld [vmem:[%s2037_s28 + $0x20] sm:$0xff]  }
  0x14   : > { %296 = vst.msk [vmem:[#allocation2 + $0x60] sm:$0xff] %vm283_vm1, %v1844_v5  ;;  %297 = vst.msk [vmem:[#allocation2 + $0x68] sm:$0xff] %vm283_vm1, %v1844_v5  ;;  %v1797_v18 = vld [vmem:[%s2037_s28 + $0xa0] sm:$0xff]   ;;  %v1798_v19 = vld [vmem:[%s2037_s28 + $0x28] sm:$0xff]  }
  0x15   : > { %298 = vst.msk [vmem:[#allocation2 + $0x70] sm:$0xff] %vm283_vm1, %v1844_v5  ;;  %299 = vst.msk [vmem:[#allocation2 + $0x78] sm:$0xff] %vm283_vm1, %v1844_v5  ;;  %v1799_v20 = vld [vmem:[%s2037_s28 + $0xa8] sm:$0xff]   ;;  %v1800_v21 = vld [vmem:[%s2037_s28 + $0x30] sm:$0xff]  }
  0x16   : > { %300 = vst.msk [vmem:[#allocation2 + $0x80] sm:$0xff] %vm283_vm1, %v1844_v5  ;;  %301 = vst.msk [vmem:[#allocation2 + $0x88] sm:$0xff] %vm283_vm1, %v1844_v5  ;;  %1667 = vmatpush3.bf16.msra.mxu0 %v1892_v3  ;;  %1749 = vmatpush3.bf16.msra.mxu1 %v1892_v3  ;;  %v1801_v22 = vld [vmem:[%s2037_s28 + $0xb0] sm:$0xff]   ;;  %v1802_v23 = vld [vmem:[%s2037_s28 + $0x38] sm:$0xff]  }
  0x17   : > { %302 = vst.msk [vmem:[#allocation2 + $0x90] sm:$0xff] %vm283_vm1, %v1844_v5  ;;  %303 = vst.msk [vmem:[#allocation2 + $0x98] sm:$0xff] %vm283_vm1, %v1844_v5  ;;  %1668 = vmatprep.subr.bf16.mxu0 %v1901_v4  ;;  %1743 = vmatprep.subr.bf16.mxu1 %v1901_v4  ;;  %v1803_v24 = vld [vmem:[%s2037_s28 + $0xb8] sm:$0xff]   ;;  %v1804_v25 = vld [vmem:[%s2037_s28 + $0x40] sm:$0xff]  }
  0x18   : > { %304 = vst.msk [vmem:[#allocation2 + $0xa0] sm:$0xff] %vm283_vm1, %v1844_v5  ;;  %305 = vst.msk [vmem:[#allocation2 + $0xa8] sm:$0xff] %vm283_vm1, %v1844_v5  ;;  %v1805_v26 = vld [vmem:[%s2037_s28 + $0xc0] sm:$0xff]   ;;  %v1806_v27 = vld [vmem:[%s2037_s28 + $0x48] sm:$0xff]  }
  0x19   : > { %306 = vst.msk [vmem:[#allocation2 + $0xb0] sm:$0xff] %vm283_vm1, %v1844_v5  ;;  %307 = vst.msk [vmem:[#allocation2 + $0xb8] sm:$0xff] %vm283_vm1, %v1844_v5  ;;  %v1807_v28 = vld [vmem:[%s2037_s28 + $0xc8] sm:$0xff]   ;;  %v1808_v29 = vld [vmem:[%s2037_s28 + $0x50] sm:$0xff]  }
  0x1a   : > { %308 = vst.msk [vmem:[#allocation2 + $0xc0] sm:$0xff] %vm283_vm1, %v1844_v5  ;;  %309 = vst.msk [vmem:[#allocation2 + $0xc8] sm:$0xff] %vm283_vm1, %v1844_v5  ;;  %1669 = vmatpush3.bf16.msra.mxu0 %v1901_v4  ;;  %1750 = vmatpush3.bf16.msra.mxu1 %v1901_v4  ;;  %v1809_v30 = vld [vmem:[%s2037_s28 + $0xd0] sm:$0xff]   ;;  %v1810_v31 = vld [vmem:[%s2037_s28 + $0x58] sm:$0xff]  }
  0x1b   : > { %310 = vst.msk [vmem:[#allocation2 + $0xd0] sm:$0xff] %vm283_vm1, %v1844_v5  ;;  %311 = vst.msk [vmem:[#allocation2 + $0xd8] sm:$0xff] %vm283_vm1, %v1844_v5  ;;  %1670 = vmatprep.subr.bf16.mxu0 %v1785_v8  ;;  %1744 = vmatprep.subr.bf16.mxu1 %v1785_v8  ;;  %v1811_v32 = vld [vmem:[%s2037_s28 + $0xd8] sm:$0xff]   ;;  %v1812_v33 = vld [vmem:[%s2037_s28 + $0x60] sm:$0xff]  }
  0x1c   : > { %312 = vst.msk [vmem:[#allocation2 + $0xe0] sm:$0xff] %vm283_vm1, %v1844_v5  ;;  %313 = vst.msk [vmem:[#allocation2 + $0xe8] sm:$0xff] %vm283_vm1, %v1844_v5  ;;  %v1813_v34 = vld [vmem:[%s2037_s28 + $0xe0] sm:$0xff]   ;;  %v1814_v35 = vld [vmem:[%s2037_s28 + $0x68] sm:$0xff]  }
  0x1d   : > { %314 = vst.msk [vmem:[#allocation2 + $0xf0] sm:$0xff] %vm283_vm1, %v1844_v5  ;;  %315 = vst.msk [vmem:[#allocation2 + $0xf8] sm:$0xff] %vm283_vm1, %v1844_v5  ;;  %v1815_v36 = vld [vmem:[%s2037_s28 + $0xe8] sm:$0xff]   ;;  %v1816_v37 = vld [vmem:[%s2037_s28 + $0x70] sm:$0xff]  }
  0x1e   : > { %316 = vst.msk [vmem:[#allocation2 + $0x100] sm:$0xff] %vm283_vm1, %v1844_v5  ;;  %317 = vst.msk [vmem:[#allocation2 + $0x108] sm:$0xff] %vm283_vm1, %v1844_v5  ;;  %1671 = vmatpush3.bf16.msra.mxu0 %v1785_v8  ;;  %1751 = vmatpush3.bf16.msra.mxu1 %v1785_v8  ;;  %v1817_v38 = vld [vmem:[%s2037_s28 + $0xf0] sm:$0xff]   ;;  %v1818_v39 = vld [vmem:[%s2037_s28 + $0x78] sm:$0xff]  }
  0x1f   : > { %318 = vst.msk [vmem:[#allocation2 + $0x110] sm:$0xff] %vm283_vm1, %v1844_v5  ;;  %319 = vst.msk [vmem:[#allocation2 + $0x118] sm:$0xff] %vm283_vm1, %v1844_v5  ;;  %1672 = vmatprep.subr.bf16.mxu0 %v1786_v9  ;;  %1745 = vmatprep.subr.bf16.mxu1 %v1786_v9  ;;  %v1819_v40 = vld [vmem:[%s2037_s28 + $0xf8] sm:$0xff]   ;;  %v350_v41 = vld [vmem:[#allocation2 + $0x10] sm:$0xff] }
  0x20   : > { %320 = vst.msk [vmem:[#allocation2 + $0x120] sm:$0xff] %vm283_vm1, %v1844_v5  ;;  %321 = vst.msk [vmem:[#allocation2 + $0x128] sm:$0xff] %vm283_vm1, %v1844_v5  ;;  %v348_v45 = vld [vmem:[#allocation2] sm:$0xff]  ;;  %v351_v51 = vld [vmem:[#allocation2 + $0x18] sm:$0xff] }
  0x21   : > { %322 = vst.msk [vmem:[#allocation2 + $0x130] sm:$0xff] %vm283_vm1, %v1844_v5  ;;  %323 = vst.msk [vmem:[#allocation2 + $0x138] sm:$0xff] %vm283_vm1, %v1844_v5  ;;  %v349_v57 = vld [vmem:[#allocation2 + $0x8] sm:$0xff]  ;;  %v354_v63 = vld [vmem:[#allocation2 + $0x30] sm:$0xff] }
  0x22   : > { %324 = vst.msk [vmem:[#allocation2 + $0x140] sm:$0xff] %vm283_vm1, %v1844_v5  ;;  %325 = vst.msk [vmem:[#allocation2 + $0x148] sm:$0xff] %vm283_vm1, %v1844_v5  ;;  %1673 = vmatpush3.bf16.msra.mxu0 %v1786_v9  ;;  %1752 = vmatpush3.bf16.msra.mxu1 %v1786_v9  ;;  %v2128_v3 = vld [vmem:[%s2396_s2] ss:$0 sm:$0xff] }
  0x23   : > { %326 = vst.msk [vmem:[#allocation2 + $0x150] sm:$0xff] %vm283_vm1, %v1844_v5  ;;  %327 = vst.msk [vmem:[#allocation2 + $0x158] sm:$0xff] %vm283_vm1, %v1844_v5  ;;  %1674 = vmatprep.subr.bf16.mxu0 %v1787_v10  ;;  %1746 = vmatprep.subr.bf16.mxu1 %v1787_v10  ;;  %v352_v6 = vld [vmem:[#allocation2 + $0x20] sm:$0xff] }
  0x24   : > { %328 = vst.msk [vmem:[#allocation2 + $0x160] sm:$0xff] %vm283_vm1, %v1844_v5  ;;  %329 = vst.msk [vmem:[#allocation2 + $0x168] sm:$0xff] %vm283_vm1, %v1844_v5 }
  0x25   : > { %330 = vst.msk [vmem:[#allocation2 + $0x170] sm:$0xff] %vm283_vm1, %v1844_v5  ;;  %331 = vst.msk [vmem:[#allocation2 + $0x178] sm:$0xff] %vm283_vm1, %v1844_v5  ;;  %v380_v46 = vld [vmem:[#allocation2 + $0x100] sm:$0xff]  ;;  %v381_v58 = vld [vmem:[#allocation2 + $0x108] sm:$0xff] }
  0x26   : > { %332 = vst.msk [vmem:[#allocation2 + $0x180] sm:$0xff] %vm283_vm1, %v1844_v5  ;;  %333 = vst.msk [vmem:[#allocation2 + $0x188] sm:$0xff] %vm283_vm1, %v1844_v5  ;;  %1675 = vmatpush3.bf16.msra.mxu0 %v1787_v10  ;;  %1753 = vmatpush3.bf16.msra.mxu1 %v1787_v10  ;;  %v382_v42 = vld [vmem:[#allocation2 + $0x110] sm:$0xff]  ;;  %v383_v52 = vld [vmem:[#allocation2 + $0x118] sm:$0xff] }
  0x27   : > { %334 = vst.msk [vmem:[#allocation2 + $0x190] sm:$0xff] %vm283_vm1, %v1844_v5  ;;  %335 = vst.msk [vmem:[#allocation2 + $0x198] sm:$0xff] %vm283_vm1, %v1844_v5  ;;  %v384_v7 = vld [vmem:[#allocation2 + $0x120] sm:$0xff]  ;;  %v355_v10 = vld [vmem:[#allocation2 + $0x38] sm:$0xff] }
  0x28   : > { %336 = vst.msk [vmem:[#allocation2 + $0x1a0] sm:$0xff] %vm283_vm1, %v1844_v5  ;;  %337 = vst.msk [vmem:[#allocation2 + $0x1a8] sm:$0xff] %vm283_vm1, %v1844_v5  ;;  %v386_v0 = vld [vmem:[#allocation2 + $0x130] sm:$0xff] }
  0x29   : > { %338 = vst.msk [vmem:[#allocation2 + $0x1b0] sm:$0xff] %vm283_vm1, %v1844_v5  ;;  %339 = vst.msk [vmem:[#allocation2 + $0x1b8] sm:$0xff] %vm283_vm1, %v1844_v5  ;;  %1677 = vmatmul.mubr.msk.bf16.vlgmr.msra.gmra.mxu0 %vm691_vm2, %v1790_v11  ;;  %1709 = vmatmul.mubr.msk.bf16.vlgmr.msra.gmra.mxu1 %vm691_vm2, %v1791_v12 }
  0x2a   : > { %340 = vst.msk [vmem:[#allocation2 + $0x1c0] sm:$0xff] %vm283_vm1, %v1844_v5  ;;  %341 = vst.msk [vmem:[#allocation2 + $0x1c8] sm:$0xff] %vm283_vm1, %v1844_v5  ;;  %1680 = vmatprep.mubr.msk.bf16.mxu0 %vm691_vm2, %v1792_v13  ;;  %1712 = vmatprep.mubr.msk.bf16.mxu1 %vm691_vm2, %v1793_v14 }
  0x2b   : > { %342 = vst.msk [vmem:[#allocation2 + $0x1d0] sm:$0xff] %vm283_vm1, %v1844_v5  ;;  %343 = vst.msk [vmem:[#allocation2 + $0x1d8] sm:$0xff] %vm283_vm1, %v1844_v5 }
  0x2c   : > { %344 = vst.msk [vmem:[#allocation2 + $0x1e0] sm:$0xff] %vm283_vm1, %v1844_v5  ;;  %345 = vst.msk [vmem:[#allocation2 + $0x1e8] sm:$0xff] %vm283_vm1, %v1844_v5 }
  0x2d   : > { %346 = vst.msk [vmem:[#allocation2 + $0x1f0] sm:$0xff] %vm283_vm1, %v1844_v5  ;;  %347 = vst.msk [vmem:[#allocation2 + $0x1f8] sm:$0xff] %vm283_vm1, %v1844_v5 }
  0x31   : > { %1681 = vmatmul.mubr.msk.bf16.gmra.mxu0 %vm691_vm2, %v1794_v15  ;;  %1713 = vmatmul.mubr.msk.bf16.gmra.mxu1 %vm691_vm2, %v1795_v16  ;;  %v387_v15 = vld [vmem:[#allocation2 + $0x138] sm:$0xff] }
  0x32   : > { %1684 = vmatprep.mubr.msk.bf16.mxu0 %vm691_vm2, %v1796_v17  ;;  %1716 = vmatprep.mubr.msk.bf16.mxu1 %vm691_vm2, %v1797_v18 }
  0x39   : > { %1685 = vmatmul.mubr.msk.bf16.gmra.mxu0 %vm691_vm2, %v1798_v19  ;;  %1717 = vmatmul.mubr.msk.bf16.gmra.mxu1 %vm691_vm2, %v1799_v20  ;;  %v353_v20 = vld [vmem:[#allocation2 + $0x28] sm:$0xff] }
  0x3a   : > { %1688 = vmatprep.mubr.msk.bf16.mxu0 %vm691_vm2, %v1800_v21  ;;  %1720 = vmatprep.mubr.msk.bf16.mxu1 %vm691_vm2, %v1801_v22 }
  0x41   : > { %1689 = vmatmul.mubr.msk.bf16.gmra.mxu0 %vm691_vm2, %v1802_v23  ;;  %1721 = vmatmul.mubr.msk.bf16.gmra.mxu1 %vm691_vm2, %v1803_v24 }
  0x42   : > { %1692 = vmatprep.mubr.msk.bf16.mxu0 %vm691_vm2, %v1804_v25  ;;  %1724 = vmatprep.mubr.msk.bf16.mxu1 %vm691_vm2, %v1805_v26  ;;  %v385_v25 = vld [vmem:[#allocation2 + $0x128] sm:$0xff] }
  0x49   : > { %1693 = vmatmul.mubr.msk.bf16.gmra.mxu0 %vm691_vm2, %v1806_v27  ;;  %1725 = vmatmul.mubr.msk.bf16.gmra.mxu1 %vm691_vm2, %v1807_v28 }
  0x4a   : > { %1696 = vmatprep.mubr.msk.bf16.mxu0 %vm691_vm2, %v1808_v29  ;;  %1728 = vmatprep.mubr.msk.bf16.mxu1 %vm691_vm2, %v1809_v30  ;;  %v358_v30 = vld [vmem:[#allocation2 + $0x50] sm:$0xff] }
  0x51   : > { %1697 = vmatmul.mubr.msk.bf16.gmra.mxu0 %vm691_vm2, %v1810_v31  ;;  %1729 = vmatmul.mubr.msk.bf16.gmra.mxu1 %vm691_vm2, %v1811_v32 }
  0x52   : > { %1700 = vmatprep.mubr.msk.bf16.mxu0 %vm691_vm2, %v1812_v33  ;;  %1732 = vmatprep.mubr.msk.bf16.mxu1 %vm691_vm2, %v1813_v34 }
  0x59   : > { %1701 = vmatmul.mubr.msk.bf16.gmra.mxu0 %vm691_vm2, %v1814_v35  ;;  %1733 = vmatmul.mubr.msk.bf16.gmra.mxu1 %vm691_vm2, %v1815_v36  ;;  %v390_v35 = vld [vmem:[#allocation2 + $0x150] sm:$0xff] }
  0x5a   : > { %1704 = vmatprep.mubr.msk.bf16.mxu0 %vm691_vm2, %v1816_v37  ;;  %1736 = vmatprep.mubr.msk.bf16.mxu1 %vm691_vm2, %v1817_v38 }
  0x61   : > { %1705 = vmatmul.mubr.msk.bf16.gmra.mxu0 %vm691_vm2, %v1818_v39  ;;  %1737 = vmatmul.mubr.msk.bf16.gmra.mxu1 %vm691_vm2, %v1819_v40  ;;  %v356_v40 = vld [vmem:[#allocation2 + $0x40] sm:$0xff] }
  0xe9   : > { %v1678_v43 = vpop.f32.mrf.mxu0  ;;  %v1710_v44 = vpop.f32.mrf.mxu1 }
  0xea   : > { %v1083_v47 = vadd.f32 %v1678_v43, %v350_v41  ;;  %v1115_v48 = vadd.f32 %v1710_v44, %v382_v42 }
  0xeb   : > { %v826_v49 = vpop.f32.mrf.mxu0  ;;  %v954_v50 = vpop.f32.mrf.mxu1 }
  0xec   : > { %1148 = vst.msk [vmem:[#allocation2 + $0x10] sm:$0xff] %vm283_vm1, %v1083_v47  ;;  %1180 = vst.msk [vmem:[#allocation2 + $0x110] sm:$0xff] %vm283_vm1, %v1115_v48  ;;  %v1081_v53 = vadd.f32 %v826_v49, %v348_v45  ;;  %v1113_v54 = vadd.f32 %v954_v50, %v380_v46  ;;  %v388_v45 = vld [vmem:[#allocation2 + $0x140] sm:$0xff]  ;;  %v359_v50 = vld [vmem:[#allocation2 + $0x58] sm:$0xff] }
  0xed   : > { %v1679_v55 = vpop.f32.mrf.mxu0  ;;  %v1711_v56 = vpop.f32.mrf.mxu1 }
  0xee   : > { %1146 = vst.msk [vmem:[#allocation2] sm:$0xff] %vm283_vm1, %v1081_v53  ;;  %1178 = vst.msk [vmem:[#allocation2 + $0x100] sm:$0xff] %vm283_vm1, %v1113_v54  ;;  %v1084_v59 = vadd.f32 %v1679_v55, %v351_v51  ;;  %v1116_v60 = vadd.f32 %v1711_v56, %v383_v52  ;;  %v391_v55 = vld [vmem:[#allocation2 + $0x158] sm:$0xff] }
  0xef   : > { %v829_v61 = vpop.f32.mrf.mxu0  ;;  %v957_v62 = vpop.f32.mrf.mxu1 }
  0xf0   : > { %1149 = vst.msk [vmem:[#allocation2 + $0x18] sm:$0xff] %vm283_vm1, %v1084_v59  ;;  %1181 = vst.msk [vmem:[#allocation2 + $0x118] sm:$0xff] %vm283_vm1, %v1116_v60  ;;  %v1082_v1 = vadd.f32 %v829_v61, %v349_v57  ;;  %v1114_v2 = vadd.f32 %v957_v62, %v381_v58  ;;  %v357_v60 = vld [vmem:[#allocation2 + $0x48] sm:$0xff] }
  0xf1   : > { %v1682_v4 = vpop.f32.mrf.mxu0  ;;  %v1714_v5 = vpop.f32.mrf.mxu1 }
  0xf2   : > { %1147 = vst.msk [vmem:[#allocation2 + $0x8] sm:$0xff] %vm283_vm1, %v1082_v1  ;;  %1179 = vst.msk [vmem:[#allocation2 + $0x108] sm:$0xff] %vm283_vm1, %v1114_v2  ;;  %v1087_v8 = vadd.f32 %v1682_v4, %v354_v63  ;;  %v1119_v9 = vadd.f32 %v1714_v5, %v386_v0  ;;  %v389_v1 = vld [vmem:[#allocation2 + $0x148] sm:$0xff] }
  0xf3   : > { %v1215_v11 = vld [vmem:[#allocation2 + $0x10] sm:$0xff]  ;;  %v842_v13 = vpop.f32.mrf.mxu0  ;;  %v970_v14 = vpop.f32.mrf.mxu1 }
  0xf4   : > { %v1247_v12 = vld [vmem:[#allocation2 + $0x110] sm:$0xff]  ;;  %v1286_v16 = vadd.f32 %v2128_v3, %v1215_v11  ;;  %1152 = vst.msk [vmem:[#allocation2 + $0x30] sm:$0xff] %vm283_vm1, %v1087_v8  ;;  %1184 = vst.msk [vmem:[#allocation2 + $0x130] sm:$0xff] %vm283_vm1, %v1119_v9  ;;  %v1085_v18 = vadd.f32 %v842_v13, %v352_v6  ;;  %v1117_v19 = vadd.f32 %v970_v14, %v384_v7 }
  0xf5   : > { %v1318_v17 = vadd.f32 %v2128_v3, %v1247_v12  ;;  %v1213_v21 = vld [vmem:[#allocation2] sm:$0xff]  ;;  %v1683_v23 = vpop.f32.mrf.mxu0  ;;  %v1715_v24 = vpop.f32.mrf.mxu1  ;;  %v362_v7 = vld [vmem:[#allocation2 + $0x70] sm:$0xff] }
  0xf6   : > { %v1245_v22 = vld [vmem:[#allocation2 + $0x100] sm:$0xff]  ;;  %1350 = vst.msk [vmem:[%s2135_s16 + $0x10] sm:$0xff] %vm283_vm1, %v1286_v16  ;;  %v1284_v26 = vadd.f32 %v2128_v3, %v1213_v21  ;;  %1150 = vst.msk [vmem:[#allocation2 + $0x20] sm:$0xff] %vm283_vm1, %v1085_v18  ;;  %v1088_v28 = vadd.f32 %v1683_v23, %v355_v10  ;;  %v1120_v29 = vadd.f32 %v1715_v24, %v387_v15  ;;  %v394_v12 = vld [vmem:[#allocation2 + $0x170] sm:$0xff] }
  0xf7   : > { %1382 = vst.msk [vmem:[%s2135_s16 + $0x110] sm:$0xff] %vm283_vm1, %v1318_v17  ;;  %v1316_v27 = vadd.f32 %v2128_v3, %v1245_v22  ;;  %1182 = vst.msk [vmem:[#allocation2 + $0x120] sm:$0xff] %vm283_vm1, %v1117_v19  ;;  %v1216_v31 = vld [vmem:[#allocation2 + $0x18] sm:$0xff]  ;;  %v845_v33 = vpop.f32.mrf.mxu0  ;;  %v973_v34 = vpop.f32.mrf.mxu1  ;;  %v360_v17 = vld [vmem:[#allocation2 + $0x60] sm:$0xff] }
  0xf8   : > { %v1248_v32 = vld [vmem:[#allocation2 + $0x118] sm:$0xff]  ;;  %1348 = vst.msk [vmem:[%s2135_s16] sm:$0xff] %vm283_vm1, %v1284_v26  ;;  %v1287_v36 = vadd.f32 %v2128_v3, %v1216_v31  ;;  %1153 = vst.msk [vmem:[#allocation2 + $0x38] sm:$0xff] %vm283_vm1, %v1088_v28  ;;  %v1086_v38 = vadd.f32 %v845_v33, %v353_v20  ;;  %v1118_v39 = vadd.f32 %v973_v34, %v385_v25  ;;  %v392_v22 = vld [vmem:[#allocation2 + $0x160] sm:$0xff] }
  0xf9   : > { %1380 = vst.msk [vmem:[%s2135_s16 + $0x100] sm:$0xff] %vm283_vm1, %v1316_v27  ;;  %v1319_v37 = vadd.f32 %v2128_v3, %v1248_v32  ;;  %1185 = vst.msk [vmem:[#allocation2 + $0x138] sm:$0xff] %vm283_vm1, %v1120_v29  ;;  %v1214_v41 = vld [vmem:[#allocation2 + $0x8] sm:$0xff]  ;;  %v1686_v43 = vpop.f32.mrf.mxu0  ;;  %v1718_v44 = vpop.f32.mrf.mxu1  ;;  %v363_v27 = vld [vmem:[#allocation2 + $0x78] sm:$0xff] }
  0xfa   : > { %v1246_v42 = vld [vmem:[#allocation2 + $0x108] sm:$0xff]  ;;  %1351 = vst.msk [vmem:[%s2135_s16 + $0x18] sm:$0xff] %vm283_vm1, %v1287_v36  ;;  %v1285_v46 = vadd.f32 %v2128_v3, %v1214_v41  ;;  %1151 = vst.msk [vmem:[#allocation2 + $0x28] sm:$0xff] %vm283_vm1, %v1086_v38  ;;  %v1091_v48 = vadd.f32 %v1686_v43, %v358_v30  ;;  %v1123_v49 = vadd.f32 %v1718_v44, %v390_v35  ;;  %v395_v32 = vld [vmem:[#allocation2 + $0x178] sm:$0xff] }
  0xfb   : > { %1383 = vst.msk [vmem:[%s2135_s16 + $0x118] sm:$0xff] %vm283_vm1, %v1319_v37  ;;  %v1317_v47 = vadd.f32 %v2128_v3, %v1246_v42  ;;  %1183 = vst.msk [vmem:[#allocation2 + $0x128] sm:$0xff] %vm283_vm1, %v1118_v39  ;;  %v1219_v51 = vld [vmem:[#allocation2 + $0x30] sm:$0xff]  ;;  %v858_v53 = vpop.f32.mrf.mxu0  ;;  %v986_v54 = vpop.f32.mrf.mxu1  ;;  %v361_v37 = vld [vmem:[#allocation2 + $0x68] sm:$0xff] }
  0xfc   : > { %v1251_v52 = vld [vmem:[#allocation2 + $0x130] sm:$0xff]  ;;  %1349 = vst.msk [vmem:[%s2135_s16 + $0x8] sm:$0xff] %vm283_vm1, %v1285_v46  ;;  %v1290_v56 = vadd.f32 %v2128_v3, %v1219_v51  ;;  %1156 = vst.msk [vmem:[#allocation2 + $0x50] sm:$0xff] %vm283_vm1, %v1091_v48  ;;  %v1089_v58 = vadd.f32 %v858_v53, %v356_v40  ;;  %v1121_v59 = vadd.f32 %v986_v54, %v388_v45  ;;  %v393_v42 = vld [vmem:[#allocation2 + $0x168] sm:$0xff] }
  0xfd   : > { %1381 = vst.msk [vmem:[%s2135_s16 + $0x108] sm:$0xff] %vm283_vm1, %v1317_v47  ;;  %v1322_v57 = vadd.f32 %v2128_v3, %v1251_v52  ;;  %1188 = vst.msk [vmem:[#allocation2 + $0x150] sm:$0xff] %vm283_vm1, %v1123_v49  ;;  %v1217_v61 = vld [vmem:[#allocation2 + $0x20] sm:$0xff]  ;;  %v1687_v63 = vpop.f32.mrf.mxu0  ;;  %v1719_v0 = vpop.f32.mrf.mxu1  ;;  %v366_v47 = vld [vmem:[#allocation2 + $0x90] sm:$0xff] }
  0xfe   : > { %v1249_v62 = vld [vmem:[#allocation2 + $0x120] sm:$0xff]  ;;  %1354 = vst.msk [vmem:[%s2135_s16 + $0x30] sm:$0xff] %vm283_vm1, %v1290_v56  ;;  %v1288_v2 = vadd.f32 %v2128_v3, %v1217_v61  ;;  %1154 = vst.msk [vmem:[#allocation2 + $0x40] sm:$0xff] %vm283_vm1, %v1089_v58  ;;  %v1092_v5 = vadd.f32 %v1687_v63, %v359_v50  ;;  %v1124_v6 = vadd.f32 %v1719_v0, %v391_v55  ;;  %v398_v52 = vld [vmem:[#allocation2 + $0x190] sm:$0xff] }
  0xff   : > { %1386 = vst.msk [vmem:[%s2135_s16 + $0x130] sm:$0xff] %vm283_vm1, %v1322_v57  ;;  %v1320_v4 = vadd.f32 %v2128_v3, %v1249_v62  ;;  %1186 = vst.msk [vmem:[#allocation2 + $0x140] sm:$0xff] %vm283_vm1, %v1121_v59  ;;  %v1220_v8 = vld [vmem:[#allocation2 + $0x38] sm:$0xff]  ;;  %v861_v10 = vpop.f32.mrf.mxu0  ;;  %v989_v11 = vpop.f32.mrf.mxu1  ;;  %v364_v57 = vld [vmem:[#allocation2 + $0x80] sm:$0xff] }
 0x100   : > { %v1252_v9 = vld [vmem:[#allocation2 + $0x138] sm:$0xff]  ;;  %1352 = vst.msk [vmem:[%s2135_s16 + $0x20] sm:$0xff] %vm283_vm1, %v1288_v2  ;;  %v1291_v13 = vadd.f32 %v2128_v3, %v1220_v8  ;;  %1157 = vst.msk [vmem:[#allocation2 + $0x58] sm:$0xff] %vm283_vm1, %v1092_v5  ;;  %v1090_v15 = vadd.f32 %v861_v10, %v357_v60  ;;  %v1122_v16 = vadd.f32 %v989_v11, %v389_v1  ;;  %v396_v62 = vld [vmem:[#allocation2 + $0x180] sm:$0xff] }
 0x101   : > { %1384 = vst.msk [vmem:[%s2135_s16 + $0x120] sm:$0xff] %vm283_vm1, %v1320_v4  ;;  %v1323_v14 = vadd.f32 %v2128_v3, %v1252_v9  ;;  %1189 = vst.msk [vmem:[#allocation2 + $0x158] sm:$0xff] %vm283_vm1, %v1124_v6  ;;  %v1218_v18 = vld [vmem:[#allocation2 + $0x28] sm:$0xff]  ;;  %v1690_v20 = vpop.f32.mrf.mxu0  ;;  %v1722_v21 = vpop.f32.mrf.mxu1  ;;  %v367_v4 = vld [vmem:[#allocation2 + $0x98] sm:$0xff] }
 0x102   : > { %v1250_v19 = vld [vmem:[#allocation2 + $0x128] sm:$0xff]  ;;  %1355 = vst.msk [vmem:[%s2135_s16 + $0x38] sm:$0xff] %vm283_vm1, %v1291_v13  ;;  %v1289_v23 = vadd.f32 %v2128_v3, %v1218_v18  ;;  %1155 = vst.msk [vmem:[#allocation2 + $0x48] sm:$0xff] %vm283_vm1, %v1090_v15  ;;  %v1095_v25 = vadd.f32 %v1690_v20, %v362_v7  ;;  %v1127_v26 = vadd.f32 %v1722_v21, %v394_v12  ;;  %v399_v9 = vld [vmem:[#allocation2 + $0x198] sm:$0xff] }
 0x103   : > { %1387 = vst.msk [vmem:[%s2135_s16 + $0x138] sm:$0xff] %vm283_vm1, %v1323_v14  ;;  %v1321_v24 = vadd.f32 %v2128_v3, %v1250_v19  ;;  %1187 = vst.msk [vmem:[#allocation2 + $0x148] sm:$0xff] %vm283_vm1, %v1122_v16  ;;  %v1223_v28 = vld [vmem:[#allocation2 + $0x50] sm:$0xff]  ;;  %v874_v30 = vpop.f32.mrf.mxu0  ;;  %v1002_v31 = vpop.f32.mrf.mxu1  ;;  %v365_v14 = vld [vmem:[#allocation2 + $0x88] sm:$0xff] }
 0x104   : > { %v1255_v29 = vld [vmem:[#allocation2 + $0x150] sm:$0xff]  ;;  %1353 = vst.msk [vmem:[%s2135_s16 + $0x28] sm:$0xff] %vm283_vm1, %v1289_v23  ;;  %v1294_v33 = vadd.f32 %v2128_v3, %v1223_v28  ;;  %1160 = vst.msk [vmem:[#allocation2 + $0x70] sm:$0xff] %vm283_vm1, %v1095_v25  ;;  %v1093_v35 = vadd.f32 %v874_v30, %v360_v17  ;;  %v1125_v36 = vadd.f32 %v1002_v31, %v392_v22  ;;  %v397_v19 = vld [vmem:[#allocation2 + $0x188] sm:$0xff] }
 0x105   : > { %1385 = vst.msk [vmem:[%s2135_s16 + $0x128] sm:$0xff] %vm283_vm1, %v1321_v24  ;;  %v1326_v34 = vadd.f32 %v2128_v3, %v1255_v29  ;;  %1192 = vst.msk [vmem:[#allocation2 + $0x170] sm:$0xff] %vm283_vm1, %v1127_v26  ;;  %v1221_v38 = vld [vmem:[#allocation2 + $0x40] sm:$0xff]  ;;  %v1691_v40 = vpop.f32.mrf.mxu0  ;;  %v1723_v41 = vpop.f32.mrf.mxu1  ;;  %v370_v24 = vld [vmem:[#allocation2 + $0xb0] sm:$0xff] }
 0x106   : > { %v1253_v39 = vld [vmem:[#allocation2 + $0x140] sm:$0xff]  ;;  %1358 = vst.msk [vmem:[%s2135_s16 + $0x50] sm:$0xff] %vm283_vm1, %v1294_v33  ;;  %v1292_v43 = vadd.f32 %v2128_v3, %v1221_v38  ;;  %1158 = vst.msk [vmem:[#allocation2 + $0x60] sm:$0xff] %vm283_vm1, %v1093_v35  ;;  %v1096_v45 = vadd.f32 %v1691_v40, %v363_v27  ;;  %v1128_v46 = vadd.f32 %v1723_v41, %v395_v32  ;;  %v402_v29 = vld [vmem:[#allocation2 + $0x1b0] sm:$0xff] }
 0x107   : > { %1390 = vst.msk [vmem:[%s2135_s16 + $0x150] sm:$0xff] %vm283_vm1, %v1326_v34  ;;  %v1324_v44 = vadd.f32 %v2128_v3, %v1253_v39  ;;  %1190 = vst.msk [vmem:[#allocation2 + $0x160] sm:$0xff] %vm283_vm1, %v1125_v36  ;;  %v1224_v48 = vld [vmem:[#allocation2 + $0x58] sm:$0xff]  ;;  %v877_v50 = vpop.f32.mrf.mxu0  ;;  %v1005_v51 = vpop.f32.mrf.mxu1  ;;  %v368_v34 = vld [vmem:[#allocation2 + $0xa0] sm:$0xff] }
 0x108   : > { %v1256_v49 = vld [vmem:[#allocation2 + $0x158] sm:$0xff]  ;;  %1356 = vst.msk [vmem:[%s2135_s16 + $0x40] sm:$0xff] %vm283_vm1, %v1292_v43  ;;  %v1295_v53 = vadd.f32 %v2128_v3, %v1224_v48  ;;  %1161 = vst.msk [vmem:[#allocation2 + $0x78] sm:$0xff] %vm283_vm1, %v1096_v45  ;;  %v1094_v55 = vadd.f32 %v877_v50, %v361_v37  ;;  %v1126_v56 = vadd.f32 %v1005_v51, %v393_v42  ;;  %v400_v39 = vld [vmem:[#allocation2 + $0x1a0] sm:$0xff] }
 0x109   : > { %1388 = vst.msk [vmem:[%s2135_s16 + $0x140] sm:$0xff] %vm283_vm1, %v1324_v44  ;;  %v1327_v54 = vadd.f32 %v2128_v3, %v1256_v49  ;;  %1193 = vst.msk [vmem:[#allocation2 + $0x178] sm:$0xff] %vm283_vm1, %v1128_v46  ;;  %v1222_v58 = vld [vmem:[#allocation2 + $0x48] sm:$0xff]  ;;  %v1694_v60 = vpop.f32.mrf.mxu0  ;;  %v1726_v61 = vpop.f32.mrf.mxu1  ;;  %v371_v44 = vld [vmem:[#allocation2 + $0xb8] sm:$0xff] }
 0x10a   : > { %v1254_v59 = vld [vmem:[#allocation2 + $0x148] sm:$0xff]  ;;  %1359 = vst.msk [vmem:[%s2135_s16 + $0x58] sm:$0xff] %vm283_vm1, %v1295_v53  ;;  %v1293_v63 = vadd.f32 %v2128_v3, %v1222_v58  ;;  %1159 = vst.msk [vmem:[#allocation2 + $0x68] sm:$0xff] %vm283_vm1, %v1094_v55  ;;  %v1099_v1 = vadd.f32 %v1694_v60, %v366_v47  ;;  %v1131_v2 = vadd.f32 %v1726_v61, %v398_v52  ;;  %v403_v49 = vld [vmem:[#allocation2 + $0x1b8] sm:$0xff] }
 0x10b   : > { %1391 = vst.msk [vmem:[%s2135_s16 + $0x158] sm:$0xff] %vm283_vm1, %v1327_v54  ;;  %v1325_v0 = vadd.f32 %v2128_v3, %v1254_v59  ;;  %1191 = vst.msk [vmem:[#allocation2 + $0x168] sm:$0xff] %vm283_vm1, %v1126_v56  ;;  %v1227_v5 = vld [vmem:[#allocation2 + $0x70] sm:$0xff]  ;;  %v890_v7 = vpop.f32.mrf.mxu0  ;;  %v1018_v8 = vpop.f32.mrf.mxu1  ;;  %v369_v54 = vld [vmem:[#allocation2 + $0xa8] sm:$0xff] }
 0x10c   : > { %v1259_v6 = vld [vmem:[#allocation2 + $0x170] sm:$0xff]  ;;  %1357 = vst.msk [vmem:[%s2135_s16 + $0x48] sm:$0xff] %vm283_vm1, %v1293_v63  ;;  %v1298_v10 = vadd.f32 %v2128_v3, %v1227_v5  ;;  %1164 = vst.msk [vmem:[#allocation2 + $0x90] sm:$0xff] %vm283_vm1, %v1099_v1  ;;  %v1097_v12 = vadd.f32 %v890_v7, %v364_v57  ;;  %v1129_v13 = vadd.f32 %v1018_v8, %v396_v62  ;;  %v401_v59 = vld [vmem:[#allocation2 + $0x1a8] sm:$0xff] }
 0x10d   : > { %1389 = vst.msk [vmem:[%s2135_s16 + $0x148] sm:$0xff] %vm283_vm1, %v1325_v0  ;;  %v1330_v11 = vadd.f32 %v2128_v3, %v1259_v6  ;;  %1196 = vst.msk [vmem:[#allocation2 + $0x190] sm:$0xff] %vm283_vm1, %v1131_v2  ;;  %v1225_v15 = vld [vmem:[#allocation2 + $0x60] sm:$0xff]  ;;  %v1695_v17 = vpop.f32.mrf.mxu0  ;;  %v1727_v18 = vpop.f32.mrf.mxu1  ;;  %v374_v0 = vld [vmem:[#allocation2 + $0xd0] sm:$0xff] }
 0x10e   : > { %v1257_v16 = vld [vmem:[#allocation2 + $0x160] sm:$0xff]  ;;  %1362 = vst.msk [vmem:[%s2135_s16 + $0x70] sm:$0xff] %vm283_vm1, %v1298_v10  ;;  %v1296_v20 = vadd.f32 %v2128_v3, %v1225_v15  ;;  %1162 = vst.msk [vmem:[#allocation2 + $0x80] sm:$0xff] %vm283_vm1, %v1097_v12  ;;  %v1100_v22 = vadd.f32 %v1695_v17, %v367_v4  ;;  %v1132_v23 = vadd.f32 %v1727_v18, %v399_v9  ;;  %v406_v6 = vld [vmem:[#allocation2 + $0x1d0] sm:$0xff] }
 0x10f   : > { %1394 = vst.msk [vmem:[%s2135_s16 + $0x170] sm:$0xff] %vm283_vm1, %v1330_v11  ;;  %v1328_v21 = vadd.f32 %v2128_v3, %v1257_v16  ;;  %1194 = vst.msk [vmem:[#allocation2 + $0x180] sm:$0xff] %vm283_vm1, %v1129_v13  ;;  %v1228_v25 = vld [vmem:[#allocation2 + $0x78] sm:$0xff]  ;;  %v893_v27 = vpop.f32.mrf.mxu0  ;;  %v1021_v28 = vpop.f32.mrf.mxu1  ;;  %v372_v11 = vld [vmem:[#allocation2 + $0xc0] sm:$0xff] }
 0x110   : > { %v1260_v26 = vld [vmem:[#allocation2 + $0x178] sm:$0xff]  ;;  %1360 = vst.msk [vmem:[%s2135_s16 + $0x60] sm:$0xff] %vm283_vm1, %v1296_v20  ;;  %v1299_v30 = vadd.f32 %v2128_v3, %v1228_v25  ;;  %1165 = vst.msk [vmem:[#allocation2 + $0x98] sm:$0xff] %vm283_vm1, %v1100_v22  ;;  %v1098_v32 = vadd.f32 %v893_v27, %v365_v14  ;;  %v1130_v33 = vadd.f32 %v1021_v28, %v397_v19  ;;  %v404_v16 = vld [vmem:[#allocation2 + $0x1c0] sm:$0xff] }
 0x111   : > { %1392 = vst.msk [vmem:[%s2135_s16 + $0x160] sm:$0xff] %vm283_vm1, %v1328_v21  ;;  %v1331_v31 = vadd.f32 %v2128_v3, %v1260_v26  ;;  %1197 = vst.msk [vmem:[#allocation2 + $0x198] sm:$0xff] %vm283_vm1, %v1132_v23  ;;  %v1226_v35 = vld [vmem:[#allocation2 + $0x68] sm:$0xff]  ;;  %v1698_v37 = vpop.f32.mrf.mxu0  ;;  %v1730_v38 = vpop.f32.mrf.mxu1  ;;  %v375_v21 = vld [vmem:[#allocation2 + $0xd8] sm:$0xff] }
 0x112   : > { %v1258_v36 = vld [vmem:[#allocation2 + $0x168] sm:$0xff]  ;;  %1363 = vst.msk [vmem:[%s2135_s16 + $0x78] sm:$0xff] %vm283_vm1, %v1299_v30  ;;  %v1297_v40 = vadd.f32 %v2128_v3, %v1226_v35  ;;  %1163 = vst.msk [vmem:[#allocation2 + $0x88] sm:$0xff] %vm283_vm1, %v1098_v32  ;;  %v1103_v42 = vadd.f32 %v1698_v37, %v370_v24  ;;  %v1135_v43 = vadd.f32 %v1730_v38, %v402_v29  ;;  %v407_v26 = vld [vmem:[#allocation2 + $0x1d8] sm:$0xff] }
 0x113   : > { %1395 = vst.msk [vmem:[%s2135_s16 + $0x178] sm:$0xff] %vm283_vm1, %v1331_v31  ;;  %v1329_v41 = vadd.f32 %v2128_v3, %v1258_v36  ;;  %1195 = vst.msk [vmem:[#allocation2 + $0x188] sm:$0xff] %vm283_vm1, %v1130_v33  ;;  %v1231_v45 = vld [vmem:[#allocation2 + $0x90] sm:$0xff]  ;;  %v906_v47 = vpop.f32.mrf.mxu0  ;;  %v1034_v48 = vpop.f32.mrf.mxu1  ;;  %v373_v31 = vld [vmem:[#allocation2 + $0xc8] sm:$0xff] }
 0x114   : > { %v1263_v46 = vld [vmem:[#allocation2 + $0x190] sm:$0xff]  ;;  %1361 = vst.msk [vmem:[%s2135_s16 + $0x68] sm:$0xff] %vm283_vm1, %v1297_v40  ;;  %v1302_v50 = vadd.f32 %v2128_v3, %v1231_v45  ;;  %1168 = vst.msk [vmem:[#allocation2 + $0xb0] sm:$0xff] %vm283_vm1, %v1103_v42  ;;  %v1101_v52 = vadd.f32 %v906_v47, %v368_v34  ;;  %v1133_v53 = vadd.f32 %v1034_v48, %v400_v39  ;;  %v405_v36 = vld [vmem:[#allocation2 + $0x1c8] sm:$0xff] }
 0x115   : > { %1393 = vst.msk [vmem:[%s2135_s16 + $0x168] sm:$0xff] %vm283_vm1, %v1329_v41  ;;  %v1334_v51 = vadd.f32 %v2128_v3, %v1263_v46  ;;  %1200 = vst.msk [vmem:[#allocation2 + $0x1b0] sm:$0xff] %vm283_vm1, %v1135_v43  ;;  %v1229_v55 = vld [vmem:[#allocation2 + $0x80] sm:$0xff]  ;;  %v1699_v57 = vpop.f32.mrf.mxu0  ;;  %v1731_v58 = vpop.f32.mrf.mxu1  ;;  %v378_v41 = vld [vmem:[#allocation2 + $0xf0] sm:$0xff] }
 0x116   : > { %v1261_v56 = vld [vmem:[#allocation2 + $0x180] sm:$0xff]  ;;  %1366 = vst.msk [vmem:[%s2135_s16 + $0x90] sm:$0xff] %vm283_vm1, %v1302_v50  ;;  %v1300_v60 = vadd.f32 %v2128_v3, %v1229_v55  ;;  %1166 = vst.msk [vmem:[#allocation2 + $0xa0] sm:$0xff] %vm283_vm1, %v1101_v52  ;;  %v1104_v62 = vadd.f32 %v1699_v57, %v371_v44  ;;  %v1136_v63 = vadd.f32 %v1731_v58, %v403_v49  ;;  %v410_v46 = vld [vmem:[#allocation2 + $0x1f0] sm:$0xff] }
 0x117   : > { %1398 = vst.msk [vmem:[%s2135_s16 + $0x190] sm:$0xff] %vm283_vm1, %v1334_v51  ;;  %v1332_v61 = vadd.f32 %v2128_v3, %v1261_v56  ;;  %1198 = vst.msk [vmem:[#allocation2 + $0x1a0] sm:$0xff] %vm283_vm1, %v1133_v53  ;;  %v1232_v1 = vld [vmem:[#allocation2 + $0x98] sm:$0xff]  ;;  %v909_v4 = vpop.f32.mrf.mxu0  ;;  %v1037_v5 = vpop.f32.mrf.mxu1  ;;  %v376_v51 = vld [vmem:[#allocation2 + $0xe0] sm:$0xff] }
 0x118   : > { %v1264_v2 = vld [vmem:[#allocation2 + $0x198] sm:$0xff]  ;;  %1364 = vst.msk [vmem:[%s2135_s16 + $0x80] sm:$0xff] %vm283_vm1, %v1300_v60  ;;  %v1303_v7 = vadd.f32 %v2128_v3, %v1232_v1  ;;  %1169 = vst.msk [vmem:[#allocation2 + $0xb8] sm:$0xff] %vm283_vm1, %v1104_v62  ;;  %v1102_v9 = vadd.f32 %v909_v4, %v369_v54  ;;  %v1134_v10 = vadd.f32 %v1037_v5, %v401_v59  ;;  %v408_v56 = vld [vmem:[#allocation2 + $0x1e0] sm:$0xff] }
 0x119   : > { %1396 = vst.msk [vmem:[%s2135_s16 + $0x180] sm:$0xff] %vm283_vm1, %v1332_v61  ;;  %v1335_v8 = vadd.f32 %v2128_v3, %v1264_v2  ;;  %1201 = vst.msk [vmem:[#allocation2 + $0x1b8] sm:$0xff] %vm283_vm1, %v1136_v63  ;;  %v1230_v12 = vld [vmem:[#allocation2 + $0x88] sm:$0xff]  ;;  %v1702_v14 = vpop.f32.mrf.mxu0  ;;  %v1734_v15 = vpop.f32.mrf.mxu1  ;;  %v379_v61 = vld [vmem:[#allocation2 + $0xf8] sm:$0xff] }
 0x11a   : > { %v1262_v13 = vld [vmem:[#allocation2 + $0x188] sm:$0xff]  ;;  %1367 = vst.msk [vmem:[%s2135_s16 + $0x98] sm:$0xff] %vm283_vm1, %v1303_v7  ;;  %v1301_v17 = vadd.f32 %v2128_v3, %v1230_v12  ;;  %1167 = vst.msk [vmem:[#allocation2 + $0xa8] sm:$0xff] %vm283_vm1, %v1102_v9  ;;  %v1107_v19 = vadd.f32 %v1702_v14, %v374_v0  ;;  %v1139_v20 = vadd.f32 %v1734_v15, %v406_v6  ;;  %v411_v2 = vld [vmem:[#allocation2 + $0x1f8] sm:$0xff] }
 0x11b   : > { %1399 = vst.msk [vmem:[%s2135_s16 + $0x198] sm:$0xff] %vm283_vm1, %v1335_v8  ;;  %v1333_v18 = vadd.f32 %v2128_v3, %v1262_v13  ;;  %1199 = vst.msk [vmem:[#allocation2 + $0x1a8] sm:$0xff] %vm283_vm1, %v1134_v10  ;;  %v1235_v22 = vld [vmem:[#allocation2 + $0xb0] sm:$0xff]  ;;  %v922_v24 = vpop.f32.mrf.mxu0  ;;  %v1050_v25 = vpop.f32.mrf.mxu1  ;;  %v377_v8 = vld [vmem:[#allocation2 + $0xe8] sm:$0xff] }
 0x11c   : > { %v1267_v23 = vld [vmem:[#allocation2 + $0x1b0] sm:$0xff]  ;;  %1365 = vst.msk [vmem:[%s2135_s16 + $0x88] sm:$0xff] %vm283_vm1, %v1301_v17  ;;  %v1306_v27 = vadd.f32 %v2128_v3, %v1235_v22  ;;  %1172 = vst.msk [vmem:[#allocation2 + $0xd0] sm:$0xff] %vm283_vm1, %v1107_v19  ;;  %v1105_v29 = vadd.f32 %v922_v24, %v372_v11  ;;  %v1137_v30 = vadd.f32 %v1050_v25, %v404_v16  ;;  %v409_v13 = vld [vmem:[#allocation2 + $0x1e8] sm:$0xff] }
 0x11d   : > { %1397 = vst.msk [vmem:[%s2135_s16 + $0x188] sm:$0xff] %vm283_vm1, %v1333_v18  ;;  %v1338_v28 = vadd.f32 %v2128_v3, %v1267_v23  ;;  %1204 = vst.msk [vmem:[#allocation2 + $0x1d0] sm:$0xff] %vm283_vm1, %v1139_v20  ;;  %v1233_v32 = vld [vmem:[#allocation2 + $0xa0] sm:$0xff]  ;;  %v1703_v34 = vpop.f32.mrf.mxu0  ;;  %v1735_v35 = vpop.f32.mrf.mxu1 }
 0x11e   : > { %v1265_v33 = vld [vmem:[#allocation2 + $0x1a0] sm:$0xff]  ;;  %1370 = vst.msk [vmem:[%s2135_s16 + $0xb0] sm:$0xff] %vm283_vm1, %v1306_v27  ;;  %v1304_v37 = vadd.f32 %v2128_v3, %v1233_v32  ;;  %1170 = vst.msk [vmem:[#allocation2 + $0xc0] sm:$0xff] %vm283_vm1, %v1105_v29  ;;  %v1108_v39 = vadd.f32 %v1703_v34, %v375_v21  ;;  %v1140_v40 = vadd.f32 %v1735_v35, %v407_v26 }
 0x11f   : > { %1402 = vst.msk [vmem:[%s2135_s16 + $0x1b0] sm:$0xff] %vm283_vm1, %v1338_v28  ;;  %v1336_v38 = vadd.f32 %v2128_v3, %v1265_v33  ;;  %1202 = vst.msk [vmem:[#allocation2 + $0x1c0] sm:$0xff] %vm283_vm1, %v1137_v30  ;;  %v1236_v42 = vld [vmem:[#allocation2 + $0xb8] sm:$0xff]  ;;  %v925_v44 = vpop.f32.mrf.mxu0  ;;  %v1053_v45 = vpop.f32.mrf.mxu1 }
 0x120   : > { %v1268_v43 = vld [vmem:[#allocation2 + $0x1b8] sm:$0xff]  ;;  %1368 = vst.msk [vmem:[%s2135_s16 + $0xa0] sm:$0xff] %vm283_vm1, %v1304_v37  ;;  %v1307_v47 = vadd.f32 %v2128_v3, %v1236_v42  ;;  %1173 = vst.msk [vmem:[#allocation2 + $0xd8] sm:$0xff] %vm283_vm1, %v1108_v39  ;;  %v1106_v49 = vadd.f32 %v925_v44, %v373_v31  ;;  %v1138_v50 = vadd.f32 %v1053_v45, %v405_v36 }
 0x121   : > { %1400 = vst.msk [vmem:[%s2135_s16 + $0x1a0] sm:$0xff] %vm283_vm1, %v1336_v38  ;;  %v1339_v48 = vadd.f32 %v2128_v3, %v1268_v43  ;;  %1205 = vst.msk [vmem:[#allocation2 + $0x1d8] sm:$0xff] %vm283_vm1, %v1140_v40  ;;  %v1234_v52 = vld [vmem:[#allocation2 + $0xa8] sm:$0xff]  ;;  %v1706_v54 = vpop.f32.mrf.mxu0  ;;  %v1738_v55 = vpop.f32.mrf.mxu1 }
 0x122   : > { %v1266_v53 = vld [vmem:[#allocation2 + $0x1a8] sm:$0xff]  ;;  %1371 = vst.msk [vmem:[%s2135_s16 + $0xb8] sm:$0xff] %vm283_vm1, %v1307_v47  ;;  %v1305_v57 = vadd.f32 %v2128_v3, %v1234_v52  ;;  %1171 = vst.msk [vmem:[#allocation2 + $0xc8] sm:$0xff] %vm283_vm1, %v1106_v49  ;;  %v1111_v59 = vadd.f32 %v1706_v54, %v378_v41  ;;  %v1143_v60 = vadd.f32 %v1738_v55, %v410_v46 }
 0x123   : > { %1403 = vst.msk [vmem:[%s2135_s16 + $0x1b8] sm:$0xff] %vm283_vm1, %v1339_v48  ;;  %v1337_v58 = vadd.f32 %v2128_v3, %v1266_v53  ;;  %1203 = vst.msk [vmem:[#allocation2 + $0x1c8] sm:$0xff] %vm283_vm1, %v1138_v50  ;;  %v1239_v62 = vld [vmem:[#allocation2 + $0xd0] sm:$0xff]  ;;  %v938_v0 = vpop.f32.mrf.mxu0  ;;  %v1066_v1 = vpop.f32.mrf.mxu1 }
 0x124   : > { %v1271_v63 = vld [vmem:[#allocation2 + $0x1d0] sm:$0xff]  ;;  %1369 = vst.msk [vmem:[%s2135_s16 + $0xa8] sm:$0xff] %vm283_vm1, %v1305_v57  ;;  %v1310_v4 = vadd.f32 %v2128_v3, %v1239_v62  ;;  %1176 = vst.msk [vmem:[#allocation2 + $0xf0] sm:$0xff] %vm283_vm1, %v1111_v59  ;;  %v1109_v6 = vadd.f32 %v938_v0, %v376_v51  ;;  %v1141_v7 = vadd.f32 %v1066_v1, %v408_v56 }
 0x125   : > { %1401 = vst.msk [vmem:[%s2135_s16 + $0x1a8] sm:$0xff] %vm283_vm1, %v1337_v58  ;;  %v1342_v5 = vadd.f32 %v2128_v3, %v1271_v63  ;;  %1208 = vst.msk [vmem:[#allocation2 + $0x1f0] sm:$0xff] %vm283_vm1, %v1143_v60  ;;  %v1237_v9 = vld [vmem:[#allocation2 + $0xc0] sm:$0xff]  ;;  %v1707_v11 = vpop.f32.mrf.mxu0  ;;  %v1739_v12 = vpop.f32.mrf.mxu1 }
 0x126   : > { %v1269_v10 = vld [vmem:[#allocation2 + $0x1c0] sm:$0xff]  ;;  %1374 = vst.msk [vmem:[%s2135_s16 + $0xd0] sm:$0xff] %vm283_vm1, %v1310_v4  ;;  %v1308_v14 = vadd.f32 %v2128_v3, %v1237_v9  ;;  %1174 = vst.msk [vmem:[#allocation2 + $0xe0] sm:$0xff] %vm283_vm1, %v1109_v6  ;;  %v1112_v16 = vadd.f32 %v1707_v11, %v379_v61  ;;  %v1144_v17 = vadd.f32 %v1739_v12, %v411_v2 }
 0x127   : > { %1406 = vst.msk [vmem:[%s2135_s16 + $0x1d0] sm:$0xff] %vm283_vm1, %v1342_v5  ;;  %v1340_v15 = vadd.f32 %v2128_v3, %v1269_v10  ;;  %1206 = vst.msk [vmem:[#allocation2 + $0x1e0] sm:$0xff] %vm283_vm1, %v1141_v7  ;;  %v1240_v18 = vld [vmem:[#allocation2 + $0xd8] sm:$0xff]  ;;  %v941_v20 = vpop.f32.mrf.mxu0  ;;  %v1069_v21 = vpop.f32.mrf.mxu1 }
 0x128   : > { %v1272_v19 = vld [vmem:[#allocation2 + $0x1d8] sm:$0xff]  ;;  %1372 = vst.msk [vmem:[%s2135_s16 + $0xc0] sm:$0xff] %vm283_vm1, %v1308_v14  ;;  %v1311_v22 = vadd.f32 %v2128_v3, %v1240_v18  ;;  %1177 = vst.msk [vmem:[#allocation2 + $0xf8] sm:$0xff] %vm283_vm1, %v1112_v16  ;;  %v1110_v24 = vadd.f32 %v941_v20, %v377_v8  ;;  %v1142_v25 = vadd.f32 %v1069_v21, %v409_v13 }
 0x129   : > { %1404 = vst.msk [vmem:[%s2135_s16 + $0x1c0] sm:$0xff] %vm283_vm1, %v1340_v15  ;;  %v1343_v23 = vadd.f32 %v2128_v3, %v1272_v19  ;;  %1209 = vst.msk [vmem:[#allocation2 + $0x1f8] sm:$0xff] %vm283_vm1, %v1144_v17  ;;  %v1238_v26 = vld [vmem:[#allocation2 + $0xc8] sm:$0xff] }
 0x12a   : > { %v1270_v27 = vld [vmem:[#allocation2 + $0x1c8] sm:$0xff]  ;;  %1375 = vst.msk [vmem:[%s2135_s16 + $0xd8] sm:$0xff] %vm283_vm1, %v1311_v22  ;;  %v1309_v28 = vadd.f32 %v2128_v3, %v1238_v26  ;;  %1175 = vst.msk [vmem:[#allocation2 + $0xe8] sm:$0xff] %vm283_vm1, %v1110_v24 }
 0x12b   : > { %1407 = vst.msk [vmem:[%s2135_s16 + $0x1d8] sm:$0xff] %vm283_vm1, %v1343_v23  ;;  %v1341_v29 = vadd.f32 %v2128_v3, %v1270_v27  ;;  %1207 = vst.msk [vmem:[#allocation2 + $0x1e8] sm:$0xff] %vm283_vm1, %v1142_v25  ;;  %v1243_v30 = vld [vmem:[#allocation2 + $0xf0] sm:$0xff] }
 0x12c   : > { %v1275_v31 = vld [vmem:[#allocation2 + $0x1f0] sm:$0xff]  ;;  %1373 = vst.msk [vmem:[%s2135_s16 + $0xc8] sm:$0xff] %vm283_vm1, %v1309_v28  ;;  %v1314_v32 = vadd.f32 %v2128_v3, %v1243_v30 }
 0x12d   : > { %1405 = vst.msk [vmem:[%s2135_s16 + $0x1c8] sm:$0xff] %vm283_vm1, %v1341_v29  ;;  %v1346_v33 = vadd.f32 %v2128_v3, %v1275_v31  ;;  %v1241_v34 = vld [vmem:[#allocation2 + $0xe0] sm:$0xff] }
 0x12e   : > { %v1273_v35 = vld [vmem:[#allocation2 + $0x1e0] sm:$0xff]  ;;  %1378 = vst.msk [vmem:[%s2135_s16 + $0xf0] sm:$0xff] %vm283_vm1, %v1314_v32  ;;  %v1312_v36 = vadd.f32 %v2128_v3, %v1241_v34 }
 0x12f   : > { %1410 = vst.msk [vmem:[%s2135_s16 + $0x1f0] sm:$0xff] %vm283_vm1, %v1346_v33  ;;  %v1344_v37 = vadd.f32 %v2128_v3, %v1273_v35  ;;  %v1244_v38 = vld [vmem:[#allocation2 + $0xf8] sm:$0xff] }
 0x130   : > { %v1276_v39 = vld [vmem:[#allocation2 + $0x1f8] sm:$0xff]  ;;  %1376 = vst.msk [vmem:[%s2135_s16 + $0xe0] sm:$0xff] %vm283_vm1, %v1312_v36  ;;  %v1315_v40 = vadd.f32 %v2128_v3, %v1244_v38 }
 0x131   : > { %1408 = vst.msk [vmem:[%s2135_s16 + $0x1e0] sm:$0xff] %vm283_vm1, %v1344_v37  ;;  %v1347_v41 = vadd.f32 %v2128_v3, %v1276_v39  ;;  %v1242_v42 = vld [vmem:[#allocation2 + $0xe8] sm:$0xff] }
 0x132   : > { %v1274_v43 = vld [vmem:[#allocation2 + $0x1e8] sm:$0xff]  ;;  %1379 = vst.msk [vmem:[%s2135_s16 + $0xf8] sm:$0xff] %vm283_vm1, %v1315_v40  ;;  %v1313_v44 = vadd.f32 %v2128_v3, %v1242_v42 }
 0x133   : > { %1411 = vst.msk [vmem:[%s2135_s16 + $0x1f8] sm:$0xff] %vm283_vm1, %v1347_v41  ;;  %v1345_v45 = vadd.f32 %v2128_v3, %v1274_v43 }
 0x134   : > { %1377 = vst.msk [vmem:[%s2135_s16 + $0xe8] sm:$0xff] %vm283_vm1, %v1313_v44 }
 0x135   : > { %1409 = vst.msk [vmem:[%s2135_s16 + $0x1e8] sm:$0xff] %vm283_vm1, %v1345_v45 }
 0x136 PF: > { %s13_s14 = sadd.s32 1, %s1842_s14   ;;  %s2398_s12 = smov %s1838_s13 }
 0x137   : > { %p10_p5 = scmp.ge.s32.totalorder %s13_s14, 4   ;;  %s2399_s13 = smov %s2401_s15 }
 0x139   :  { %12 = sbr.rel (!%p10_p5) target bundleno = 2 (0x2), region = 76 }

// kernel: double_conv_up_forward.7
= control target key start
LH: loop header
LB: loop body
LE: loop exit
PB: predicated region body
PF: predicated region fallthrough
CT: control target
= control target key end

     0   :  { %s1769_s9 = smov 0   ;;  %s1771_s10 = smov 0   ;;  %s2243_s0 = inlined_call_operand.vmem [shape: bf16[4,1024,108], index: 0, kind: input, shape index: {}]   ;;  %s2244_s1 = inlined_call_operand.vmem [shape: bf16[4,108,4], index: 1, kind: input, shape index: {}]   ;;  %s2245_s2 = inlined_call_operand.vmem [shape: f32[4,1024,4], index: 2, kind: output, shape index: {}]  }
   0x1   :  { %s1773_s11 = smov 0   ;;  %s1775_s12 = smov 0  }
   0x2   :  { %s1777_s13 = smov 0  }
   0x3 LB: > { %s27_s14 = sadd.s32 1, %s1743_s11  ;;  %s31_s15 = sadd.s32 1, %s1747_s12  ;;  %s1751_s13 = sphi %s1777_s13, %s12_s13   ;;  %s1747_s12 = sphi %s1775_s12, %s2250_s12   ;;  %s1743_s11 = sphi %s1773_s11, %s2249_s11   ;;  %s1739_s10 = sphi %s1771_s10, %s2248_s10   ;;  %s1735_s9 = sphi %s1769_s9, %s2247_s9  }
   0x4   : > { %p29_p0 = scmp.ge.s32.totalorder %s27_s14, 2  ;;  %p1418_p1 = scmp.ge.s32.totalorder %s1751_s13, 1 }
   0x5   : > { %p162_p2 = scmp.lt.s32.totalorder %s1751_s13, 9 }
   0x6   : > { %s2252_s14 = smov (%p29_p0, %s27_s14), 0  ;;  %s2254_s15 = smov (!%p29_p0, %s31_s15), %s1747_s12 }
   0x7   : > { %p163_p3 = pnand %p1418_p1, %p162_p2  ;;  %p33_p4 = scmp.ge.s32.totalorder %s2254_s15, 4 }
   0x8   : > { %s1419_s16 = sshll.u32 (!%p163_p3), %s1735_s9, 6  ;;  %p205_p5 = scmp.lt.s32.totalorder (!%p163_p3), %s1739_s10, 3 }
   0x9   : > { %s2256_s15 = smov (%p33_p4, %s2254_s15), 0  ;;  %166 = sbr.rel (%p163_p3) target bundleno = 314 (0x13a), region = 28 }
   0xa   : > { %p1807_p6 = scmp.lt.s32.totalorder (!%p163_p3), %s1419_s16, 127 }
   0xe   : > { %vm242_vm0 = vcmask 31744   ;;  %v1753_v0 = vmov 0.0   ;;  %s2258_s10 = smov (!%p205_p5, %s1739_s10), 3  ;;  %s2260_s16 = smov (!%p1807_p6, %s1419_s16), 127  ;;  %vm747_vm1 = vcmask 1045504   ;;  %vm650_vm2 = vcmask 883712  }
   0xf   : > { %245 = vst.msk [vmem:[#allocation2 + $0x10] sm:$0xff] %vm242_vm0, %v1753_v0  ;;  %243 = vst.msk [vmem:[#allocation2] sm:$0xff] %vm242_vm0, %v1753_v0  ;;  %s1420_s18 = sshll.u32 %s2258_s10, 7  ;;  %s1632_s19 = smul.u32 56, %s2258_s10 }
  0x10   : > { %244 = vst.msk [vmem:[#allocation2 + $0x8] sm:$0xff] %vm242_vm0, %v1753_v0  ;;  %246 = vst.msk [vmem:[#allocation2 + $0x18] sm:$0xff] %vm242_vm0, %v1753_v0  ;;  %s1946_s20 = sadd.s32 %s1420_s18, %s2260_s16 }
  0x11   : > { %247 = vst.msk [vmem:[#allocation2 + $0x20] sm:$0xff] %vm242_vm0, %v1753_v0  ;;  %248 = vst.msk [vmem:[#allocation2 + $0x28] sm:$0xff] %vm242_vm0, %v1753_v0  ;;  %s1951_s23 = scalar_lea.vmem %s2244_s1, %s1632_s19  ;;  %s1421_s24 = sshll.u32 %s1946_s20, 2 }
  0x12   : > { %249 = vst.msk [vmem:[#allocation2 + $0x30] sm:$0xff] %vm242_vm0, %v1753_v0  ;;  %250 = vst.msk [vmem:[#allocation2 + $0x38] sm:$0xff] %vm242_vm0, %v1753_v0  ;;  %v1675_v1 = vld [vmem:[%s1951_s23 + $0x28] sm:$0xff]   ;;  %v1674_v2 = vld [vmem:[%s1951_s23 + $0x30] sm:$0x3f]   ;;  %s1959_s27 = scalar_lea.vmem %s2243_s0, %s1421_s24  ;;  %s1425_s28 = sshll.u32 %s1946_s20, 3 }
  0x13   : > { %251 = vst.msk [vmem:[#allocation2 + $0x40] sm:$0xff] %vm242_vm0, %v1753_v0  ;;  %252 = vst.msk [vmem:[#allocation2 + $0x48] sm:$0xff] %vm242_vm0, %v1753_v0  ;;  %1630 = vmatprep.subr.msk.bf16.mxu0 %vm747_vm1, %v1674_v2  ;;  %1631 = vmatprep.subr.msk.bf16.mxu1 %vm747_vm1, %v1674_v2  ;;  %v749_v3 = vsel %vm747_vm1, %v1674_v2, 0  ;;  %v1676_v4 = vld [vmem:[%s1951_s23 + $0x20] sm:$0xff]   ;;  %v1677_v7 = vld [vmem:[%s1951_s23 + $0x18] sm:$0xff]   ;;  %s2040_s3 = scalar_lea.vmem %s2245_s2, %s1425_s28 }
  0x14   : > { %253 = vst.msk [vmem:[#allocation2 + $0x50] sm:$0xff] %vm242_vm0, %v1753_v0  ;;  %254 = vst.msk [vmem:[#allocation2 + $0x58] sm:$0xff] %vm242_vm0, %v1753_v0  ;;  %1539 = vmatpush3.bf16.msra.mxu0 %v749_v3  ;;  %1623 = vmatpush3.bf16.msra.mxu1 %v749_v3  ;;  %v1681_v5 = vld [vmem:[%s1959_s27] sm:$0xff]   ;;  %v1678_v8 = vld [vmem:[%s1951_s23 + $0x10] sm:$0xff]  }
  0x15   : > { %255 = vst.msk [vmem:[#allocation2 + $0x60] sm:$0xff] %vm242_vm0, %v1753_v0  ;;  %256 = vst.msk [vmem:[#allocation2 + $0x68] sm:$0xff] %vm242_vm0, %v1753_v0  ;;  %1540 = vmatprep.subr.bf16.mxu0 %v1675_v1  ;;  %1617 = vmatprep.subr.bf16.mxu1 %v1675_v1  ;;  %v1682_v6 = vld [vmem:[%s1959_s27 + $0x80] sm:$0xff]   ;;  %v1679_v9 = vld [vmem:[%s1951_s23 + $0x8] sm:$0xff]  }
  0x16   : > { %257 = vst.msk [vmem:[#allocation2 + $0x70] sm:$0xff] %vm242_vm0, %v1753_v0  ;;  %258 = vst.msk [vmem:[#allocation2 + $0x78] sm:$0xff] %vm242_vm0, %v1753_v0  ;;  %1552 = vmatprep.mubr.msk.bf16.mxu0 %vm650_vm2, %v1681_v5  ;;  %1584 = vmatprep.mubr.msk.bf16.mxu1 %vm650_vm2, %v1682_v6  ;;  %v1680_v10 = vld [vmem:[%s1951_s23] sm:$0xff]   ;;  %v1683_v11 = vld [vmem:[%s1959_s27 + $0x8] sm:$0xff]  }
  0x17   : > { %259 = vst.msk [vmem:[#allocation2 + $0x80] sm:$0xff] %vm242_vm0, %v1753_v0  ;;  %260 = vst.msk [vmem:[#allocation2 + $0x88] sm:$0xff] %vm242_vm0, %v1753_v0  ;;  %v1684_v12 = vld [vmem:[%s1959_s27 + $0x88] sm:$0xff]   ;;  %v1685_v13 = vld [vmem:[%s1959_s27 + $0x10] sm:$0xff]  }
  0x18   : > { %261 = vst.msk [vmem:[#allocation2 + $0x90] sm:$0xff] %vm242_vm0, %v1753_v0  ;;  %262 = vst.msk [vmem:[#allocation2 + $0x98] sm:$0xff] %vm242_vm0, %v1753_v0  ;;  %1541 = vmatpush3.bf16.msra.mxu0 %v1675_v1  ;;  %1624 = vmatpush3.bf16.msra.mxu1 %v1675_v1  ;;  %v1686_v14 = vld [vmem:[%s1959_s27 + $0x90] sm:$0xff]   ;;  %v1687_v15 = vld [vmem:[%s1959_s27 + $0x18] sm:$0xff]  }
  0x19   : > { %263 = vst.msk [vmem:[#allocation2 + $0xa0] sm:$0xff] %vm242_vm0, %v1753_v0  ;;  %264 = vst.msk [vmem:[#allocation2 + $0xa8] sm:$0xff] %vm242_vm0, %v1753_v0  ;;  %1542 = vmatprep.subr.bf16.mxu0 %v1676_v4  ;;  %1618 = vmatprep.subr.bf16.mxu1 %v1676_v4  ;;  %v1688_v16 = vld [vmem:[%s1959_s27 + $0x98] sm:$0xff]   ;;  %v1689_v17 = vld [vmem:[%s1959_s27 + $0x20] sm:$0xff]  }
  0x1a   : > { %265 = vst.msk [vmem:[#allocation2 + $0xb0] sm:$0xff] %vm242_vm0, %v1753_v0  ;;  %266 = vst.msk [vmem:[#allocation2 + $0xb8] sm:$0xff] %vm242_vm0, %v1753_v0  ;;  %v1690_v18 = vld [vmem:[%s1959_s27 + $0xa0] sm:$0xff]   ;;  %v1691_v19 = vld [vmem:[%s1959_s27 + $0x28] sm:$0xff]  }
  0x1b   : > { %267 = vst.msk [vmem:[#allocation2 + $0xc0] sm:$0xff] %vm242_vm0, %v1753_v0  ;;  %268 = vst.msk [vmem:[#allocation2 + $0xc8] sm:$0xff] %vm242_vm0, %v1753_v0  ;;  %v1692_v20 = vld [vmem:[%s1959_s27 + $0xa8] sm:$0xff]   ;;  %v1693_v21 = vld [vmem:[%s1959_s27 + $0x30] sm:$0xff]  }
  0x1c   : > { %269 = vst.msk [vmem:[#allocation2 + $0xd0] sm:$0xff] %vm242_vm0, %v1753_v0  ;;  %270 = vst.msk [vmem:[#allocation2 + $0xd8] sm:$0xff] %vm242_vm0, %v1753_v0  ;;  %1543 = vmatpush3.bf16.msra.mxu0 %v1676_v4  ;;  %1625 = vmatpush3.bf16.msra.mxu1 %v1676_v4  ;;  %v1694_v22 = vld [vmem:[%s1959_s27 + $0xb0] sm:$0xff]   ;;  %v1695_v23 = vld [vmem:[%s1959_s27 + $0x38] sm:$0xff]  }
  0x1d   : > { %271 = vst.msk [vmem:[#allocation2 + $0xe0] sm:$0xff] %vm242_vm0, %v1753_v0  ;;  %272 = vst.msk [vmem:[#allocation2 + $0xe8] sm:$0xff] %vm242_vm0, %v1753_v0  ;;  %1544 = vmatprep.subr.bf16.mxu0 %v1677_v7  ;;  %1619 = vmatprep.subr.bf16.mxu1 %v1677_v7  ;;  %v1696_v24 = vld [vmem:[%s1959_s27 + $0xb8] sm:$0xff]   ;;  %v1697_v25 = vld [vmem:[%s1959_s27 + $0x40] sm:$0xff]  }
  0x1e   : > { %273 = vst.msk [vmem:[#allocation2 + $0xf0] sm:$0xff] %vm242_vm0, %v1753_v0  ;;  %274 = vst.msk [vmem:[#allocation2 + $0xf8] sm:$0xff] %vm242_vm0, %v1753_v0  ;;  %v1698_v26 = vld [vmem:[%s1959_s27 + $0xc0] sm:$0xff]   ;;  %v1699_v27 = vld [vmem:[%s1959_s27 + $0x48] sm:$0xff]  }
  0x1f   : > { %275 = vst.msk [vmem:[#allocation2 + $0x100] sm:$0xff] %vm242_vm0, %v1753_v0  ;;  %276 = vst.msk [vmem:[#allocation2 + $0x108] sm:$0xff] %vm242_vm0, %v1753_v0  ;;  %v1700_v28 = vld [vmem:[%s1959_s27 + $0xc8] sm:$0xff]   ;;  %v1701_v29 = vld [vmem:[%s1959_s27 + $0x50] sm:$0xff]  }
  0x20   : > { %277 = vst.msk [vmem:[#allocation2 + $0x110] sm:$0xff] %vm242_vm0, %v1753_v0  ;;  %278 = vst.msk [vmem:[#allocation2 + $0x118] sm:$0xff] %vm242_vm0, %v1753_v0  ;;  %1545 = vmatpush3.bf16.msra.mxu0 %v1677_v7  ;;  %1626 = vmatpush3.bf16.msra.mxu1 %v1677_v7  ;;  %v1702_v30 = vld [vmem:[%s1959_s27 + $0xd0] sm:$0xff]   ;;  %v1703_v31 = vld [vmem:[%s1959_s27 + $0x58] sm:$0xff]  }
  0x21   : > { %279 = vst.msk [vmem:[#allocation2 + $0x120] sm:$0xff] %vm242_vm0, %v1753_v0  ;;  %280 = vst.msk [vmem:[#allocation2 + $0x128] sm:$0xff] %vm242_vm0, %v1753_v0  ;;  %1546 = vmatprep.subr.bf16.mxu0 %v1678_v8  ;;  %1620 = vmatprep.subr.bf16.mxu1 %v1678_v8  ;;  %v1704_v32 = vld [vmem:[%s1959_s27 + $0xd8] sm:$0xff]   ;;  %v1705_v33 = vld [vmem:[%s1959_s27 + $0x60] sm:$0xff]  }
  0x22   : > { %281 = vst.msk [vmem:[#allocation2 + $0x130] sm:$0xff] %vm242_vm0, %v1753_v0  ;;  %282 = vst.msk [vmem:[#allocation2 + $0x138] sm:$0xff] %vm242_vm0, %v1753_v0  ;;  %v1706_v34 = vld [vmem:[%s1959_s27 + $0xe0] sm:$0xff]   ;;  %v1707_v35 = vld [vmem:[%s1959_s27 + $0x68] sm:$0xff]  }
  0x23   : > { %283 = vst.msk [vmem:[#allocation2 + $0x140] sm:$0xff] %vm242_vm0, %v1753_v0  ;;  %284 = vst.msk [vmem:[#allocation2 + $0x148] sm:$0xff] %vm242_vm0, %v1753_v0  ;;  %v1708_v36 = vld [vmem:[%s1959_s27 + $0xe8] sm:$0xff]   ;;  %v1709_v37 = vld [vmem:[%s1959_s27 + $0x70] sm:$0xff]  }
  0x24   : > { %285 = vst.msk [vmem:[#allocation2 + $0x150] sm:$0xff] %vm242_vm0, %v1753_v0  ;;  %286 = vst.msk [vmem:[#allocation2 + $0x158] sm:$0xff] %vm242_vm0, %v1753_v0  ;;  %1547 = vmatpush3.bf16.msra.mxu0 %v1678_v8  ;;  %1627 = vmatpush3.bf16.msra.mxu1 %v1678_v8  ;;  %v1710_v38 = vld [vmem:[%s1959_s27 + $0xf0] sm:$0xff]   ;;  %v1711_v39 = vld [vmem:[%s1959_s27 + $0x78] sm:$0xff]  }
  0x25   : > { %287 = vst.msk [vmem:[#allocation2 + $0x160] sm:$0xff] %vm242_vm0, %v1753_v0  ;;  %288 = vst.msk [vmem:[#allocation2 + $0x168] sm:$0xff] %vm242_vm0, %v1753_v0  ;;  %1548 = vmatprep.subr.bf16.mxu0 %v1679_v9  ;;  %1621 = vmatprep.subr.bf16.mxu1 %v1679_v9  ;;  %v1712_v40 = vld [vmem:[%s1959_s27 + $0xf8] sm:$0xff]   ;;  %v309_v41 = vld [vmem:[#allocation2 + $0x10] sm:$0xff] }
  0x26   : > { %289 = vst.msk [vmem:[#allocation2 + $0x170] sm:$0xff] %vm242_vm0, %v1753_v0  ;;  %290 = vst.msk [vmem:[#allocation2 + $0x178] sm:$0xff] %vm242_vm0, %v1753_v0  ;;  %v307_v45 = vld [vmem:[#allocation2] sm:$0xff]  ;;  %v310_v51 = vld [vmem:[#allocation2 + $0x18] sm:$0xff] }
  0x27   : > { %291 = vst.msk [vmem:[#allocation2 + $0x180] sm:$0xff] %vm242_vm0, %v1753_v0  ;;  %292 = vst.msk [vmem:[#allocation2 + $0x188] sm:$0xff] %vm242_vm0, %v1753_v0  ;;  %v341_v42 = vld [vmem:[#allocation2 + $0x110] sm:$0xff]  ;;  %v339_v46 = vld [vmem:[#allocation2 + $0x100] sm:$0xff] }
  0x28   : > { %293 = vst.msk [vmem:[#allocation2 + $0x190] sm:$0xff] %vm242_vm0, %v1753_v0  ;;  %294 = vst.msk [vmem:[#allocation2 + $0x198] sm:$0xff] %vm242_vm0, %v1753_v0  ;;  %1549 = vmatpush3.bf16.msra.mxu0 %v1679_v9  ;;  %1628 = vmatpush3.bf16.msra.mxu1 %v1679_v9  ;;  %v342_v52 = vld [vmem:[#allocation2 + $0x118] sm:$0xff]  ;;  %v308_v57 = vld [vmem:[#allocation2 + $0x8] sm:$0xff] }
  0x29   : > { %295 = vst.msk [vmem:[#allocation2 + $0x1a0] sm:$0xff] %vm242_vm0, %v1753_v0  ;;  %296 = vst.msk [vmem:[#allocation2 + $0x1a8] sm:$0xff] %vm242_vm0, %v1753_v0  ;;  %1550 = vmatprep.subr.bf16.mxu0 %v1680_v10  ;;  %1622 = vmatprep.subr.bf16.mxu1 %v1680_v10  ;;  %v340_v58 = vld [vmem:[#allocation2 + $0x108] sm:$0xff]  ;;  %v313_v63 = vld [vmem:[#allocation2 + $0x30] sm:$0xff] }
  0x2a   : > { %297 = vst.msk [vmem:[#allocation2 + $0x1b0] sm:$0xff] %vm242_vm0, %v1753_v0  ;;  %298 = vst.msk [vmem:[#allocation2 + $0x1b8] sm:$0xff] %vm242_vm0, %v1753_v0  ;;  %v311_v5 = vld [vmem:[#allocation2 + $0x20] sm:$0xff]  ;;  %v314_v9 = vld [vmem:[#allocation2 + $0x38] sm:$0xff] }
  0x2b   : > { %299 = vst.msk [vmem:[#allocation2 + $0x1c0] sm:$0xff] %vm242_vm0, %v1753_v0  ;;  %300 = vst.msk [vmem:[#allocation2 + $0x1c8] sm:$0xff] %vm242_vm0, %v1753_v0  ;;  %v343_v6 = vld [vmem:[#allocation2 + $0x120] sm:$0xff] }
  0x2c   : > { %301 = vst.msk [vmem:[#allocation2 + $0x1d0] sm:$0xff] %vm242_vm0, %v1753_v0  ;;  %302 = vst.msk [vmem:[#allocation2 + $0x1d8] sm:$0xff] %vm242_vm0, %v1753_v0  ;;  %1551 = vmatpush3.bf16.msra.mxu0 %v1680_v10  ;;  %1629 = vmatpush3.bf16.msra.mxu1 %v1680_v10 }
  0x2d   : > { %303 = vst.msk [vmem:[#allocation2 + $0x1e0] sm:$0xff] %vm242_vm0, %v1753_v0  ;;  %304 = vst.msk [vmem:[#allocation2 + $0x1e8] sm:$0xff] %vm242_vm0, %v1753_v0 }
  0x2e   : > { %305 = vst.msk [vmem:[#allocation2 + $0x1f0] sm:$0xff] %vm242_vm0, %v1753_v0  ;;  %306 = vst.msk [vmem:[#allocation2 + $0x1f8] sm:$0xff] %vm242_vm0, %v1753_v0  ;;  %v345_v0 = vld [vmem:[#allocation2 + $0x130] sm:$0xff] }
  0x2f   : > { %1553 = vmatmul.mubr.msk.bf16.vlgmr.msra.gmra.mxu0 %vm650_vm2, %v1683_v11  ;;  %1585 = vmatmul.mubr.msk.bf16.vlgmr.msra.gmra.mxu1 %vm650_vm2, %v1684_v12 }
  0x30   : > { %1556 = vmatprep.mubr.msk.bf16.mxu0 %vm650_vm2, %v1685_v13  ;;  %1588 = vmatprep.mubr.msk.bf16.mxu1 %vm650_vm2, %v1686_v14  ;;  %v346_v14 = vld [vmem:[#allocation2 + $0x138] sm:$0xff] }
  0x37   : > { %1557 = vmatmul.mubr.msk.bf16.gmra.mxu0 %vm650_vm2, %v1687_v15  ;;  %1589 = vmatmul.mubr.msk.bf16.gmra.mxu1 %vm650_vm2, %v1688_v16 }
  0x38   : > { %1560 = vmatprep.mubr.msk.bf16.mxu0 %vm650_vm2, %v1689_v17  ;;  %1592 = vmatprep.mubr.msk.bf16.mxu1 %vm650_vm2, %v1690_v18  ;;  %v312_v17 = vld [vmem:[#allocation2 + $0x28] sm:$0xff] }
  0x3f   : > { %1561 = vmatmul.mubr.msk.bf16.gmra.mxu0 %vm650_vm2, %v1691_v19  ;;  %1593 = vmatmul.mubr.msk.bf16.gmra.mxu1 %vm650_vm2, %v1692_v20 }
  0x40   : > { %1564 = vmatprep.mubr.msk.bf16.mxu0 %vm650_vm2, %v1693_v21  ;;  %1596 = vmatprep.mubr.msk.bf16.mxu1 %vm650_vm2, %v1694_v22  ;;  %v344_v22 = vld [vmem:[#allocation2 + $0x128] sm:$0xff] }
  0x47   : > { %1565 = vmatmul.mubr.msk.bf16.gmra.mxu0 %vm650_vm2, %v1695_v23  ;;  %1597 = vmatmul.mubr.msk.bf16.gmra.mxu1 %vm650_vm2, %v1696_v24 }
  0x48   : > { %1568 = vmatprep.mubr.msk.bf16.mxu0 %vm650_vm2, %v1697_v25  ;;  %1600 = vmatprep.mubr.msk.bf16.mxu1 %vm650_vm2, %v1698_v26  ;;  %v317_v25 = vld [vmem:[#allocation2 + $0x50] sm:$0xff] }
  0x4f   : > { %1569 = vmatmul.mubr.msk.bf16.gmra.mxu0 %vm650_vm2, %v1699_v27  ;;  %1601 = vmatmul.mubr.msk.bf16.gmra.mxu1 %vm650_vm2, %v1700_v28 }
  0x50   : > { %1572 = vmatprep.mubr.msk.bf16.mxu0 %vm650_vm2, %v1701_v29  ;;  %1604 = vmatprep.mubr.msk.bf16.mxu1 %vm650_vm2, %v1702_v30  ;;  %v349_v30 = vld [vmem:[#allocation2 + $0x150] sm:$0xff] }
  0x57   : > { %1573 = vmatmul.mubr.msk.bf16.gmra.mxu0 %vm650_vm2, %v1703_v31  ;;  %1605 = vmatmul.mubr.msk.bf16.gmra.mxu1 %vm650_vm2, %v1704_v32 }
  0x58   : > { %1576 = vmatprep.mubr.msk.bf16.mxu0 %vm650_vm2, %v1705_v33  ;;  %1608 = vmatprep.mubr.msk.bf16.mxu1 %vm650_vm2, %v1706_v34  ;;  %v315_v33 = vld [vmem:[#allocation2 + $0x40] sm:$0xff] }
  0x5f   : > { %1577 = vmatmul.mubr.msk.bf16.gmra.mxu0 %vm650_vm2, %v1707_v35  ;;  %1609 = vmatmul.mubr.msk.bf16.gmra.mxu1 %vm650_vm2, %v1708_v36 }
  0x60   : > { %1580 = vmatprep.mubr.msk.bf16.mxu0 %vm650_vm2, %v1709_v37  ;;  %1612 = vmatprep.mubr.msk.bf16.mxu1 %vm650_vm2, %v1710_v38  ;;  %v347_v38 = vld [vmem:[#allocation2 + $0x140] sm:$0xff] }
  0x67   : > { %1581 = vmatmul.mubr.msk.bf16.gmra.mxu0 %vm650_vm2, %v1711_v39  ;;  %1613 = vmatmul.mubr.msk.bf16.gmra.mxu1 %vm650_vm2, %v1712_v40 }
  0xef   : > { %v1554_v43 = vpop.f32.mrf.mxu0  ;;  %v1586_v44 = vpop.f32.mrf.mxu1 }
  0xf0   : > { %v1042_v47 = vadd.f32 %v1554_v43, %v309_v41  ;;  %v1074_v48 = vadd.f32 %v1586_v44, %v341_v42  ;;  %v318_v41 = vld [vmem:[#allocation2 + $0x58] sm:$0xff] }
  0xf1   : > { %v785_v49 = vpop.f32.mrf.mxu0  ;;  %v913_v50 = vpop.f32.mrf.mxu1 }
  0xf2   : > { %1107 = vst.msk [vmem:[#allocation2 + $0x10] sm:$0xff] %vm242_vm0, %v1042_v47  ;;  %1139 = vst.msk [vmem:[#allocation2 + $0x110] sm:$0xff] %vm242_vm0, %v1074_v48  ;;  %v1040_v53 = vadd.f32 %v785_v49, %v307_v45  ;;  %v1072_v54 = vadd.f32 %v913_v50, %v339_v46  ;;  %v350_v46 = vld [vmem:[#allocation2 + $0x158] sm:$0xff]  ;;  %v316_v49 = vld [vmem:[#allocation2 + $0x48] sm:$0xff] }
  0xf3   : > { %v1555_v55 = vpop.f32.mrf.mxu0  ;;  %v1587_v56 = vpop.f32.mrf.mxu1 }
  0xf4   : > { %1105 = vst.msk [vmem:[#allocation2] sm:$0xff] %vm242_vm0, %v1040_v53  ;;  %1137 = vst.msk [vmem:[#allocation2 + $0x100] sm:$0xff] %vm242_vm0, %v1072_v54  ;;  %v1043_v59 = vadd.f32 %v1555_v55, %v310_v51  ;;  %v1075_v60 = vadd.f32 %v1587_v56, %v342_v52  ;;  %v348_v54 = vld [vmem:[#allocation2 + $0x148] sm:$0xff] }
  0xf5   : > { %v788_v61 = vpop.f32.mrf.mxu0  ;;  %v916_v62 = vpop.f32.mrf.mxu1 }
  0xf6   : > { %1108 = vst.msk [vmem:[#allocation2 + $0x18] sm:$0xff] %vm242_vm0, %v1043_v59  ;;  %1140 = vst.msk [vmem:[#allocation2 + $0x118] sm:$0xff] %vm242_vm0, %v1075_v60  ;;  %v1041_v1 = vadd.f32 %v788_v61, %v308_v57  ;;  %v1073_v2 = vadd.f32 %v916_v62, %v340_v58  ;;  %v321_v57 = vld [vmem:[#allocation2 + $0x70] sm:$0xff] }
  0xf7   : > { %v1558_v3 = vpop.f32.mrf.mxu0  ;;  %v1590_v4 = vpop.f32.mrf.mxu1  ;;  %v353_v62 = vld [vmem:[#allocation2 + $0x170] sm:$0xff] }
  0xf8   : > { %1106 = vst.msk [vmem:[#allocation2 + $0x8] sm:$0xff] %vm242_vm0, %v1041_v1  ;;  %1138 = vst.msk [vmem:[#allocation2 + $0x108] sm:$0xff] %vm242_vm0, %v1073_v2  ;;  %v1046_v7 = vadd.f32 %v1558_v3, %v313_v63  ;;  %v1078_v8 = vadd.f32 %v1590_v4, %v345_v0  ;;  %v319_v1 = vld [vmem:[#allocation2 + $0x60] sm:$0xff] }
  0xf9   : > { %v1174_v10 = vld [vmem:[#allocation2 + $0x10] sm:$0xff]  ;;  %v801_v12 = vpop.f32.mrf.mxu0  ;;  %v929_v13 = vpop.f32.mrf.mxu1 }
  0xfa   : > { %v1206_v11 = vld [vmem:[#allocation2 + $0x110] sm:$0xff]  ;;  %1238 = vst.msk [vmem:[%s2040_s3 + $0x10] sm:$0xff] %vm242_vm0, %v1174_v10  ;;  %1111 = vst.msk [vmem:[#allocation2 + $0x30] sm:$0xff] %vm242_vm0, %v1046_v7  ;;  %v1044_v15 = vadd.f32 %v801_v12, %v311_v5  ;;  %v1076_v16 = vadd.f32 %v929_v13, %v343_v6  ;;  %v351_v6 = vld [vmem:[#allocation2 + $0x160] sm:$0xff] }
  0xfb   : > { %1270 = vst.msk [vmem:[%s2040_s3 + $0x110] sm:$0xff] %vm242_vm0, %v1206_v11  ;;  %1143 = vst.msk [vmem:[#allocation2 + $0x130] sm:$0xff] %vm242_vm0, %v1078_v8  ;;  %v1172_v18 = vld [vmem:[#allocation2] sm:$0xff]  ;;  %v1559_v20 = vpop.f32.mrf.mxu0  ;;  %v1591_v21 = vpop.f32.mrf.mxu1 }
  0xfc   : > { %v1204_v19 = vld [vmem:[#allocation2 + $0x100] sm:$0xff]  ;;  %1236 = vst.msk [vmem:[%s2040_s3] sm:$0xff] %vm242_vm0, %v1172_v18  ;;  %1109 = vst.msk [vmem:[#allocation2 + $0x20] sm:$0xff] %vm242_vm0, %v1044_v15  ;;  %v1047_v23 = vadd.f32 %v1559_v20, %v314_v9  ;;  %v1079_v24 = vadd.f32 %v1591_v21, %v346_v14  ;;  %v322_v9 = vld [vmem:[#allocation2 + $0x78] sm:$0xff] }
  0xfd   : > { %1268 = vst.msk [vmem:[%s2040_s3 + $0x100] sm:$0xff] %vm242_vm0, %v1204_v19  ;;  %1141 = vst.msk [vmem:[#allocation2 + $0x120] sm:$0xff] %vm242_vm0, %v1076_v16  ;;  %v1175_v26 = vld [vmem:[#allocation2 + $0x18] sm:$0xff]  ;;  %v804_v28 = vpop.f32.mrf.mxu0  ;;  %v932_v29 = vpop.f32.mrf.mxu1 }
  0xfe   : > { %v1207_v27 = vld [vmem:[#allocation2 + $0x118] sm:$0xff]  ;;  %1239 = vst.msk [vmem:[%s2040_s3 + $0x18] sm:$0xff] %vm242_vm0, %v1175_v26  ;;  %1112 = vst.msk [vmem:[#allocation2 + $0x38] sm:$0xff] %vm242_vm0, %v1047_v23  ;;  %v1045_v31 = vadd.f32 %v804_v28, %v312_v17  ;;  %v1077_v32 = vadd.f32 %v932_v29, %v344_v22  ;;  %v320_v17 = vld [vmem:[#allocation2 + $0x68] sm:$0xff] }
  0xff   : > { %1271 = vst.msk [vmem:[%s2040_s3 + $0x118] sm:$0xff] %vm242_vm0, %v1207_v27  ;;  %1144 = vst.msk [vmem:[#allocation2 + $0x138] sm:$0xff] %vm242_vm0, %v1079_v24  ;;  %v1173_v34 = vld [vmem:[#allocation2 + $0x8] sm:$0xff]  ;;  %v1562_v36 = vpop.f32.mrf.mxu0  ;;  %v1594_v37 = vpop.f32.mrf.mxu1  ;;  %v354_v14 = vld [vmem:[#allocation2 + $0x178] sm:$0xff] }
 0x100   : > { %v1205_v35 = vld [vmem:[#allocation2 + $0x108] sm:$0xff]  ;;  %1237 = vst.msk [vmem:[%s2040_s3 + $0x8] sm:$0xff] %vm242_vm0, %v1173_v34  ;;  %1110 = vst.msk [vmem:[#allocation2 + $0x28] sm:$0xff] %vm242_vm0, %v1045_v31  ;;  %v1050_v39 = vadd.f32 %v1562_v36, %v317_v25  ;;  %v1082_v40 = vadd.f32 %v1594_v37, %v349_v30  ;;  %v325_v25 = vld [vmem:[#allocation2 + $0x90] sm:$0xff] }
 0x101   : > { %1269 = vst.msk [vmem:[%s2040_s3 + $0x108] sm:$0xff] %vm242_vm0, %v1205_v35  ;;  %1142 = vst.msk [vmem:[#allocation2 + $0x128] sm:$0xff] %vm242_vm0, %v1077_v32  ;;  %v1178_v42 = vld [vmem:[#allocation2 + $0x30] sm:$0xff]  ;;  %v817_v44 = vpop.f32.mrf.mxu0  ;;  %v945_v45 = vpop.f32.mrf.mxu1  ;;  %v352_v22 = vld [vmem:[#allocation2 + $0x168] sm:$0xff] }
 0x102   : > { %v1210_v43 = vld [vmem:[#allocation2 + $0x130] sm:$0xff]  ;;  %1242 = vst.msk [vmem:[%s2040_s3 + $0x30] sm:$0xff] %vm242_vm0, %v1178_v42  ;;  %1115 = vst.msk [vmem:[#allocation2 + $0x50] sm:$0xff] %vm242_vm0, %v1050_v39  ;;  %v1048_v47 = vadd.f32 %v817_v44, %v315_v33  ;;  %v1080_v48 = vadd.f32 %v945_v45, %v347_v38  ;;  %v323_v33 = vld [vmem:[#allocation2 + $0x80] sm:$0xff] }
 0x103   : > { %1274 = vst.msk [vmem:[%s2040_s3 + $0x130] sm:$0xff] %vm242_vm0, %v1210_v43  ;;  %1147 = vst.msk [vmem:[#allocation2 + $0x150] sm:$0xff] %vm242_vm0, %v1082_v40  ;;  %v1176_v50 = vld [vmem:[#allocation2 + $0x20] sm:$0xff]  ;;  %v1563_v52 = vpop.f32.mrf.mxu0  ;;  %v1595_v53 = vpop.f32.mrf.mxu1  ;;  %v357_v30 = vld [vmem:[#allocation2 + $0x190] sm:$0xff] }
 0x104   : > { %v1208_v51 = vld [vmem:[#allocation2 + $0x120] sm:$0xff]  ;;  %1240 = vst.msk [vmem:[%s2040_s3 + $0x20] sm:$0xff] %vm242_vm0, %v1176_v50  ;;  %1113 = vst.msk [vmem:[#allocation2 + $0x40] sm:$0xff] %vm242_vm0, %v1048_v47  ;;  %v1051_v55 = vadd.f32 %v1563_v52, %v318_v41  ;;  %v1083_v56 = vadd.f32 %v1595_v53, %v350_v46  ;;  %v326_v41 = vld [vmem:[#allocation2 + $0x98] sm:$0xff] }
 0x105   : > { %1272 = vst.msk [vmem:[%s2040_s3 + $0x120] sm:$0xff] %vm242_vm0, %v1208_v51  ;;  %1145 = vst.msk [vmem:[#allocation2 + $0x140] sm:$0xff] %vm242_vm0, %v1080_v48  ;;  %v1179_v58 = vld [vmem:[#allocation2 + $0x38] sm:$0xff]  ;;  %v820_v60 = vpop.f32.mrf.mxu0  ;;  %v948_v61 = vpop.f32.mrf.mxu1  ;;  %v355_v38 = vld [vmem:[#allocation2 + $0x180] sm:$0xff] }
 0x106   : > { %v1211_v59 = vld [vmem:[#allocation2 + $0x138] sm:$0xff]  ;;  %1243 = vst.msk [vmem:[%s2040_s3 + $0x38] sm:$0xff] %vm242_vm0, %v1179_v58  ;;  %1116 = vst.msk [vmem:[#allocation2 + $0x58] sm:$0xff] %vm242_vm0, %v1051_v55  ;;  %v1049_v63 = vadd.f32 %v820_v60, %v316_v49  ;;  %v1081_v0 = vadd.f32 %v948_v61, %v348_v54  ;;  %v324_v49 = vld [vmem:[#allocation2 + $0x88] sm:$0xff] }
 0x107   : > { %1275 = vst.msk [vmem:[%s2040_s3 + $0x138] sm:$0xff] %vm242_vm0, %v1211_v59  ;;  %1148 = vst.msk [vmem:[#allocation2 + $0x158] sm:$0xff] %vm242_vm0, %v1083_v56  ;;  %v1177_v2 = vld [vmem:[#allocation2 + $0x28] sm:$0xff]  ;;  %v1566_v4 = vpop.f32.mrf.mxu0  ;;  %v1598_v5 = vpop.f32.mrf.mxu1  ;;  %v358_v46 = vld [vmem:[#allocation2 + $0x198] sm:$0xff] }
 0x108   : > { %v1209_v3 = vld [vmem:[#allocation2 + $0x128] sm:$0xff]  ;;  %1241 = vst.msk [vmem:[%s2040_s3 + $0x28] sm:$0xff] %vm242_vm0, %v1177_v2  ;;  %1114 = vst.msk [vmem:[#allocation2 + $0x48] sm:$0xff] %vm242_vm0, %v1049_v63  ;;  %v1054_v7 = vadd.f32 %v1566_v4, %v321_v57  ;;  %v1086_v8 = vadd.f32 %v1598_v5, %v353_v62  ;;  %v329_v57 = vld [vmem:[#allocation2 + $0xb0] sm:$0xff] }
 0x109   : > { %1273 = vst.msk [vmem:[%s2040_s3 + $0x128] sm:$0xff] %vm242_vm0, %v1209_v3  ;;  %1146 = vst.msk [vmem:[#allocation2 + $0x148] sm:$0xff] %vm242_vm0, %v1081_v0  ;;  %v1182_v10 = vld [vmem:[#allocation2 + $0x50] sm:$0xff]  ;;  %v833_v12 = vpop.f32.mrf.mxu0  ;;  %v961_v13 = vpop.f32.mrf.mxu1  ;;  %v356_v54 = vld [vmem:[#allocation2 + $0x188] sm:$0xff] }
 0x10a   : > { %v1214_v11 = vld [vmem:[#allocation2 + $0x150] sm:$0xff]  ;;  %1246 = vst.msk [vmem:[%s2040_s3 + $0x50] sm:$0xff] %vm242_vm0, %v1182_v10  ;;  %1119 = vst.msk [vmem:[#allocation2 + $0x70] sm:$0xff] %vm242_vm0, %v1054_v7  ;;  %v1052_v15 = vadd.f32 %v833_v12, %v319_v1  ;;  %v1084_v16 = vadd.f32 %v961_v13, %v351_v6  ;;  %v327_v1 = vld [vmem:[#allocation2 + $0xa0] sm:$0xff] }
 0x10b   : > { %1278 = vst.msk [vmem:[%s2040_s3 + $0x150] sm:$0xff] %vm242_vm0, %v1214_v11  ;;  %1151 = vst.msk [vmem:[#allocation2 + $0x170] sm:$0xff] %vm242_vm0, %v1086_v8  ;;  %v1180_v18 = vld [vmem:[#allocation2 + $0x40] sm:$0xff]  ;;  %v1567_v20 = vpop.f32.mrf.mxu0  ;;  %v1599_v21 = vpop.f32.mrf.mxu1  ;;  %v361_v62 = vld [vmem:[#allocation2 + $0x1b0] sm:$0xff] }
 0x10c   : > { %v1212_v19 = vld [vmem:[#allocation2 + $0x140] sm:$0xff]  ;;  %1244 = vst.msk [vmem:[%s2040_s3 + $0x40] sm:$0xff] %vm242_vm0, %v1180_v18  ;;  %1117 = vst.msk [vmem:[#allocation2 + $0x60] sm:$0xff] %vm242_vm0, %v1052_v15  ;;  %v1055_v23 = vadd.f32 %v1567_v20, %v322_v9  ;;  %v1087_v24 = vadd.f32 %v1599_v21, %v354_v14  ;;  %v330_v9 = vld [vmem:[#allocation2 + $0xb8] sm:$0xff] }
 0x10d   : > { %1276 = vst.msk [vmem:[%s2040_s3 + $0x140] sm:$0xff] %vm242_vm0, %v1212_v19  ;;  %1149 = vst.msk [vmem:[#allocation2 + $0x160] sm:$0xff] %vm242_vm0, %v1084_v16  ;;  %v1183_v26 = vld [vmem:[#allocation2 + $0x58] sm:$0xff]  ;;  %v836_v28 = vpop.f32.mrf.mxu0  ;;  %v964_v29 = vpop.f32.mrf.mxu1  ;;  %v359_v6 = vld [vmem:[#allocation2 + $0x1a0] sm:$0xff] }
 0x10e   : > { %v1215_v27 = vld [vmem:[#allocation2 + $0x158] sm:$0xff]  ;;  %1247 = vst.msk [vmem:[%s2040_s3 + $0x58] sm:$0xff] %vm242_vm0, %v1183_v26  ;;  %1120 = vst.msk [vmem:[#allocation2 + $0x78] sm:$0xff] %vm242_vm0, %v1055_v23  ;;  %v1053_v31 = vadd.f32 %v836_v28, %v320_v17  ;;  %v1085_v32 = vadd.f32 %v964_v29, %v352_v22  ;;  %v328_v17 = vld [vmem:[#allocation2 + $0xa8] sm:$0xff] }
 0x10f   : > { %1279 = vst.msk [vmem:[%s2040_s3 + $0x158] sm:$0xff] %vm242_vm0, %v1215_v27  ;;  %1152 = vst.msk [vmem:[#allocation2 + $0x178] sm:$0xff] %vm242_vm0, %v1087_v24  ;;  %v1181_v34 = vld [vmem:[#allocation2 + $0x48] sm:$0xff]  ;;  %v1570_v36 = vpop.f32.mrf.mxu0  ;;  %v1602_v37 = vpop.f32.mrf.mxu1  ;;  %v362_v14 = vld [vmem:[#allocation2 + $0x1b8] sm:$0xff] }
 0x110   : > { %v1213_v35 = vld [vmem:[#allocation2 + $0x148] sm:$0xff]  ;;  %1245 = vst.msk [vmem:[%s2040_s3 + $0x48] sm:$0xff] %vm242_vm0, %v1181_v34  ;;  %1118 = vst.msk [vmem:[#allocation2 + $0x68] sm:$0xff] %vm242_vm0, %v1053_v31  ;;  %v1058_v39 = vadd.f32 %v1570_v36, %v325_v25  ;;  %v1090_v40 = vadd.f32 %v1602_v37, %v357_v30  ;;  %v333_v25 = vld [vmem:[#allocation2 + $0xd0] sm:$0xff] }
 0x111   : > { %1277 = vst.msk [vmem:[%s2040_s3 + $0x148] sm:$0xff] %vm242_vm0, %v1213_v35  ;;  %1150 = vst.msk [vmem:[#allocation2 + $0x168] sm:$0xff] %vm242_vm0, %v1085_v32  ;;  %v1186_v42 = vld [vmem:[#allocation2 + $0x70] sm:$0xff]  ;;  %v849_v44 = vpop.f32.mrf.mxu0  ;;  %v977_v45 = vpop.f32.mrf.mxu1  ;;  %v360_v22 = vld [vmem:[#allocation2 + $0x1a8] sm:$0xff] }
 0x112   : > { %v1218_v43 = vld [vmem:[#allocation2 + $0x170] sm:$0xff]  ;;  %1250 = vst.msk [vmem:[%s2040_s3 + $0x70] sm:$0xff] %vm242_vm0, %v1186_v42  ;;  %1123 = vst.msk [vmem:[#allocation2 + $0x90] sm:$0xff] %vm242_vm0, %v1058_v39  ;;  %v1056_v47 = vadd.f32 %v849_v44, %v323_v33  ;;  %v1088_v48 = vadd.f32 %v977_v45, %v355_v38  ;;  %v331_v33 = vld [vmem:[#allocation2 + $0xc0] sm:$0xff] }
 0x113   : > { %1282 = vst.msk [vmem:[%s2040_s3 + $0x170] sm:$0xff] %vm242_vm0, %v1218_v43  ;;  %1155 = vst.msk [vmem:[#allocation2 + $0x190] sm:$0xff] %vm242_vm0, %v1090_v40  ;;  %v1184_v50 = vld [vmem:[#allocation2 + $0x60] sm:$0xff]  ;;  %v1571_v52 = vpop.f32.mrf.mxu0  ;;  %v1603_v53 = vpop.f32.mrf.mxu1  ;;  %v365_v30 = vld [vmem:[#allocation2 + $0x1d0] sm:$0xff] }
 0x114   : > { %v1216_v51 = vld [vmem:[#allocation2 + $0x160] sm:$0xff]  ;;  %1248 = vst.msk [vmem:[%s2040_s3 + $0x60] sm:$0xff] %vm242_vm0, %v1184_v50  ;;  %1121 = vst.msk [vmem:[#allocation2 + $0x80] sm:$0xff] %vm242_vm0, %v1056_v47  ;;  %v1059_v55 = vadd.f32 %v1571_v52, %v326_v41  ;;  %v1091_v56 = vadd.f32 %v1603_v53, %v358_v46  ;;  %v334_v41 = vld [vmem:[#allocation2 + $0xd8] sm:$0xff] }
 0x115   : > { %1280 = vst.msk [vmem:[%s2040_s3 + $0x160] sm:$0xff] %vm242_vm0, %v1216_v51  ;;  %1153 = vst.msk [vmem:[#allocation2 + $0x180] sm:$0xff] %vm242_vm0, %v1088_v48  ;;  %v1187_v58 = vld [vmem:[#allocation2 + $0x78] sm:$0xff]  ;;  %v852_v60 = vpop.f32.mrf.mxu0  ;;  %v980_v61 = vpop.f32.mrf.mxu1  ;;  %v363_v38 = vld [vmem:[#allocation2 + $0x1c0] sm:$0xff] }
 0x116   : > { %v1219_v59 = vld [vmem:[#allocation2 + $0x178] sm:$0xff]  ;;  %1251 = vst.msk [vmem:[%s2040_s3 + $0x78] sm:$0xff] %vm242_vm0, %v1187_v58  ;;  %1124 = vst.msk [vmem:[#allocation2 + $0x98] sm:$0xff] %vm242_vm0, %v1059_v55  ;;  %v1057_v63 = vadd.f32 %v852_v60, %v324_v49  ;;  %v1089_v0 = vadd.f32 %v980_v61, %v356_v54  ;;  %v332_v49 = vld [vmem:[#allocation2 + $0xc8] sm:$0xff] }
 0x117   : > { %1283 = vst.msk [vmem:[%s2040_s3 + $0x178] sm:$0xff] %vm242_vm0, %v1219_v59  ;;  %1156 = vst.msk [vmem:[#allocation2 + $0x198] sm:$0xff] %vm242_vm0, %v1091_v56  ;;  %v1185_v2 = vld [vmem:[#allocation2 + $0x68] sm:$0xff]  ;;  %v1574_v4 = vpop.f32.mrf.mxu0  ;;  %v1606_v5 = vpop.f32.mrf.mxu1  ;;  %v366_v46 = vld [vmem:[#allocation2 + $0x1d8] sm:$0xff] }
 0x118   : > { %v1217_v3 = vld [vmem:[#allocation2 + $0x168] sm:$0xff]  ;;  %1249 = vst.msk [vmem:[%s2040_s3 + $0x68] sm:$0xff] %vm242_vm0, %v1185_v2  ;;  %1122 = vst.msk [vmem:[#allocation2 + $0x88] sm:$0xff] %vm242_vm0, %v1057_v63  ;;  %v1062_v7 = vadd.f32 %v1574_v4, %v329_v57  ;;  %v1094_v8 = vadd.f32 %v1606_v5, %v361_v62  ;;  %v337_v57 = vld [vmem:[#allocation2 + $0xf0] sm:$0xff] }
 0x119   : > { %1281 = vst.msk [vmem:[%s2040_s3 + $0x168] sm:$0xff] %vm242_vm0, %v1217_v3  ;;  %1154 = vst.msk [vmem:[#allocation2 + $0x188] sm:$0xff] %vm242_vm0, %v1089_v0  ;;  %v1190_v10 = vld [vmem:[#allocation2 + $0x90] sm:$0xff]  ;;  %v865_v12 = vpop.f32.mrf.mxu0  ;;  %v993_v13 = vpop.f32.mrf.mxu1  ;;  %v364_v54 = vld [vmem:[#allocation2 + $0x1c8] sm:$0xff] }
 0x11a   : > { %v1222_v11 = vld [vmem:[#allocation2 + $0x190] sm:$0xff]  ;;  %1254 = vst.msk [vmem:[%s2040_s3 + $0x90] sm:$0xff] %vm242_vm0, %v1190_v10  ;;  %1127 = vst.msk [vmem:[#allocation2 + $0xb0] sm:$0xff] %vm242_vm0, %v1062_v7  ;;  %v1060_v15 = vadd.f32 %v865_v12, %v327_v1  ;;  %v1092_v16 = vadd.f32 %v993_v13, %v359_v6  ;;  %v335_v1 = vld [vmem:[#allocation2 + $0xe0] sm:$0xff] }
 0x11b   : > { %1286 = vst.msk [vmem:[%s2040_s3 + $0x190] sm:$0xff] %vm242_vm0, %v1222_v11  ;;  %1159 = vst.msk [vmem:[#allocation2 + $0x1b0] sm:$0xff] %vm242_vm0, %v1094_v8  ;;  %v1188_v18 = vld [vmem:[#allocation2 + $0x80] sm:$0xff]  ;;  %v1575_v20 = vpop.f32.mrf.mxu0  ;;  %v1607_v21 = vpop.f32.mrf.mxu1  ;;  %v369_v62 = vld [vmem:[#allocation2 + $0x1f0] sm:$0xff] }
 0x11c   : > { %v1220_v19 = vld [vmem:[#allocation2 + $0x180] sm:$0xff]  ;;  %1252 = vst.msk [vmem:[%s2040_s3 + $0x80] sm:$0xff] %vm242_vm0, %v1188_v18  ;;  %1125 = vst.msk [vmem:[#allocation2 + $0xa0] sm:$0xff] %vm242_vm0, %v1060_v15  ;;  %v1063_v23 = vadd.f32 %v1575_v20, %v330_v9  ;;  %v1095_v24 = vadd.f32 %v1607_v21, %v362_v14  ;;  %v338_v9 = vld [vmem:[#allocation2 + $0xf8] sm:$0xff] }
 0x11d   : > { %1284 = vst.msk [vmem:[%s2040_s3 + $0x180] sm:$0xff] %vm242_vm0, %v1220_v19  ;;  %1157 = vst.msk [vmem:[#allocation2 + $0x1a0] sm:$0xff] %vm242_vm0, %v1092_v16  ;;  %v1191_v26 = vld [vmem:[#allocation2 + $0x98] sm:$0xff]  ;;  %v868_v28 = vpop.f32.mrf.mxu0  ;;  %v996_v29 = vpop.f32.mrf.mxu1  ;;  %v367_v6 = vld [vmem:[#allocation2 + $0x1e0] sm:$0xff] }
 0x11e   : > { %v1223_v27 = vld [vmem:[#allocation2 + $0x198] sm:$0xff]  ;;  %1255 = vst.msk [vmem:[%s2040_s3 + $0x98] sm:$0xff] %vm242_vm0, %v1191_v26  ;;  %1128 = vst.msk [vmem:[#allocation2 + $0xb8] sm:$0xff] %vm242_vm0, %v1063_v23  ;;  %v1061_v31 = vadd.f32 %v868_v28, %v328_v17  ;;  %v1093_v32 = vadd.f32 %v996_v29, %v360_v22  ;;  %v336_v17 = vld [vmem:[#allocation2 + $0xe8] sm:$0xff] }
 0x11f   : > { %1287 = vst.msk [vmem:[%s2040_s3 + $0x198] sm:$0xff] %vm242_vm0, %v1223_v27  ;;  %1160 = vst.msk [vmem:[#allocation2 + $0x1b8] sm:$0xff] %vm242_vm0, %v1095_v24  ;;  %v1189_v34 = vld [vmem:[#allocation2 + $0x88] sm:$0xff]  ;;  %v1578_v36 = vpop.f32.mrf.mxu0  ;;  %v1610_v37 = vpop.f32.mrf.mxu1  ;;  %v370_v14 = vld [vmem:[#allocation2 + $0x1f8] sm:$0xff] }
 0x120   : > { %v1221_v35 = vld [vmem:[#allocation2 + $0x188] sm:$0xff]  ;;  %1253 = vst.msk [vmem:[%s2040_s3 + $0x88] sm:$0xff] %vm242_vm0, %v1189_v34  ;;  %1126 = vst.msk [vmem:[#allocation2 + $0xa8] sm:$0xff] %vm242_vm0, %v1061_v31  ;;  %v1066_v39 = vadd.f32 %v1578_v36, %v333_v25  ;;  %v1098_v40 = vadd.f32 %v1610_v37, %v365_v30 }
 0x121   : > { %1285 = vst.msk [vmem:[%s2040_s3 + $0x188] sm:$0xff] %vm242_vm0, %v1221_v35  ;;  %1158 = vst.msk [vmem:[#allocation2 + $0x1a8] sm:$0xff] %vm242_vm0, %v1093_v32  ;;  %v1194_v42 = vld [vmem:[#allocation2 + $0xb0] sm:$0xff]  ;;  %v881_v44 = vpop.f32.mrf.mxu0  ;;  %v1009_v45 = vpop.f32.mrf.mxu1  ;;  %v368_v22 = vld [vmem:[#allocation2 + $0x1e8] sm:$0xff] }
 0x122   : > { %v1226_v43 = vld [vmem:[#allocation2 + $0x1b0] sm:$0xff]  ;;  %1258 = vst.msk [vmem:[%s2040_s3 + $0xb0] sm:$0xff] %vm242_vm0, %v1194_v42  ;;  %1131 = vst.msk [vmem:[#allocation2 + $0xd0] sm:$0xff] %vm242_vm0, %v1066_v39  ;;  %v1064_v47 = vadd.f32 %v881_v44, %v331_v33  ;;  %v1096_v48 = vadd.f32 %v1009_v45, %v363_v38 }
 0x123   : > { %1290 = vst.msk [vmem:[%s2040_s3 + $0x1b0] sm:$0xff] %vm242_vm0, %v1226_v43  ;;  %1163 = vst.msk [vmem:[#allocation2 + $0x1d0] sm:$0xff] %vm242_vm0, %v1098_v40  ;;  %v1192_v50 = vld [vmem:[#allocation2 + $0xa0] sm:$0xff]  ;;  %v1579_v52 = vpop.f32.mrf.mxu0  ;;  %v1611_v53 = vpop.f32.mrf.mxu1 }
 0x124   : > { %v1224_v51 = vld [vmem:[#allocation2 + $0x1a0] sm:$0xff]  ;;  %1256 = vst.msk [vmem:[%s2040_s3 + $0xa0] sm:$0xff] %vm242_vm0, %v1192_v50  ;;  %1129 = vst.msk [vmem:[#allocation2 + $0xc0] sm:$0xff] %vm242_vm0, %v1064_v47  ;;  %v1067_v55 = vadd.f32 %v1579_v52, %v334_v41  ;;  %v1099_v56 = vadd.f32 %v1611_v53, %v366_v46 }
 0x125   : > { %1288 = vst.msk [vmem:[%s2040_s3 + $0x1a0] sm:$0xff] %vm242_vm0, %v1224_v51  ;;  %1161 = vst.msk [vmem:[#allocation2 + $0x1c0] sm:$0xff] %vm242_vm0, %v1096_v48  ;;  %v1195_v58 = vld [vmem:[#allocation2 + $0xb8] sm:$0xff]  ;;  %v884_v60 = vpop.f32.mrf.mxu0  ;;  %v1012_v61 = vpop.f32.mrf.mxu1 }
 0x126   : > { %v1227_v59 = vld [vmem:[#allocation2 + $0x1b8] sm:$0xff]  ;;  %1259 = vst.msk [vmem:[%s2040_s3 + $0xb8] sm:$0xff] %vm242_vm0, %v1195_v58  ;;  %1132 = vst.msk [vmem:[#allocation2 + $0xd8] sm:$0xff] %vm242_vm0, %v1067_v55  ;;  %v1065_v63 = vadd.f32 %v884_v60, %v332_v49  ;;  %v1097_v0 = vadd.f32 %v1012_v61, %v364_v54 }
 0x127   : > { %1291 = vst.msk [vmem:[%s2040_s3 + $0x1b8] sm:$0xff] %vm242_vm0, %v1227_v59  ;;  %1164 = vst.msk [vmem:[#allocation2 + $0x1d8] sm:$0xff] %vm242_vm0, %v1099_v56  ;;  %v1193_v2 = vld [vmem:[#allocation2 + $0xa8] sm:$0xff]  ;;  %v1582_v4 = vpop.f32.mrf.mxu0  ;;  %v1614_v5 = vpop.f32.mrf.mxu1 }
 0x128   : > { %v1225_v3 = vld [vmem:[#allocation2 + $0x1a8] sm:$0xff]  ;;  %1257 = vst.msk [vmem:[%s2040_s3 + $0xa8] sm:$0xff] %vm242_vm0, %v1193_v2  ;;  %1130 = vst.msk [vmem:[#allocation2 + $0xc8] sm:$0xff] %vm242_vm0, %v1065_v63  ;;  %v1070_v7 = vadd.f32 %v1582_v4, %v337_v57  ;;  %v1102_v8 = vadd.f32 %v1614_v5, %v369_v62 }
 0x129   : > { %1289 = vst.msk [vmem:[%s2040_s3 + $0x1a8] sm:$0xff] %vm242_vm0, %v1225_v3  ;;  %1162 = vst.msk [vmem:[#allocation2 + $0x1c8] sm:$0xff] %vm242_vm0, %v1097_v0  ;;  %v1198_v10 = vld [vmem:[#allocation2 + $0xd0] sm:$0xff]  ;;  %v897_v12 = vpop.f32.mrf.mxu0  ;;  %v1025_v13 = vpop.f32.mrf.mxu1 }
 0x12a   : > { %v1230_v11 = vld [vmem:[#allocation2 + $0x1d0] sm:$0xff]  ;;  %1262 = vst.msk [vmem:[%s2040_s3 + $0xd0] sm:$0xff] %vm242_vm0, %v1198_v10  ;;  %1135 = vst.msk [vmem:[#allocation2 + $0xf0] sm:$0xff] %vm242_vm0, %v1070_v7  ;;  %v1068_v15 = vadd.f32 %v897_v12, %v335_v1  ;;  %v1100_v16 = vadd.f32 %v1025_v13, %v367_v6 }
 0x12b   : > { %1294 = vst.msk [vmem:[%s2040_s3 + $0x1d0] sm:$0xff] %vm242_vm0, %v1230_v11  ;;  %1167 = vst.msk [vmem:[#allocation2 + $0x1f0] sm:$0xff] %vm242_vm0, %v1102_v8  ;;  %v1196_v18 = vld [vmem:[#allocation2 + $0xc0] sm:$0xff]  ;;  %v1583_v20 = vpop.f32.mrf.mxu0  ;;  %v1615_v21 = vpop.f32.mrf.mxu1 }
 0x12c   : > { %v1228_v19 = vld [vmem:[#allocation2 + $0x1c0] sm:$0xff]  ;;  %1260 = vst.msk [vmem:[%s2040_s3 + $0xc0] sm:$0xff] %vm242_vm0, %v1196_v18  ;;  %1133 = vst.msk [vmem:[#allocation2 + $0xe0] sm:$0xff] %vm242_vm0, %v1068_v15  ;;  %v1071_v23 = vadd.f32 %v1583_v20, %v338_v9  ;;  %v1103_v24 = vadd.f32 %v1615_v21, %v370_v14 }
 0x12d   : > { %1292 = vst.msk [vmem:[%s2040_s3 + $0x1c0] sm:$0xff] %vm242_vm0, %v1228_v19  ;;  %1165 = vst.msk [vmem:[#allocation2 + $0x1e0] sm:$0xff] %vm242_vm0, %v1100_v16  ;;  %v1199_v25 = vld [vmem:[#allocation2 + $0xd8] sm:$0xff]  ;;  %v900_v27 = vpop.f32.mrf.mxu0  ;;  %v1028_v28 = vpop.f32.mrf.mxu1 }
 0x12e   : > { %v1231_v26 = vld [vmem:[#allocation2 + $0x1d8] sm:$0xff]  ;;  %1263 = vst.msk [vmem:[%s2040_s3 + $0xd8] sm:$0xff] %vm242_vm0, %v1199_v25  ;;  %1136 = vst.msk [vmem:[#allocation2 + $0xf8] sm:$0xff] %vm242_vm0, %v1071_v23  ;;  %v1069_v29 = vadd.f32 %v900_v27, %v336_v17  ;;  %v1101_v30 = vadd.f32 %v1028_v28, %v368_v22 }
 0x12f   : > { %1295 = vst.msk [vmem:[%s2040_s3 + $0x1d8] sm:$0xff] %vm242_vm0, %v1231_v26  ;;  %1168 = vst.msk [vmem:[#allocation2 + $0x1f8] sm:$0xff] %vm242_vm0, %v1103_v24  ;;  %v1197_v31 = vld [vmem:[#allocation2 + $0xc8] sm:$0xff] }
 0x130   : > { %v1229_v32 = vld [vmem:[#allocation2 + $0x1c8] sm:$0xff]  ;;  %1261 = vst.msk [vmem:[%s2040_s3 + $0xc8] sm:$0xff] %vm242_vm0, %v1197_v31  ;;  %1134 = vst.msk [vmem:[#allocation2 + $0xe8] sm:$0xff] %vm242_vm0, %v1069_v29 }
 0x131   : > { %1293 = vst.msk [vmem:[%s2040_s3 + $0x1c8] sm:$0xff] %vm242_vm0, %v1229_v32  ;;  %1166 = vst.msk [vmem:[#allocation2 + $0x1e8] sm:$0xff] %vm242_vm0, %v1101_v30  ;;  %v1202_v33 = vld [vmem:[#allocation2 + $0xf0] sm:$0xff] }
 0x132   : > { %v1234_v34 = vld [vmem:[#allocation2 + $0x1f0] sm:$0xff]  ;;  %1266 = vst.msk [vmem:[%s2040_s3 + $0xf0] sm:$0xff] %vm242_vm0, %v1202_v33 }
 0x133   : > { %1298 = vst.msk [vmem:[%s2040_s3 + $0x1f0] sm:$0xff] %vm242_vm0, %v1234_v34  ;;  %v1200_v35 = vld [vmem:[#allocation2 + $0xe0] sm:$0xff] }
 0x134   : > { %v1232_v36 = vld [vmem:[#allocation2 + $0x1e0] sm:$0xff]  ;;  %1264 = vst.msk [vmem:[%s2040_s3 + $0xe0] sm:$0xff] %vm242_vm0, %v1200_v35 }
 0x135   : > { %1296 = vst.msk [vmem:[%s2040_s3 + $0x1e0] sm:$0xff] %vm242_vm0, %v1232_v36  ;;  %v1203_v37 = vld [vmem:[#allocation2 + $0xf8] sm:$0xff] }
 0x136   : > { %v1235_v38 = vld [vmem:[#allocation2 + $0x1f8] sm:$0xff]  ;;  %1267 = vst.msk [vmem:[%s2040_s3 + $0xf8] sm:$0xff] %vm242_vm0, %v1203_v37 }
 0x137   : > { %1299 = vst.msk [vmem:[%s2040_s3 + $0x1f8] sm:$0xff] %vm242_vm0, %v1235_v38  ;;  %v1201_v39 = vld [vmem:[#allocation2 + $0xe8] sm:$0xff] }
 0x138   : > { %v1233_v40 = vld [vmem:[#allocation2 + $0x1e8] sm:$0xff]  ;;  %1265 = vst.msk [vmem:[%s2040_s3 + $0xe8] sm:$0xff] %vm242_vm0, %v1201_v39 }
 0x139   : > { %1297 = vst.msk [vmem:[%s2040_s3 + $0x1e8] sm:$0xff] %vm242_vm0, %v1233_v40 }
 0x13a PF: > { %s12_s13 = sadd.s32 1, %s1751_s13   ;;  %s2247_s9 = smov %s1743_s11 }
 0x13b   : > { %p9_p7 = scmp.ge.s32.totalorder %s12_s13, 10   ;;  %s2248_s10 = smov %s1747_s12 }
 0x13c   : > { %s2249_s11 = smov %s2252_s14  ;;  %s2250_s12 = smov %s2256_s15 }
 0x13d   :  { %11 = sbr.rel (!%p9_p7) target bundleno = 3 (0x3), region = 69 }

// kernel: double_conv_up_forward.8
= control target key start
LH: loop header
LB: loop body
LE: loop exit
PB: predicated region body
PF: predicated region fallthrough
CT: control target
= control target key end

     0   :  { %s1638_s9 = smov 0   ;;  %s1640_s10 = smov 0   ;;  %s2085_s0 = inlined_call_operand.vmem [shape: bf16[1,1024,16], index: 0, kind: input, shape index: {}]   ;;  %s2086_s1 = inlined_call_operand.vmem [shape: bf16[1,16,16], index: 1, kind: input, shape index: {}]   ;;  %s2087_s2 = inlined_call_operand.vmem [shape: f32[1,1024,16], index: 2, kind: output, shape index: {}]  }
   0x1   :  { %s1642_s11 = smov 0  }
   0x2 LB: > { %s27_s12 = sadd.s32 1, %s1616_s10  ;;  %p1367_p0 = scmp.ge.s32.totalorder %s1620_s11, 1  ;;  %s1620_s11 = sphi %s1642_s11, %s12_s11   ;;  %s1616_s10 = sphi %s1640_s10, %s2090_s10   ;;  %s1612_s9 = sphi %s1638_s9, %s2089_s9  }
   0x3   : > { %p29_p1 = scmp.ge.s32.totalorder %s27_s12, 2  ;;  %p162_p2 = scmp.lt.s32.totalorder %s1620_s11, 3 }
   0x5   : > { %s2092_s12 = smov (%p29_p1, %s27_s12), 0  ;;  %p163_p3 = pnand %p1367_p0, %p162_p2 }
   0x6   : > { %s1368_s15 = sshll.u32 (!%p163_p3), %s1612_s9, 6 }
   0x7   : > { %166 = sbr.rel (%p163_p3) target bundleno = 284 (0x11c), region = 28  ;;  %p1666_p4 = scmp.lt.s32.totalorder (!%p163_p3), %s1368_s15, 127 }
   0xc   : > { %v1661_v0 = vld [vmem:[%s2086_s1] sm:$0xff]   ;;  %vm242_vm0 = vcmask 130048   ;;  %v1622_v1 = vmov 0.0   ;;  %s2094_s15 = smov (!%p1666_p4, %s1368_s15), 127 }
   0xd   : > { %1472 = vmatprep.subr.bf16.mxu0 %v1661_v0  ;;  %1538 = vmatprep.subr.bf16.mxu1 %v1661_v0  ;;  %245 = vst.msk [vmem:[#allocation2 + $0x10] sm:$0xff] %vm242_vm0, %v1622_v1  ;;  %243 = vst.msk [vmem:[#allocation2] sm:$0xff] %vm242_vm0, %v1622_v1  ;;  %s1369_s17 = sshll.u32 %s2094_s15, 2  ;;  %s1371_s21 = sshll.u32 %s2094_s15, 3 }
   0xe   : > { %244 = vst.msk [vmem:[#allocation2 + $0x8] sm:$0xff] %vm242_vm0, %v1622_v1  ;;  %246 = vst.msk [vmem:[#allocation2 + $0x18] sm:$0xff] %vm242_vm0, %v1622_v1  ;;  %1473 = vmatpush3.bf16.msra.mxu0 %v1661_v0  ;;  %1539 = vmatpush3.bf16.msra.mxu1 %v1661_v0  ;;  %s1812_s20 = scalar_lea.vmem %s2085_s0, %s1369_s17  ;;  %s1887_s24 = scalar_lea.vmem %s2087_s2, %s1371_s21 }
   0xf   : > { %247 = vst.msk [vmem:[#allocation2 + $0x20] sm:$0xff] %vm242_vm0, %v1622_v1  ;;  %248 = vst.msk [vmem:[#allocation2 + $0x28] sm:$0xff] %vm242_vm0, %v1622_v1  ;;  %v1566_v2 = vld [vmem:[%s1812_s20] sm:$0xff]   ;;  %v1568_v4 = vld [vmem:[%s1812_s20 + $0x8] sm:$0xff]  }
  0x10   : > { %249 = vst.msk [vmem:[#allocation2 + $0x30] sm:$0xff] %vm242_vm0, %v1622_v1  ;;  %250 = vst.msk [vmem:[#allocation2 + $0x38] sm:$0xff] %vm242_vm0, %v1622_v1  ;;  %v1567_v3 = vld [vmem:[%s1812_s20 + $0x80] sm:$0xff]   ;;  %1474 = vmatprep.mubr.msk.bf16.mxu0 %vm242_vm0, %v1566_v2  ;;  %v1569_v5 = vld [vmem:[%s1812_s20 + $0x88] sm:$0xff]  }
  0x11   : > { %251 = vst.msk [vmem:[#allocation2 + $0x40] sm:$0xff] %vm242_vm0, %v1622_v1  ;;  %252 = vst.msk [vmem:[#allocation2 + $0x48] sm:$0xff] %vm242_vm0, %v1622_v1  ;;  %1506 = vmatprep.mubr.msk.bf16.mxu1 %vm242_vm0, %v1567_v3  ;;  %1475 = vmatmul.mubr.msk.bf16.vlgmr.msra.gmra.mxu0 %vm242_vm0, %v1568_v4  ;;  %v1570_v6 = vld [vmem:[%s1812_s20 + $0x10] sm:$0xff]   ;;  %v1572_v8 = vld [vmem:[%s1812_s20 + $0x18] sm:$0xff]  }
  0x12   : > { %253 = vst.msk [vmem:[#allocation2 + $0x50] sm:$0xff] %vm242_vm0, %v1622_v1  ;;  %254 = vst.msk [vmem:[#allocation2 + $0x58] sm:$0xff] %vm242_vm0, %v1622_v1  ;;  %1507 = vmatmul.mubr.msk.bf16.vlgmr.msra.gmra.mxu1 %vm242_vm0, %v1569_v5  ;;  %v1571_v7 = vld [vmem:[%s1812_s20 + $0x90] sm:$0xff]   ;;  %1478 = vmatprep.mubr.msk.bf16.mxu0 %vm242_vm0, %v1570_v6  ;;  %v1573_v9 = vld [vmem:[%s1812_s20 + $0x98] sm:$0xff]  }
  0x13   : > { %255 = vst.msk [vmem:[#allocation2 + $0x60] sm:$0xff] %vm242_vm0, %v1622_v1  ;;  %256 = vst.msk [vmem:[#allocation2 + $0x68] sm:$0xff] %vm242_vm0, %v1622_v1  ;;  %1510 = vmatprep.mubr.msk.bf16.mxu1 %vm242_vm0, %v1571_v7  ;;  %v1574_v10 = vld [vmem:[%s1812_s20 + $0x20] sm:$0xff]   ;;  %v1576_v12 = vld [vmem:[%s1812_s20 + $0x28] sm:$0xff]  }
  0x14   : > { %257 = vst.msk [vmem:[#allocation2 + $0x70] sm:$0xff] %vm242_vm0, %v1622_v1  ;;  %258 = vst.msk [vmem:[#allocation2 + $0x78] sm:$0xff] %vm242_vm0, %v1622_v1  ;;  %v1575_v11 = vld [vmem:[%s1812_s20 + $0xa0] sm:$0xff]   ;;  %v1577_v13 = vld [vmem:[%s1812_s20 + $0xa8] sm:$0xff]  }
  0x15   : > { %259 = vst.msk [vmem:[#allocation2 + $0x80] sm:$0xff] %vm242_vm0, %v1622_v1  ;;  %260 = vst.msk [vmem:[#allocation2 + $0x88] sm:$0xff] %vm242_vm0, %v1622_v1  ;;  %v1578_v14 = vld [vmem:[%s1812_s20 + $0x30] sm:$0xff]   ;;  %v1580_v16 = vld [vmem:[%s1812_s20 + $0x38] sm:$0xff]  }
  0x16   : > { %261 = vst.msk [vmem:[#allocation2 + $0x90] sm:$0xff] %vm242_vm0, %v1622_v1  ;;  %262 = vst.msk [vmem:[#allocation2 + $0x98] sm:$0xff] %vm242_vm0, %v1622_v1  ;;  %v1579_v15 = vld [vmem:[%s1812_s20 + $0xb0] sm:$0xff]   ;;  %v1581_v17 = vld [vmem:[%s1812_s20 + $0xb8] sm:$0xff]  }
  0x17   : > { %263 = vst.msk [vmem:[#allocation2 + $0xa0] sm:$0xff] %vm242_vm0, %v1622_v1  ;;  %264 = vst.msk [vmem:[#allocation2 + $0xa8] sm:$0xff] %vm242_vm0, %v1622_v1  ;;  %v1582_v18 = vld [vmem:[%s1812_s20 + $0x40] sm:$0xff]   ;;  %v1584_v20 = vld [vmem:[%s1812_s20 + $0x48] sm:$0xff]  }
  0x18   : > { %265 = vst.msk [vmem:[#allocation2 + $0xb0] sm:$0xff] %vm242_vm0, %v1622_v1  ;;  %266 = vst.msk [vmem:[#allocation2 + $0xb8] sm:$0xff] %vm242_vm0, %v1622_v1  ;;  %v1583_v19 = vld [vmem:[%s1812_s20 + $0xc0] sm:$0xff]   ;;  %v1585_v21 = vld [vmem:[%s1812_s20 + $0xc8] sm:$0xff]  }
  0x19   : > { %267 = vst.msk [vmem:[#allocation2 + $0xc0] sm:$0xff] %vm242_vm0, %v1622_v1  ;;  %268 = vst.msk [vmem:[#allocation2 + $0xc8] sm:$0xff] %vm242_vm0, %v1622_v1  ;;  %1479 = vmatmul.mubr.msk.bf16.gmra.mxu0 %vm242_vm0, %v1572_v8  ;;  %v1586_v22 = vld [vmem:[%s1812_s20 + $0x50] sm:$0xff]   ;;  %v1588_v24 = vld [vmem:[%s1812_s20 + $0x58] sm:$0xff]  }
  0x1a   : > { %269 = vst.msk [vmem:[#allocation2 + $0xd0] sm:$0xff] %vm242_vm0, %v1622_v1  ;;  %270 = vst.msk [vmem:[#allocation2 + $0xd8] sm:$0xff] %vm242_vm0, %v1622_v1  ;;  %1511 = vmatmul.mubr.msk.bf16.gmra.mxu1 %vm242_vm0, %v1573_v9  ;;  %1482 = vmatprep.mubr.msk.bf16.mxu0 %vm242_vm0, %v1574_v10  ;;  %v1587_v23 = vld [vmem:[%s1812_s20 + $0xd0] sm:$0xff]   ;;  %v1589_v25 = vld [vmem:[%s1812_s20 + $0xd8] sm:$0xff]  }
  0x1b   : > { %271 = vst.msk [vmem:[#allocation2 + $0xe0] sm:$0xff] %vm242_vm0, %v1622_v1  ;;  %272 = vst.msk [vmem:[#allocation2 + $0xe8] sm:$0xff] %vm242_vm0, %v1622_v1  ;;  %1514 = vmatprep.mubr.msk.bf16.mxu1 %vm242_vm0, %v1575_v11  ;;  %v1590_v26 = vld [vmem:[%s1812_s20 + $0x60] sm:$0xff]   ;;  %v1592_v28 = vld [vmem:[%s1812_s20 + $0x68] sm:$0xff]  }
  0x1c   : > { %273 = vst.msk [vmem:[#allocation2 + $0xf0] sm:$0xff] %vm242_vm0, %v1622_v1  ;;  %274 = vst.msk [vmem:[#allocation2 + $0xf8] sm:$0xff] %vm242_vm0, %v1622_v1  ;;  %v1591_v27 = vld [vmem:[%s1812_s20 + $0xe0] sm:$0xff]   ;;  %v1593_v29 = vld [vmem:[%s1812_s20 + $0xe8] sm:$0xff]  }
  0x1d   : > { %275 = vst.msk [vmem:[#allocation2 + $0x100] sm:$0xff] %vm242_vm0, %v1622_v1  ;;  %276 = vst.msk [vmem:[#allocation2 + $0x108] sm:$0xff] %vm242_vm0, %v1622_v1  ;;  %v1594_v30 = vld [vmem:[%s1812_s20 + $0x70] sm:$0xff]   ;;  %v1596_v32 = vld [vmem:[%s1812_s20 + $0x78] sm:$0xff]  }
  0x1e   : > { %277 = vst.msk [vmem:[#allocation2 + $0x110] sm:$0xff] %vm242_vm0, %v1622_v1  ;;  %278 = vst.msk [vmem:[#allocation2 + $0x118] sm:$0xff] %vm242_vm0, %v1622_v1  ;;  %v1595_v31 = vld [vmem:[%s1812_s20 + $0xf0] sm:$0xff]   ;;  %v1597_v33 = vld [vmem:[%s1812_s20 + $0xf8] sm:$0xff]  }
  0x1f   : > { %279 = vst.msk [vmem:[#allocation2 + $0x120] sm:$0xff] %vm242_vm0, %v1622_v1  ;;  %280 = vst.msk [vmem:[#allocation2 + $0x128] sm:$0xff] %vm242_vm0, %v1622_v1  ;;  %v309_v34 = vld [vmem:[#allocation2 + $0x10] sm:$0xff]  ;;  %v307_v37 = vld [vmem:[#allocation2] sm:$0xff] }
  0x20   : > { %281 = vst.msk [vmem:[#allocation2 + $0x130] sm:$0xff] %vm242_vm0, %v1622_v1  ;;  %282 = vst.msk [vmem:[#allocation2 + $0x138] sm:$0xff] %vm242_vm0, %v1622_v1  ;;  %v310_v43 = vld [vmem:[#allocation2 + $0x18] sm:$0xff]  ;;  %v308_v49 = vld [vmem:[#allocation2 + $0x8] sm:$0xff] }
  0x21   : > { %283 = vst.msk [vmem:[#allocation2 + $0x140] sm:$0xff] %vm242_vm0, %v1622_v1  ;;  %284 = vst.msk [vmem:[#allocation2 + $0x148] sm:$0xff] %vm242_vm0, %v1622_v1  ;;  %1483 = vmatmul.mubr.msk.bf16.gmra.mxu0 %vm242_vm0, %v1576_v12  ;;  %v313_v55 = vld [vmem:[#allocation2 + $0x30] sm:$0xff]  ;;  %v311_v61 = vld [vmem:[#allocation2 + $0x20] sm:$0xff] }
  0x22   : > { %285 = vst.msk [vmem:[#allocation2 + $0x150] sm:$0xff] %vm242_vm0, %v1622_v1  ;;  %286 = vst.msk [vmem:[#allocation2 + $0x158] sm:$0xff] %vm242_vm0, %v1622_v1  ;;  %1515 = vmatmul.mubr.msk.bf16.gmra.mxu1 %vm242_vm0, %v1577_v13  ;;  %1486 = vmatprep.mubr.msk.bf16.mxu0 %vm242_vm0, %v1578_v14  ;;  %v314_v4 = vld [vmem:[#allocation2 + $0x38] sm:$0xff]  ;;  %v312_v12 = vld [vmem:[#allocation2 + $0x28] sm:$0xff] }
  0x23   : > { %287 = vst.msk [vmem:[#allocation2 + $0x160] sm:$0xff] %vm242_vm0, %v1622_v1  ;;  %288 = vst.msk [vmem:[#allocation2 + $0x168] sm:$0xff] %vm242_vm0, %v1622_v1  ;;  %1518 = vmatprep.mubr.msk.bf16.mxu1 %vm242_vm0, %v1579_v15 }
  0x24   : > { %289 = vst.msk [vmem:[#allocation2 + $0x170] sm:$0xff] %vm242_vm0, %v1622_v1  ;;  %290 = vst.msk [vmem:[#allocation2 + $0x178] sm:$0xff] %vm242_vm0, %v1622_v1  ;;  %v339_v40 = vld [vmem:[#allocation2 + $0x100] sm:$0xff]  ;;  %v340_v52 = vld [vmem:[#allocation2 + $0x108] sm:$0xff] }
  0x25   : > { %291 = vst.msk [vmem:[#allocation2 + $0x180] sm:$0xff] %vm242_vm0, %v1622_v1  ;;  %292 = vst.msk [vmem:[#allocation2 + $0x188] sm:$0xff] %vm242_vm0, %v1622_v1  ;;  %v341_v35 = vld [vmem:[#allocation2 + $0x110] sm:$0xff]  ;;  %v342_v46 = vld [vmem:[#allocation2 + $0x118] sm:$0xff] }
  0x26   : > { %293 = vst.msk [vmem:[#allocation2 + $0x190] sm:$0xff] %vm242_vm0, %v1622_v1  ;;  %294 = vst.msk [vmem:[#allocation2 + $0x198] sm:$0xff] %vm242_vm0, %v1622_v1  ;;  %v343_v0 = vld [vmem:[#allocation2 + $0x120] sm:$0xff] }
  0x27   : > { %295 = vst.msk [vmem:[#allocation2 + $0x1a0] sm:$0xff] %vm242_vm0, %v1622_v1  ;;  %296 = vst.msk [vmem:[#allocation2 + $0x1a8] sm:$0xff] %vm242_vm0, %v1622_v1  ;;  %v345_v58 = vld [vmem:[#allocation2 + $0x130] sm:$0xff]  ;;  %v346_v8 = vld [vmem:[#allocation2 + $0x138] sm:$0xff] }
  0x28   : > { %297 = vst.msk [vmem:[#allocation2 + $0x1b0] sm:$0xff] %vm242_vm0, %v1622_v1  ;;  %298 = vst.msk [vmem:[#allocation2 + $0x1b8] sm:$0xff] %vm242_vm0, %v1622_v1 }
  0x29   : > { %299 = vst.msk [vmem:[#allocation2 + $0x1c0] sm:$0xff] %vm242_vm0, %v1622_v1  ;;  %300 = vst.msk [vmem:[#allocation2 + $0x1c8] sm:$0xff] %vm242_vm0, %v1622_v1  ;;  %1487 = vmatmul.mubr.msk.bf16.gmra.mxu0 %vm242_vm0, %v1580_v16  ;;  %v344_v16 = vld [vmem:[#allocation2 + $0x128] sm:$0xff] }
  0x2a   : > { %301 = vst.msk [vmem:[#allocation2 + $0x1d0] sm:$0xff] %vm242_vm0, %v1622_v1  ;;  %302 = vst.msk [vmem:[#allocation2 + $0x1d8] sm:$0xff] %vm242_vm0, %v1622_v1  ;;  %1519 = vmatmul.mubr.msk.bf16.gmra.mxu1 %vm242_vm0, %v1581_v17  ;;  %1490 = vmatprep.mubr.msk.bf16.mxu0 %vm242_vm0, %v1582_v18 }
  0x2b   : > { %303 = vst.msk [vmem:[#allocation2 + $0x1e0] sm:$0xff] %vm242_vm0, %v1622_v1  ;;  %304 = vst.msk [vmem:[#allocation2 + $0x1e8] sm:$0xff] %vm242_vm0, %v1622_v1  ;;  %1522 = vmatprep.mubr.msk.bf16.mxu1 %vm242_vm0, %v1583_v19 }
  0x2c   : > { %305 = vst.msk [vmem:[#allocation2 + $0x1f0] sm:$0xff] %vm242_vm0, %v1622_v1  ;;  %306 = vst.msk [vmem:[#allocation2 + $0x1f8] sm:$0xff] %vm242_vm0, %v1622_v1 }
  0x31   : > { %1491 = vmatmul.mubr.msk.bf16.gmra.mxu0 %vm242_vm0, %v1584_v20  ;;  %v317_v20 = vld [vmem:[#allocation2 + $0x50] sm:$0xff] }
  0x32   : > { %1523 = vmatmul.mubr.msk.bf16.gmra.mxu1 %vm242_vm0, %v1585_v21  ;;  %1494 = vmatprep.mubr.msk.bf16.mxu0 %vm242_vm0, %v1586_v22 }
  0x33   : > { %1526 = vmatprep.mubr.msk.bf16.mxu1 %vm242_vm0, %v1587_v23 }
  0x39   : > { %1495 = vmatmul.mubr.msk.bf16.gmra.mxu0 %vm242_vm0, %v1588_v24  ;;  %v349_v24 = vld [vmem:[#allocation2 + $0x150] sm:$0xff] }
  0x3a   : > { %1527 = vmatmul.mubr.msk.bf16.gmra.mxu1 %vm242_vm0, %v1589_v25  ;;  %1498 = vmatprep.mubr.msk.bf16.mxu0 %vm242_vm0, %v1590_v26 }
  0x3b   : > { %1530 = vmatprep.mubr.msk.bf16.mxu1 %vm242_vm0, %v1591_v27 }
  0x41   : > { %1499 = vmatmul.mubr.msk.bf16.gmra.mxu0 %vm242_vm0, %v1592_v28  ;;  %v315_v28 = vld [vmem:[#allocation2 + $0x40] sm:$0xff] }
  0x42   : > { %1531 = vmatmul.mubr.msk.bf16.gmra.mxu1 %vm242_vm0, %v1593_v29  ;;  %1502 = vmatprep.mubr.msk.bf16.mxu0 %vm242_vm0, %v1594_v30 }
  0x43   : > { %1534 = vmatprep.mubr.msk.bf16.mxu1 %vm242_vm0, %v1595_v31 }
  0x49   : > { %1503 = vmatmul.mubr.msk.bf16.gmra.mxu0 %vm242_vm0, %v1596_v32  ;;  %v347_v32 = vld [vmem:[#allocation2 + $0x140] sm:$0xff] }
  0x4a   : > { %1535 = vmatmul.mubr.msk.bf16.gmra.mxu1 %vm242_vm0, %v1597_v33 }
  0xd1   : > { %v1476_v36 = vpop.f32.mrf.mxu0 }
  0xd2   : > { %v991_v38 = vadd.f32 %v1476_v36, %v309_v34  ;;  %v1508_v39 = vpop.f32.mrf.mxu1  ;;  %v318_v36 = vld [vmem:[#allocation2 + $0x58] sm:$0xff] }
  0xd3   : > { %v1023_v41 = vadd.f32 %v1508_v39, %v341_v35  ;;  %v734_v42 = vpop.f32.mrf.mxu0 }
  0xd4   : > { %1055 = vst.msk [vmem:[#allocation2 + $0x10] sm:$0xff] %vm242_vm0, %v991_v38  ;;  %v989_v44 = vadd.f32 %v734_v42, %v307_v37  ;;  %v862_v45 = vpop.f32.mrf.mxu1 }
  0xd5   : > { %1087 = vst.msk [vmem:[#allocation2 + $0x110] sm:$0xff] %vm242_vm0, %v1023_v41  ;;  %v1021_v47 = vadd.f32 %v862_v45, %v339_v40  ;;  %v1477_v48 = vpop.f32.mrf.mxu0  ;;  %v350_v40 = vld [vmem:[#allocation2 + $0x158] sm:$0xff] }
  0xd6   : > { %1053 = vst.msk [vmem:[#allocation2] sm:$0xff] %vm242_vm0, %v989_v44  ;;  %v992_v50 = vadd.f32 %v1477_v48, %v310_v43  ;;  %v1509_v51 = vpop.f32.mrf.mxu1  ;;  %v316_v44 = vld [vmem:[#allocation2 + $0x48] sm:$0xff] }
  0xd7   : > { %1085 = vst.msk [vmem:[#allocation2 + $0x100] sm:$0xff] %vm242_vm0, %v1021_v47  ;;  %v1024_v53 = vadd.f32 %v1509_v51, %v342_v46  ;;  %v737_v54 = vpop.f32.mrf.mxu0  ;;  %v348_v48 = vld [vmem:[#allocation2 + $0x148] sm:$0xff] }
  0xd8   : > { %1056 = vst.msk [vmem:[#allocation2 + $0x18] sm:$0xff] %vm242_vm0, %v992_v50  ;;  %v990_v56 = vadd.f32 %v737_v54, %v308_v49  ;;  %v865_v57 = vpop.f32.mrf.mxu1 }
  0xd9   : > { %1088 = vst.msk [vmem:[#allocation2 + $0x118] sm:$0xff] %vm242_vm0, %v1024_v53  ;;  %v1022_v59 = vadd.f32 %v865_v57, %v340_v52  ;;  %v1480_v60 = vpop.f32.mrf.mxu0  ;;  %v321_v52 = vld [vmem:[#allocation2 + $0x70] sm:$0xff] }
  0xda   : > { %1054 = vst.msk [vmem:[#allocation2 + $0x8] sm:$0xff] %vm242_vm0, %v990_v56  ;;  %v995_v62 = vadd.f32 %v1480_v60, %v313_v55  ;;  %v1512_v63 = vpop.f32.mrf.mxu1  ;;  %v353_v56 = vld [vmem:[#allocation2 + $0x170] sm:$0xff]  ;;  %v319_v60 = vld [vmem:[#allocation2 + $0x60] sm:$0xff] }
  0xdb   : > { %v1122_v1 = vld [vmem:[#allocation2 + $0x10] sm:$0xff]  ;;  %1086 = vst.msk [vmem:[#allocation2 + $0x108] sm:$0xff] %vm242_vm0, %v1022_v59  ;;  %v1027_v2 = vadd.f32 %v1512_v63, %v345_v58  ;;  %v750_v3 = vpop.f32.mrf.mxu0 }
  0xdc   : > { %1186 = vst.msk [vmem:[%s1887_s24 + $0x10] sm:$0xff] %vm242_vm0, %v1122_v1  ;;  %v1154_v5 = vld [vmem:[#allocation2 + $0x110] sm:$0xff]  ;;  %1059 = vst.msk [vmem:[#allocation2 + $0x30] sm:$0xff] %vm242_vm0, %v995_v62  ;;  %v993_v6 = vadd.f32 %v750_v3, %v311_v61  ;;  %v878_v7 = vpop.f32.mrf.mxu1 }
  0xdd   : > { %1218 = vst.msk [vmem:[%s1887_s24 + $0x110] sm:$0xff] %vm242_vm0, %v1154_v5  ;;  %v1120_v9 = vld [vmem:[#allocation2] sm:$0xff]  ;;  %1091 = vst.msk [vmem:[#allocation2 + $0x130] sm:$0xff] %vm242_vm0, %v1027_v2  ;;  %v1025_v10 = vadd.f32 %v878_v7, %v343_v0  ;;  %v1481_v11 = vpop.f32.mrf.mxu0 }
  0xde   : > { %1184 = vst.msk [vmem:[%s1887_s24] sm:$0xff] %vm242_vm0, %v1120_v9  ;;  %v1152_v13 = vld [vmem:[#allocation2 + $0x100] sm:$0xff]  ;;  %1057 = vst.msk [vmem:[#allocation2 + $0x20] sm:$0xff] %vm242_vm0, %v993_v6  ;;  %v996_v14 = vadd.f32 %v1481_v11, %v314_v4  ;;  %v1513_v15 = vpop.f32.mrf.mxu1  ;;  %v322_v4 = vld [vmem:[#allocation2 + $0x78] sm:$0xff] }
  0xdf   : > { %1216 = vst.msk [vmem:[%s1887_s24 + $0x100] sm:$0xff] %vm242_vm0, %v1152_v13  ;;  %v1123_v17 = vld [vmem:[#allocation2 + $0x18] sm:$0xff]  ;;  %1089 = vst.msk [vmem:[#allocation2 + $0x120] sm:$0xff] %vm242_vm0, %v1025_v10  ;;  %v1028_v18 = vadd.f32 %v1513_v15, %v346_v8  ;;  %v753_v19 = vpop.f32.mrf.mxu0  ;;  %v351_v0 = vld [vmem:[#allocation2 + $0x160] sm:$0xff] }
  0xe0   : > { %1187 = vst.msk [vmem:[%s1887_s24 + $0x18] sm:$0xff] %vm242_vm0, %v1123_v17  ;;  %v1155_v21 = vld [vmem:[#allocation2 + $0x118] sm:$0xff]  ;;  %1060 = vst.msk [vmem:[#allocation2 + $0x38] sm:$0xff] %vm242_vm0, %v996_v14  ;;  %v994_v22 = vadd.f32 %v753_v19, %v312_v12  ;;  %v881_v23 = vpop.f32.mrf.mxu1  ;;  %v320_v12 = vld [vmem:[#allocation2 + $0x68] sm:$0xff] }
  0xe1   : > { %1219 = vst.msk [vmem:[%s1887_s24 + $0x118] sm:$0xff] %vm242_vm0, %v1155_v21  ;;  %v1121_v25 = vld [vmem:[#allocation2 + $0x8] sm:$0xff]  ;;  %1092 = vst.msk [vmem:[#allocation2 + $0x138] sm:$0xff] %vm242_vm0, %v1028_v18  ;;  %v1026_v26 = vadd.f32 %v881_v23, %v344_v16  ;;  %v1484_v27 = vpop.f32.mrf.mxu0  ;;  %v354_v8 = vld [vmem:[#allocation2 + $0x178] sm:$0xff] }
  0xe2   : > { %1185 = vst.msk [vmem:[%s1887_s24 + $0x8] sm:$0xff] %vm242_vm0, %v1121_v25  ;;  %v1153_v29 = vld [vmem:[#allocation2 + $0x108] sm:$0xff]  ;;  %1058 = vst.msk [vmem:[#allocation2 + $0x28] sm:$0xff] %vm242_vm0, %v994_v22  ;;  %v999_v30 = vadd.f32 %v1484_v27, %v317_v20  ;;  %v1516_v31 = vpop.f32.mrf.mxu1  ;;  %v325_v20 = vld [vmem:[#allocation2 + $0x90] sm:$0xff] }
  0xe3   : > { %1217 = vst.msk [vmem:[%s1887_s24 + $0x108] sm:$0xff] %vm242_vm0, %v1153_v29  ;;  %v1126_v33 = vld [vmem:[#allocation2 + $0x30] sm:$0xff]  ;;  %1090 = vst.msk [vmem:[#allocation2 + $0x128] sm:$0xff] %vm242_vm0, %v1026_v26  ;;  %v1031_v34 = vadd.f32 %v1516_v31, %v349_v24  ;;  %v766_v35 = vpop.f32.mrf.mxu0  ;;  %v352_v16 = vld [vmem:[#allocation2 + $0x168] sm:$0xff] }
  0xe4   : > { %1190 = vst.msk [vmem:[%s1887_s24 + $0x30] sm:$0xff] %vm242_vm0, %v1126_v33  ;;  %v1158_v37 = vld [vmem:[#allocation2 + $0x130] sm:$0xff]  ;;  %1063 = vst.msk [vmem:[#allocation2 + $0x50] sm:$0xff] %vm242_vm0, %v999_v30  ;;  %v997_v38 = vadd.f32 %v766_v35, %v315_v28  ;;  %v894_v39 = vpop.f32.mrf.mxu1  ;;  %v323_v28 = vld [vmem:[#allocation2 + $0x80] sm:$0xff] }
  0xe5   : > { %1222 = vst.msk [vmem:[%s1887_s24 + $0x130] sm:$0xff] %vm242_vm0, %v1158_v37  ;;  %v1124_v41 = vld [vmem:[#allocation2 + $0x20] sm:$0xff]  ;;  %1095 = vst.msk [vmem:[#allocation2 + $0x150] sm:$0xff] %vm242_vm0, %v1031_v34  ;;  %v1029_v42 = vadd.f32 %v894_v39, %v347_v32  ;;  %v1485_v43 = vpop.f32.mrf.mxu0  ;;  %v357_v24 = vld [vmem:[#allocation2 + $0x190] sm:$0xff] }
  0xe6   : > { %1188 = vst.msk [vmem:[%s1887_s24 + $0x20] sm:$0xff] %vm242_vm0, %v1124_v41  ;;  %v1156_v45 = vld [vmem:[#allocation2 + $0x120] sm:$0xff]  ;;  %1061 = vst.msk [vmem:[#allocation2 + $0x40] sm:$0xff] %vm242_vm0, %v997_v38  ;;  %v1000_v46 = vadd.f32 %v1485_v43, %v318_v36  ;;  %v1517_v47 = vpop.f32.mrf.mxu1  ;;  %v326_v36 = vld [vmem:[#allocation2 + $0x98] sm:$0xff] }
  0xe7   : > { %1220 = vst.msk [vmem:[%s1887_s24 + $0x120] sm:$0xff] %vm242_vm0, %v1156_v45  ;;  %v1127_v49 = vld [vmem:[#allocation2 + $0x38] sm:$0xff]  ;;  %1093 = vst.msk [vmem:[#allocation2 + $0x140] sm:$0xff] %vm242_vm0, %v1029_v42  ;;  %v1032_v50 = vadd.f32 %v1517_v47, %v350_v40  ;;  %v769_v51 = vpop.f32.mrf.mxu0  ;;  %v355_v32 = vld [vmem:[#allocation2 + $0x180] sm:$0xff] }
  0xe8   : > { %1191 = vst.msk [vmem:[%s1887_s24 + $0x38] sm:$0xff] %vm242_vm0, %v1127_v49  ;;  %v1159_v53 = vld [vmem:[#allocation2 + $0x138] sm:$0xff]  ;;  %1064 = vst.msk [vmem:[#allocation2 + $0x58] sm:$0xff] %vm242_vm0, %v1000_v46  ;;  %v998_v54 = vadd.f32 %v769_v51, %v316_v44  ;;  %v897_v55 = vpop.f32.mrf.mxu1  ;;  %v324_v44 = vld [vmem:[#allocation2 + $0x88] sm:$0xff] }
  0xe9   : > { %1223 = vst.msk [vmem:[%s1887_s24 + $0x138] sm:$0xff] %vm242_vm0, %v1159_v53  ;;  %v1125_v57 = vld [vmem:[#allocation2 + $0x28] sm:$0xff]  ;;  %1096 = vst.msk [vmem:[#allocation2 + $0x158] sm:$0xff] %vm242_vm0, %v1032_v50  ;;  %v1030_v58 = vadd.f32 %v897_v55, %v348_v48  ;;  %v1488_v59 = vpop.f32.mrf.mxu0  ;;  %v358_v40 = vld [vmem:[#allocation2 + $0x198] sm:$0xff] }
  0xea   : > { %1189 = vst.msk [vmem:[%s1887_s24 + $0x28] sm:$0xff] %vm242_vm0, %v1125_v57  ;;  %v1157_v61 = vld [vmem:[#allocation2 + $0x128] sm:$0xff]  ;;  %1062 = vst.msk [vmem:[#allocation2 + $0x48] sm:$0xff] %vm242_vm0, %v998_v54  ;;  %v1003_v62 = vadd.f32 %v1488_v59, %v321_v52  ;;  %v1520_v63 = vpop.f32.mrf.mxu1  ;;  %v329_v52 = vld [vmem:[#allocation2 + $0xb0] sm:$0xff] }
  0xeb   : > { %1221 = vst.msk [vmem:[%s1887_s24 + $0x128] sm:$0xff] %vm242_vm0, %v1157_v61  ;;  %v1130_v1 = vld [vmem:[#allocation2 + $0x50] sm:$0xff]  ;;  %1094 = vst.msk [vmem:[#allocation2 + $0x148] sm:$0xff] %vm242_vm0, %v1030_v58  ;;  %v1035_v2 = vadd.f32 %v1520_v63, %v353_v56  ;;  %v782_v3 = vpop.f32.mrf.mxu0  ;;  %v356_v48 = vld [vmem:[#allocation2 + $0x188] sm:$0xff] }
  0xec   : > { %1194 = vst.msk [vmem:[%s1887_s24 + $0x50] sm:$0xff] %vm242_vm0, %v1130_v1  ;;  %v1162_v5 = vld [vmem:[#allocation2 + $0x150] sm:$0xff]  ;;  %1067 = vst.msk [vmem:[#allocation2 + $0x70] sm:$0xff] %vm242_vm0, %v1003_v62  ;;  %v1001_v6 = vadd.f32 %v782_v3, %v319_v60  ;;  %v910_v7 = vpop.f32.mrf.mxu1  ;;  %v327_v60 = vld [vmem:[#allocation2 + $0xa0] sm:$0xff] }
  0xed   : > { %1226 = vst.msk [vmem:[%s1887_s24 + $0x150] sm:$0xff] %vm242_vm0, %v1162_v5  ;;  %v1128_v9 = vld [vmem:[#allocation2 + $0x40] sm:$0xff]  ;;  %1099 = vst.msk [vmem:[#allocation2 + $0x170] sm:$0xff] %vm242_vm0, %v1035_v2  ;;  %v1033_v10 = vadd.f32 %v910_v7, %v351_v0  ;;  %v1489_v11 = vpop.f32.mrf.mxu0  ;;  %v361_v56 = vld [vmem:[#allocation2 + $0x1b0] sm:$0xff] }
  0xee   : > { %1192 = vst.msk [vmem:[%s1887_s24 + $0x40] sm:$0xff] %vm242_vm0, %v1128_v9  ;;  %v1160_v13 = vld [vmem:[#allocation2 + $0x140] sm:$0xff]  ;;  %1065 = vst.msk [vmem:[#allocation2 + $0x60] sm:$0xff] %vm242_vm0, %v1001_v6  ;;  %v1004_v14 = vadd.f32 %v1489_v11, %v322_v4  ;;  %v1521_v15 = vpop.f32.mrf.mxu1  ;;  %v330_v4 = vld [vmem:[#allocation2 + $0xb8] sm:$0xff] }
  0xef   : > { %1224 = vst.msk [vmem:[%s1887_s24 + $0x140] sm:$0xff] %vm242_vm0, %v1160_v13  ;;  %v1131_v17 = vld [vmem:[#allocation2 + $0x58] sm:$0xff]  ;;  %1097 = vst.msk [vmem:[#allocation2 + $0x160] sm:$0xff] %vm242_vm0, %v1033_v10  ;;  %v1036_v18 = vadd.f32 %v1521_v15, %v354_v8  ;;  %v785_v19 = vpop.f32.mrf.mxu0  ;;  %v359_v0 = vld [vmem:[#allocation2 + $0x1a0] sm:$0xff] }
  0xf0   : > { %1195 = vst.msk [vmem:[%s1887_s24 + $0x58] sm:$0xff] %vm242_vm0, %v1131_v17  ;;  %v1163_v21 = vld [vmem:[#allocation2 + $0x158] sm:$0xff]  ;;  %1068 = vst.msk [vmem:[#allocation2 + $0x78] sm:$0xff] %vm242_vm0, %v1004_v14  ;;  %v1002_v22 = vadd.f32 %v785_v19, %v320_v12  ;;  %v913_v23 = vpop.f32.mrf.mxu1  ;;  %v328_v12 = vld [vmem:[#allocation2 + $0xa8] sm:$0xff] }
  0xf1   : > { %1227 = vst.msk [vmem:[%s1887_s24 + $0x158] sm:$0xff] %vm242_vm0, %v1163_v21  ;;  %v1129_v25 = vld [vmem:[#allocation2 + $0x48] sm:$0xff]  ;;  %1100 = vst.msk [vmem:[#allocation2 + $0x178] sm:$0xff] %vm242_vm0, %v1036_v18  ;;  %v1034_v26 = vadd.f32 %v913_v23, %v352_v16  ;;  %v1492_v27 = vpop.f32.mrf.mxu0  ;;  %v362_v8 = vld [vmem:[#allocation2 + $0x1b8] sm:$0xff] }
  0xf2   : > { %1193 = vst.msk [vmem:[%s1887_s24 + $0x48] sm:$0xff] %vm242_vm0, %v1129_v25  ;;  %v1161_v29 = vld [vmem:[#allocation2 + $0x148] sm:$0xff]  ;;  %1066 = vst.msk [vmem:[#allocation2 + $0x68] sm:$0xff] %vm242_vm0, %v1002_v22  ;;  %v1007_v30 = vadd.f32 %v1492_v27, %v325_v20  ;;  %v1524_v31 = vpop.f32.mrf.mxu1  ;;  %v333_v20 = vld [vmem:[#allocation2 + $0xd0] sm:$0xff] }
  0xf3   : > { %1225 = vst.msk [vmem:[%s1887_s24 + $0x148] sm:$0xff] %vm242_vm0, %v1161_v29  ;;  %v1134_v33 = vld [vmem:[#allocation2 + $0x70] sm:$0xff]  ;;  %1098 = vst.msk [vmem:[#allocation2 + $0x168] sm:$0xff] %vm242_vm0, %v1034_v26  ;;  %v1039_v34 = vadd.f32 %v1524_v31, %v357_v24  ;;  %v798_v35 = vpop.f32.mrf.mxu0  ;;  %v360_v16 = vld [vmem:[#allocation2 + $0x1a8] sm:$0xff] }
  0xf4   : > { %1198 = vst.msk [vmem:[%s1887_s24 + $0x70] sm:$0xff] %vm242_vm0, %v1134_v33  ;;  %v1166_v37 = vld [vmem:[#allocation2 + $0x170] sm:$0xff]  ;;  %1071 = vst.msk [vmem:[#allocation2 + $0x90] sm:$0xff] %vm242_vm0, %v1007_v30  ;;  %v1005_v38 = vadd.f32 %v798_v35, %v323_v28  ;;  %v926_v39 = vpop.f32.mrf.mxu1  ;;  %v331_v28 = vld [vmem:[#allocation2 + $0xc0] sm:$0xff] }
  0xf5   : > { %1230 = vst.msk [vmem:[%s1887_s24 + $0x170] sm:$0xff] %vm242_vm0, %v1166_v37  ;;  %v1132_v41 = vld [vmem:[#allocation2 + $0x60] sm:$0xff]  ;;  %1103 = vst.msk [vmem:[#allocation2 + $0x190] sm:$0xff] %vm242_vm0, %v1039_v34  ;;  %v1037_v42 = vadd.f32 %v926_v39, %v355_v32  ;;  %v1493_v43 = vpop.f32.mrf.mxu0  ;;  %v365_v24 = vld [vmem:[#allocation2 + $0x1d0] sm:$0xff] }
  0xf6   : > { %1196 = vst.msk [vmem:[%s1887_s24 + $0x60] sm:$0xff] %vm242_vm0, %v1132_v41  ;;  %v1164_v45 = vld [vmem:[#allocation2 + $0x160] sm:$0xff]  ;;  %1069 = vst.msk [vmem:[#allocation2 + $0x80] sm:$0xff] %vm242_vm0, %v1005_v38  ;;  %v1008_v46 = vadd.f32 %v1493_v43, %v326_v36  ;;  %v1525_v47 = vpop.f32.mrf.mxu1  ;;  %v334_v36 = vld [vmem:[#allocation2 + $0xd8] sm:$0xff] }
  0xf7   : > { %1228 = vst.msk [vmem:[%s1887_s24 + $0x160] sm:$0xff] %vm242_vm0, %v1164_v45  ;;  %v1135_v49 = vld [vmem:[#allocation2 + $0x78] sm:$0xff]  ;;  %1101 = vst.msk [vmem:[#allocation2 + $0x180] sm:$0xff] %vm242_vm0, %v1037_v42  ;;  %v1040_v50 = vadd.f32 %v1525_v47, %v358_v40  ;;  %v801_v51 = vpop.f32.mrf.mxu0  ;;  %v363_v32 = vld [vmem:[#allocation2 + $0x1c0] sm:$0xff] }
  0xf8   : > { %1199 = vst.msk [vmem:[%s1887_s24 + $0x78] sm:$0xff] %vm242_vm0, %v1135_v49  ;;  %v1167_v53 = vld [vmem:[#allocation2 + $0x178] sm:$0xff]  ;;  %1072 = vst.msk [vmem:[#allocation2 + $0x98] sm:$0xff] %vm242_vm0, %v1008_v46  ;;  %v1006_v54 = vadd.f32 %v801_v51, %v324_v44  ;;  %v929_v55 = vpop.f32.mrf.mxu1  ;;  %v332_v44 = vld [vmem:[#allocation2 + $0xc8] sm:$0xff] }
  0xf9   : > { %1231 = vst.msk [vmem:[%s1887_s24 + $0x178] sm:$0xff] %vm242_vm0, %v1167_v53  ;;  %v1133_v57 = vld [vmem:[#allocation2 + $0x68] sm:$0xff]  ;;  %1104 = vst.msk [vmem:[#allocation2 + $0x198] sm:$0xff] %vm242_vm0, %v1040_v50  ;;  %v1038_v58 = vadd.f32 %v929_v55, %v356_v48  ;;  %v1496_v59 = vpop.f32.mrf.mxu0  ;;  %v366_v40 = vld [vmem:[#allocation2 + $0x1d8] sm:$0xff] }
  0xfa   : > { %1197 = vst.msk [vmem:[%s1887_s24 + $0x68] sm:$0xff] %vm242_vm0, %v1133_v57  ;;  %v1165_v61 = vld [vmem:[#allocation2 + $0x168] sm:$0xff]  ;;  %1070 = vst.msk [vmem:[#allocation2 + $0x88] sm:$0xff] %vm242_vm0, %v1006_v54  ;;  %v1011_v62 = vadd.f32 %v1496_v59, %v329_v52  ;;  %v1528_v63 = vpop.f32.mrf.mxu1  ;;  %v337_v52 = vld [vmem:[#allocation2 + $0xf0] sm:$0xff] }
  0xfb   : > { %1229 = vst.msk [vmem:[%s1887_s24 + $0x168] sm:$0xff] %vm242_vm0, %v1165_v61  ;;  %v1138_v1 = vld [vmem:[#allocation2 + $0x90] sm:$0xff]  ;;  %1102 = vst.msk [vmem:[#allocation2 + $0x188] sm:$0xff] %vm242_vm0, %v1038_v58  ;;  %v1043_v2 = vadd.f32 %v1528_v63, %v361_v56  ;;  %v814_v3 = vpop.f32.mrf.mxu0  ;;  %v364_v48 = vld [vmem:[#allocation2 + $0x1c8] sm:$0xff] }
  0xfc   : > { %1202 = vst.msk [vmem:[%s1887_s24 + $0x90] sm:$0xff] %vm242_vm0, %v1138_v1  ;;  %v1170_v5 = vld [vmem:[#allocation2 + $0x190] sm:$0xff]  ;;  %1075 = vst.msk [vmem:[#allocation2 + $0xb0] sm:$0xff] %vm242_vm0, %v1011_v62  ;;  %v1009_v6 = vadd.f32 %v814_v3, %v327_v60  ;;  %v942_v7 = vpop.f32.mrf.mxu1  ;;  %v335_v60 = vld [vmem:[#allocation2 + $0xe0] sm:$0xff] }
  0xfd   : > { %1234 = vst.msk [vmem:[%s1887_s24 + $0x190] sm:$0xff] %vm242_vm0, %v1170_v5  ;;  %v1136_v9 = vld [vmem:[#allocation2 + $0x80] sm:$0xff]  ;;  %1107 = vst.msk [vmem:[#allocation2 + $0x1b0] sm:$0xff] %vm242_vm0, %v1043_v2  ;;  %v1041_v10 = vadd.f32 %v942_v7, %v359_v0  ;;  %v1497_v11 = vpop.f32.mrf.mxu0  ;;  %v369_v56 = vld [vmem:[#allocation2 + $0x1f0] sm:$0xff] }
  0xfe   : > { %1200 = vst.msk [vmem:[%s1887_s24 + $0x80] sm:$0xff] %vm242_vm0, %v1136_v9  ;;  %v1168_v13 = vld [vmem:[#allocation2 + $0x180] sm:$0xff]  ;;  %1073 = vst.msk [vmem:[#allocation2 + $0xa0] sm:$0xff] %vm242_vm0, %v1009_v6  ;;  %v1012_v14 = vadd.f32 %v1497_v11, %v330_v4  ;;  %v1529_v15 = vpop.f32.mrf.mxu1  ;;  %v338_v4 = vld [vmem:[#allocation2 + $0xf8] sm:$0xff] }
  0xff   : > { %1232 = vst.msk [vmem:[%s1887_s24 + $0x180] sm:$0xff] %vm242_vm0, %v1168_v13  ;;  %v1139_v17 = vld [vmem:[#allocation2 + $0x98] sm:$0xff]  ;;  %1105 = vst.msk [vmem:[#allocation2 + $0x1a0] sm:$0xff] %vm242_vm0, %v1041_v10  ;;  %v1044_v18 = vadd.f32 %v1529_v15, %v362_v8  ;;  %v817_v19 = vpop.f32.mrf.mxu0  ;;  %v367_v0 = vld [vmem:[#allocation2 + $0x1e0] sm:$0xff] }
 0x100   : > { %1203 = vst.msk [vmem:[%s1887_s24 + $0x98] sm:$0xff] %vm242_vm0, %v1139_v17  ;;  %v1171_v21 = vld [vmem:[#allocation2 + $0x198] sm:$0xff]  ;;  %1076 = vst.msk [vmem:[#allocation2 + $0xb8] sm:$0xff] %vm242_vm0, %v1012_v14  ;;  %v1010_v22 = vadd.f32 %v817_v19, %v328_v12  ;;  %v945_v23 = vpop.f32.mrf.mxu1  ;;  %v336_v12 = vld [vmem:[#allocation2 + $0xe8] sm:$0xff] }
 0x101   : > { %1235 = vst.msk [vmem:[%s1887_s24 + $0x198] sm:$0xff] %vm242_vm0, %v1171_v21  ;;  %v1137_v25 = vld [vmem:[#allocation2 + $0x88] sm:$0xff]  ;;  %1108 = vst.msk [vmem:[#allocation2 + $0x1b8] sm:$0xff] %vm242_vm0, %v1044_v18  ;;  %v1042_v26 = vadd.f32 %v945_v23, %v360_v16  ;;  %v1500_v27 = vpop.f32.mrf.mxu0  ;;  %v370_v8 = vld [vmem:[#allocation2 + $0x1f8] sm:$0xff] }
 0x102   : > { %1201 = vst.msk [vmem:[%s1887_s24 + $0x88] sm:$0xff] %vm242_vm0, %v1137_v25  ;;  %v1169_v29 = vld [vmem:[#allocation2 + $0x188] sm:$0xff]  ;;  %1074 = vst.msk [vmem:[#allocation2 + $0xa8] sm:$0xff] %vm242_vm0, %v1010_v22  ;;  %v1015_v30 = vadd.f32 %v1500_v27, %v333_v20  ;;  %v1532_v31 = vpop.f32.mrf.mxu1 }
 0x103   : > { %1233 = vst.msk [vmem:[%s1887_s24 + $0x188] sm:$0xff] %vm242_vm0, %v1169_v29  ;;  %v1142_v33 = vld [vmem:[#allocation2 + $0xb0] sm:$0xff]  ;;  %1106 = vst.msk [vmem:[#allocation2 + $0x1a8] sm:$0xff] %vm242_vm0, %v1042_v26  ;;  %v1047_v34 = vadd.f32 %v1532_v31, %v365_v24  ;;  %v830_v35 = vpop.f32.mrf.mxu0  ;;  %v368_v16 = vld [vmem:[#allocation2 + $0x1e8] sm:$0xff] }
 0x104   : > { %1206 = vst.msk [vmem:[%s1887_s24 + $0xb0] sm:$0xff] %vm242_vm0, %v1142_v33  ;;  %v1174_v37 = vld [vmem:[#allocation2 + $0x1b0] sm:$0xff]  ;;  %1079 = vst.msk [vmem:[#allocation2 + $0xd0] sm:$0xff] %vm242_vm0, %v1015_v30  ;;  %v1013_v38 = vadd.f32 %v830_v35, %v331_v28  ;;  %v958_v39 = vpop.f32.mrf.mxu1 }
 0x105   : > { %1238 = vst.msk [vmem:[%s1887_s24 + $0x1b0] sm:$0xff] %vm242_vm0, %v1174_v37  ;;  %v1140_v41 = vld [vmem:[#allocation2 + $0xa0] sm:$0xff]  ;;  %1111 = vst.msk [vmem:[#allocation2 + $0x1d0] sm:$0xff] %vm242_vm0, %v1047_v34  ;;  %v1045_v42 = vadd.f32 %v958_v39, %v363_v32  ;;  %v1501_v43 = vpop.f32.mrf.mxu0 }
 0x106   : > { %1204 = vst.msk [vmem:[%s1887_s24 + $0xa0] sm:$0xff] %vm242_vm0, %v1140_v41  ;;  %v1172_v45 = vld [vmem:[#allocation2 + $0x1a0] sm:$0xff]  ;;  %1077 = vst.msk [vmem:[#allocation2 + $0xc0] sm:$0xff] %vm242_vm0, %v1013_v38  ;;  %v1016_v46 = vadd.f32 %v1501_v43, %v334_v36  ;;  %v1533_v47 = vpop.f32.mrf.mxu1 }
 0x107   : > { %1236 = vst.msk [vmem:[%s1887_s24 + $0x1a0] sm:$0xff] %vm242_vm0, %v1172_v45  ;;  %v1143_v49 = vld [vmem:[#allocation2 + $0xb8] sm:$0xff]  ;;  %1109 = vst.msk [vmem:[#allocation2 + $0x1c0] sm:$0xff] %vm242_vm0, %v1045_v42  ;;  %v1048_v50 = vadd.f32 %v1533_v47, %v366_v40  ;;  %v833_v51 = vpop.f32.mrf.mxu0 }
 0x108   : > { %1207 = vst.msk [vmem:[%s1887_s24 + $0xb8] sm:$0xff] %vm242_vm0, %v1143_v49  ;;  %v1175_v53 = vld [vmem:[#allocation2 + $0x1b8] sm:$0xff]  ;;  %1080 = vst.msk [vmem:[#allocation2 + $0xd8] sm:$0xff] %vm242_vm0, %v1016_v46  ;;  %v1014_v54 = vadd.f32 %v833_v51, %v332_v44  ;;  %v961_v55 = vpop.f32.mrf.mxu1 }
 0x109   : > { %1239 = vst.msk [vmem:[%s1887_s24 + $0x1b8] sm:$0xff] %vm242_vm0, %v1175_v53  ;;  %v1141_v57 = vld [vmem:[#allocation2 + $0xa8] sm:$0xff]  ;;  %1112 = vst.msk [vmem:[#allocation2 + $0x1d8] sm:$0xff] %vm242_vm0, %v1048_v50  ;;  %v1046_v58 = vadd.f32 %v961_v55, %v364_v48  ;;  %v1504_v59 = vpop.f32.mrf.mxu0 }
 0x10a   : > { %1205 = vst.msk [vmem:[%s1887_s24 + $0xa8] sm:$0xff] %vm242_vm0, %v1141_v57  ;;  %v1173_v61 = vld [vmem:[#allocation2 + $0x1a8] sm:$0xff]  ;;  %1078 = vst.msk [vmem:[#allocation2 + $0xc8] sm:$0xff] %vm242_vm0, %v1014_v54  ;;  %v1019_v62 = vadd.f32 %v1504_v59, %v337_v52  ;;  %v1536_v63 = vpop.f32.mrf.mxu1 }
 0x10b   : > { %1237 = vst.msk [vmem:[%s1887_s24 + $0x1a8] sm:$0xff] %vm242_vm0, %v1173_v61  ;;  %v1146_v1 = vld [vmem:[#allocation2 + $0xd0] sm:$0xff]  ;;  %1110 = vst.msk [vmem:[#allocation2 + $0x1c8] sm:$0xff] %vm242_vm0, %v1046_v58  ;;  %v1051_v2 = vadd.f32 %v1536_v63, %v369_v56  ;;  %v846_v3 = vpop.f32.mrf.mxu0 }
 0x10c   : > { %1210 = vst.msk [vmem:[%s1887_s24 + $0xd0] sm:$0xff] %vm242_vm0, %v1146_v1  ;;  %v1178_v5 = vld [vmem:[#allocation2 + $0x1d0] sm:$0xff]  ;;  %1083 = vst.msk [vmem:[#allocation2 + $0xf0] sm:$0xff] %vm242_vm0, %v1019_v62  ;;  %v1017_v6 = vadd.f32 %v846_v3, %v335_v60  ;;  %v974_v7 = vpop.f32.mrf.mxu1 }
 0x10d   : > { %1242 = vst.msk [vmem:[%s1887_s24 + $0x1d0] sm:$0xff] %vm242_vm0, %v1178_v5  ;;  %v1144_v9 = vld [vmem:[#allocation2 + $0xc0] sm:$0xff]  ;;  %1115 = vst.msk [vmem:[#allocation2 + $0x1f0] sm:$0xff] %vm242_vm0, %v1051_v2  ;;  %v1049_v10 = vadd.f32 %v974_v7, %v367_v0  ;;  %v1505_v11 = vpop.f32.mrf.mxu0 }
 0x10e   : > { %1208 = vst.msk [vmem:[%s1887_s24 + $0xc0] sm:$0xff] %vm242_vm0, %v1144_v9  ;;  %v1176_v13 = vld [vmem:[#allocation2 + $0x1c0] sm:$0xff]  ;;  %1081 = vst.msk [vmem:[#allocation2 + $0xe0] sm:$0xff] %vm242_vm0, %v1017_v6  ;;  %v1020_v14 = vadd.f32 %v1505_v11, %v338_v4  ;;  %v1537_v15 = vpop.f32.mrf.mxu1 }
 0x10f   : > { %1240 = vst.msk [vmem:[%s1887_s24 + $0x1c0] sm:$0xff] %vm242_vm0, %v1176_v13  ;;  %v1147_v17 = vld [vmem:[#allocation2 + $0xd8] sm:$0xff]  ;;  %1113 = vst.msk [vmem:[#allocation2 + $0x1e0] sm:$0xff] %vm242_vm0, %v1049_v10  ;;  %v1052_v18 = vadd.f32 %v1537_v15, %v370_v8  ;;  %v849_v19 = vpop.f32.mrf.mxu0 }
 0x110   : > { %1211 = vst.msk [vmem:[%s1887_s24 + $0xd8] sm:$0xff] %vm242_vm0, %v1147_v17  ;;  %v1179_v20 = vld [vmem:[#allocation2 + $0x1d8] sm:$0xff]  ;;  %1084 = vst.msk [vmem:[#allocation2 + $0xf8] sm:$0xff] %vm242_vm0, %v1020_v14  ;;  %v1018_v21 = vadd.f32 %v849_v19, %v336_v12  ;;  %v977_v22 = vpop.f32.mrf.mxu1 }
 0x111   : > { %1243 = vst.msk [vmem:[%s1887_s24 + $0x1d8] sm:$0xff] %vm242_vm0, %v1179_v20  ;;  %v1145_v23 = vld [vmem:[#allocation2 + $0xc8] sm:$0xff]  ;;  %1116 = vst.msk [vmem:[#allocation2 + $0x1f8] sm:$0xff] %vm242_vm0, %v1052_v18  ;;  %v1050_v24 = vadd.f32 %v977_v22, %v368_v16 }
 0x112   : > { %1209 = vst.msk [vmem:[%s1887_s24 + $0xc8] sm:$0xff] %vm242_vm0, %v1145_v23  ;;  %v1177_v25 = vld [vmem:[#allocation2 + $0x1c8] sm:$0xff]  ;;  %1082 = vst.msk [vmem:[#allocation2 + $0xe8] sm:$0xff] %vm242_vm0, %v1018_v21 }
 0x113   : > { %1241 = vst.msk [vmem:[%s1887_s24 + $0x1c8] sm:$0xff] %vm242_vm0, %v1177_v25  ;;  %v1150_v26 = vld [vmem:[#allocation2 + $0xf0] sm:$0xff]  ;;  %1114 = vst.msk [vmem:[#allocation2 + $0x1e8] sm:$0xff] %vm242_vm0, %v1050_v24 }
 0x114   : > { %1214 = vst.msk [vmem:[%s1887_s24 + $0xf0] sm:$0xff] %vm242_vm0, %v1150_v26  ;;  %v1182_v27 = vld [vmem:[#allocation2 + $0x1f0] sm:$0xff] }
 0x115   : > { %1246 = vst.msk [vmem:[%s1887_s24 + $0x1f0] sm:$0xff] %vm242_vm0, %v1182_v27  ;;  %v1148_v28 = vld [vmem:[#allocation2 + $0xe0] sm:$0xff] }
 0x116   : > { %1212 = vst.msk [vmem:[%s1887_s24 + $0xe0] sm:$0xff] %vm242_vm0, %v1148_v28  ;;  %v1180_v29 = vld [vmem:[#allocation2 + $0x1e0] sm:$0xff] }
 0x117   : > { %1244 = vst.msk [vmem:[%s1887_s24 + $0x1e0] sm:$0xff] %vm242_vm0, %v1180_v29  ;;  %v1151_v30 = vld [vmem:[#allocation2 + $0xf8] sm:$0xff] }
 0x118   : > { %1215 = vst.msk [vmem:[%s1887_s24 + $0xf8] sm:$0xff] %vm242_vm0, %v1151_v30  ;;  %v1183_v31 = vld [vmem:[#allocation2 + $0x1f8] sm:$0xff] }
 0x119   : > { %1247 = vst.msk [vmem:[%s1887_s24 + $0x1f8] sm:$0xff] %vm242_vm0, %v1183_v31  ;;  %v1149_v32 = vld [vmem:[#allocation2 + $0xe8] sm:$0xff] }
 0x11a   : > { %1213 = vst.msk [vmem:[%s1887_s24 + $0xe8] sm:$0xff] %vm242_vm0, %v1149_v32  ;;  %v1181_v33 = vld [vmem:[#allocation2 + $0x1e8] sm:$0xff] }
 0x11b   : > { %1245 = vst.msk [vmem:[%s1887_s24 + $0x1e8] sm:$0xff] %vm242_vm0, %v1181_v33 }
 0x11c PF: > { %s12_s11 = sadd.s32 1, %s1620_s11   ;;  %s2089_s9 = smov %s1616_s10 }
 0x11d   : > { %p9_p5 = scmp.ge.s32.totalorder %s12_s11, 4   ;;  %s2090_s10 = smov %s2092_s12 }
 0x11f   :  { %11 = sbr.rel (!%p9_p5) target bundleno = 2 (0x2), region = 69 }

// kernel: double_conv_up_forward.9
= control target key start
LH: loop header
LB: loop body
LE: loop exit
PB: predicated region body
PF: predicated region fallthrough
CT: control target
= control target key end

     0   :  { %s1654_s9 = smov 0   ;;  %s1656_s10 = smov 0   ;;  %s2091_s0 = inlined_call_operand.vmem [shape: bf16[1,1024,32], index: 0, kind: input, shape index: {}]   ;;  %s2092_s1 = inlined_call_operand.vmem [shape: bf16[1,32,8], index: 1, kind: input, shape index: {}]   ;;  %s2093_s2 = inlined_call_operand.vmem [shape: f32[1,1024,8], index: 2, kind: output, shape index: {}]  }
   0x1   :  { %s1658_s11 = smov 0  }
   0x2 LB: > { %s27_s12 = sadd.s32 1, %s1632_s10  ;;  %p1376_p0 = scmp.ge.s32.totalorder %s1636_s11, 1  ;;  %s1636_s11 = sphi %s1658_s11, %s12_s11   ;;  %s1632_s10 = sphi %s1656_s10, %s2095_s10   ;;  %s1628_s9 = sphi %s1654_s9, %s2094_s9  }
   0x3   : > { %p29_p1 = scmp.ge.s32.totalorder %s27_s12, 2  ;;  %p162_p2 = scmp.lt.s32.totalorder %s1636_s11, 3 }
   0x5   : > { %s2097_s12 = smov (%p29_p1, %s27_s12), 0  ;;  %p163_p3 = pnand %p1376_p0, %p162_p2 }
   0x6   : > { %s1377_s15 = sshll.u32 (!%p163_p3), %s1628_s9, 6 }
   0x7   : > { %166 = sbr.rel (%p163_p3) target bundleno = 288 (0x120), region = 28  ;;  %p207_p4 = scmp.lt.s32.totalorder (!%p163_p3), %s1377_s15, 127 }
   0xc   : > { %v1580_v0 = vld [vmem:[%s2092_s1 + $0x8] sm:$0xff]   ;;  %v1678_v1 = vld [vmem:[%s2092_s1] sm:$0xff]   ;;  %vm242_vm0 = vcmask 64512   ;;  %s2099_s15 = smov (!%p207_p4, %s1377_s15), 127  ;;  %v1638_v2 = vmov 0.0   ;;  %vm611_vm1 = vcmask 261120  }
   0xd   : > { %1483 = vmatprep.subr.bf16.mxu0 %v1580_v0  ;;  %1551 = vmatprep.subr.bf16.mxu1 %v1580_v0  ;;  %245 = vst.msk [vmem:[#allocation2 + $0x10] sm:$0xff] %vm242_vm0, %v1638_v2  ;;  %243 = vst.msk [vmem:[#allocation2] sm:$0xff] %vm242_vm0, %v1638_v2  ;;  %s1378_s18 = sshll.u32 %s2099_s15, 2  ;;  %s1380_s22 = sshll.u32 %s2099_s15, 3 }
   0xe   : > { %1484 = vmatpush3.bf16.msra.mxu0 %v1580_v0  ;;  %1553 = vmatpush3.bf16.msra.mxu1 %v1580_v0  ;;  %244 = vst.msk [vmem:[#allocation2 + $0x8] sm:$0xff] %vm242_vm0, %v1638_v2  ;;  %246 = vst.msk [vmem:[#allocation2 + $0x18] sm:$0xff] %vm242_vm0, %v1638_v2  ;;  %s1816_s21 = scalar_lea.vmem %s2091_s0, %s1378_s18  ;;  %s1893_s25 = scalar_lea.vmem %s2093_s2, %s1380_s22 }
   0xf   : > { %247 = vst.msk [vmem:[#allocation2 + $0x20] sm:$0xff] %vm242_vm0, %v1638_v2  ;;  %248 = vst.msk [vmem:[#allocation2 + $0x28] sm:$0xff] %vm242_vm0, %v1638_v2  ;;  %1485 = vmatprep.subr.bf16.mxu0 %v1678_v1  ;;  %1552 = vmatprep.subr.bf16.mxu1 %v1678_v1  ;;  %v1582_v3 = vld [vmem:[%s1816_s21] sm:$0xff]   ;;  %v1584_v5 = vld [vmem:[%s1816_s21 + $0x8] sm:$0xff]  }
  0x10   : > { %249 = vst.msk [vmem:[#allocation2 + $0x30] sm:$0xff] %vm242_vm0, %v1638_v2  ;;  %250 = vst.msk [vmem:[#allocation2 + $0x38] sm:$0xff] %vm242_vm0, %v1638_v2  ;;  %v1583_v4 = vld [vmem:[%s1816_s21 + $0x80] sm:$0xff]   ;;  %1487 = vmatprep.mubr.msk.bf16.mxu0 %vm611_vm1, %v1582_v3  ;;  %v1585_v6 = vld [vmem:[%s1816_s21 + $0x88] sm:$0xff]  }
  0x11   : > { %251 = vst.msk [vmem:[#allocation2 + $0x40] sm:$0xff] %vm242_vm0, %v1638_v2  ;;  %252 = vst.msk [vmem:[#allocation2 + $0x48] sm:$0xff] %vm242_vm0, %v1638_v2  ;;  %1519 = vmatprep.mubr.msk.bf16.mxu1 %vm611_vm1, %v1583_v4  ;;  %v1586_v7 = vld [vmem:[%s1816_s21 + $0x10] sm:$0xff]   ;;  %v1588_v9 = vld [vmem:[%s1816_s21 + $0x18] sm:$0xff]  }
  0x12   : > { %253 = vst.msk [vmem:[#allocation2 + $0x50] sm:$0xff] %vm242_vm0, %v1638_v2  ;;  %254 = vst.msk [vmem:[#allocation2 + $0x58] sm:$0xff] %vm242_vm0, %v1638_v2  ;;  %1486 = vmatpush3.bf16.msra.mxu0 %v1678_v1  ;;  %1554 = vmatpush3.bf16.msra.mxu1 %v1678_v1  ;;  %v1587_v8 = vld [vmem:[%s1816_s21 + $0x90] sm:$0xff]   ;;  %v1589_v10 = vld [vmem:[%s1816_s21 + $0x98] sm:$0xff]  }
  0x13   : > { %255 = vst.msk [vmem:[#allocation2 + $0x60] sm:$0xff] %vm242_vm0, %v1638_v2  ;;  %256 = vst.msk [vmem:[#allocation2 + $0x68] sm:$0xff] %vm242_vm0, %v1638_v2  ;;  %v1590_v11 = vld [vmem:[%s1816_s21 + $0x20] sm:$0xff]   ;;  %v1592_v13 = vld [vmem:[%s1816_s21 + $0x28] sm:$0xff]  }
  0x14   : > { %257 = vst.msk [vmem:[#allocation2 + $0x70] sm:$0xff] %vm242_vm0, %v1638_v2  ;;  %258 = vst.msk [vmem:[#allocation2 + $0x78] sm:$0xff] %vm242_vm0, %v1638_v2  ;;  %v1591_v12 = vld [vmem:[%s1816_s21 + $0xa0] sm:$0xff]   ;;  %v1593_v14 = vld [vmem:[%s1816_s21 + $0xa8] sm:$0xff]  }
  0x15   : > { %259 = vst.msk [vmem:[#allocation2 + $0x80] sm:$0xff] %vm242_vm0, %v1638_v2  ;;  %260 = vst.msk [vmem:[#allocation2 + $0x88] sm:$0xff] %vm242_vm0, %v1638_v2  ;;  %1488 = vmatmul.mubr.msk.bf16.vlgmr.msra.gmra.mxu0 %vm611_vm1, %v1584_v5  ;;  %1520 = vmatmul.mubr.msk.bf16.vlgmr.msra.gmra.mxu1 %vm611_vm1, %v1585_v6  ;;  %v1594_v15 = vld [vmem:[%s1816_s21 + $0x30] sm:$0xff]   ;;  %v1596_v17 = vld [vmem:[%s1816_s21 + $0x38] sm:$0xff]  }
  0x16   : > { %261 = vst.msk [vmem:[#allocation2 + $0x90] sm:$0xff] %vm242_vm0, %v1638_v2  ;;  %262 = vst.msk [vmem:[#allocation2 + $0x98] sm:$0xff] %vm242_vm0, %v1638_v2  ;;  %1491 = vmatprep.mubr.msk.bf16.mxu0 %vm611_vm1, %v1586_v7  ;;  %1523 = vmatprep.mubr.msk.bf16.mxu1 %vm611_vm1, %v1587_v8  ;;  %v1595_v16 = vld [vmem:[%s1816_s21 + $0xb0] sm:$0xff]   ;;  %v1597_v18 = vld [vmem:[%s1816_s21 + $0xb8] sm:$0xff]  }
  0x17   : > { %263 = vst.msk [vmem:[#allocation2 + $0xa0] sm:$0xff] %vm242_vm0, %v1638_v2  ;;  %264 = vst.msk [vmem:[#allocation2 + $0xa8] sm:$0xff] %vm242_vm0, %v1638_v2  ;;  %v1598_v19 = vld [vmem:[%s1816_s21 + $0x40] sm:$0xff]   ;;  %v1600_v21 = vld [vmem:[%s1816_s21 + $0x48] sm:$0xff]  }
  0x18   : > { %265 = vst.msk [vmem:[#allocation2 + $0xb0] sm:$0xff] %vm242_vm0, %v1638_v2  ;;  %266 = vst.msk [vmem:[#allocation2 + $0xb8] sm:$0xff] %vm242_vm0, %v1638_v2  ;;  %v1599_v20 = vld [vmem:[%s1816_s21 + $0xc0] sm:$0xff]   ;;  %v1601_v22 = vld [vmem:[%s1816_s21 + $0xc8] sm:$0xff]  }
  0x19   : > { %267 = vst.msk [vmem:[#allocation2 + $0xc0] sm:$0xff] %vm242_vm0, %v1638_v2  ;;  %268 = vst.msk [vmem:[#allocation2 + $0xc8] sm:$0xff] %vm242_vm0, %v1638_v2  ;;  %v1602_v23 = vld [vmem:[%s1816_s21 + $0x50] sm:$0xff]   ;;  %v1604_v25 = vld [vmem:[%s1816_s21 + $0x58] sm:$0xff]  }
  0x1a   : > { %269 = vst.msk [vmem:[#allocation2 + $0xd0] sm:$0xff] %vm242_vm0, %v1638_v2  ;;  %270 = vst.msk [vmem:[#allocation2 + $0xd8] sm:$0xff] %vm242_vm0, %v1638_v2  ;;  %v1603_v24 = vld [vmem:[%s1816_s21 + $0xd0] sm:$0xff]   ;;  %v1605_v26 = vld [vmem:[%s1816_s21 + $0xd8] sm:$0xff]  }
  0x1b   : > { %271 = vst.msk [vmem:[#allocation2 + $0xe0] sm:$0xff] %vm242_vm0, %v1638_v2  ;;  %272 = vst.msk [vmem:[#allocation2 + $0xe8] sm:$0xff] %vm242_vm0, %v1638_v2  ;;  %v1606_v27 = vld [vmem:[%s1816_s21 + $0x60] sm:$0xff]   ;;  %v1608_v29 = vld [vmem:[%s1816_s21 + $0x68] sm:$0xff]  }
  0x1c   : > { %273 = vst.msk [vmem:[#allocation2 + $0xf0] sm:$0xff] %vm242_vm0, %v1638_v2  ;;  %274 = vst.msk [vmem:[#allocation2 + $0xf8] sm:$0xff] %vm242_vm0, %v1638_v2  ;;  %v1607_v28 = vld [vmem:[%s1816_s21 + $0xe0] sm:$0xff]   ;;  %v1609_v30 = vld [vmem:[%s1816_s21 + $0xe8] sm:$0xff]  }
  0x1d   : > { %275 = vst.msk [vmem:[#allocation2 + $0x100] sm:$0xff] %vm242_vm0, %v1638_v2  ;;  %276 = vst.msk [vmem:[#allocation2 + $0x108] sm:$0xff] %vm242_vm0, %v1638_v2  ;;  %1492 = vmatmul.mubr.msk.bf16.gmra.mxu0 %vm611_vm1, %v1588_v9  ;;  %1524 = vmatmul.mubr.msk.bf16.gmra.mxu1 %vm611_vm1, %v1589_v10  ;;  %v1610_v31 = vld [vmem:[%s1816_s21 + $0x70] sm:$0xff]   ;;  %v1612_v33 = vld [vmem:[%s1816_s21 + $0x78] sm:$0xff]  }
  0x1e   : > { %277 = vst.msk [vmem:[#allocation2 + $0x110] sm:$0xff] %vm242_vm0, %v1638_v2  ;;  %278 = vst.msk [vmem:[#allocation2 + $0x118] sm:$0xff] %vm242_vm0, %v1638_v2  ;;  %1495 = vmatprep.mubr.msk.bf16.mxu0 %vm611_vm1, %v1590_v11  ;;  %1527 = vmatprep.mubr.msk.bf16.mxu1 %vm611_vm1, %v1591_v12  ;;  %v1611_v32 = vld [vmem:[%s1816_s21 + $0xf0] sm:$0xff]   ;;  %v1613_v34 = vld [vmem:[%s1816_s21 + $0xf8] sm:$0xff]  }
  0x1f   : > { %279 = vst.msk [vmem:[#allocation2 + $0x120] sm:$0xff] %vm242_vm0, %v1638_v2  ;;  %280 = vst.msk [vmem:[#allocation2 + $0x128] sm:$0xff] %vm242_vm0, %v1638_v2  ;;  %v309_v35 = vld [vmem:[#allocation2 + $0x10] sm:$0xff]  ;;  %v307_v38 = vld [vmem:[#allocation2] sm:$0xff] }
  0x20   : > { %281 = vst.msk [vmem:[#allocation2 + $0x130] sm:$0xff] %vm242_vm0, %v1638_v2  ;;  %282 = vst.msk [vmem:[#allocation2 + $0x138] sm:$0xff] %vm242_vm0, %v1638_v2  ;;  %v310_v44 = vld [vmem:[#allocation2 + $0x18] sm:$0xff]  ;;  %v308_v50 = vld [vmem:[#allocation2 + $0x8] sm:$0xff] }
  0x21   : > { %283 = vst.msk [vmem:[#allocation2 + $0x140] sm:$0xff] %vm242_vm0, %v1638_v2  ;;  %284 = vst.msk [vmem:[#allocation2 + $0x148] sm:$0xff] %vm242_vm0, %v1638_v2  ;;  %v313_v56 = vld [vmem:[#allocation2 + $0x30] sm:$0xff]  ;;  %v311_v62 = vld [vmem:[#allocation2 + $0x20] sm:$0xff] }
  0x22   : > { %285 = vst.msk [vmem:[#allocation2 + $0x150] sm:$0xff] %vm242_vm0, %v1638_v2  ;;  %286 = vst.msk [vmem:[#allocation2 + $0x158] sm:$0xff] %vm242_vm0, %v1638_v2  ;;  %v314_v5 = vld [vmem:[#allocation2 + $0x38] sm:$0xff] }
  0x23   : > { %287 = vst.msk [vmem:[#allocation2 + $0x160] sm:$0xff] %vm242_vm0, %v1638_v2  ;;  %288 = vst.msk [vmem:[#allocation2 + $0x168] sm:$0xff] %vm242_vm0, %v1638_v2 }
  0x24   : > { %289 = vst.msk [vmem:[#allocation2 + $0x170] sm:$0xff] %vm242_vm0, %v1638_v2  ;;  %290 = vst.msk [vmem:[#allocation2 + $0x178] sm:$0xff] %vm242_vm0, %v1638_v2  ;;  %v339_v41 = vld [vmem:[#allocation2 + $0x100] sm:$0xff]  ;;  %v340_v53 = vld [vmem:[#allocation2 + $0x108] sm:$0xff] }
  0x25   : > { %291 = vst.msk [vmem:[#allocation2 + $0x180] sm:$0xff] %vm242_vm0, %v1638_v2  ;;  %292 = vst.msk [vmem:[#allocation2 + $0x188] sm:$0xff] %vm242_vm0, %v1638_v2  ;;  %1496 = vmatmul.mubr.msk.bf16.gmra.mxu0 %vm611_vm1, %v1592_v13  ;;  %1528 = vmatmul.mubr.msk.bf16.gmra.mxu1 %vm611_vm1, %v1593_v14  ;;  %v341_v36 = vld [vmem:[#allocation2 + $0x110] sm:$0xff]  ;;  %v342_v47 = vld [vmem:[#allocation2 + $0x118] sm:$0xff] }
  0x26   : > { %293 = vst.msk [vmem:[#allocation2 + $0x190] sm:$0xff] %vm242_vm0, %v1638_v2  ;;  %294 = vst.msk [vmem:[#allocation2 + $0x198] sm:$0xff] %vm242_vm0, %v1638_v2  ;;  %1499 = vmatprep.mubr.msk.bf16.mxu0 %vm611_vm1, %v1594_v15  ;;  %1531 = vmatprep.mubr.msk.bf16.mxu1 %vm611_vm1, %v1595_v16  ;;  %v343_v1 = vld [vmem:[#allocation2 + $0x120] sm:$0xff]  ;;  %v312_v13 = vld [vmem:[#allocation2 + $0x28] sm:$0xff] }
  0x27   : > { %295 = vst.msk [vmem:[#allocation2 + $0x1a0] sm:$0xff] %vm242_vm0, %v1638_v2  ;;  %296 = vst.msk [vmem:[#allocation2 + $0x1a8] sm:$0xff] %vm242_vm0, %v1638_v2  ;;  %v345_v59 = vld [vmem:[#allocation2 + $0x130] sm:$0xff]  ;;  %v346_v9 = vld [vmem:[#allocation2 + $0x138] sm:$0xff] }
  0x28   : > { %297 = vst.msk [vmem:[#allocation2 + $0x1b0] sm:$0xff] %vm242_vm0, %v1638_v2  ;;  %298 = vst.msk [vmem:[#allocation2 + $0x1b8] sm:$0xff] %vm242_vm0, %v1638_v2 }
  0x29   : > { %299 = vst.msk [vmem:[#allocation2 + $0x1c0] sm:$0xff] %vm242_vm0, %v1638_v2  ;;  %300 = vst.msk [vmem:[#allocation2 + $0x1c8] sm:$0xff] %vm242_vm0, %v1638_v2 }
  0x2a   : > { %301 = vst.msk [vmem:[#allocation2 + $0x1d0] sm:$0xff] %vm242_vm0, %v1638_v2  ;;  %302 = vst.msk [vmem:[#allocation2 + $0x1d8] sm:$0xff] %vm242_vm0, %v1638_v2 }
  0x2b   : > { %303 = vst.msk [vmem:[#allocation2 + $0x1e0] sm:$0xff] %vm242_vm0, %v1638_v2  ;;  %304 = vst.msk [vmem:[#allocation2 + $0x1e8] sm:$0xff] %vm242_vm0, %v1638_v2 }
  0x2c   : > { %305 = vst.msk [vmem:[#allocation2 + $0x1f0] sm:$0xff] %vm242_vm0, %v1638_v2  ;;  %306 = vst.msk [vmem:[#allocation2 + $0x1f8] sm:$0xff] %vm242_vm0, %v1638_v2 }
  0x2d   : > { %1500 = vmatmul.mubr.msk.bf16.gmra.mxu0 %vm611_vm1, %v1596_v17  ;;  %1532 = vmatmul.mubr.msk.bf16.gmra.mxu1 %vm611_vm1, %v1597_v18  ;;  %v344_v17 = vld [vmem:[#allocation2 + $0x128] sm:$0xff] }
  0x2e   : > { %1503 = vmatprep.mubr.msk.bf16.mxu0 %vm611_vm1, %v1598_v19  ;;  %1535 = vmatprep.mubr.msk.bf16.mxu1 %vm611_vm1, %v1599_v20 }
  0x35   : > { %1504 = vmatmul.mubr.msk.bf16.gmra.mxu0 %vm611_vm1, %v1600_v21  ;;  %1536 = vmatmul.mubr.msk.bf16.gmra.mxu1 %vm611_vm1, %v1601_v22  ;;  %v317_v21 = vld [vmem:[#allocation2 + $0x50] sm:$0xff] }
  0x36   : > { %1507 = vmatprep.mubr.msk.bf16.mxu0 %vm611_vm1, %v1602_v23  ;;  %1539 = vmatprep.mubr.msk.bf16.mxu1 %vm611_vm1, %v1603_v24 }
  0x3d   : > { %1508 = vmatmul.mubr.msk.bf16.gmra.mxu0 %vm611_vm1, %v1604_v25  ;;  %1540 = vmatmul.mubr.msk.bf16.gmra.mxu1 %vm611_vm1, %v1605_v26  ;;  %v349_v25 = vld [vmem:[#allocation2 + $0x150] sm:$0xff] }
  0x3e   : > { %1511 = vmatprep.mubr.msk.bf16.mxu0 %vm611_vm1, %v1606_v27  ;;  %1543 = vmatprep.mubr.msk.bf16.mxu1 %vm611_vm1, %v1607_v28 }
  0x45   : > { %1512 = vmatmul.mubr.msk.bf16.gmra.mxu0 %vm611_vm1, %v1608_v29  ;;  %1544 = vmatmul.mubr.msk.bf16.gmra.mxu1 %vm611_vm1, %v1609_v30  ;;  %v315_v29 = vld [vmem:[#allocation2 + $0x40] sm:$0xff] }
  0x46   : > { %1515 = vmatprep.mubr.msk.bf16.mxu0 %vm611_vm1, %v1610_v31  ;;  %1547 = vmatprep.mubr.msk.bf16.mxu1 %vm611_vm1, %v1611_v32 }
  0x4d   : > { %1516 = vmatmul.mubr.msk.bf16.gmra.mxu0 %vm611_vm1, %v1612_v33  ;;  %1548 = vmatmul.mubr.msk.bf16.gmra.mxu1 %vm611_vm1, %v1613_v34  ;;  %v347_v33 = vld [vmem:[#allocation2 + $0x140] sm:$0xff] }
  0xd5   : > { %v1489_v37 = vpop.f32.mrf.mxu0  ;;  %v1521_v40 = vpop.f32.mrf.mxu1 }
  0xd6   : > { %v999_v39 = vadd.f32 %v1489_v37, %v309_v35  ;;  %v1031_v42 = vadd.f32 %v1521_v40, %v341_v36  ;;  %v318_v37 = vld [vmem:[#allocation2 + $0x58] sm:$0xff] }
  0xd7   : > { %v742_v43 = vpop.f32.mrf.mxu0  ;;  %v870_v46 = vpop.f32.mrf.mxu1 }
  0xd8   : > { %1064 = vst.msk [vmem:[#allocation2 + $0x10] sm:$0xff] %vm242_vm0, %v999_v39  ;;  %v997_v45 = vadd.f32 %v742_v43, %v307_v38  ;;  %1096 = vst.msk [vmem:[#allocation2 + $0x110] sm:$0xff] %vm242_vm0, %v1031_v42  ;;  %v1029_v48 = vadd.f32 %v870_v46, %v339_v41  ;;  %v350_v41 = vld [vmem:[#allocation2 + $0x158] sm:$0xff] }
  0xd9   : > { %v1490_v49 = vpop.f32.mrf.mxu0  ;;  %v1522_v52 = vpop.f32.mrf.mxu1 }
  0xda   : > { %1062 = vst.msk [vmem:[#allocation2] sm:$0xff] %vm242_vm0, %v997_v45  ;;  %v1000_v51 = vadd.f32 %v1490_v49, %v310_v44  ;;  %1094 = vst.msk [vmem:[#allocation2 + $0x100] sm:$0xff] %vm242_vm0, %v1029_v48  ;;  %v1032_v54 = vadd.f32 %v1522_v52, %v342_v47  ;;  %v316_v45 = vld [vmem:[#allocation2 + $0x48] sm:$0xff] }
  0xdb   : > { %v745_v55 = vpop.f32.mrf.mxu0  ;;  %v873_v58 = vpop.f32.mrf.mxu1  ;;  %v348_v49 = vld [vmem:[#allocation2 + $0x148] sm:$0xff] }
  0xdc   : > { %1065 = vst.msk [vmem:[#allocation2 + $0x18] sm:$0xff] %vm242_vm0, %v1000_v51  ;;  %v998_v57 = vadd.f32 %v745_v55, %v308_v50  ;;  %1097 = vst.msk [vmem:[#allocation2 + $0x118] sm:$0xff] %vm242_vm0, %v1032_v54  ;;  %v1030_v60 = vadd.f32 %v873_v58, %v340_v53  ;;  %v321_v53 = vld [vmem:[#allocation2 + $0x70] sm:$0xff] }
  0xdd   : > { %v1493_v61 = vpop.f32.mrf.mxu0  ;;  %v1525_v0 = vpop.f32.mrf.mxu1 }
  0xde   : > { %1063 = vst.msk [vmem:[#allocation2 + $0x8] sm:$0xff] %vm242_vm0, %v998_v57  ;;  %v1003_v63 = vadd.f32 %v1493_v61, %v313_v56  ;;  %1095 = vst.msk [vmem:[#allocation2 + $0x108] sm:$0xff] %vm242_vm0, %v1030_v60  ;;  %v1035_v3 = vadd.f32 %v1525_v0, %v345_v59  ;;  %v353_v57 = vld [vmem:[#allocation2 + $0x170] sm:$0xff]  ;;  %v319_v61 = vld [vmem:[#allocation2 + $0x60] sm:$0xff] }
  0xdf   : > { %v1131_v2 = vld [vmem:[#allocation2 + $0x10] sm:$0xff]  ;;  %v758_v4 = vpop.f32.mrf.mxu0  ;;  %v886_v8 = vpop.f32.mrf.mxu1 }
  0xe0   : > { %1195 = vst.msk [vmem:[%s1893_s25 + $0x10] sm:$0xff] %vm242_vm0, %v1131_v2  ;;  %v1163_v6 = vld [vmem:[#allocation2 + $0x110] sm:$0xff]  ;;  %1068 = vst.msk [vmem:[#allocation2 + $0x30] sm:$0xff] %vm242_vm0, %v1003_v63  ;;  %v1001_v7 = vadd.f32 %v758_v4, %v311_v62  ;;  %v1033_v11 = vadd.f32 %v886_v8, %v343_v1  ;;  %v351_v1 = vld [vmem:[#allocation2 + $0x160] sm:$0xff] }
  0xe1   : > { %1227 = vst.msk [vmem:[%s1893_s25 + $0x110] sm:$0xff] %vm242_vm0, %v1163_v6  ;;  %v1129_v10 = vld [vmem:[#allocation2] sm:$0xff]  ;;  %1100 = vst.msk [vmem:[#allocation2 + $0x130] sm:$0xff] %vm242_vm0, %v1035_v3  ;;  %v1494_v12 = vpop.f32.mrf.mxu0  ;;  %v1526_v16 = vpop.f32.mrf.mxu1 }
  0xe2   : > { %1193 = vst.msk [vmem:[%s1893_s25] sm:$0xff] %vm242_vm0, %v1129_v10  ;;  %v1161_v14 = vld [vmem:[#allocation2 + $0x100] sm:$0xff]  ;;  %1066 = vst.msk [vmem:[#allocation2 + $0x20] sm:$0xff] %vm242_vm0, %v1001_v7  ;;  %v1004_v15 = vadd.f32 %v1494_v12, %v314_v5  ;;  %v1036_v19 = vadd.f32 %v1526_v16, %v346_v9  ;;  %v322_v5 = vld [vmem:[#allocation2 + $0x78] sm:$0xff] }
  0xe3   : > { %1225 = vst.msk [vmem:[%s1893_s25 + $0x100] sm:$0xff] %vm242_vm0, %v1161_v14  ;;  %v1132_v18 = vld [vmem:[#allocation2 + $0x18] sm:$0xff]  ;;  %1098 = vst.msk [vmem:[#allocation2 + $0x120] sm:$0xff] %vm242_vm0, %v1033_v11  ;;  %v761_v20 = vpop.f32.mrf.mxu0  ;;  %v889_v24 = vpop.f32.mrf.mxu1 }
  0xe4   : > { %1196 = vst.msk [vmem:[%s1893_s25 + $0x18] sm:$0xff] %vm242_vm0, %v1132_v18  ;;  %v1164_v22 = vld [vmem:[#allocation2 + $0x118] sm:$0xff]  ;;  %1069 = vst.msk [vmem:[#allocation2 + $0x38] sm:$0xff] %vm242_vm0, %v1004_v15  ;;  %v1002_v23 = vadd.f32 %v761_v20, %v312_v13  ;;  %v1034_v27 = vadd.f32 %v889_v24, %v344_v17  ;;  %v320_v13 = vld [vmem:[#allocation2 + $0x68] sm:$0xff] }
  0xe5   : > { %1228 = vst.msk [vmem:[%s1893_s25 + $0x118] sm:$0xff] %vm242_vm0, %v1164_v22  ;;  %v1130_v26 = vld [vmem:[#allocation2 + $0x8] sm:$0xff]  ;;  %1101 = vst.msk [vmem:[#allocation2 + $0x138] sm:$0xff] %vm242_vm0, %v1036_v19  ;;  %v1497_v28 = vpop.f32.mrf.mxu0  ;;  %v1529_v32 = vpop.f32.mrf.mxu1  ;;  %v354_v9 = vld [vmem:[#allocation2 + $0x178] sm:$0xff] }
  0xe6   : > { %1194 = vst.msk [vmem:[%s1893_s25 + $0x8] sm:$0xff] %vm242_vm0, %v1130_v26  ;;  %v1162_v30 = vld [vmem:[#allocation2 + $0x108] sm:$0xff]  ;;  %1067 = vst.msk [vmem:[#allocation2 + $0x28] sm:$0xff] %vm242_vm0, %v1002_v23  ;;  %v1007_v31 = vadd.f32 %v1497_v28, %v317_v21  ;;  %v1039_v35 = vadd.f32 %v1529_v32, %v349_v25  ;;  %v325_v21 = vld [vmem:[#allocation2 + $0x90] sm:$0xff] }
  0xe7   : > { %1226 = vst.msk [vmem:[%s1893_s25 + $0x108] sm:$0xff] %vm242_vm0, %v1162_v30  ;;  %v1135_v34 = vld [vmem:[#allocation2 + $0x30] sm:$0xff]  ;;  %1099 = vst.msk [vmem:[#allocation2 + $0x128] sm:$0xff] %vm242_vm0, %v1034_v27  ;;  %v774_v36 = vpop.f32.mrf.mxu0  ;;  %v902_v40 = vpop.f32.mrf.mxu1  ;;  %v352_v17 = vld [vmem:[#allocation2 + $0x168] sm:$0xff] }
  0xe8   : > { %1199 = vst.msk [vmem:[%s1893_s25 + $0x30] sm:$0xff] %vm242_vm0, %v1135_v34  ;;  %v1167_v38 = vld [vmem:[#allocation2 + $0x130] sm:$0xff]  ;;  %1072 = vst.msk [vmem:[#allocation2 + $0x50] sm:$0xff] %vm242_vm0, %v1007_v31  ;;  %v1005_v39 = vadd.f32 %v774_v36, %v315_v29  ;;  %v1037_v43 = vadd.f32 %v902_v40, %v347_v33  ;;  %v323_v29 = vld [vmem:[#allocation2 + $0x80] sm:$0xff] }
  0xe9   : > { %1231 = vst.msk [vmem:[%s1893_s25 + $0x130] sm:$0xff] %vm242_vm0, %v1167_v38  ;;  %v1133_v42 = vld [vmem:[#allocation2 + $0x20] sm:$0xff]  ;;  %1104 = vst.msk [vmem:[#allocation2 + $0x150] sm:$0xff] %vm242_vm0, %v1039_v35  ;;  %v1498_v44 = vpop.f32.mrf.mxu0  ;;  %v1530_v48 = vpop.f32.mrf.mxu1  ;;  %v357_v25 = vld [vmem:[#allocation2 + $0x190] sm:$0xff] }
  0xea   : > { %1197 = vst.msk [vmem:[%s1893_s25 + $0x20] sm:$0xff] %vm242_vm0, %v1133_v42  ;;  %v1165_v46 = vld [vmem:[#allocation2 + $0x120] sm:$0xff]  ;;  %1070 = vst.msk [vmem:[#allocation2 + $0x40] sm:$0xff] %vm242_vm0, %v1005_v39  ;;  %v1008_v47 = vadd.f32 %v1498_v44, %v318_v37  ;;  %v1040_v51 = vadd.f32 %v1530_v48, %v350_v41  ;;  %v326_v37 = vld [vmem:[#allocation2 + $0x98] sm:$0xff] }
  0xeb   : > { %1229 = vst.msk [vmem:[%s1893_s25 + $0x120] sm:$0xff] %vm242_vm0, %v1165_v46  ;;  %v1136_v50 = vld [vmem:[#allocation2 + $0x38] sm:$0xff]  ;;  %1102 = vst.msk [vmem:[#allocation2 + $0x140] sm:$0xff] %vm242_vm0, %v1037_v43  ;;  %v777_v52 = vpop.f32.mrf.mxu0  ;;  %v905_v56 = vpop.f32.mrf.mxu1  ;;  %v355_v33 = vld [vmem:[#allocation2 + $0x180] sm:$0xff] }
  0xec   : > { %1200 = vst.msk [vmem:[%s1893_s25 + $0x38] sm:$0xff] %vm242_vm0, %v1136_v50  ;;  %v1168_v54 = vld [vmem:[#allocation2 + $0x138] sm:$0xff]  ;;  %1073 = vst.msk [vmem:[#allocation2 + $0x58] sm:$0xff] %vm242_vm0, %v1008_v47  ;;  %v1006_v55 = vadd.f32 %v777_v52, %v316_v45  ;;  %v1038_v59 = vadd.f32 %v905_v56, %v348_v49  ;;  %v324_v45 = vld [vmem:[#allocation2 + $0x88] sm:$0xff] }
  0xed   : > { %1232 = vst.msk [vmem:[%s1893_s25 + $0x138] sm:$0xff] %vm242_vm0, %v1168_v54  ;;  %v1134_v58 = vld [vmem:[#allocation2 + $0x28] sm:$0xff]  ;;  %1105 = vst.msk [vmem:[#allocation2 + $0x158] sm:$0xff] %vm242_vm0, %v1040_v51  ;;  %v1501_v60 = vpop.f32.mrf.mxu0  ;;  %v1533_v0 = vpop.f32.mrf.mxu1  ;;  %v358_v41 = vld [vmem:[#allocation2 + $0x198] sm:$0xff] }
  0xee   : > { %1198 = vst.msk [vmem:[%s1893_s25 + $0x28] sm:$0xff] %vm242_vm0, %v1134_v58  ;;  %v1166_v62 = vld [vmem:[#allocation2 + $0x128] sm:$0xff]  ;;  %1071 = vst.msk [vmem:[#allocation2 + $0x48] sm:$0xff] %vm242_vm0, %v1006_v55  ;;  %v1011_v63 = vadd.f32 %v1501_v60, %v321_v53  ;;  %v1043_v3 = vadd.f32 %v1533_v0, %v353_v57  ;;  %v329_v53 = vld [vmem:[#allocation2 + $0xb0] sm:$0xff] }
  0xef   : > { %1230 = vst.msk [vmem:[%s1893_s25 + $0x128] sm:$0xff] %vm242_vm0, %v1166_v62  ;;  %v1139_v2 = vld [vmem:[#allocation2 + $0x50] sm:$0xff]  ;;  %1103 = vst.msk [vmem:[#allocation2 + $0x148] sm:$0xff] %vm242_vm0, %v1038_v59  ;;  %v790_v4 = vpop.f32.mrf.mxu0  ;;  %v918_v8 = vpop.f32.mrf.mxu1  ;;  %v356_v49 = vld [vmem:[#allocation2 + $0x188] sm:$0xff] }
  0xf0   : > { %1203 = vst.msk [vmem:[%s1893_s25 + $0x50] sm:$0xff] %vm242_vm0, %v1139_v2  ;;  %v1171_v6 = vld [vmem:[#allocation2 + $0x150] sm:$0xff]  ;;  %1076 = vst.msk [vmem:[#allocation2 + $0x70] sm:$0xff] %vm242_vm0, %v1011_v63  ;;  %v1009_v7 = vadd.f32 %v790_v4, %v319_v61  ;;  %v1041_v11 = vadd.f32 %v918_v8, %v351_v1  ;;  %v327_v61 = vld [vmem:[#allocation2 + $0xa0] sm:$0xff] }
  0xf1   : > { %1235 = vst.msk [vmem:[%s1893_s25 + $0x150] sm:$0xff] %vm242_vm0, %v1171_v6  ;;  %v1137_v10 = vld [vmem:[#allocation2 + $0x40] sm:$0xff]  ;;  %1108 = vst.msk [vmem:[#allocation2 + $0x170] sm:$0xff] %vm242_vm0, %v1043_v3  ;;  %v1502_v12 = vpop.f32.mrf.mxu0  ;;  %v1534_v16 = vpop.f32.mrf.mxu1  ;;  %v361_v57 = vld [vmem:[#allocation2 + $0x1b0] sm:$0xff] }
  0xf2   : > { %1201 = vst.msk [vmem:[%s1893_s25 + $0x40] sm:$0xff] %vm242_vm0, %v1137_v10  ;;  %v1169_v14 = vld [vmem:[#allocation2 + $0x140] sm:$0xff]  ;;  %1074 = vst.msk [vmem:[#allocation2 + $0x60] sm:$0xff] %vm242_vm0, %v1009_v7  ;;  %v1012_v15 = vadd.f32 %v1502_v12, %v322_v5  ;;  %v1044_v19 = vadd.f32 %v1534_v16, %v354_v9  ;;  %v330_v5 = vld [vmem:[#allocation2 + $0xb8] sm:$0xff] }
  0xf3   : > { %1233 = vst.msk [vmem:[%s1893_s25 + $0x140] sm:$0xff] %vm242_vm0, %v1169_v14  ;;  %v1140_v18 = vld [vmem:[#allocation2 + $0x58] sm:$0xff]  ;;  %1106 = vst.msk [vmem:[#allocation2 + $0x160] sm:$0xff] %vm242_vm0, %v1041_v11  ;;  %v793_v20 = vpop.f32.mrf.mxu0  ;;  %v921_v24 = vpop.f32.mrf.mxu1  ;;  %v359_v1 = vld [vmem:[#allocation2 + $0x1a0] sm:$0xff] }
  0xf4   : > { %1204 = vst.msk [vmem:[%s1893_s25 + $0x58] sm:$0xff] %vm242_vm0, %v1140_v18  ;;  %v1172_v22 = vld [vmem:[#allocation2 + $0x158] sm:$0xff]  ;;  %1077 = vst.msk [vmem:[#allocation2 + $0x78] sm:$0xff] %vm242_vm0, %v1012_v15  ;;  %v1010_v23 = vadd.f32 %v793_v20, %v320_v13  ;;  %v1042_v27 = vadd.f32 %v921_v24, %v352_v17  ;;  %v328_v13 = vld [vmem:[#allocation2 + $0xa8] sm:$0xff] }
  0xf5   : > { %1236 = vst.msk [vmem:[%s1893_s25 + $0x158] sm:$0xff] %vm242_vm0, %v1172_v22  ;;  %v1138_v26 = vld [vmem:[#allocation2 + $0x48] sm:$0xff]  ;;  %1109 = vst.msk [vmem:[#allocation2 + $0x178] sm:$0xff] %vm242_vm0, %v1044_v19  ;;  %v1505_v28 = vpop.f32.mrf.mxu0  ;;  %v1537_v32 = vpop.f32.mrf.mxu1  ;;  %v362_v9 = vld [vmem:[#allocation2 + $0x1b8] sm:$0xff] }
  0xf6   : > { %1202 = vst.msk [vmem:[%s1893_s25 + $0x48] sm:$0xff] %vm242_vm0, %v1138_v26  ;;  %v1170_v30 = vld [vmem:[#allocation2 + $0x148] sm:$0xff]  ;;  %1075 = vst.msk [vmem:[#allocation2 + $0x68] sm:$0xff] %vm242_vm0, %v1010_v23  ;;  %v1015_v31 = vadd.f32 %v1505_v28, %v325_v21  ;;  %v1047_v35 = vadd.f32 %v1537_v32, %v357_v25  ;;  %v333_v21 = vld [vmem:[#allocation2 + $0xd0] sm:$0xff] }
  0xf7   : > { %1234 = vst.msk [vmem:[%s1893_s25 + $0x148] sm:$0xff] %vm242_vm0, %v1170_v30  ;;  %v1143_v34 = vld [vmem:[#allocation2 + $0x70] sm:$0xff]  ;;  %1107 = vst.msk [vmem:[#allocation2 + $0x168] sm:$0xff] %vm242_vm0, %v1042_v27  ;;  %v806_v36 = vpop.f32.mrf.mxu0  ;;  %v934_v40 = vpop.f32.mrf.mxu1  ;;  %v360_v17 = vld [vmem:[#allocation2 + $0x1a8] sm:$0xff] }
  0xf8   : > { %1207 = vst.msk [vmem:[%s1893_s25 + $0x70] sm:$0xff] %vm242_vm0, %v1143_v34  ;;  %v1175_v38 = vld [vmem:[#allocation2 + $0x170] sm:$0xff]  ;;  %1080 = vst.msk [vmem:[#allocation2 + $0x90] sm:$0xff] %vm242_vm0, %v1015_v31  ;;  %v1013_v39 = vadd.f32 %v806_v36, %v323_v29  ;;  %v1045_v43 = vadd.f32 %v934_v40, %v355_v33  ;;  %v331_v29 = vld [vmem:[#allocation2 + $0xc0] sm:$0xff] }
  0xf9   : > { %1239 = vst.msk [vmem:[%s1893_s25 + $0x170] sm:$0xff] %vm242_vm0, %v1175_v38  ;;  %v1141_v42 = vld [vmem:[#allocation2 + $0x60] sm:$0xff]  ;;  %1112 = vst.msk [vmem:[#allocation2 + $0x190] sm:$0xff] %vm242_vm0, %v1047_v35  ;;  %v1506_v44 = vpop.f32.mrf.mxu0  ;;  %v1538_v48 = vpop.f32.mrf.mxu1  ;;  %v365_v25 = vld [vmem:[#allocation2 + $0x1d0] sm:$0xff] }
  0xfa   : > { %1205 = vst.msk [vmem:[%s1893_s25 + $0x60] sm:$0xff] %vm242_vm0, %v1141_v42  ;;  %v1173_v46 = vld [vmem:[#allocation2 + $0x160] sm:$0xff]  ;;  %1078 = vst.msk [vmem:[#allocation2 + $0x80] sm:$0xff] %vm242_vm0, %v1013_v39  ;;  %v1016_v47 = vadd.f32 %v1506_v44, %v326_v37  ;;  %v1048_v51 = vadd.f32 %v1538_v48, %v358_v41  ;;  %v334_v37 = vld [vmem:[#allocation2 + $0xd8] sm:$0xff] }
  0xfb   : > { %1237 = vst.msk [vmem:[%s1893_s25 + $0x160] sm:$0xff] %vm242_vm0, %v1173_v46  ;;  %v1144_v50 = vld [vmem:[#allocation2 + $0x78] sm:$0xff]  ;;  %1110 = vst.msk [vmem:[#allocation2 + $0x180] sm:$0xff] %vm242_vm0, %v1045_v43  ;;  %v809_v52 = vpop.f32.mrf.mxu0  ;;  %v937_v56 = vpop.f32.mrf.mxu1  ;;  %v363_v33 = vld [vmem:[#allocation2 + $0x1c0] sm:$0xff] }
  0xfc   : > { %1208 = vst.msk [vmem:[%s1893_s25 + $0x78] sm:$0xff] %vm242_vm0, %v1144_v50  ;;  %v1176_v54 = vld [vmem:[#allocation2 + $0x178] sm:$0xff]  ;;  %1081 = vst.msk [vmem:[#allocation2 + $0x98] sm:$0xff] %vm242_vm0, %v1016_v47  ;;  %v1014_v55 = vadd.f32 %v809_v52, %v324_v45  ;;  %v1046_v59 = vadd.f32 %v937_v56, %v356_v49  ;;  %v332_v45 = vld [vmem:[#allocation2 + $0xc8] sm:$0xff] }
  0xfd   : > { %1240 = vst.msk [vmem:[%s1893_s25 + $0x178] sm:$0xff] %vm242_vm0, %v1176_v54  ;;  %v1142_v58 = vld [vmem:[#allocation2 + $0x68] sm:$0xff]  ;;  %1113 = vst.msk [vmem:[#allocation2 + $0x198] sm:$0xff] %vm242_vm0, %v1048_v51  ;;  %v1509_v60 = vpop.f32.mrf.mxu0  ;;  %v1541_v0 = vpop.f32.mrf.mxu1  ;;  %v366_v41 = vld [vmem:[#allocation2 + $0x1d8] sm:$0xff] }
  0xfe   : > { %1206 = vst.msk [vmem:[%s1893_s25 + $0x68] sm:$0xff] %vm242_vm0, %v1142_v58  ;;  %v1174_v62 = vld [vmem:[#allocation2 + $0x168] sm:$0xff]  ;;  %1079 = vst.msk [vmem:[#allocation2 + $0x88] sm:$0xff] %vm242_vm0, %v1014_v55  ;;  %v1019_v63 = vadd.f32 %v1509_v60, %v329_v53  ;;  %v1051_v3 = vadd.f32 %v1541_v0, %v361_v57  ;;  %v337_v53 = vld [vmem:[#allocation2 + $0xf0] sm:$0xff] }
  0xff   : > { %1238 = vst.msk [vmem:[%s1893_s25 + $0x168] sm:$0xff] %vm242_vm0, %v1174_v62  ;;  %v1147_v2 = vld [vmem:[#allocation2 + $0x90] sm:$0xff]  ;;  %1111 = vst.msk [vmem:[#allocation2 + $0x188] sm:$0xff] %vm242_vm0, %v1046_v59  ;;  %v822_v4 = vpop.f32.mrf.mxu0  ;;  %v950_v8 = vpop.f32.mrf.mxu1  ;;  %v364_v49 = vld [vmem:[#allocation2 + $0x1c8] sm:$0xff] }
 0x100   : > { %1211 = vst.msk [vmem:[%s1893_s25 + $0x90] sm:$0xff] %vm242_vm0, %v1147_v2  ;;  %v1179_v6 = vld [vmem:[#allocation2 + $0x190] sm:$0xff]  ;;  %1084 = vst.msk [vmem:[#allocation2 + $0xb0] sm:$0xff] %vm242_vm0, %v1019_v63  ;;  %v1017_v7 = vadd.f32 %v822_v4, %v327_v61  ;;  %v1049_v11 = vadd.f32 %v950_v8, %v359_v1  ;;  %v335_v61 = vld [vmem:[#allocation2 + $0xe0] sm:$0xff] }
 0x101   : > { %1243 = vst.msk [vmem:[%s1893_s25 + $0x190] sm:$0xff] %vm242_vm0, %v1179_v6  ;;  %v1145_v10 = vld [vmem:[#allocation2 + $0x80] sm:$0xff]  ;;  %1116 = vst.msk [vmem:[#allocation2 + $0x1b0] sm:$0xff] %vm242_vm0, %v1051_v3  ;;  %v1510_v12 = vpop.f32.mrf.mxu0  ;;  %v1542_v16 = vpop.f32.mrf.mxu1  ;;  %v369_v57 = vld [vmem:[#allocation2 + $0x1f0] sm:$0xff] }
 0x102   : > { %1209 = vst.msk [vmem:[%s1893_s25 + $0x80] sm:$0xff] %vm242_vm0, %v1145_v10  ;;  %v1177_v14 = vld [vmem:[#allocation2 + $0x180] sm:$0xff]  ;;  %1082 = vst.msk [vmem:[#allocation2 + $0xa0] sm:$0xff] %vm242_vm0, %v1017_v7  ;;  %v1020_v15 = vadd.f32 %v1510_v12, %v330_v5  ;;  %v1052_v19 = vadd.f32 %v1542_v16, %v362_v9  ;;  %v338_v5 = vld [vmem:[#allocation2 + $0xf8] sm:$0xff] }
 0x103   : > { %1241 = vst.msk [vmem:[%s1893_s25 + $0x180] sm:$0xff] %vm242_vm0, %v1177_v14  ;;  %v1148_v18 = vld [vmem:[#allocation2 + $0x98] sm:$0xff]  ;;  %1114 = vst.msk [vmem:[#allocation2 + $0x1a0] sm:$0xff] %vm242_vm0, %v1049_v11  ;;  %v825_v20 = vpop.f32.mrf.mxu0  ;;  %v953_v24 = vpop.f32.mrf.mxu1  ;;  %v367_v1 = vld [vmem:[#allocation2 + $0x1e0] sm:$0xff] }
 0x104   : > { %1212 = vst.msk [vmem:[%s1893_s25 + $0x98] sm:$0xff] %vm242_vm0, %v1148_v18  ;;  %v1180_v22 = vld [vmem:[#allocation2 + $0x198] sm:$0xff]  ;;  %1085 = vst.msk [vmem:[#allocation2 + $0xb8] sm:$0xff] %vm242_vm0, %v1020_v15  ;;  %v1018_v23 = vadd.f32 %v825_v20, %v328_v13  ;;  %v1050_v27 = vadd.f32 %v953_v24, %v360_v17  ;;  %v336_v13 = vld [vmem:[#allocation2 + $0xe8] sm:$0xff] }
 0x105   : > { %1244 = vst.msk [vmem:[%s1893_s25 + $0x198] sm:$0xff] %vm242_vm0, %v1180_v22  ;;  %v1146_v26 = vld [vmem:[#allocation2 + $0x88] sm:$0xff]  ;;  %1117 = vst.msk [vmem:[#allocation2 + $0x1b8] sm:$0xff] %vm242_vm0, %v1052_v19  ;;  %v1513_v28 = vpop.f32.mrf.mxu0  ;;  %v1545_v32 = vpop.f32.mrf.mxu1  ;;  %v370_v9 = vld [vmem:[#allocation2 + $0x1f8] sm:$0xff] }
 0x106   : > { %1210 = vst.msk [vmem:[%s1893_s25 + $0x88] sm:$0xff] %vm242_vm0, %v1146_v26  ;;  %v1178_v30 = vld [vmem:[#allocation2 + $0x188] sm:$0xff]  ;;  %1083 = vst.msk [vmem:[#allocation2 + $0xa8] sm:$0xff] %vm242_vm0, %v1018_v23  ;;  %v1023_v31 = vadd.f32 %v1513_v28, %v333_v21  ;;  %v1055_v35 = vadd.f32 %v1545_v32, %v365_v25 }
 0x107   : > { %1242 = vst.msk [vmem:[%s1893_s25 + $0x188] sm:$0xff] %vm242_vm0, %v1178_v30  ;;  %v1151_v34 = vld [vmem:[#allocation2 + $0xb0] sm:$0xff]  ;;  %1115 = vst.msk [vmem:[#allocation2 + $0x1a8] sm:$0xff] %vm242_vm0, %v1050_v27  ;;  %v838_v36 = vpop.f32.mrf.mxu0  ;;  %v966_v40 = vpop.f32.mrf.mxu1  ;;  %v368_v17 = vld [vmem:[#allocation2 + $0x1e8] sm:$0xff] }
 0x108   : > { %1215 = vst.msk [vmem:[%s1893_s25 + $0xb0] sm:$0xff] %vm242_vm0, %v1151_v34  ;;  %v1183_v38 = vld [vmem:[#allocation2 + $0x1b0] sm:$0xff]  ;;  %1088 = vst.msk [vmem:[#allocation2 + $0xd0] sm:$0xff] %vm242_vm0, %v1023_v31  ;;  %v1021_v39 = vadd.f32 %v838_v36, %v331_v29  ;;  %v1053_v43 = vadd.f32 %v966_v40, %v363_v33 }
 0x109   : > { %1247 = vst.msk [vmem:[%s1893_s25 + $0x1b0] sm:$0xff] %vm242_vm0, %v1183_v38  ;;  %v1149_v42 = vld [vmem:[#allocation2 + $0xa0] sm:$0xff]  ;;  %1120 = vst.msk [vmem:[#allocation2 + $0x1d0] sm:$0xff] %vm242_vm0, %v1055_v35  ;;  %v1514_v44 = vpop.f32.mrf.mxu0  ;;  %v1546_v48 = vpop.f32.mrf.mxu1 }
 0x10a   : > { %1213 = vst.msk [vmem:[%s1893_s25 + $0xa0] sm:$0xff] %vm242_vm0, %v1149_v42  ;;  %v1181_v46 = vld [vmem:[#allocation2 + $0x1a0] sm:$0xff]  ;;  %1086 = vst.msk [vmem:[#allocation2 + $0xc0] sm:$0xff] %vm242_vm0, %v1021_v39  ;;  %v1024_v47 = vadd.f32 %v1514_v44, %v334_v37  ;;  %v1056_v51 = vadd.f32 %v1546_v48, %v366_v41 }
 0x10b   : > { %1245 = vst.msk [vmem:[%s1893_s25 + $0x1a0] sm:$0xff] %vm242_vm0, %v1181_v46  ;;  %v1152_v50 = vld [vmem:[#allocation2 + $0xb8] sm:$0xff]  ;;  %1118 = vst.msk [vmem:[#allocation2 + $0x1c0] sm:$0xff] %vm242_vm0, %v1053_v43  ;;  %v841_v52 = vpop.f32.mrf.mxu0  ;;  %v969_v56 = vpop.f32.mrf.mxu1 }
 0x10c   : > { %1216 = vst.msk [vmem:[%s1893_s25 + $0xb8] sm:$0xff] %vm242_vm0, %v1152_v50  ;;  %v1184_v54 = vld [vmem:[#allocation2 + $0x1b8] sm:$0xff]  ;;  %1089 = vst.msk [vmem:[#allocation2 + $0xd8] sm:$0xff] %vm242_vm0, %v1024_v47  ;;  %v1022_v55 = vadd.f32 %v841_v52, %v332_v45  ;;  %v1054_v59 = vadd.f32 %v969_v56, %v364_v49 }
 0x10d   : > { %1248 = vst.msk [vmem:[%s1893_s25 + $0x1b8] sm:$0xff] %vm242_vm0, %v1184_v54  ;;  %v1150_v58 = vld [vmem:[#allocation2 + $0xa8] sm:$0xff]  ;;  %1121 = vst.msk [vmem:[#allocation2 + $0x1d8] sm:$0xff] %vm242_vm0, %v1056_v51  ;;  %v1517_v60 = vpop.f32.mrf.mxu0  ;;  %v1549_v0 = vpop.f32.mrf.mxu1 }
 0x10e   : > { %1214 = vst.msk [vmem:[%s1893_s25 + $0xa8] sm:$0xff] %vm242_vm0, %v1150_v58  ;;  %v1182_v62 = vld [vmem:[#allocation2 + $0x1a8] sm:$0xff]  ;;  %1087 = vst.msk [vmem:[#allocation2 + $0xc8] sm:$0xff] %vm242_vm0, %v1022_v55  ;;  %v1027_v63 = vadd.f32 %v1517_v60, %v337_v53  ;;  %v1059_v3 = vadd.f32 %v1549_v0, %v369_v57 }
 0x10f   : > { %1246 = vst.msk [vmem:[%s1893_s25 + $0x1a8] sm:$0xff] %vm242_vm0, %v1182_v62  ;;  %v1155_v2 = vld [vmem:[#allocation2 + $0xd0] sm:$0xff]  ;;  %1119 = vst.msk [vmem:[#allocation2 + $0x1c8] sm:$0xff] %vm242_vm0, %v1054_v59  ;;  %v854_v4 = vpop.f32.mrf.mxu0  ;;  %v982_v8 = vpop.f32.mrf.mxu1 }
 0x110   : > { %1219 = vst.msk [vmem:[%s1893_s25 + $0xd0] sm:$0xff] %vm242_vm0, %v1155_v2  ;;  %v1187_v6 = vld [vmem:[#allocation2 + $0x1d0] sm:$0xff]  ;;  %1092 = vst.msk [vmem:[#allocation2 + $0xf0] sm:$0xff] %vm242_vm0, %v1027_v63  ;;  %v1025_v7 = vadd.f32 %v854_v4, %v335_v61  ;;  %v1057_v11 = vadd.f32 %v982_v8, %v367_v1 }
 0x111   : > { %1251 = vst.msk [vmem:[%s1893_s25 + $0x1d0] sm:$0xff] %vm242_vm0, %v1187_v6  ;;  %v1153_v10 = vld [vmem:[#allocation2 + $0xc0] sm:$0xff]  ;;  %1124 = vst.msk [vmem:[#allocation2 + $0x1f0] sm:$0xff] %vm242_vm0, %v1059_v3  ;;  %v1518_v12 = vpop.f32.mrf.mxu0  ;;  %v1550_v16 = vpop.f32.mrf.mxu1 }
 0x112   : > { %1217 = vst.msk [vmem:[%s1893_s25 + $0xc0] sm:$0xff] %vm242_vm0, %v1153_v10  ;;  %v1185_v14 = vld [vmem:[#allocation2 + $0x1c0] sm:$0xff]  ;;  %1090 = vst.msk [vmem:[#allocation2 + $0xe0] sm:$0xff] %vm242_vm0, %v1025_v7  ;;  %v1028_v15 = vadd.f32 %v1518_v12, %v338_v5  ;;  %v1060_v19 = vadd.f32 %v1550_v16, %v370_v9 }
 0x113   : > { %1249 = vst.msk [vmem:[%s1893_s25 + $0x1c0] sm:$0xff] %vm242_vm0, %v1185_v14  ;;  %v1156_v18 = vld [vmem:[#allocation2 + $0xd8] sm:$0xff]  ;;  %1122 = vst.msk [vmem:[#allocation2 + $0x1e0] sm:$0xff] %vm242_vm0, %v1057_v11  ;;  %v857_v20 = vpop.f32.mrf.mxu0  ;;  %v985_v23 = vpop.f32.mrf.mxu1 }
 0x114   : > { %1220 = vst.msk [vmem:[%s1893_s25 + $0xd8] sm:$0xff] %vm242_vm0, %v1156_v18  ;;  %v1188_v21 = vld [vmem:[#allocation2 + $0x1d8] sm:$0xff]  ;;  %1093 = vst.msk [vmem:[#allocation2 + $0xf8] sm:$0xff] %vm242_vm0, %v1028_v15  ;;  %v1026_v22 = vadd.f32 %v857_v20, %v336_v13  ;;  %v1058_v25 = vadd.f32 %v985_v23, %v368_v17 }
 0x115   : > { %1252 = vst.msk [vmem:[%s1893_s25 + $0x1d8] sm:$0xff] %vm242_vm0, %v1188_v21  ;;  %v1154_v24 = vld [vmem:[#allocation2 + $0xc8] sm:$0xff]  ;;  %1125 = vst.msk [vmem:[#allocation2 + $0x1f8] sm:$0xff] %vm242_vm0, %v1060_v19 }
 0x116   : > { %1218 = vst.msk [vmem:[%s1893_s25 + $0xc8] sm:$0xff] %vm242_vm0, %v1154_v24  ;;  %v1186_v26 = vld [vmem:[#allocation2 + $0x1c8] sm:$0xff]  ;;  %1091 = vst.msk [vmem:[#allocation2 + $0xe8] sm:$0xff] %vm242_vm0, %v1026_v22 }
 0x117   : > { %1250 = vst.msk [vmem:[%s1893_s25 + $0x1c8] sm:$0xff] %vm242_vm0, %v1186_v26  ;;  %v1159_v27 = vld [vmem:[#allocation2 + $0xf0] sm:$0xff]  ;;  %1123 = vst.msk [vmem:[#allocation2 + $0x1e8] sm:$0xff] %vm242_vm0, %v1058_v25 }
 0x118   : > { %1223 = vst.msk [vmem:[%s1893_s25 + $0xf0] sm:$0xff] %vm242_vm0, %v1159_v27  ;;  %v1191_v28 = vld [vmem:[#allocation2 + $0x1f0] sm:$0xff] }
 0x119   : > { %1255 = vst.msk [vmem:[%s1893_s25 + $0x1f0] sm:$0xff] %vm242_vm0, %v1191_v28  ;;  %v1157_v29 = vld [vmem:[#allocation2 + $0xe0] sm:$0xff] }
 0x11a   : > { %1221 = vst.msk [vmem:[%s1893_s25 + $0xe0] sm:$0xff] %vm242_vm0, %v1157_v29  ;;  %v1189_v30 = vld [vmem:[#allocation2 + $0x1e0] sm:$0xff] }
 0x11b   : > { %1253 = vst.msk [vmem:[%s1893_s25 + $0x1e0] sm:$0xff] %vm242_vm0, %v1189_v30  ;;  %v1160_v31 = vld [vmem:[#allocation2 + $0xf8] sm:$0xff] }
 0x11c   : > { %1224 = vst.msk [vmem:[%s1893_s25 + $0xf8] sm:$0xff] %vm242_vm0, %v1160_v31  ;;  %v1192_v32 = vld [vmem:[#allocation2 + $0x1f8] sm:$0xff] }
 0x11d   : > { %1256 = vst.msk [vmem:[%s1893_s25 + $0x1f8] sm:$0xff] %vm242_vm0, %v1192_v32  ;;  %v1158_v33 = vld [vmem:[#allocation2 + $0xe8] sm:$0xff] }
 0x11e   : > { %1222 = vst.msk [vmem:[%s1893_s25 + $0xe8] sm:$0xff] %vm242_vm0, %v1158_v33  ;;  %v1190_v34 = vld [vmem:[#allocation2 + $0x1e8] sm:$0xff] }
 0x11f   : > { %1254 = vst.msk [vmem:[%s1893_s25 + $0x1e8] sm:$0xff] %vm242_vm0, %v1190_v34 }
 0x120 PF: > { %s12_s11 = sadd.s32 1, %s1636_s11   ;;  %s2094_s9 = smov %s1632_s10 }
 0x121   : > { %p9_p5 = scmp.ge.s32.totalorder %s12_s11, 4   ;;  %s2095_s10 = smov %s2097_s12 }
 0x123   :  { %11 = sbr.rel (!%p9_p5) target bundleno = 2 (0x2), region = 69 }

// kernel: double_conv_up_forward.11
= control target key start
LH: loop header
LB: loop body
LE: loop exit
PB: predicated region body
PF: predicated region fallthrough
CT: control target
= control target key end

     0   :  { %s1508_s12 = smov 0   ;;  %s1510_s13 = smov 0   ;;  %s2746_s0 = inlined_call_operand.vmem [shape: f32[2,512,16], index: 0, kind: input, shape index: {}]   ;;  %s2747_s1 = inlined_call_operand.vmem [shape: f32[2,512,16], index: 1, kind: input, shape index: {}]   ;;  %s2748_s2 = inlined_call_operand.vmem [shape: f32[2,512,16], index: 2, kind: input, shape index: {}]   ;;  %s2749_s3 = inlined_call_operand.vmem [shape: f32[2,512,16], index: 3, kind: output, shape index: {}]  }
   0x1   :  { %s1512_s14 = smov 0  }
   0x2 LB: > { %s25_s15 = sadd.s32 1, %s1482_s13  ;;  %p1295_p0 = scmp.ge.s32.totalorder %s1486_s14, 1  ;;  %s1486_s14 = sphi %s1512_s14, %s13_s14   ;;  %s1482_s13 = sphi %s1510_s13, %s2920_s13   ;;  %s1478_s12 = sphi %s1508_s12, %s2919_s12  }
   0x3   : > { %p27_p1 = scmp.ge.s32.totalorder %s25_s15, 2  ;;  %p186_p2 = scmp.lt.s32.totalorder %s1486_s14, 3 }
   0x5   : > { %s2922_s15 = smov (%p27_p1, %s25_s15), 0  ;;  %p187_p3 = pnand %p1295_p0, %p186_p2 }
   0x7   : > { %190 = sbr.rel (%p187_p3) target bundleno = 302 (0x12e), region = 32 }
   0xc   : > { %p232_p4 = scmp.lt.s32.totalorder %s1478_s12, 1  ;;  %vm328_vm0 = vcmask 130048  }
   0xe   : > { %s2924_s12 = smov (!%p232_p4, %s1478_s12), 1 }
   0xf   : > { %s1526_s16 = sshll.u32 %s2924_s12, 9 }
  0x10   : > { %s1532_s19 = scalar_lea.vmem %s2746_s0, %s1526_s16  ;;  %s2337_s22 = scalar_lea.vmem %s2747_s1, %s1526_s16 }
  0x11   : > { %v1535_v0 = vld [vmem:[%s1532_s19] sm:$0xff]  ;;  %v1538_v1 = vld [vmem:[%s1532_s19 + $0x8] sm:$0xff]  ;;  %v1541_v2 = vld [vmem:[%s1532_s19 + $0x10] sm:$0xff]  ;;  %s2343_s25 = scalar_lea.vmem %s2748_s2, %s1526_s16  ;;  %s2383_s28 = scalar_lea.vmem %s2749_s3, %s1526_s16 }
  0x12   : > { %v1544_v3 = vld [vmem:[%s1532_s19 + $0x18] sm:$0xff]  ;;  %v1547_v4 = vld [vmem:[%s1532_s19 + $0x20] sm:$0xff]  ;;  %v1550_v5 = vld [vmem:[%s1532_s19 + $0x28] sm:$0xff]  ;;  %v329_v6 = vsel %vm328_vm0, %v1535_v0, -inf  ;;  %v330_v7 = vsel %vm328_vm0, %v1538_v1, -inf  ;;  %v331_v8 = vsel %vm328_vm0, %v1541_v2, -inf }
  0x13   : > { %v1559_v9 = vld [vmem:[%s1532_s19 + $0x30] sm:$0xff]  ;;  %v1562_v10 = vld [vmem:[%s1532_s19 + $0x38] sm:$0xff]  ;;  %v1565_v11 = vld [vmem:[%s1532_s19 + $0x40] sm:$0xff]  ;;  %v332_v12 = vsel %vm328_vm0, %v1544_v3, -inf  ;;  %v333_v13 = vsel %vm328_vm0, %v1547_v4, -inf  ;;  %v335_v14 = vsel %vm328_vm0, %v1550_v5, -inf }
  0x14   : > { %v1574_v15 = vld [vmem:[%s1532_s19 + $0x48] sm:$0xff]  ;;  %v1577_v16 = vld [vmem:[%s1532_s19 + $0x50] sm:$0xff]  ;;  %v1580_v17 = vld [vmem:[%s1532_s19 + $0x58] sm:$0xff]  ;;  %v334_v18 = vmax.f32 %v329_v6, %v333_v13  ;;  %v336_v19 = vmax.f32 %v330_v7, %v335_v14  ;;  %v337_v20 = vsel %vm328_vm0, %v1559_v9, -inf  ;;  %v339_v21 = vsel %vm328_vm0, %v1562_v10, -inf }
  0x15   : > { %v1587_v22 = vld [vmem:[%s1532_s19 + $0x60] sm:$0xff]  ;;  %v1590_v23 = vld [vmem:[%s1532_s19 + $0x68] sm:$0xff]  ;;  %v1593_v24 = vld [vmem:[%s1532_s19 + $0x70] sm:$0xff]  ;;  %v338_v25 = vmax.f32 %v331_v8, %v337_v20  ;;  %v340_v26 = vmax.f32 %v332_v12, %v339_v21  ;;  %v341_v27 = vsel %vm328_vm0, %v1565_v11, -inf  ;;  %v343_v28 = vsel %vm328_vm0, %v1574_v15, -inf }
  0x16   : > { %2796 = vst [vmem:[#allocation2_spill] sm:$0xff] %v1587_v22  ;;  %2797 = vst [vmem:[#allocation3_spill] sm:$0xff] %v1590_v23  ;;  %v1600_v29 = vld [vmem:[%s1532_s19 + $0x78] sm:$0xff]  ;;  %v1603_v30 = vld [vmem:[%s1532_s19 + $0x80] sm:$0xff]  ;;  %v342_v32 = vmax.f32 %v334_v18, %v341_v27  ;;  %v344_v33 = vmax.f32 %v336_v19, %v343_v28  ;;  %v345_v34 = vsel %vm328_vm0, %v1577_v16, -inf  ;;  %v347_v35 = vsel %vm328_vm0, %v1580_v17, -inf }
  0x17   : > { %2798 = vst [vmem:[#allocation4_spill] sm:$0xff] %v1593_v24  ;;  %2799 = vst [vmem:[#allocation5_spill] sm:$0xff] %v1600_v29  ;;  %v1606_v31 = vld [vmem:[%s1532_s19 + $0x88] sm:$0xff]  ;;  %v1613_v36 = vld [vmem:[%s1532_s19 + $0x90] sm:$0xff]  ;;  %v346_v38 = vmax.f32 %v338_v25, %v345_v34  ;;  %v348_v39 = vmax.f32 %v340_v26, %v347_v35  ;;  %v349_v40 = vsel %vm328_vm0, %v1587_v22, -inf  ;;  %v351_v41 = vsel %vm328_vm0, %v1590_v23, -inf }
  0x18   : > { %2800 = vst [vmem:[#allocation6_spill] sm:$0xff] %v1603_v30  ;;  %2801 = vst [vmem:[#allocation7_spill] sm:$0xff] %v1606_v31  ;;  %v1616_v37 = vld [vmem:[%s1532_s19 + $0x98] sm:$0xff]  ;;  %v1623_v42 = vld [vmem:[%s1532_s19 + $0xa0] sm:$0xff]  ;;  %v350_v44 = vmax.f32 %v342_v32, %v349_v40  ;;  %v352_v45 = vmax.f32 %v344_v33, %v351_v41  ;;  %v353_v46 = vsel %vm328_vm0, %v1593_v24, -inf  ;;  %v355_v47 = vsel %vm328_vm0, %v1600_v29, -inf }
  0x19   : > { %2802 = vst [vmem:[#allocation8_spill] sm:$0xff] %v1613_v36  ;;  %2803 = vst [vmem:[#allocation9_spill] sm:$0xff] %v1616_v37  ;;  %v1626_v43 = vld [vmem:[%s1532_s19 + $0xa8] sm:$0xff]  ;;  %v1633_v48 = vld [vmem:[%s1532_s19 + $0xb0] sm:$0xff]  ;;  %v354_v50 = vmax.f32 %v346_v38, %v353_v46  ;;  %v356_v51 = vmax.f32 %v348_v39, %v355_v47  ;;  %v357_v52 = vsel %vm328_vm0, %v1603_v30, -inf  ;;  %v359_v53 = vsel %vm328_vm0, %v1606_v31, -inf }
  0x1a   : > { %2804 = vst [vmem:[#allocation10_spill] sm:$0xff] %v1623_v42  ;;  %2805 = vst [vmem:[#allocation11_spill] sm:$0xff] %v1626_v43  ;;  %v1636_v49 = vld [vmem:[%s1532_s19 + $0xb8] sm:$0xff]  ;;  %v1643_v54 = vld [vmem:[%s1532_s19 + $0xc0] sm:$0xff]  ;;  %v358_v56 = vmax.f32 %v350_v44, %v357_v52  ;;  %v360_v57 = vmax.f32 %v352_v45, %v359_v53  ;;  %v361_v58 = vsel %vm328_vm0, %v1613_v36, -inf  ;;  %v363_v59 = vsel %vm328_vm0, %v1616_v37, -inf }
  0x1b   : > { %2806 = vst [vmem:[#allocation12_spill] sm:$0xff] %v1633_v48  ;;  %2807 = vst [vmem:[#allocation13_spill] sm:$0xff] %v1636_v49  ;;  %v1646_v55 = vld [vmem:[%s1532_s19 + $0xc8] sm:$0xff]  ;;  %v1653_v60 = vld [vmem:[%s1532_s19 + $0xd0] sm:$0xff]  ;;  %v362_v62 = vmax.f32 %v354_v50, %v361_v58  ;;  %v364_v63 = vmax.f32 %v356_v51, %v363_v59  ;;  %v365_v6 = vsel %vm328_vm0, %v1623_v42, -inf  ;;  %v367_v7 = vsel %vm328_vm0, %v1626_v43, -inf }
  0x1c   : > { %2808 = vst [vmem:[#allocation14_spill] sm:$0xff] %v1643_v54  ;;  %2809 = vst [vmem:[#allocation15_spill] sm:$0xff] %v1646_v55  ;;  %v1656_v61 = vld [vmem:[%s1532_s19 + $0xd8] sm:$0xff]  ;;  %v1663_v8 = vld [vmem:[%s1532_s19 + $0xe0] sm:$0xff]  ;;  %v366_v13 = vmax.f32 %v358_v56, %v365_v6  ;;  %v368_v14 = vmax.f32 %v360_v57, %v367_v7  ;;  %v369_v18 = vsel %vm328_vm0, %v1633_v48, -inf  ;;  %v371_v19 = vsel %vm328_vm0, %v1636_v49, -inf }
  0x1d   : > { %2810 = vst [vmem:[#allocation16_spill] sm:$0xff] %v1653_v60  ;;  %2811 = vst [vmem:[#allocation17_spill] sm:$0xff] %v1656_v61  ;;  %v1666_v12 = vld [vmem:[%s1532_s19 + $0xe8] sm:$0xff]  ;;  %v1673_v20 = vld [vmem:[%s1532_s19 + $0xf0] sm:$0xff]  ;;  %v370_v25 = vmax.f32 %v362_v62, %v369_v18  ;;  %v372_v26 = vmax.f32 %v364_v63, %v371_v19  ;;  %v373_v27 = vsel %vm328_vm0, %v1643_v54, -inf  ;;  %v375_v28 = vsel %vm328_vm0, %v1646_v55, -inf }
  0x1e   : > { %2812 = vst [vmem:[#allocation18_spill] sm:$0xff] %v1663_v8  ;;  %2813 = vst [vmem:[#allocation19_spill] sm:$0xff] %v1666_v12  ;;  %v1676_v21 = vld [vmem:[%s1532_s19 + $0xf8] sm:$0xff]  ;;  %v1683_v32 = vld [vmem:[%s1532_s19 + $0x100] sm:$0xff]  ;;  %v374_v34 = vmax.f32 %v366_v13, %v373_v27  ;;  %v376_v35 = vmax.f32 %v368_v14, %v375_v28  ;;  %v377_v38 = vsel %vm328_vm0, %v1653_v60, -inf  ;;  %v379_v39 = vsel %vm328_vm0, %v1656_v61, -inf }
  0x1f   : > { %2814 = vst [vmem:[#allocation20_spill] sm:$0xff] %v1673_v20  ;;  %2815 = vst [vmem:[#allocation21_spill] sm:$0xff] %v1676_v21  ;;  %v1686_v33 = vld [vmem:[%s1532_s19 + $0x108] sm:$0xff]  ;;  %v1693_v40 = vld [vmem:[%s1532_s19 + $0x110] sm:$0xff]  ;;  %v378_v44 = vmax.f32 %v370_v25, %v377_v38  ;;  %v380_v45 = vmax.f32 %v372_v26, %v379_v39  ;;  %v381_v46 = vsel %vm328_vm0, %v1663_v8, -inf  ;;  %v383_v47 = vsel %vm328_vm0, %v1666_v12, -inf }
  0x20   : > { %2816 = vst [vmem:[#allocation22_spill] sm:$0xff] %v1683_v32  ;;  %v1696_v41 = vld [vmem:[%s1532_s19 + $0x118] sm:$0xff]  ;;  %v1703_v50 = vld [vmem:[%s1532_s19 + $0x120] sm:$0xff]  ;;  %v1706_v51 = vld [vmem:[%s1532_s19 + $0x128] sm:$0xff]  ;;  %v382_v52 = vmax.f32 %v374_v34, %v381_v46  ;;  %v384_v53 = vmax.f32 %v376_v35, %v383_v47  ;;  %v385_v56 = vsel %vm328_vm0, %v1673_v20, -inf  ;;  %v387_v57 = vsel %vm328_vm0, %v1676_v21, -inf }
  0x21   : > { %v1713_v58 = vld [vmem:[%s1532_s19 + $0x130] sm:$0xff]  ;;  %v1716_v59 = vld [vmem:[%s1532_s19 + $0x138] sm:$0xff]  ;;  %v386_v62 = vmax.f32 %v378_v44, %v385_v56  ;;  %v388_v63 = vmax.f32 %v380_v45, %v387_v57  ;;  %v389_v6 = vsel %vm328_vm0, %v1683_v32, -inf  ;;  %v391_v7 = vsel %vm328_vm0, %v1686_v33, -inf  ;;  %v1723_v13 = vld [vmem:[%s1532_s19 + $0x140] sm:$0xff] }
  0x22   : > { %v1726_v14 = vld [vmem:[%s1532_s19 + $0x148] sm:$0xff]  ;;  %v390_v18 = vmax.f32 %v382_v52, %v389_v6  ;;  %v392_v19 = vmax.f32 %v384_v53, %v391_v7  ;;  %v393_v25 = vsel %vm328_vm0, %v1693_v40, -inf  ;;  %v395_v26 = vsel %vm328_vm0, %v1696_v41, -inf  ;;  %v1733_v27 = vld [vmem:[%s1532_s19 + $0x150] sm:$0xff]  ;;  %v1736_v28 = vld [vmem:[%s1532_s19 + $0x158] sm:$0xff] }
  0x23   : > { %v394_v34 = vmax.f32 %v386_v62, %v393_v25  ;;  %v396_v35 = vmax.f32 %v388_v63, %v395_v26  ;;  %v397_v38 = vsel %vm328_vm0, %v1703_v50, -inf  ;;  %v399_v39 = vsel %vm328_vm0, %v1706_v51, -inf  ;;  %v1743_v44 = vld [vmem:[%s1532_s19 + $0x160] sm:$0xff]  ;;  %v1746_v45 = vld [vmem:[%s1532_s19 + $0x168] sm:$0xff]  ;;  %v1753_v56 = vld [vmem:[%s1532_s19 + $0x170] sm:$0xff] }
  0x24   : > { %v398_v46 = vmax.f32 %v390_v18, %v397_v38  ;;  %v400_v47 = vmax.f32 %v392_v19, %v399_v39  ;;  %v401_v52 = vsel %vm328_vm0, %v1713_v58, -inf  ;;  %v403_v53 = vsel %vm328_vm0, %v1716_v59, -inf  ;;  %v1756_v57 = vld [vmem:[%s1532_s19 + $0x178] sm:$0xff]  ;;  %v1763_v18 = vld [vmem:[%s1532_s19 + $0x180] sm:$0xff]  ;;  %v1766_v19 = vld [vmem:[%s1532_s19 + $0x188] sm:$0xff] }
  0x25   : > { %v402_v62 = vmax.f32 %v394_v34, %v401_v52  ;;  %v404_v63 = vmax.f32 %v396_v35, %v403_v53  ;;  %v405_v6 = vsel %vm328_vm0, %v1723_v13, -inf  ;;  %v407_v7 = vsel %vm328_vm0, %v1726_v14, -inf  ;;  %v1773_v38 = vld [vmem:[%s1532_s19 + $0x190] sm:$0xff]  ;;  %v1776_v39 = vld [vmem:[%s1532_s19 + $0x198] sm:$0xff] }
  0x26   : > { %v406_v25 = vmax.f32 %v398_v46, %v405_v6  ;;  %v408_v26 = vmax.f32 %v400_v47, %v407_v7  ;;  %v409_v34 = vsel %vm328_vm0, %v1733_v27, -inf  ;;  %v411_v35 = vsel %vm328_vm0, %v1736_v28, -inf  ;;  %v1783_v6 = vld [vmem:[%s1532_s19 + $0x1a0] sm:$0xff]  ;;  %v1786_v7 = vld [vmem:[%s1532_s19 + $0x1a8] sm:$0xff] }
  0x27   : > { %v410_v52 = vmax.f32 %v402_v62, %v409_v34  ;;  %v412_v53 = vmax.f32 %v404_v63, %v411_v35  ;;  %v413_v46 = vsel %vm328_vm0, %v1743_v44, -inf  ;;  %v415_v47 = vsel %vm328_vm0, %v1746_v45, -inf  ;;  %v1793_v34 = vld [vmem:[%s1532_s19 + $0x1b0] sm:$0xff]  ;;  %v1796_v35 = vld [vmem:[%s1532_s19 + $0x1b8] sm:$0xff] }
  0x28   : > { %v414_v32 = vmax.f32 %v406_v25, %v413_v46  ;;  %v416_v21 = vmax.f32 %v408_v26, %v415_v47  ;;  %v417_v62 = vsel %vm328_vm0, %v1753_v56, -inf  ;;  %v419_v63 = vsel %vm328_vm0, %v1756_v57, -inf  ;;  %v1803_v46 = vld [vmem:[%s1532_s19 + $0x1c0] sm:$0xff]  ;;  %v1806_v47 = vld [vmem:[%s1532_s19 + $0x1c8] sm:$0xff] }
  0x29   : > { %v418_v20 = vmax.f32 %v410_v52, %v417_v62  ;;  %v420_v12 = vmax.f32 %v412_v53, %v419_v63  ;;  %v421_v25 = vsel %vm328_vm0, %v1763_v18, -inf  ;;  %v423_v26 = vsel %vm328_vm0, %v1766_v19, -inf  ;;  %v1813_v62 = vld [vmem:[%s1532_s19 + $0x1d0] sm:$0xff]  ;;  %v1816_v63 = vld [vmem:[%s1532_s19 + $0x1d8] sm:$0xff] }
  0x2a   : > { %v422_v8 = vmax.f32 %v414_v32, %v421_v25  ;;  %v424_v61 = vmax.f32 %v416_v21, %v423_v26  ;;  %v425_v52 = vsel %vm328_vm0, %v1773_v38, -inf  ;;  %v427_v53 = vsel %vm328_vm0, %v1776_v39, -inf  ;;  %v1823_v21 = vld [vmem:[%s1532_s19 + $0x1e0] sm:$0xff]  ;;  %v1826_v25 = vld [vmem:[%s1532_s19 + $0x1e8] sm:$0xff] }
  0x2b   : > { %v426_v60 = vmax.f32 %v418_v20, %v425_v52  ;;  %v428_v55 = vmax.f32 %v420_v12, %v427_v53  ;;  %v429_v54 = vsel %vm328_vm0, %v1783_v6, -inf  ;;  %v431_v32 = vsel %vm328_vm0, %v1786_v7, -inf  ;;  %v1833_v20 = vld [vmem:[%s1532_s19 + $0x1f0] sm:$0xff]  ;;  %v1836_v12 = vld [vmem:[%s1532_s19 + $0x1f8] sm:$0xff] }
  0x2c   : > { %v430_v26 = vmax.f32 %v422_v8, %v429_v54  ;;  %v432_v49 = vmax.f32 %v424_v61, %v431_v32  ;;  %v433_v48 = vsel %vm328_vm0, %v1793_v34, -inf  ;;  %v435_v43 = vsel %vm328_vm0, %v1796_v35, -inf }
  0x2d   : > { %v434_v52 = vmax.f32 %v426_v60, %v433_v48  ;;  %v436_v53 = vmax.f32 %v428_v55, %v435_v43  ;;  %v437_v42 = vsel %vm328_vm0, %v1803_v46, -inf  ;;  %v439_v37 = vsel %vm328_vm0, %v1806_v47, -inf }
  0x2e   : > { %v438_v54 = vmax.f32 %v430_v26, %v437_v42  ;;  %v440_v61 = vmax.f32 %v432_v49, %v439_v37  ;;  %v441_v8 = vsel %vm328_vm0, %v1813_v62, -inf  ;;  %v443_v32 = vsel %vm328_vm0, %v1816_v63, -inf }
  0x2f   : > { %v442_v36 = vmax.f32 %v434_v52, %v441_v8  ;;  %v444_v31 = vmax.f32 %v436_v53, %v443_v32  ;;  %v445_v48 = vsel %vm328_vm0, %v1823_v21, -inf  ;;  %v447_v43 = vsel %vm328_vm0, %v1826_v25, -inf }
  0x30   : > { %v446_v55 = vmax.f32 %v438_v54, %v445_v48  ;;  %v448_v60 = vmax.f32 %v440_v61, %v447_v43  ;;  %v449_v42 = vsel %vm328_vm0, %v1833_v20, -inf  ;;  %v451_v37 = vsel %vm328_vm0, %v1836_v12, -inf }
  0x31   : > { %v450_v49 = vmax.f32 %v442_v36, %v449_v42  ;;  %v452_v26 = vmax.f32 %v444_v31, %v451_v37 }
  0x32   : > { %v453_v30 = vmax.f32 %v446_v55, %v448_v60 }
  0x33   : > { %v454_v29 = vmax.f32 %v450_v49, %v452_v26 }
  0x35   : > { %v455_v52 = vmax.f32 %v453_v30, %v454_v29 }
  0x37   : > { %v456_v53 = vrot.slane %v455_v52, 4 }
  0x39   : > { %v457_v8 = vmax.f32 %v455_v52, %v456_v53 }
  0x3b   : > { %v458_v32 = vrot.slane %v457_v8, 2 }
  0x3d   : > { %v459_v24 = vmax.f32 %v457_v8, %v458_v32 }
  0x3f   : > { %v460_v23 = vrot.slane %v459_v24, 1 }
  0x41   : > { %v1854_v22 = vmax.f32 %v459_v24, %v460_v23 }
  0x43   : > { %v462_v54 = vsub.f32 %v1535_v0, %v1854_v22  ;;  %v463_v61 = vsub.f32 %v1538_v1, %v1854_v22  ;;  %v464_v36 = vsub.f32 %v1541_v2, %v1854_v22  ;;  %v465_v31 = vsub.f32 %v1544_v3, %v1854_v22 }
  0x44   : > { %v466_v53 = vsub.f32 %v1547_v4, %v1854_v22  ;;  %v467_v32 = vsub.f32 %v1550_v5, %v1854_v22  ;;  %v468_v49 = vsub.f32 %v1559_v9, %v1854_v22  ;;  %v469_v52 = vsub.f32 %v1562_v10, %v1854_v22 }
  0x45   : > { %v526_v42 = vmul.f32 1.442695, %v462_v54  ;;  %v528_v8 = vmul.f32 1.442695, %v463_v61  ;;  %v530_v60 = vmul.f32 1.442695, %v464_v36  ;;  %v470_v4 = vsub.f32 %v1565_v11, %v1854_v22 }
  0x46   : > { %v532_v55 = vmul.f32 1.442695, %v465_v31  ;;  %v534_v37 = vmul.f32 1.442695, %v466_v53  ;;  %v536_v54 = vmul.f32 1.442695, %v467_v32  ;;  %v471_v5 = vsub.f32 %v1574_v15, %v1854_v22 }
  0x47   : > { %1334 = vpow2.f32 %v526_v42  ;;  %v538_v61 = vmul.f32 1.442695, %v468_v49  ;;  %v540_v36 = vmul.f32 1.442695, %v469_v52  ;;  %v472_v9 = vsub.f32 %v1577_v16, %v1854_v22  ;;  %v2817_v11 = vld [vmem:[#allocation2_spill] sm:$0xff]  ;;  %v2818_v16 = vld [vmem:[#allocation3_spill] sm:$0xff] }
  0x48   : > { %1336 = vpow2.f32 %v528_v8  ;;  %v542_v31 = vmul.f32 1.442695, %v470_v4  ;;  %v473_v10 = vsub.f32 %v1580_v17, %v1854_v22  ;;  %v474_v42 = vsub.f32 %v2817_v11, %v1854_v22  ;;  %v2819_v17 = vld [vmem:[#allocation4_spill] sm:$0xff] }
  0x49   : > { %1338 = vpow2.f32 %v530_v60  ;;  %v475_v52 = vsub.f32 %v2818_v16, %v1854_v22  ;;  %v476_v32 = vsub.f32 %v2819_v17, %v1854_v22  ;;  %v2821_v16 = vld [vmem:[#allocation6_spill] sm:$0xff] }
  0x4a   : > { %1340 = vpow2.f32 %v532_v55  ;;  %v544_v55 = vmul.f32 1.442695, %v471_v5  ;;  %v548_v53 = vmul.f32 1.442695, %v473_v10  ;;  %v478_v17 = vsub.f32 %v2821_v16, %v1854_v22 }
  0x4b   : > { %1342 = vpow2.f32 %v534_v37  ;;  %v546_v37 = vmul.f32 1.442695, %v472_v9  ;;  %v554_v26 = vmul.f32 1.442695, %v476_v32 }
  0x4c   : > { %1344 = vpow2.f32 %v536_v54  ;;  %v550_v54 = vmul.f32 1.442695, %v474_v42  ;;  %v558_v16 = vmul.f32 1.442695, %v478_v17 }
  0x4d   : > { %1346 = vpow2.f32 %v538_v61 }
  0x4e   : > { %1348 = vpow2.f32 %v540_v36 }
  0x4f   : > { %1350 = vpow2.f32 %v542_v31  ;;  %v2820_v31 = vld [vmem:[#allocation5_spill] sm:$0xff] }
  0x50   : > { %1352 = vpow2.f32 %v544_v55  ;;  %v477_v10 = vsub.f32 %v2820_v31, %v1854_v22  ;;  %v552_v55 = vmul.f32 1.442695, %v475_v52 }
  0x51   : > { %1354 = vpow2.f32 %v546_v37 }
  0x52   : > { %1356 = vpow2.f32 %v548_v53  ;;  %v2822_v53 = vld [vmem:[#allocation7_spill] sm:$0xff]  ;;  %v556_v31 = vmul.f32 1.442695, %v477_v10 }
  0x53   : > { %1358 = vpow2.f32 %v550_v54  ;;  %v479_v52 = vsub.f32 %v2822_v53, %v1854_v22  ;;  %v2823_v54 = vld [vmem:[#allocation8_spill] sm:$0xff] }
  0x54   : > { %v1942_v60 = vpop.eup %1334  ;;  %1360 = vpow2.f32 %v552_v55  ;;  %v480_v32 = vsub.f32 %v2823_v54, %v1854_v22  ;;  %v2824_v55 = vld [vmem:[#allocation9_spill] sm:$0xff] }
  0x55   : > { %v1946_v15 = vpop.eup %1336  ;;  %v654_v4 = vsel %vm328_vm0, %v1942_v60, 0.0  ;;  %1362 = vpow2.f32 %v554_v26  ;;  %v481_v10 = vsub.f32 %v2824_v55, %v1854_v22  ;;  %v560_v53 = vmul.f32 1.442695, %v479_v52  ;;  %v2825_v26 = vld [vmem:[#allocation10_spill] sm:$0xff] }
  0x56   : > { %v1948_v49 = vpop.eup %1338  ;;  %v655_v61 = vsel %vm328_vm0, %v1946_v15, 0.0  ;;  %1364 = vpow2.f32 %v556_v31  ;;  %v482_v17 = vsub.f32 %v2825_v26, %v1854_v22  ;;  %v562_v54 = vmul.f32 1.442695, %v480_v32  ;;  %v2826_v31 = vld [vmem:[#allocation11_spill] sm:$0xff] }
  0x57   : > { %v1952_v8 = vpop.eup %1340  ;;  %v656_v36 = vadd.f32 %v655_v61, %v654_v4  ;;  %v657_v9 = vsel %vm328_vm0, %v1948_v49, 0.0  ;;  %1366 = vpow2.f32 %v558_v16  ;;  %v483_v52 = vsub.f32 %v2826_v31, %v1854_v22  ;;  %v2827_v16 = vld [vmem:[#allocation12_spill] sm:$0xff] }
  0x58   : > { %v1960_v5 = vpop.eup %1342  ;;  %v659_v11 = vsel %vm328_vm0, %v1952_v8, 0.0  ;;  %1368 = vpow2.f32 %v560_v53  ;;  %v564_v55 = vmul.f32 1.442695, %v481_v10  ;;  %v484_v32 = vsub.f32 %v2827_v16, %v1854_v22  ;;  %v2829_v53 = vld [vmem:[#allocation13_spill] sm:$0xff] }
  0x59   : > { %v1968_v42 = vpop.eup %1344  ;;  %v658_v37 = vadd.f32 %v657_v9, %v656_v36  ;;  %v661_v4 = vsel %vm328_vm0, %v1960_v5, 0.0  ;;  %1370 = vpow2.f32 %v562_v54  ;;  %v566_v26 = vmul.f32 1.442695, %v482_v17  ;;  %v2831_v54 = vld [vmem:[#allocation14_spill] sm:$0xff] }
  0x5a   : > { %v1974_v61 = vpop.eup %1346  ;;  %v663_v48 = vsel %vm328_vm0, %v1968_v42, 0.0  ;;  %v485_v10 = vsub.f32 %v2829_v53, %v1854_v22  ;;  %1372 = vpow2.f32 %v564_v55  ;;  %v568_v31 = vmul.f32 1.442695, %v483_v52  ;;  %v2833_v55 = vld [vmem:[#allocation15_spill] sm:$0xff] }
  0x5b   : > { %v660_v43 = vadd.f32 %v659_v11, %v658_v37  ;;  %v1980_v36 = vpop.eup %1348  ;;  %v665_v24 = vsel %vm328_vm0, %v1974_v61, 0.0  ;;  %v486_v17 = vsub.f32 %v2831_v54, %v1854_v22  ;;  %1374 = vpow2.f32 %v566_v26  ;;  %v2835_v26 = vld [vmem:[#allocation16_spill] sm:$0xff] }
  0x5c   : > { %v1986_v11 = vpop.eup %1350  ;;  %v667_v3 = vsel %vm328_vm0, %v1980_v36, 0.0  ;;  %v570_v16 = vmul.f32 1.442695, %v484_v32  ;;  %v487_v52 = vsub.f32 %v2833_v55, %v1854_v22  ;;  %1376 = vpow2.f32 %v568_v31  ;;  %v2837_v31 = vld [vmem:[#allocation17_spill] sm:$0xff] }
  0x5d   : > { %v662_v9 = vadd.f32 %v661_v4, %v660_v43  ;;  %v1992_v43 = vpop.eup %1352  ;;  %v669_v2 = vsel %vm328_vm0, %v1986_v11, 0.0  ;;  %v572_v53 = vmul.f32 1.442695, %v485_v10  ;;  %v488_v32 = vsub.f32 %v2835_v26, %v1854_v22 }
  0x5e   : > { %v671_v1 = vsel %vm328_vm0, %v1992_v43, 0.0  ;;  %1378 = vpow2.f32 %v570_v16  ;;  %v574_v54 = vmul.f32 1.442695, %v486_v17  ;;  %v489_v10 = vsub.f32 %v2837_v31, %v1854_v22  ;;  %v2839_v16 = vld [vmem:[#allocation18_spill] sm:$0xff] }
  0x5f   : > { %v664_v37 = vadd.f32 %v663_v48, %v662_v9  ;;  %v1998_v48 = vpop.eup %1354  ;;  %1380 = vpow2.f32 %v572_v53  ;;  %v576_v55 = vmul.f32 1.442695, %v487_v52  ;;  %v490_v17 = vsub.f32 %v2839_v16, %v1854_v22  ;;  %v2841_v53 = vld [vmem:[#allocation19_spill] sm:$0xff] }
  0x60   : > { %v673_v0 = vsel %vm328_vm0, %v1998_v48, 0.0  ;;  %1382 = vpow2.f32 %v574_v54  ;;  %v578_v26 = vmul.f32 1.442695, %v488_v32  ;;  %v491_v52 = vsub.f32 %v2841_v53, %v1854_v22  ;;  %v2843_v54 = vld [vmem:[#allocation20_spill] sm:$0xff] }
  0x61   : > { %v666_v4 = vadd.f32 %v665_v24, %v664_v37  ;;  %v2004_v24 = vpop.eup %1356  ;;  %1384 = vpow2.f32 %v576_v55  ;;  %v580_v31 = vmul.f32 1.442695, %v489_v10  ;;  %v492_v32 = vsub.f32 %v2843_v54, %v1854_v22  ;;  %v2844_v55 = vld [vmem:[#allocation21_spill] sm:$0xff] }
  0x62   : > { %v675_v23 = vsel %vm328_vm0, %v2004_v24, 0.0  ;;  %1386 = vpow2.f32 %v578_v26  ;;  %v582_v16 = vmul.f32 1.442695, %v490_v17  ;;  %v493_v10 = vsub.f32 %v2844_v55, %v1854_v22  ;;  %v2845_v26 = vld [vmem:[#allocation22_spill] sm:$0xff] }
  0x63   : > { %v668_v9 = vadd.f32 %v667_v3, %v666_v4  ;;  %v2010_v3 = vpop.eup %1358  ;;  %1388 = vpow2.f32 %v580_v31  ;;  %v584_v53 = vmul.f32 1.442695, %v491_v52  ;;  %v494_v17 = vsub.f32 %v2845_v26, %v1854_v22 }
  0x64   : > { %2828 = vst [vmem:[#allocation2_spill] sm:$0xff] %v2010_v3  ;;  %v677_v30 = vsel %vm328_vm0, %v2010_v3, 0.0  ;;  %1390 = vpow2.f32 %v582_v16  ;;  %v586_v54 = vmul.f32 1.442695, %v492_v32  ;;  %v588_v31 = vmul.f32 1.442695, %v493_v10 }
  0x65   : > { %v670_v37 = vadd.f32 %v669_v2, %v668_v9  ;;  %v2016_v2 = vpop.eup %1360  ;;  %1392 = vpow2.f32 %v584_v53 }
  0x66   : > { %2830 = vst [vmem:[#allocation3_spill] sm:$0xff] %v2016_v2  ;;  %v679_v29 = vsel %vm328_vm0, %v2016_v2, 0.0 }
  0x67   : > { %v672_v4 = vadd.f32 %v671_v1, %v670_v37  ;;  %v2022_v1 = vpop.eup %1362  ;;  %1394 = vpow2.f32 %v586_v54 }
  0x68   : > { %2832 = vst [vmem:[#allocation4_spill] sm:$0xff] %v2022_v1  ;;  %v681_v3 = vsel %vm328_vm0, %v2022_v1, 0.0 }
  0x69   : > { %v674_v9 = vadd.f32 %v673_v0, %v672_v4  ;;  %v2028_v0 = vpop.eup %1364  ;;  %1396 = vpow2.f32 %v588_v31 }
  0x6a   : > { %2834 = vst [vmem:[#allocation5_spill] sm:$0xff] %v2028_v0  ;;  %v683_v2 = vsel %vm328_vm0, %v2028_v0, 0.0 }
  0x6b   : > { %v676_v37 = vadd.f32 %v675_v23, %v674_v9  ;;  %v2034_v23 = vpop.eup %1366 }
  0x6c   : > { %2836 = vst [vmem:[#allocation6_spill] sm:$0xff] %v2034_v23  ;;  %v685_v1 = vsel %vm328_vm0, %v2034_v23, 0.0 }
  0x6d   : > { %v678_v4 = vadd.f32 %v677_v30, %v676_v37  ;;  %v2040_v30 = vpop.eup %1368 }
  0x6e   : > { %2838 = vst [vmem:[#allocation7_spill] sm:$0xff] %v2040_v30  ;;  %v687_v0 = vsel %vm328_vm0, %v2040_v30, 0.0 }
  0x6f   : > { %v680_v9 = vadd.f32 %v679_v29, %v678_v4  ;;  %v2046_v29 = vpop.eup %1370 }
  0x70   : > { %2840 = vst [vmem:[#allocation8_spill] sm:$0xff] %v2046_v29  ;;  %v689_v23 = vsel %vm328_vm0, %v2046_v29, 0.0 }
  0x71   : > { %v682_v37 = vadd.f32 %v681_v3, %v680_v9  ;;  %v2052_v3 = vpop.eup %1372 }
  0x72   : > { %2842 = vst [vmem:[#allocation9_spill] sm:$0xff] %v2052_v3  ;;  %v691_v30 = vsel %vm328_vm0, %v2052_v3, 0.0 }
  0x73   : > { %v684_v4 = vadd.f32 %v683_v2, %v682_v37  ;;  %v2058_v2 = vpop.eup %1374 }
  0x74   : > { %v693_v29 = vsel %vm328_vm0, %v2058_v2, 0.0 }
  0x75   : > { %v686_v9 = vadd.f32 %v685_v1, %v684_v4  ;;  %v2064_v1 = vpop.eup %1376 }
  0x76   : > { %v695_v52 = vsel %vm328_vm0, %v2064_v1, 0.0 }
  0x77   : > { %v688_v37 = vadd.f32 %v687_v0, %v686_v9  ;;  %v2070_v0 = vpop.eup %1378 }
  0x78   : > { %v2074_v55 = vpop.eup %1380  ;;  %v697_v16 = vsel %vm328_vm0, %v2070_v0, 0.0 }
  0x79   : > { %v690_v4 = vadd.f32 %v689_v23, %v688_v37  ;;  %v590_v23 = vmul.f32 1.442695, %v494_v17  ;;  %v2078_v32 = vpop.eup %1382  ;;  %v699_v10 = vsel %vm328_vm0, %v2074_v55, 0.0 }
  0x7a   : > { %v701_v54 = vsel %vm328_vm0, %v2078_v32, 0.0 }
  0x7b   : > { %v692_v9 = vadd.f32 %v691_v30, %v690_v4  ;;  %v2846_v30 = vsub.f32 %v1686_v33, %v1854_v22  ;;  %v2085_v4 = vpop.eup %1384  ;;  %1398 = vpow2.f32 %v590_v23  ;;  %v2848_v33 = vsub.f32 %v1696_v41, %v1854_v22 }
  0x7c   : > { %v2850_v41 = vsub.f32 %v1706_v51, %v1854_v22  ;;  %v2852_v51 = vsub.f32 %v1716_v59, %v1854_v22  ;;  %v2854_v59 = vsub.f32 %v1726_v14, %v1854_v22  ;;  %v2856_v14 = vsub.f32 %v1736_v28, %v1854_v22 }
  0x7d   : > { %v694_v3 = vadd.f32 %v693_v29, %v692_v9  ;;  %v592_v53 = vmul.f32 1.442695, %v2846_v30  ;;  %v2847_v29 = vsub.f32 %v1693_v40, %v1854_v22  ;;  %v596_v31 = vmul.f32 1.442695, %v2848_v33 }
  0x7e   : > { %v2849_v40 = vsub.f32 %v1703_v50, %v1854_v22  ;;  %v2851_v50 = vsub.f32 %v1713_v58, %v1854_v22  ;;  %v2853_v58 = vsub.f32 %v1723_v13, %v1854_v22  ;;  %v2855_v13 = vsub.f32 %v1733_v27, %v1854_v22 }
  0x7f   : > { %v696_v37 = vadd.f32 %v695_v52, %v694_v3  ;;  %v594_v17 = vmul.f32 1.442695, %v2847_v29  ;;  %v2092_v3 = vpop.eup %1386  ;;  %1400 = vpow2.f32 %v592_v53  ;;  %v703_v52 = vsel %vm328_vm0, %v2085_v4, 0.0 }
  0x80   : > { %v705_v30 = vsel %vm328_vm0, %v2092_v3, 0.0  ;;  %v2857_v27 = vsub.f32 %v1743_v44, %v1854_v22  ;;  %v2858_v28 = vsub.f32 %v1746_v45, %v1854_v22  ;;  %v2859_v44 = vsub.f32 %v1753_v56, %v1854_v22 }
  0x81   : > { %v698_v26 = vadd.f32 %v697_v16, %v696_v37  ;;  %v2099_v16 = vpop.eup %1388  ;;  %1402 = vpow2.f32 %v594_v17  ;;  %v598_v37 = vmul.f32 1.442695, %v2849_v40  ;;  %v2860_v45 = vsub.f32 %v1756_v57, %v1854_v22 }
  0x82   : > { %1404 = vpow2.f32 %v596_v31  ;;  %v707_v29 = vsel %vm328_vm0, %v2099_v16, 0.0  ;;  %v2861_v56 = vsub.f32 %v1763_v18, %v1854_v22  ;;  %v2862_v57 = vsub.f32 %v1766_v19, %v1854_v22 }
  0x83   : > { %v700_v9 = vadd.f32 %v699_v10, %v698_v26  ;;  %v2106_v10 = vpop.eup %1390  ;;  %v600_v26 = vmul.f32 1.442695, %v2850_v41  ;;  %1406 = vpow2.f32 %v598_v37  ;;  %v2863_v18 = vsub.f32 %v1773_v38, %v1854_v22 }
  0x84   : > { %v709_v33 = vsel %vm328_vm0, %v2106_v10, 0.0  ;;  %v2864_v19 = vsub.f32 %v1776_v39, %v1854_v22  ;;  %v2865_v38 = vsub.f32 %v1783_v6, %v1854_v22  ;;  %v2866_v39 = vsub.f32 %v1786_v7, %v1854_v22 }
  0x85   : > { %v702_v23 = vadd.f32 %v701_v54, %v700_v9  ;;  %v2113_v54 = vpop.eup %1392  ;;  %v602_v9 = vmul.f32 1.442695, %v2851_v50  ;;  %1408 = vpow2.f32 %v600_v26  ;;  %v2867_v6 = vsub.f32 %v1793_v34, %v1854_v22 }
  0x86   : > { %v711_v40 = vsel %vm328_vm0, %v2113_v54, 0.0  ;;  %v2868_v7 = vsub.f32 %v1796_v35, %v1854_v22  ;;  %v2870_v34 = vsub.f32 %v1803_v46, %v1854_v22  ;;  %v2872_v35 = vsub.f32 %v1806_v47, %v1854_v22 }
  0x87   : > { %v704_v53 = vadd.f32 %v703_v52, %v702_v23  ;;  %v2120_v52 = vpop.eup %1394  ;;  %v604_v23 = vmul.f32 1.442695, %v2852_v51  ;;  %1410 = vpow2.f32 %v602_v9  ;;  %v2874_v46 = vsub.f32 %v1813_v62, %v1854_v22 }
  0x88   : > { %v713_v41 = vsel %vm328_vm0, %v2120_v52, 0.0  ;;  %v2876_v47 = vsub.f32 %v1816_v63, %v1854_v22  ;;  %v2878_v62 = vsub.f32 %v1823_v21, %v1854_v22  ;;  %v2880_v63 = vsub.f32 %v1826_v25, %v1854_v22 }
  0x89   : > { %v706_v17 = vadd.f32 %v705_v30, %v704_v53  ;;  %v2127_v30 = vpop.eup %1396  ;;  %v606_v53 = vmul.f32 1.442695, %v2853_v58  ;;  %1412 = vpow2.f32 %v604_v23  ;;  %v2882_v21 = vsub.f32 %v1833_v20, %v1854_v22 }
  0x8a   : > { %v715_v50 = vsel %vm328_vm0, %v2127_v30, 0.0  ;;  %v2884_v25 = vsub.f32 %v1836_v12, %v1854_v22 }
  0x8b   : > { %v708_v31 = vadd.f32 %v707_v29, %v706_v17  ;;  %v2134_v29 = vpop.eup %1398  ;;  %v608_v17 = vmul.f32 1.442695, %v2854_v59  ;;  %1414 = vpow2.f32 %v606_v53 }
  0x8c   : > { %v717_v51 = vsel %vm328_vm0, %v2134_v29, 0.0 }
  0x8d   : > { %v710_v37 = vadd.f32 %v709_v33, %v708_v31  ;;  %v2141_v33 = vpop.eup %1400  ;;  %v610_v31 = vmul.f32 1.442695, %v2855_v13  ;;  %1416 = vpow2.f32 %v608_v17 }
  0x8e   : > { %v719_v58 = vsel %vm328_vm0, %v2141_v33, 0.0 }
  0x8f   : > { %v712_v26 = vadd.f32 %v711_v40, %v710_v37  ;;  %v2148_v40 = vpop.eup %1402  ;;  %v612_v37 = vmul.f32 1.442695, %v2856_v14  ;;  %1418 = vpow2.f32 %v610_v31 }
  0x90   : > { %v721_v59 = vsel %vm328_vm0, %v2148_v40, 0.0 }
  0x91   : > { %v714_v9 = vadd.f32 %v713_v41, %v712_v26  ;;  %v2155_v41 = vpop.eup %1404  ;;  %v614_v26 = vmul.f32 1.442695, %v2857_v27  ;;  %1420 = vpow2.f32 %v612_v37 }
  0x92   : > { %v723_v13 = vsel %vm328_vm0, %v2155_v41, 0.0 }
  0x93   : > { %v716_v23 = vadd.f32 %v715_v50, %v714_v9  ;;  %v2162_v50 = vpop.eup %1406  ;;  %v616_v9 = vmul.f32 1.442695, %v2858_v28  ;;  %1422 = vpow2.f32 %v614_v26 }
  0x94   : > { %v725_v14 = vsel %vm328_vm0, %v2162_v50, 0.0 }
  0x95   : > { %v718_v53 = vadd.f32 %v717_v51, %v716_v23  ;;  %v2169_v51 = vpop.eup %1408  ;;  %v618_v23 = vmul.f32 1.442695, %v2859_v44  ;;  %1424 = vpow2.f32 %v616_v9 }
  0x96   : > { %v727_v27 = vsel %vm328_vm0, %v2169_v51, 0.0 }
  0x97   : > { %v720_v17 = vadd.f32 %v719_v58, %v718_v53  ;;  %v2176_v58 = vpop.eup %1410  ;;  %v620_v53 = vmul.f32 1.442695, %v2860_v45  ;;  %1426 = vpow2.f32 %v618_v23 }
  0x98   : > { %v729_v28 = vsel %vm328_vm0, %v2176_v58, 0.0 }
  0x99   : > { %v722_v31 = vadd.f32 %v721_v59, %v720_v17  ;;  %v2183_v59 = vpop.eup %1412  ;;  %v622_v17 = vmul.f32 1.442695, %v2861_v56  ;;  %1428 = vpow2.f32 %v620_v53 }
  0x9a   : > { %v731_v44 = vsel %vm328_vm0, %v2183_v59, 0.0 }
  0x9b   : > { %v724_v37 = vadd.f32 %v723_v13, %v722_v31  ;;  %v2190_v13 = vpop.eup %1414  ;;  %v624_v31 = vmul.f32 1.442695, %v2862_v57  ;;  %1430 = vpow2.f32 %v622_v17 }
  0x9c   : > { %v733_v45 = vsel %vm328_vm0, %v2190_v13, 0.0 }
  0x9d   : > { %v726_v26 = vadd.f32 %v725_v14, %v724_v37  ;;  %v2197_v14 = vpop.eup %1416  ;;  %v626_v37 = vmul.f32 1.442695, %v2863_v18  ;;  %1432 = vpow2.f32 %v624_v31 }
  0x9e   : > { %v735_v56 = vsel %vm328_vm0, %v2197_v14, 0.0 }
  0x9f   : > { %v728_v9 = vadd.f32 %v727_v27, %v726_v26  ;;  %v2204_v27 = vpop.eup %1418  ;;  %v628_v26 = vmul.f32 1.442695, %v2864_v19  ;;  %1434 = vpow2.f32 %v626_v37 }
  0xa0   : > { %v737_v57 = vsel %vm328_vm0, %v2204_v27, 0.0 }
  0xa1   : > { %v730_v23 = vadd.f32 %v729_v28, %v728_v9  ;;  %v2211_v28 = vpop.eup %1420  ;;  %v630_v9 = vmul.f32 1.442695, %v2865_v38  ;;  %1436 = vpow2.f32 %v628_v26 }
  0xa2   : > { %v739_v18 = vsel %vm328_vm0, %v2211_v28, 0.0 }
  0xa3   : > { %v732_v53 = vadd.f32 %v731_v44, %v730_v23  ;;  %v2218_v44 = vpop.eup %1422  ;;  %v632_v23 = vmul.f32 1.442695, %v2866_v39  ;;  %1438 = vpow2.f32 %v630_v9 }
  0xa4   : > { %v741_v19 = vsel %vm328_vm0, %v2218_v44, 0.0 }
  0xa5   : > { %v734_v17 = vadd.f32 %v733_v45, %v732_v53  ;;  %v2225_v45 = vpop.eup %1424  ;;  %v634_v53 = vmul.f32 1.442695, %v2867_v6  ;;  %1440 = vpow2.f32 %v632_v23 }
  0xa6   : > { %v743_v38 = vsel %vm328_vm0, %v2225_v45, 0.0 }
  0xa7   : > { %v736_v31 = vadd.f32 %v735_v56, %v734_v17  ;;  %v2232_v56 = vpop.eup %1426  ;;  %v636_v17 = vmul.f32 1.442695, %v2868_v7  ;;  %1442 = vpow2.f32 %v634_v53 }
  0xa8   : > { %v745_v39 = vsel %vm328_vm0, %v2232_v56, 0.0 }
  0xa9   : > { %v738_v37 = vadd.f32 %v737_v57, %v736_v31  ;;  %v2239_v57 = vpop.eup %1428  ;;  %v638_v31 = vmul.f32 1.442695, %v2870_v34  ;;  %1444 = vpow2.f32 %v636_v17 }
  0xaa   : > { %2869 = vst [vmem:[#allocation10_spill] sm:$0xff] %v2239_v57  ;;  %v747_v6 = vsel %vm328_vm0, %v2239_v57, 0.0 }
  0xab   : > { %v740_v26 = vadd.f32 %v739_v18, %v738_v37  ;;  %v2246_v18 = vpop.eup %1430  ;;  %v640_v37 = vmul.f32 1.442695, %v2872_v35  ;;  %1446 = vpow2.f32 %v638_v31 }
  0xac   : > { %2871 = vst [vmem:[#allocation11_spill] sm:$0xff] %v2246_v18  ;;  %v749_v7 = vsel %vm328_vm0, %v2246_v18, 0.0  ;;  %v986_v18 = vld [vmem:[%s2343_s25 + $0x30] sm:$0xff] }
  0xad   : > { %v742_v9 = vadd.f32 %v741_v19, %v740_v26  ;;  %v2253_v19 = vpop.eup %1432  ;;  %v642_v26 = vmul.f32 1.442695, %v2874_v46  ;;  %1448 = vpow2.f32 %v640_v37 }
  0xae   : > { %2873 = vst [vmem:[#allocation12_spill] sm:$0xff] %v2253_v19  ;;  %v751_v34 = vsel %vm328_vm0, %v2253_v19, 0.0  ;;  %v985_v19 = vld [vmem:[%s2343_s25 + $0x28] sm:$0xff] }
  0xaf   : > { %v744_v23 = vadd.f32 %v743_v38, %v742_v9  ;;  %v2260_v38 = vpop.eup %1434  ;;  %v644_v9 = vmul.f32 1.442695, %v2876_v47  ;;  %1450 = vpow2.f32 %v642_v26 }
  0xb0   : > { %2875 = vst [vmem:[#allocation13_spill] sm:$0xff] %v2260_v38  ;;  %v753_v35 = vsel %vm328_vm0, %v2260_v38, 0.0 }
  0xb1   : > { %v746_v53 = vadd.f32 %v745_v39, %v744_v23  ;;  %v2267_v39 = vpop.eup %1436  ;;  %v646_v23 = vmul.f32 1.442695, %v2878_v62  ;;  %1452 = vpow2.f32 %v644_v9 }
  0xb2   : > { %2877 = vst [vmem:[#allocation14_spill] sm:$0xff] %v2267_v39  ;;  %v755_v46 = vsel %vm328_vm0, %v2267_v39, 0.0 }
  0xb3   : > { %v748_v17 = vadd.f32 %v747_v6, %v746_v53  ;;  %v2274_v6 = vpop.eup %1438  ;;  %v648_v53 = vmul.f32 1.442695, %v2880_v63  ;;  %1454 = vpow2.f32 %v646_v23 }
  0xb4   : > { %2879 = vst [vmem:[#allocation15_spill] sm:$0xff] %v2274_v6  ;;  %v757_v47 = vsel %vm328_vm0, %v2274_v6, 0.0 }
  0xb5   : > { %v750_v31 = vadd.f32 %v749_v7, %v748_v17  ;;  %v2281_v7 = vpop.eup %1440  ;;  %v650_v17 = vmul.f32 1.442695, %v2882_v21  ;;  %1456 = vpow2.f32 %v648_v53 }
  0xb6   : > { %2881 = vst [vmem:[#allocation16_spill] sm:$0xff] %v2281_v7  ;;  %v759_v62 = vsel %vm328_vm0, %v2281_v7, 0.0 }
  0xb7   : > { %v752_v37 = vadd.f32 %v751_v34, %v750_v31  ;;  %v2288_v34 = vpop.eup %1442  ;;  %v652_v31 = vmul.f32 1.442695, %v2884_v25  ;;  %1458 = vpow2.f32 %v650_v17 }
  0xb8   : > { %2883 = vst [vmem:[#allocation17_spill] sm:$0xff] %v2288_v34  ;;  %v761_v20 = vsel %vm328_vm0, %v2288_v34, 0.0 }
  0xb9   : > { %v754_v26 = vadd.f32 %v753_v35, %v752_v37  ;;  %v2295_v35 = vpop.eup %1444  ;;  %1460 = vpow2.f32 %v652_v31 }
  0xba   : > { %2885 = vst [vmem:[#allocation18_spill] sm:$0xff] %v2295_v35  ;;  %v2299_v37 = vpop.eup %1446  ;;  %v763_v53 = vsel %vm328_vm0, %v2295_v35, 0.0 }
  0xbb   : > { %v756_v9 = vadd.f32 %v755_v46, %v754_v26  ;;  %2886 = vst [vmem:[#allocation19_spill] sm:$0xff] %v2299_v37  ;;  %v2303_v46 = vpop.eup %1448  ;;  %v765_v12 = vsel %vm328_vm0, %v2299_v37, 0.0 }
  0xbc   : > { %2887 = vst [vmem:[#allocation20_spill] sm:$0xff] %v2303_v46  ;;  %v2307_v26 = vpop.eup %1450  ;;  %v767_v17 = vsel %vm328_vm0, %v2303_v46, 0.0 }
  0xbd   : > { %v758_v23 = vadd.f32 %v757_v47, %v756_v9  ;;  %2888 = vst [vmem:[#allocation21_spill] sm:$0xff] %v2307_v26  ;;  %v769_v25 = vsel %vm328_vm0, %v2307_v26, 0.0 }
  0xbe   : > { %v2311_v47 = vpop.eup %1452 }
  0xbf   : > { %v760_v63 = vadd.f32 %v759_v62, %v758_v23  ;;  %2889 = vst [vmem:[#allocation22_spill] sm:$0xff] %v2311_v47  ;;  %v771_v23 = vsel %vm328_vm0, %v2311_v47, 0.0 }
  0xc0   : > { %v2315_v31 = vpop.eup %1454 }
  0xc1   : > { %v762_v22 = vadd.f32 %v761_v20, %v760_v63  ;;  %2890 = vst [vmem:[#allocation23_spill] sm:$0xff] %v2315_v31 }
  0xc2   : > { %v2319_v20 = vpop.eup %1456 }
  0xc3   : > { %v764_v21 = vadd.f32 %v763_v53, %v762_v22  ;;  %2891 = vst [vmem:[#allocation24_spill] sm:$0xff] %v2319_v20  ;;  %v773_v53 = vsel %vm328_vm0, %v2315_v31, 0.0 }
  0xc4   : > { %v2323_v22 = vpop.eup %1458 }
  0xc5   : > { %v766_v9 = vadd.f32 %v765_v12, %v764_v21  ;;  %2892 = vst [vmem:[#allocation25_spill] sm:$0xff] %v2323_v22  ;;  %v775_v12 = vsel %vm328_vm0, %v2319_v20, 0.0  ;;  %v984_v20 = vld [vmem:[%s2343_s25 + $0x20] sm:$0xff] }
  0xc6   : > { %v2327_v21 = vpop.eup %1460 }
  0xc7   : > { %v768_v62 = vadd.f32 %v767_v17, %v766_v9  ;;  %2893 = vst [vmem:[#allocation26_spill] sm:$0xff] %v2327_v21  ;;  %v777_v9 = vsel %vm328_vm0, %v2323_v22, 0.0  ;;  %v983_v22 = vld [vmem:[%s2343_s25 + $0x18] sm:$0xff] }
  0xc9   : > { %v770_v63 = vadd.f32 %v769_v25, %v768_v62  ;;  %v779_v25 = vsel %vm328_vm0, %v2327_v21, 0.0  ;;  %v982_v21 = vld [vmem:[%s2343_s25 + $0x10] sm:$0xff] }
  0xcb   : > { %v772_v46 = vadd.f32 %v771_v23, %v770_v63 }
  0xcd   : > { %v774_v17 = vadd.f32 %v773_v53, %v772_v46  ;;  %v855_v46 = vld [vmem:[%s2337_s22 + $0x18] sm:$0xff]  ;;  %v857_v53 = vld [vmem:[%s2337_s22 + $0x28] sm:$0xff] }
  0xcf   : > { %v776_v47 = vadd.f32 %v775_v12, %v774_v17 }
  0xd1   : > { %v778_v62 = vadd.f32 %v777_v9, %v776_v47  ;;  %v980_v47 = vld [vmem:[%s2343_s25] sm:$0xff]  ;;  %v981_v9 = vld [vmem:[%s2343_s25 + $0x8] sm:$0xff] }
  0xd3   : > { %v780_v31 = vadd.f32 %v779_v25, %v778_v62 }
  0xd5   : > { %v781_v26 = vrot.slane %v780_v31, 4 }
  0xd7   : > { %v782_v37 = vadd.f32 %v781_v26, %v780_v31  ;;  %v856_v31 = vld [vmem:[%s2337_s22 + $0x20] sm:$0xff] }
  0xd9   : > { %v783_v23 = vrot.slane %v782_v37, 2 }
  0xdb   : > { %v784_v63 = vadd.f32 %v783_v23, %v782_v37  ;;  %v854_v37 = vld [vmem:[%s2337_s22 + $0x10] sm:$0xff] }
  0xdc   : > { %v858_v23 = vld [vmem:[%s2337_s22 + $0x30] sm:$0xff] }
  0xdd   : > { %v785_v35 = vrot.slane %v784_v63, 1 }
  0xdf   : > { %v786_v34 = vadd.f32 %v785_v35, %v784_v63  ;;  %v853_v35 = vld [vmem:[%s2337_s22 + $0x8] sm:$0xff]  ;;  %v859_v63 = vld [vmem:[%s2337_s22 + $0x38] sm:$0xff] }
  0xe1   : > { %1462 = vrcp.f32 %v786_v34  ;;  %v852_v34 = vld [vmem:[%s2337_s22] sm:$0xff] }
  0xee   : > { %v2349_v26 = vpop.eup %1462 }
  0xef   : > { %v788_v12 = vmul.f32 %v2349_v26, %v1942_v60  ;;  %v789_v17 = vmul.f32 %v2349_v26, %v1946_v15  ;;  %v790_v25 = vmul.f32 %v2349_v26, %v1948_v49  ;;  %v791_v62 = vmul.f32 %v2349_v26, %v1952_v8 }
  0xf0   : > { %v792_v60 = vmul.f32 %v2349_v26, %v1960_v5  ;;  %v793_v15 = vmul.f32 %v2349_v26, %v1968_v42  ;;  %v794_v49 = vmul.f32 %v2349_v26, %v1974_v61  ;;  %v795_v7 = vmul.f32 %v2349_v26, %v1980_v36  ;;  %v987_v5 = vld [vmem:[%s2343_s25 + $0x38] sm:$0xff] }
  0xf1   : > { %v916_v8 = vmul.f32 %v852_v34, %v788_v12  ;;  %v917_v6 = vmul.f32 %v853_v35, %v789_v17  ;;  %v918_v39 = vmul.f32 %v854_v37, %v790_v25  ;;  %v919_v38 = vmul.f32 %v855_v46, %v791_v62  ;;  %v860_v17 = vld [vmem:[%s2337_s22 + $0x40] sm:$0xff]  ;;  %v861_v25 = vld [vmem:[%s2337_s22 + $0x48] sm:$0xff]  ;;  %v862_v62 = vld [vmem:[%s2337_s22 + $0x50] sm:$0xff] }
  0xf2   : > { %v920_v42 = vmul.f32 %v856_v31, %v792_v60  ;;  %v921_v61 = vmul.f32 %v857_v53, %v793_v15  ;;  %v922_v36 = vmul.f32 %v858_v23, %v794_v49  ;;  %v923_v34 = vmul.f32 %v859_v63, %v795_v7  ;;  %v988_v7 = vld [vmem:[%s2343_s25 + $0x40] sm:$0xff]  ;;  %v2895_v60 = vld [vmem:[#allocation3_spill] sm:$0xff]  ;;  %v2896_v49 = vld [vmem:[#allocation4_spill] sm:$0xff] }
  0xf3   : > { %v1044_v35 = vadd.f32 %v980_v47, %v916_v8  ;;  %v1045_v37 = vadd.f32 %v981_v9, %v917_v6  ;;  %v1046_v46 = vadd.f32 %v982_v21, %v918_v39  ;;  %v1047_v12 = vadd.f32 %v983_v22, %v919_v38  ;;  %v989_v47 = vld [vmem:[%s2343_s25 + $0x48] sm:$0xff]  ;;  %v863_v6 = vld [vmem:[%s2337_s22 + $0x58] sm:$0xff]  ;;  %v864_v39 = vld [vmem:[%s2337_s22 + $0x60] sm:$0xff] }
  0xf4   : > { %v1048_v57 = vadd.f32 %v984_v20, %v920_v42  ;;  %v1049_v31 = vadd.f32 %v985_v19, %v921_v61  ;;  %v1050_v53 = vadd.f32 %v986_v18, %v922_v36  ;;  %v1051_v23 = vadd.f32 %v987_v5, %v923_v34  ;;  %v865_v22 = vld [vmem:[%s2337_s22 + $0x68] sm:$0xff]  ;;  %v866_v21 = vld [vmem:[%s2337_s22 + $0x70] sm:$0xff]  ;;  %v867_v9 = vld [vmem:[%s2337_s22 + $0x78] sm:$0xff] }
  0xf5   : > { %1108 = vst.msk [vmem:[%s2383_s28] sm:$0xff] %vm328_vm0, %v1044_v35  ;;  %1109 = vst.msk [vmem:[%s2383_s28 + $0x8] sm:$0xff] %vm328_vm0, %v1045_v37  ;;  %v796_v18 = vmul.f32 %v2349_v26, %v1986_v11  ;;  %v797_v19 = vmul.f32 %v2349_v26, %v1992_v43  ;;  %v798_v38 = vmul.f32 %v2349_v26, %v1998_v48  ;;  %v990_v11 = vld [vmem:[%s2343_s25 + $0x50] sm:$0xff]  ;;  %v991_v43 = vld [vmem:[%s2343_s25 + $0x58] sm:$0xff] }
  0xf6   : > { %1110 = vst.msk [vmem:[%s2383_s28 + $0x10] sm:$0xff] %vm328_vm0, %v1046_v46  ;;  %1111 = vst.msk [vmem:[%s2383_s28 + $0x18] sm:$0xff] %vm328_vm0, %v1047_v12  ;;  %v799_v20 = vmul.f32 %v2349_v26, %v2004_v24  ;;  %v2894_v48 = vld [vmem:[#allocation2_spill] sm:$0xff]  ;;  %v801_v15 = vmul.f32 %v2349_v26, %v2895_v60  ;;  %v2897_v8 = vld [vmem:[#allocation5_spill] sm:$0xff] }
  0xf7   : > { %1112 = vst.msk [vmem:[%s2383_s28 + $0x20] sm:$0xff] %vm328_vm0, %v1048_v57  ;;  %1113 = vst.msk [vmem:[%s2383_s28 + $0x28] sm:$0xff] %vm328_vm0, %v1049_v31  ;;  %v800_v63 = vmul.f32 %v2349_v26, %v2894_v48  ;;  %v992_v24 = vld [vmem:[%s2343_s25 + $0x60] sm:$0xff]  ;;  %v802_v57 = vmul.f32 %v2349_v26, %v2896_v49  ;;  %v803_v5 = vmul.f32 %v2349_v26, %v2897_v8  ;;  %v993_v35 = vld [vmem:[%s2343_s25 + $0x68] sm:$0xff] }
  0xf8   : > { %1114 = vst.msk [vmem:[%s2383_s28 + $0x30] sm:$0xff] %vm328_vm0, %v1050_v53  ;;  %1115 = vst.msk [vmem:[%s2383_s28 + $0x38] sm:$0xff] %vm328_vm0, %v1051_v23  ;;  %v924_v42 = vmul.f32 %v860_v17, %v796_v18  ;;  %v925_v61 = vmul.f32 %v861_v25, %v797_v19  ;;  %v926_v36 = vmul.f32 %v862_v62, %v798_v38  ;;  %v994_v37 = vld [vmem:[%s2343_s25 + $0x70] sm:$0xff]  ;;  %v995_v46 = vld [vmem:[%s2343_s25 + $0x78] sm:$0xff] }
  0xf9   : > { %v927_v34 = vmul.f32 %v863_v6, %v799_v20  ;;  %v928_v12 = vmul.f32 %v864_v39, %v800_v63  ;;  %v929_v31 = vmul.f32 %v865_v22, %v801_v15  ;;  %v930_v53 = vmul.f32 %v866_v21, %v802_v57  ;;  %v868_v6 = vld [vmem:[%s2337_s22 + $0x80] sm:$0xff]  ;;  %v869_v18 = vld [vmem:[%s2337_s22 + $0x88] sm:$0xff]  ;;  %v870_v19 = vld [vmem:[%s2337_s22 + $0x90] sm:$0xff] }
  0xfa   : > { %v931_v23 = vmul.f32 %v867_v9, %v803_v5  ;;  %v1052_v48 = vadd.f32 %v988_v7, %v924_v42  ;;  %v1053_v17 = vadd.f32 %v989_v47, %v925_v61  ;;  %v1054_v25 = vadd.f32 %v990_v11, %v926_v36  ;;  %v996_v21 = vld [vmem:[%s2343_s25 + $0x80] sm:$0xff]  ;;  %v997_v7 = vld [vmem:[%s2343_s25 + $0x88] sm:$0xff]  ;;  %v871_v47 = vld [vmem:[%s2337_s22 + $0x98] sm:$0xff] }
  0xfb   : > { %v1055_v62 = vadd.f32 %v991_v43, %v927_v34  ;;  %v1056_v38 = vadd.f32 %v992_v24, %v928_v12  ;;  %v1057_v39 = vadd.f32 %v993_v35, %v929_v31  ;;  %v1058_v20 = vadd.f32 %v994_v37, %v930_v53  ;;  %v872_v9 = vld [vmem:[%s2337_s22 + $0xa0] sm:$0xff]  ;;  %v2899_v63 = vld [vmem:[#allocation7_spill] sm:$0xff]  ;;  %v2900_v60 = vld [vmem:[#allocation8_spill] sm:$0xff] }
  0xfc   : > { %v1059_v22 = vadd.f32 %v995_v46, %v931_v23  ;;  %1116 = vst.msk [vmem:[%s2383_s28 + $0x40] sm:$0xff] %vm328_vm0, %v1052_v48  ;;  %1117 = vst.msk [vmem:[%s2383_s28 + $0x48] sm:$0xff] %vm328_vm0, %v1053_v17  ;;  %v2898_v11 = vld [vmem:[#allocation6_spill] sm:$0xff]  ;;  %v805_v24 = vmul.f32 %v2349_v26, %v2899_v63  ;;  %v806_v15 = vmul.f32 %v2349_v26, %v2900_v60  ;;  %v2901_v49 = vld [vmem:[#allocation9_spill] sm:$0xff] }
  0xfd   : > { %1118 = vst.msk [vmem:[%s2383_s28 + $0x50] sm:$0xff] %vm328_vm0, %v1054_v25  ;;  %1119 = vst.msk [vmem:[%s2383_s28 + $0x58] sm:$0xff] %vm328_vm0, %v1055_v62  ;;  %v804_v43 = vmul.f32 %v2349_v26, %v2898_v11  ;;  %v807_v57 = vmul.f32 %v2349_v26, %v2901_v49  ;;  %v873_v8 = vld [vmem:[%s2337_s22 + $0xa8] sm:$0xff]  ;;  %v874_v5 = vld [vmem:[%s2337_s22 + $0xb0] sm:$0xff]  ;;  %v808_v34 = vmul.f32 %v2349_v26, %v2058_v2 }
  0xfe   : > { %v875_v42 = vld [vmem:[%s2337_s22 + $0xb8] sm:$0xff]  ;;  %1120 = vst.msk [vmem:[%s2383_s28 + $0x60] sm:$0xff] %vm328_vm0, %v1056_v38  ;;  %1121 = vst.msk [vmem:[%s2383_s28 + $0x68] sm:$0xff] %vm328_vm0, %v1057_v39  ;;  %v998_v61 = vld [vmem:[%s2343_s25 + $0x90] sm:$0xff]  ;;  %v809_v37 = vmul.f32 %v2349_v26, %v2064_v1  ;;  %v810_v46 = vmul.f32 %v2349_v26, %v2070_v0  ;;  %v811_v12 = vmul.f32 %v2349_v26, %v2074_v55 }
  0xff   : > { %1122 = vst.msk [vmem:[%s2383_s28 + $0x70] sm:$0xff] %vm328_vm0, %v1058_v20  ;;  %1123 = vst.msk [vmem:[%s2383_s28 + $0x78] sm:$0xff] %vm328_vm0, %v1059_v22  ;;  %v999_v36 = vld [vmem:[%s2343_s25 + $0x98] sm:$0xff]  ;;  %v1000_v35 = vld [vmem:[%s2343_s25 + $0xa0] sm:$0xff]  ;;  %v932_v31 = vmul.f32 %v868_v6, %v804_v43  ;;  %v933_v53 = vmul.f32 %v869_v18, %v805_v24  ;;  %v934_v23 = vmul.f32 %v870_v19, %v806_v15 }
 0x100   : > { %v935_v48 = vmul.f32 %v871_v47, %v807_v57  ;;  %v1001_v17 = vld [vmem:[%s2343_s25 + $0xa8] sm:$0xff]  ;;  %v1002_v25 = vld [vmem:[%s2343_s25 + $0xb0] sm:$0xff]  ;;  %v1003_v2 = vld [vmem:[%s2343_s25 + $0xb8] sm:$0xff]  ;;  %v936_v62 = vmul.f32 %v872_v9, %v808_v34  ;;  %v937_v1 = vmul.f32 %v873_v8, %v809_v37  ;;  %v938_v38 = vmul.f32 %v874_v5, %v810_v46 }
 0x101   : > { %v939_v0 = vmul.f32 %v875_v42, %v811_v12  ;;  %v1060_v55 = vadd.f32 %v996_v21, %v932_v31  ;;  %v1061_v6 = vadd.f32 %v997_v7, %v933_v53  ;;  %v1062_v18 = vadd.f32 %v998_v61, %v934_v23  ;;  %v876_v39 = vld [vmem:[%s2337_s22 + $0xc0] sm:$0xff]  ;;  %v877_v20 = vld [vmem:[%s2337_s22 + $0xc8] sm:$0xff]  ;;  %v878_v22 = vld [vmem:[%s2337_s22 + $0xd0] sm:$0xff] }
 0x102   : > { %v1063_v19 = vadd.f32 %v999_v36, %v935_v48  ;;  %v1064_v47 = vadd.f32 %v1000_v35, %v936_v62  ;;  %v1065_v9 = vadd.f32 %v1001_v17, %v937_v1  ;;  %v1066_v11 = vadd.f32 %v1002_v25, %v938_v38  ;;  %v1004_v63 = vld [vmem:[%s2343_s25 + $0xc0] sm:$0xff]  ;;  %v1005_v21 = vld [vmem:[%s2343_s25 + $0xc8] sm:$0xff]  ;;  %v879_v7 = vld [vmem:[%s2337_s22 + $0xd8] sm:$0xff] }
 0x103   : > { %v1067_v43 = vadd.f32 %v1003_v2, %v939_v0  ;;  %v880_v24 = vld [vmem:[%s2337_s22 + $0xe0] sm:$0xff]  ;;  %1124 = vst.msk [vmem:[%s2383_s28 + $0x80] sm:$0xff] %vm328_vm0, %v1060_v55  ;;  %1125 = vst.msk [vmem:[%s2383_s28 + $0x88] sm:$0xff] %vm328_vm0, %v1061_v6  ;;  %v812_v60 = vmul.f32 %v2349_v26, %v2078_v32  ;;  %v813_v15 = vmul.f32 %v2349_v26, %v2085_v4  ;;  %v881_v8 = vld [vmem:[%s2337_s22 + $0xe8] sm:$0xff] }
 0x104   : > { %1126 = vst.msk [vmem:[%s2383_s28 + $0x90] sm:$0xff] %vm328_vm0, %v1062_v18  ;;  %1127 = vst.msk [vmem:[%s2383_s28 + $0x98] sm:$0xff] %vm328_vm0, %v1063_v19  ;;  %v814_v49 = vmul.f32 %v2349_v26, %v2092_v3  ;;  %v815_v57 = vmul.f32 %v2349_v26, %v2099_v16  ;;  %v882_v5 = vld [vmem:[%s2337_s22 + $0xf0] sm:$0xff]  ;;  %v883_v42 = vld [vmem:[%s2337_s22 + $0xf8] sm:$0xff]  ;;  %v816_v3 = vmul.f32 %v2349_v26, %v2106_v10 }
 0x105   : > { %1128 = vst.msk [vmem:[%s2383_s28 + $0xa0] sm:$0xff] %vm328_vm0, %v1064_v47  ;;  %1129 = vst.msk [vmem:[%s2383_s28 + $0xa8] sm:$0xff] %vm328_vm0, %v1065_v9  ;;  %v1006_v32 = vld [vmem:[%s2343_s25 + $0xd0] sm:$0xff]  ;;  %v1007_v4 = vld [vmem:[%s2343_s25 + $0xd8] sm:$0xff]  ;;  %v817_v61 = vmul.f32 %v2349_v26, %v2113_v54  ;;  %v818_v36 = vmul.f32 %v2349_v26, %v2120_v52  ;;  %v819_v34 = vmul.f32 %v2349_v26, %v2127_v30 }
 0x106   : > { %1130 = vst.msk [vmem:[%s2383_s28 + $0xb0] sm:$0xff] %vm328_vm0, %v1066_v11  ;;  %1131 = vst.msk [vmem:[%s2383_s28 + $0xb8] sm:$0xff] %vm328_vm0, %v1067_v43  ;;  %v1008_v16 = vld [vmem:[%s2343_s25 + $0xe0] sm:$0xff]  ;;  %v940_v35 = vmul.f32 %v876_v39, %v812_v60  ;;  %v941_v37 = vmul.f32 %v877_v20, %v813_v15  ;;  %v942_v46 = vmul.f32 %v878_v22, %v814_v49  ;;  %v1009_v31 = vld [vmem:[%s2343_s25 + $0xe8] sm:$0xff] }
 0x107   : > { %v943_v12 = vmul.f32 %v879_v7, %v815_v57  ;;  %v1010_v53 = vld [vmem:[%s2343_s25 + $0xf0] sm:$0xff]  ;;  %v1011_v10 = vld [vmem:[%s2343_s25 + $0xf8] sm:$0xff]  ;;  %v944_v23 = vmul.f32 %v880_v24, %v816_v3  ;;  %v945_v54 = vmul.f32 %v881_v8, %v817_v61  ;;  %v946_v48 = vmul.f32 %v882_v5, %v818_v36  ;;  %v884_v62 = vld [vmem:[%s2337_s22 + $0x100] sm:$0xff] }
 0x108   : > { %v947_v52 = vmul.f32 %v883_v42, %v819_v34  ;;  %v1068_v30 = vadd.f32 %v1004_v63, %v940_v35  ;;  %v1069_v17 = vadd.f32 %v1005_v21, %v941_v37  ;;  %v1070_v25 = vadd.f32 %v1006_v32, %v942_v46  ;;  %v885_v1 = vld [vmem:[%s2337_s22 + $0x108] sm:$0xff]  ;;  %v886_v38 = vld [vmem:[%s2337_s22 + $0x110] sm:$0xff]  ;;  %v1012_v19 = vld [vmem:[%s2343_s25 + $0x100] sm:$0xff] }
 0x109   : > { %v1071_v2 = vadd.f32 %v1007_v4, %v943_v12  ;;  %v1072_v0 = vadd.f32 %v1008_v16, %v944_v23  ;;  %v1073_v55 = vadd.f32 %v1009_v31, %v945_v54  ;;  %v1074_v6 = vadd.f32 %v1010_v53, %v946_v48  ;;  %v1013_v39 = vld [vmem:[%s2343_s25 + $0x108] sm:$0xff]  ;;  %v887_v20 = vld [vmem:[%s2337_s22 + $0x118] sm:$0xff]  ;;  %v888_v22 = vld [vmem:[%s2337_s22 + $0x120] sm:$0xff] }
 0x10a   : > { %v1075_v18 = vadd.f32 %v1011_v10, %v947_v52  ;;  %1132 = vst.msk [vmem:[%s2383_s28 + $0xc0] sm:$0xff] %vm328_vm0, %v1068_v30  ;;  %1133 = vst.msk [vmem:[%s2383_s28 + $0xc8] sm:$0xff] %vm328_vm0, %v1069_v17  ;;  %v820_v47 = vmul.f32 %v2349_v26, %v2134_v29  ;;  %v821_v9 = vmul.f32 %v2349_v26, %v2141_v33  ;;  %v889_v63 = vld [vmem:[%s2337_s22 + $0x128] sm:$0xff]  ;;  %v890_v21 = vld [vmem:[%s2337_s22 + $0x130] sm:$0xff] }
 0x10b   : > { %1134 = vst.msk [vmem:[%s2383_s28 + $0xd0] sm:$0xff] %vm328_vm0, %v1070_v25  ;;  %1135 = vst.msk [vmem:[%s2383_s28 + $0xd8] sm:$0xff] %vm328_vm0, %v1071_v2  ;;  %v822_v11 = vmul.f32 %v2349_v26, %v2148_v40  ;;  %v823_v43 = vmul.f32 %v2349_v26, %v2155_v41  ;;  %v891_v7 = vld [vmem:[%s2337_s22 + $0x138] sm:$0xff]  ;;  %v1014_v29 = vld [vmem:[%s2343_s25 + $0x110] sm:$0xff]  ;;  %v824_v40 = vmul.f32 %v2349_v26, %v2162_v50 }
 0x10c   : > { %1136 = vst.msk [vmem:[%s2383_s28 + $0xe0] sm:$0xff] %vm328_vm0, %v1072_v0  ;;  %1137 = vst.msk [vmem:[%s2383_s28 + $0xe8] sm:$0xff] %vm328_vm0, %v1073_v55  ;;  %v1015_v33 = vld [vmem:[%s2343_s25 + $0x118] sm:$0xff]  ;;  %v1016_v41 = vld [vmem:[%s2343_s25 + $0x120] sm:$0xff]  ;;  %v825_v24 = vmul.f32 %v2349_v26, %v2169_v51  ;;  %v826_v60 = vmul.f32 %v2349_v26, %v2176_v58  ;;  %v827_v15 = vmul.f32 %v2349_v26, %v2183_v59 }
 0x10d   : > { %1138 = vst.msk [vmem:[%s2383_s28 + $0xf0] sm:$0xff] %vm328_vm0, %v1074_v6  ;;  %1139 = vst.msk [vmem:[%s2383_s28 + $0xf8] sm:$0xff] %vm328_vm0, %v1075_v18  ;;  %v948_v49 = vmul.f32 %v884_v62, %v820_v47  ;;  %v949_v57 = vmul.f32 %v885_v1, %v821_v9  ;;  %v950_v8 = vmul.f32 %v886_v38, %v822_v11  ;;  %v1017_v42 = vld [vmem:[%s2343_s25 + $0x128] sm:$0xff]  ;;  %v1018_v32 = vld [vmem:[%s2343_s25 + $0x130] sm:$0xff] }
 0x10e   : > { %v951_v5 = vmul.f32 %v887_v20, %v823_v43  ;;  %v1019_v50 = vld [vmem:[%s2343_s25 + $0x138] sm:$0xff]  ;;  %v952_v4 = vmul.f32 %v888_v22, %v824_v40  ;;  %v953_v51 = vmul.f32 %v889_v63, %v825_v24  ;;  %v954_v3 = vmul.f32 %v890_v21, %v826_v60  ;;  %v892_v34 = vld [vmem:[%s2337_s22 + $0x140] sm:$0xff]  ;;  %v893_v35 = vld [vmem:[%s2337_s22 + $0x148] sm:$0xff] }
 0x10f   : > { %v955_v58 = vmul.f32 %v891_v7, %v827_v15  ;;  %v1076_v59 = vadd.f32 %v1012_v19, %v948_v49  ;;  %v1077_v16 = vadd.f32 %v1013_v39, %v949_v57  ;;  %v1078_v61 = vadd.f32 %v1014_v29, %v950_v8  ;;  %v894_v37 = vld [vmem:[%s2337_s22 + $0x150] sm:$0xff]  ;;  %v1020_v10 = vld [vmem:[%s2343_s25 + $0x140] sm:$0xff]  ;;  %v1021_v23 = vld [vmem:[%s2343_s25 + $0x148] sm:$0xff] }
 0x110   : > { %v1079_v36 = vadd.f32 %v1015_v33, %v951_v5  ;;  %v1080_v46 = vadd.f32 %v1016_v41, %v952_v4  ;;  %v1081_v12 = vadd.f32 %v1017_v42, %v953_v51  ;;  %v1082_v31 = vadd.f32 %v1018_v32, %v954_v3  ;;  %v895_v54 = vld [vmem:[%s2337_s22 + $0x158] sm:$0xff]  ;;  %v896_v48 = vld [vmem:[%s2337_s22 + $0x160] sm:$0xff]  ;;  %v897_v2 = vld [vmem:[%s2337_s22 + $0x168] sm:$0xff] }
 0x111   : > { %v1083_v53 = vadd.f32 %v1019_v50, %v955_v58  ;;  %1140 = vst.msk [vmem:[%s2383_s28 + $0x100] sm:$0xff] %vm328_vm0, %v1076_v59  ;;  %1141 = vst.msk [vmem:[%s2383_s28 + $0x108] sm:$0xff] %vm328_vm0, %v1077_v16  ;;  %v828_v52 = vmul.f32 %v2349_v26, %v2190_v13  ;;  %v829_v30 = vmul.f32 %v2349_v26, %v2197_v14  ;;  %v898_v62 = vld [vmem:[%s2337_s22 + $0x170] sm:$0xff]  ;;  %v899_v1 = vld [vmem:[%s2337_s22 + $0x178] sm:$0xff] }
 0x112   : > { %1142 = vst.msk [vmem:[%s2383_s28 + $0x110] sm:$0xff] %vm328_vm0, %v1078_v61  ;;  %1143 = vst.msk [vmem:[%s2383_s28 + $0x118] sm:$0xff] %vm328_vm0, %v1079_v36  ;;  %v830_v17 = vmul.f32 %v2349_v26, %v2204_v27  ;;  %v831_v25 = vmul.f32 %v2349_v26, %v2211_v28  ;;  %v1022_v13 = vld [vmem:[%s2343_s25 + $0x150] sm:$0xff]  ;;  %v1023_v14 = vld [vmem:[%s2343_s25 + $0x158] sm:$0xff]  ;;  %v832_v27 = vmul.f32 %v2349_v26, %v2218_v44 }
 0x113   : > { %1144 = vst.msk [vmem:[%s2383_s28 + $0x120] sm:$0xff] %vm328_vm0, %v1080_v46  ;;  %1145 = vst.msk [vmem:[%s2383_s28 + $0x128] sm:$0xff] %vm328_vm0, %v1081_v12  ;;  %v1024_v28 = vld [vmem:[%s2343_s25 + $0x160] sm:$0xff]  ;;  %v833_v38 = vmul.f32 %v2349_v26, %v2225_v45  ;;  %v834_v0 = vmul.f32 %v2349_v26, %v2232_v56  ;;  %v956_v18 = vmul.f32 %v892_v34, %v828_v52  ;;  %v1025_v22 = vld [vmem:[%s2343_s25 + $0x168] sm:$0xff] }
 0x114   : > { %1146 = vst.msk [vmem:[%s2383_s28 + $0x130] sm:$0xff] %vm328_vm0, %v1082_v31  ;;  %1147 = vst.msk [vmem:[%s2383_s28 + $0x138] sm:$0xff] %vm328_vm0, %v1083_v53  ;;  %v2902_v55 = vld [vmem:[#allocation10_spill] sm:$0xff]  ;;  %v957_v19 = vmul.f32 %v893_v35, %v829_v30  ;;  %v958_v39 = vmul.f32 %v894_v37, %v830_v17  ;;  %v959_v20 = vmul.f32 %v895_v54, %v831_v25  ;;  %v1026_v47 = vld [vmem:[%s2343_s25 + $0x170] sm:$0xff] }
 0x115   : > { %v835_v6 = vmul.f32 %v2349_v26, %v2902_v55  ;;  %v1027_v44 = vld [vmem:[%s2343_s25 + $0x178] sm:$0xff]  ;;  %v960_v9 = vmul.f32 %v896_v48, %v832_v27  ;;  %v961_v45 = vmul.f32 %v897_v2, %v833_v38  ;;  %v962_v11 = vmul.f32 %v898_v62, %v834_v0  ;;  %v900_v29 = vld [vmem:[%s2337_s22 + $0x180] sm:$0xff]  ;;  %v901_v33 = vld [vmem:[%s2337_s22 + $0x188] sm:$0xff] }
 0x116   : > { %v1084_v43 = vadd.f32 %v1020_v10, %v956_v18  ;;  %v1085_v63 = vadd.f32 %v1021_v23, %v957_v19  ;;  %v1086_v21 = vadd.f32 %v1022_v13, %v958_v39  ;;  %v1087_v7 = vadd.f32 %v1023_v14, %v959_v20  ;;  %v902_v40 = vld [vmem:[%s2337_s22 + $0x190] sm:$0xff]  ;;  %v1028_v49 = vld [vmem:[%s2343_s25 + $0x180] sm:$0xff]  ;;  %v1029_v57 = vld [vmem:[%s2343_s25 + $0x188] sm:$0xff] }
 0x117   : > { %v963_v56 = vmul.f32 %v899_v1, %v835_v6  ;;  %v1088_v41 = vadd.f32 %v1024_v28, %v960_v9  ;;  %v1089_v24 = vadd.f32 %v1025_v22, %v961_v45  ;;  %v1090_v60 = vadd.f32 %v1026_v47, %v962_v11  ;;  %v903_v8 = vld [vmem:[%s2337_s22 + $0x198] sm:$0xff]  ;;  %v904_v5 = vld [vmem:[%s2337_s22 + $0x1a0] sm:$0xff]  ;;  %v2903_v42 = vld [vmem:[#allocation11_spill] sm:$0xff] }
 0x118   : > { %1148 = vst.msk [vmem:[%s2383_s28 + $0x140] sm:$0xff] %vm328_vm0, %v1084_v43  ;;  %1149 = vst.msk [vmem:[%s2383_s28 + $0x148] sm:$0xff] %vm328_vm0, %v1085_v63  ;;  %v836_v32 = vmul.f32 %v2349_v26, %v2903_v42  ;;  %v2904_v50 = vld [vmem:[#allocation12_spill] sm:$0xff]  ;;  %v2905_v51 = vld [vmem:[#allocation13_spill] sm:$0xff] }
 0x119   : > { %v1091_v15 = vadd.f32 %v1027_v44, %v963_v56  ;;  %1150 = vst.msk [vmem:[%s2383_s28 + $0x150] sm:$0xff] %vm328_vm0, %v1086_v21  ;;  %1151 = vst.msk [vmem:[%s2383_s28 + $0x158] sm:$0xff] %vm328_vm0, %v1087_v7  ;;  %v837_v4 = vmul.f32 %v2349_v26, %v2904_v50  ;;  %v838_v3 = vmul.f32 %v2349_v26, %v2905_v51  ;;  %v2906_v58 = vld [vmem:[#allocation14_spill] sm:$0xff]  ;;  %v905_v16 = vld [vmem:[%s2337_s22 + $0x1a8] sm:$0xff] }
 0x11a   : > { %v839_v59 = vmul.f32 %v2349_v26, %v2906_v58  ;;  %v906_v61 = vld [vmem:[%s2337_s22 + $0x1b0] sm:$0xff]  ;;  %v907_v36 = vld [vmem:[%s2337_s22 + $0x1b8] sm:$0xff]  ;;  %1152 = vst.msk [vmem:[%s2383_s28 + $0x160] sm:$0xff] %vm328_vm0, %v1088_v41  ;;  %1153 = vst.msk [vmem:[%s2383_s28 + $0x168] sm:$0xff] %vm328_vm0, %v1089_v24  ;;  %v964_v52 = vmul.f32 %v900_v29, %v836_v32 }
 0x11b   : > { %1154 = vst.msk [vmem:[%s2383_s28 + $0x170] sm:$0xff] %vm328_vm0, %v1090_v60  ;;  %1155 = vst.msk [vmem:[%s2383_s28 + $0x178] sm:$0xff] %vm328_vm0, %v1091_v15  ;;  %v1030_v34 = vld [vmem:[%s2343_s25 + $0x190] sm:$0xff]  ;;  %v1031_v35 = vld [vmem:[%s2343_s25 + $0x198] sm:$0xff]  ;;  %v965_v30 = vmul.f32 %v901_v33, %v837_v4  ;;  %v966_v17 = vmul.f32 %v902_v40, %v838_v3 }
 0x11c   : > { %v2907_v37 = vld [vmem:[#allocation15_spill] sm:$0xff]  ;;  %v1032_v12 = vld [vmem:[%s2343_s25 + $0x1a0] sm:$0xff]  ;;  %v2908_v31 = vld [vmem:[#allocation16_spill] sm:$0xff]  ;;  %v967_v25 = vmul.f32 %v903_v8, %v839_v59  ;;  %v1092_v38 = vadd.f32 %v1028_v49, %v964_v52 }
 0x11d   : > { %v840_v46 = vmul.f32 %v2349_v26, %v2907_v37  ;;  %v841_v53 = vmul.f32 %v2349_v26, %v2908_v31  ;;  %v2909_v10 = vld [vmem:[#allocation17_spill] sm:$0xff]  ;;  %v2910_v54 = vld [vmem:[#allocation18_spill] sm:$0xff]  ;;  %v1033_v2 = vld [vmem:[%s2343_s25 + $0x1a8] sm:$0xff]  ;;  %v1093_v0 = vadd.f32 %v1029_v57, %v965_v30  ;;  %v1094_v55 = vadd.f32 %v1030_v34, %v966_v17 }
 0x11e   : > { %v842_v23 = vmul.f32 %v2349_v26, %v2909_v10  ;;  %v843_v48 = vmul.f32 %v2349_v26, %v2910_v54  ;;  %v1034_v62 = vld [vmem:[%s2343_s25 + $0x1b0] sm:$0xff]  ;;  %v1035_v1 = vld [vmem:[%s2343_s25 + $0x1b8] sm:$0xff]  ;;  %v1095_v6 = vadd.f32 %v1031_v35, %v967_v25  ;;  %v908_v18 = vld [vmem:[%s2337_s22 + $0x1c0] sm:$0xff]  ;;  %1156 = vst.msk [vmem:[%s2383_s28 + $0x180] sm:$0xff] %vm328_vm0, %v1092_v38 }
 0x11f   : > { %v968_v13 = vmul.f32 %v904_v5, %v840_v46  ;;  %v969_v14 = vmul.f32 %v905_v16, %v841_v53  ;;  %v909_v19 = vld [vmem:[%s2337_s22 + $0x1c8] sm:$0xff]  ;;  %v910_v39 = vld [vmem:[%s2337_s22 + $0x1d0] sm:$0xff]  ;;  %v1036_v9 = vld [vmem:[%s2343_s25 + $0x1c0] sm:$0xff]  ;;  %1157 = vst.msk [vmem:[%s2383_s28 + $0x188] sm:$0xff] %vm328_vm0, %v1093_v0 }
 0x120   : > { %v970_v27 = vmul.f32 %v906_v61, %v842_v23  ;;  %v971_v28 = vmul.f32 %v907_v36, %v843_v48  ;;  %v1037_v45 = vld [vmem:[%s2343_s25 + $0x1c8] sm:$0xff]  ;;  %v911_v11 = vld [vmem:[%s2337_s22 + $0x1d8] sm:$0xff]  ;;  %v912_v56 = vld [vmem:[%s2337_s22 + $0x1e0] sm:$0xff]  ;;  %1158 = vst.msk [vmem:[%s2383_s28 + $0x190] sm:$0xff] %vm328_vm0, %v1094_v55 }
 0x121   : > { %v1096_v20 = vadd.f32 %v1032_v12, %v968_v13  ;;  %v1097_v22 = vadd.f32 %v1033_v2, %v969_v14  ;;  %1159 = vst.msk [vmem:[%s2383_s28 + $0x198] sm:$0xff] %vm328_vm0, %v1095_v6  ;;  %v2911_v43 = vld [vmem:[#allocation19_spill] sm:$0xff]  ;;  %v2912_v21 = vld [vmem:[#allocation20_spill] sm:$0xff]  ;;  %v2913_v29 = vld [vmem:[#allocation21_spill] sm:$0xff] }
 0x122   : > { %v1098_v47 = vadd.f32 %v1034_v62, %v970_v27  ;;  %v1099_v44 = vadd.f32 %v1035_v1, %v971_v28  ;;  %v844_v63 = vmul.f32 %v2349_v26, %v2911_v43  ;;  %v845_v7 = vmul.f32 %v2349_v26, %v2912_v21  ;;  %v2914_v40 = vld [vmem:[#allocation22_spill] sm:$0xff]  ;;  %v913_v24 = vld [vmem:[%s2337_s22 + $0x1e8] sm:$0xff]  ;;  %v914_v60 = vld [vmem:[%s2337_s22 + $0x1f0] sm:$0xff] }
 0x123   : > { %v846_v33 = vmul.f32 %v2349_v26, %v2913_v29  ;;  %v847_v41 = vmul.f32 %v2349_v26, %v2914_v40  ;;  %v915_v15 = vld [vmem:[%s2337_s22 + $0x1f8] sm:$0xff]  ;;  %1160 = vst.msk [vmem:[%s2383_s28 + $0x1a0] sm:$0xff] %vm328_vm0, %v1096_v20  ;;  %1161 = vst.msk [vmem:[%s2383_s28 + $0x1a8] sm:$0xff] %vm328_vm0, %v1097_v22  ;;  %v1038_v49 = vld [vmem:[%s2343_s25 + $0x1d0] sm:$0xff] }
 0x124   : > { %1162 = vst.msk [vmem:[%s2383_s28 + $0x1b0] sm:$0xff] %vm328_vm0, %v1098_v47  ;;  %1163 = vst.msk [vmem:[%s2383_s28 + $0x1b8] sm:$0xff] %vm328_vm0, %v1099_v44  ;;  %v1039_v57 = vld [vmem:[%s2343_s25 + $0x1d8] sm:$0xff]  ;;  %v2915_v8 = vld [vmem:[#allocation23_spill] sm:$0xff]  ;;  %v972_v59 = vmul.f32 %v908_v18, %v844_v63  ;;  %v973_v16 = vmul.f32 %v909_v19, %v845_v7 }
 0x125   : > { %v848_v5 = vmul.f32 %v2349_v26, %v2915_v8  ;;  %v1040_v42 = vld [vmem:[%s2343_s25 + $0x1e0] sm:$0xff]  ;;  %v2916_v32 = vld [vmem:[#allocation24_spill] sm:$0xff]  ;;  %v2917_v4 = vld [vmem:[#allocation25_spill] sm:$0xff]  ;;  %v974_v61 = vmul.f32 %v910_v39, %v846_v33  ;;  %v975_v36 = vmul.f32 %v911_v11, %v847_v41 }
 0x126   : > { %v849_v50 = vmul.f32 %v2349_v26, %v2916_v32  ;;  %v850_v51 = vmul.f32 %v2349_v26, %v2917_v4  ;;  %v2918_v3 = vld [vmem:[#allocation26_spill] sm:$0xff]  ;;  %v1041_v34 = vld [vmem:[%s2343_s25 + $0x1e8] sm:$0xff]  ;;  %v1042_v35 = vld [vmem:[%s2343_s25 + $0x1f0] sm:$0xff]  ;;  %v1101_v10 = vadd.f32 %v1037_v45, %v973_v16 }
 0x127   : > { %v851_v58 = vmul.f32 %v2349_v26, %v2918_v3  ;;  %v1043_v37 = vld [vmem:[%s2343_s25 + $0x1f8] sm:$0xff]  ;;  %v976_v46 = vmul.f32 %v912_v56, %v848_v5  ;;  %v1100_v26 = vadd.f32 %v1036_v9, %v972_v59  ;;  %v1102_v23 = vadd.f32 %v1038_v49, %v974_v61 }
 0x128   : > { %v977_v12 = vmul.f32 %v913_v24, %v849_v50  ;;  %v978_v31 = vmul.f32 %v914_v60, %v850_v51  ;;  %v1103_v54 = vadd.f32 %v1039_v57, %v975_v36  ;;  %1165 = vst.msk [vmem:[%s2383_s28 + $0x1c8] sm:$0xff] %vm328_vm0, %v1101_v10 }
 0x129   : > { %v979_v53 = vmul.f32 %v915_v15, %v851_v58  ;;  %v1104_v48 = vadd.f32 %v1040_v42, %v976_v46  ;;  %1164 = vst.msk [vmem:[%s2383_s28 + $0x1c0] sm:$0xff] %vm328_vm0, %v1100_v26  ;;  %1166 = vst.msk [vmem:[%s2383_s28 + $0x1d0] sm:$0xff] %vm328_vm0, %v1102_v23 }
 0x12a   : > { %v1105_v52 = vadd.f32 %v1041_v34, %v977_v12  ;;  %v1106_v30 = vadd.f32 %v1042_v35, %v978_v31  ;;  %1167 = vst.msk [vmem:[%s2383_s28 + $0x1d8] sm:$0xff] %vm328_vm0, %v1103_v54 }
 0x12b   : > { %v1107_v17 = vadd.f32 %v1043_v37, %v979_v53  ;;  %1168 = vst.msk [vmem:[%s2383_s28 + $0x1e0] sm:$0xff] %vm328_vm0, %v1104_v48 }
 0x12c   : > { %1169 = vst.msk [vmem:[%s2383_s28 + $0x1e8] sm:$0xff] %vm328_vm0, %v1105_v52  ;;  %1170 = vst.msk [vmem:[%s2383_s28 + $0x1f0] sm:$0xff] %vm328_vm0, %v1106_v30 }
 0x12d   : > { %1171 = vst.msk [vmem:[%s2383_s28 + $0x1f8] sm:$0xff] %vm328_vm0, %v1107_v17 }
 0x12e PF: > { %s13_s14 = sadd.s32 1, %s1486_s14   ;;  %s2919_s12 = smov %s1482_s13 }
 0x12f   : > { %p10_p5 = scmp.ge.s32.totalorder %s13_s14, 4   ;;  %s2920_s13 = smov %s2922_s15 }
 0x131   :  { %12 = sbr.rel (!%p10_p5) target bundleno = 2 (0x2), region = 68 }

// kernel: double_conv_up_forward.10
= control target key start
LH: loop header
LB: loop body
LE: loop exit
PB: predicated region body
PF: predicated region fallthrough
CT: control target
= control target key end

     0   :  { %s1756_s12 = smov 0   ;;  %s1758_s13 = smov 0   ;;  %s2266_s0 = inlined_call_operand.vmem [shape: bf16[1,1024,8], index: 0, kind: input, shape index: {}]   ;;  %s2267_s1 = inlined_call_operand.vmem [shape: bf16[1,8,16], index: 1, kind: input, shape index: {}]   ;;  %s2268_s2 = inlined_call_operand.vmem [shape: f32[1,1,16], index: 2, kind: input, shape index: {}]   ;;  %s2269_s3 = inlined_call_operand.vmem [shape: f32[1,1024,16], index: 3, kind: output, shape index: {}]  }
   0x1   :  { %s1760_s14 = smov 0  }
   0x2 LB: > { %s28_s15 = sadd.s32 1, %s1729_s13  ;;  %p1479_p0 = scmp.ge.s32.totalorder %s1733_s14, 1  ;;  %s1733_s14 = sphi %s1760_s14, %s13_s14   ;;  %s1729_s13 = sphi %s1758_s13, %s2272_s13   ;;  %s1725_s12 = sphi %s1756_s12, %s2271_s12  }
   0x3   : > { %p30_p1 = scmp.ge.s32.totalorder %s28_s15, 2  ;;  %p192_p2 = scmp.lt.s32.totalorder %s1733_s14, 3 }
   0x5   : > { %s2274_s15 = smov (%p30_p1, %s28_s15), 0  ;;  %p193_p3 = pnand %p1479_p0, %p192_p2 }
   0x6   : > { %s1480_s18 = sshll.u32 (!%p193_p3), %s1725_s12, 6 }
   0x7   : > { %196 = sbr.rel (%p193_p3) target bundleno = 286 (0x11e), region = 32  ;;  %p1782_p4 = scmp.lt.s32.totalorder (!%p193_p3), %s1480_s18, 127 }
   0xc   : > { %v468_v0 = vld [vmem:[%s2267_s1] sm:$0xf]  ;;  %vm726_vm0 = vcmask 1043456   ;;  %vm275_vm1 = vcmask 130048   ;;  %v1735_v2 = vmov 0.0   ;;  %s2276_s18 = smov (!%p1782_p4, %s1480_s18), 127 }
   0xd   : > { %1652 = vmatprep.subr.msk.bf16.mxu0 %vm726_vm0, %v468_v0  ;;  %1653 = vmatprep.subr.msk.bf16.mxu1 %vm726_vm0, %v468_v0  ;;  %v728_v1 = vsel %vm726_vm0, %v468_v0, 0  ;;  %278 = vst.msk [vmem:[#allocation2 + $0x10] sm:$0xff] %vm275_vm1, %v1735_v2  ;;  %276 = vst.msk [vmem:[#allocation2] sm:$0xff] %vm275_vm1, %v1735_v2  ;;  %s1481_s20 = sshll.u32 %s2276_s18, 2  ;;  %vm629_vm2 = vcmask 64512   ;;  %s1483_s24 = sshll.u32 %s2276_s18, 3 }
   0xe   : > { %1585 = vmatpush3.bf16.msra.mxu0 %v728_v1  ;;  %1651 = vmatpush3.bf16.msra.mxu1 %v728_v1  ;;  %277 = vst.msk [vmem:[#allocation2 + $0x8] sm:$0xff] %vm275_vm1, %v1735_v2  ;;  %279 = vst.msk [vmem:[#allocation2 + $0x18] sm:$0xff] %vm275_vm1, %v1735_v2  ;;  %s1924_s23 = scalar_lea.vmem %s2266_s0, %s1481_s20  ;;  %v1999_v60 = vld [vmem:[%s2268_s2] ss:$0 sm:$0xff]  ;;  %s2006_s29 = scalar_lea.vmem %s2269_s3, %s1483_s24 }
   0xf   : > { %280 = vst.msk [vmem:[#allocation2 + $0x20] sm:$0xff] %vm275_vm1, %v1735_v2  ;;  %281 = vst.msk [vmem:[#allocation2 + $0x28] sm:$0xff] %vm275_vm1, %v1735_v2  ;;  %v1679_v3 = vld [vmem:[%s1924_s23] sm:$0xff]   ;;  %v1681_v5 = vld [vmem:[%s1924_s23 + $0x8] sm:$0xff]  }
  0x10   : > { %282 = vst.msk [vmem:[#allocation2 + $0x30] sm:$0xff] %vm275_vm1, %v1735_v2  ;;  %283 = vst.msk [vmem:[#allocation2 + $0x38] sm:$0xff] %vm275_vm1, %v1735_v2  ;;  %v1680_v4 = vld [vmem:[%s1924_s23 + $0x80] sm:$0xff]   ;;  %1586 = vmatprep.mubr.msk.bf16.mxu0 %vm629_vm2, %v1679_v3  ;;  %v1682_v6 = vld [vmem:[%s1924_s23 + $0x88] sm:$0xff]  }
  0x11   : > { %284 = vst.msk [vmem:[#allocation2 + $0x40] sm:$0xff] %vm275_vm1, %v1735_v2  ;;  %285 = vst.msk [vmem:[#allocation2 + $0x48] sm:$0xff] %vm275_vm1, %v1735_v2  ;;  %1618 = vmatprep.mubr.msk.bf16.mxu1 %vm629_vm2, %v1680_v4  ;;  %1587 = vmatmul.mubr.msk.bf16.vlgmr.msra.gmra.mxu0 %vm629_vm2, %v1681_v5  ;;  %v1683_v7 = vld [vmem:[%s1924_s23 + $0x10] sm:$0xff]   ;;  %v1685_v9 = vld [vmem:[%s1924_s23 + $0x18] sm:$0xff]  }
  0x12   : > { %286 = vst.msk [vmem:[#allocation2 + $0x50] sm:$0xff] %vm275_vm1, %v1735_v2  ;;  %287 = vst.msk [vmem:[#allocation2 + $0x58] sm:$0xff] %vm275_vm1, %v1735_v2  ;;  %1619 = vmatmul.mubr.msk.bf16.vlgmr.msra.gmra.mxu1 %vm629_vm2, %v1682_v6  ;;  %v1684_v8 = vld [vmem:[%s1924_s23 + $0x90] sm:$0xff]   ;;  %1590 = vmatprep.mubr.msk.bf16.mxu0 %vm629_vm2, %v1683_v7  ;;  %v1686_v10 = vld [vmem:[%s1924_s23 + $0x98] sm:$0xff]  }
  0x13   : > { %288 = vst.msk [vmem:[#allocation2 + $0x60] sm:$0xff] %vm275_vm1, %v1735_v2  ;;  %289 = vst.msk [vmem:[#allocation2 + $0x68] sm:$0xff] %vm275_vm1, %v1735_v2  ;;  %1622 = vmatprep.mubr.msk.bf16.mxu1 %vm629_vm2, %v1684_v8  ;;  %v1687_v11 = vld [vmem:[%s1924_s23 + $0x20] sm:$0xff]   ;;  %v1689_v13 = vld [vmem:[%s1924_s23 + $0x28] sm:$0xff]  }
  0x14   : > { %290 = vst.msk [vmem:[#allocation2 + $0x70] sm:$0xff] %vm275_vm1, %v1735_v2  ;;  %291 = vst.msk [vmem:[#allocation2 + $0x78] sm:$0xff] %vm275_vm1, %v1735_v2  ;;  %v1688_v12 = vld [vmem:[%s1924_s23 + $0xa0] sm:$0xff]   ;;  %v1690_v14 = vld [vmem:[%s1924_s23 + $0xa8] sm:$0xff]  }
  0x15   : > { %292 = vst.msk [vmem:[#allocation2 + $0x80] sm:$0xff] %vm275_vm1, %v1735_v2  ;;  %293 = vst.msk [vmem:[#allocation2 + $0x88] sm:$0xff] %vm275_vm1, %v1735_v2  ;;  %v1691_v15 = vld [vmem:[%s1924_s23 + $0x30] sm:$0xff]   ;;  %v1693_v17 = vld [vmem:[%s1924_s23 + $0x38] sm:$0xff]  }
  0x16   : > { %294 = vst.msk [vmem:[#allocation2 + $0x90] sm:$0xff] %vm275_vm1, %v1735_v2  ;;  %295 = vst.msk [vmem:[#allocation2 + $0x98] sm:$0xff] %vm275_vm1, %v1735_v2  ;;  %v1692_v16 = vld [vmem:[%s1924_s23 + $0xb0] sm:$0xff]   ;;  %v1694_v18 = vld [vmem:[%s1924_s23 + $0xb8] sm:$0xff]  }
  0x17   : > { %296 = vst.msk [vmem:[#allocation2 + $0xa0] sm:$0xff] %vm275_vm1, %v1735_v2  ;;  %297 = vst.msk [vmem:[#allocation2 + $0xa8] sm:$0xff] %vm275_vm1, %v1735_v2  ;;  %v1695_v19 = vld [vmem:[%s1924_s23 + $0x40] sm:$0xff]   ;;  %v1697_v21 = vld [vmem:[%s1924_s23 + $0x48] sm:$0xff]  }
  0x18   : > { %298 = vst.msk [vmem:[#allocation2 + $0xb0] sm:$0xff] %vm275_vm1, %v1735_v2  ;;  %299 = vst.msk [vmem:[#allocation2 + $0xb8] sm:$0xff] %vm275_vm1, %v1735_v2  ;;  %v1696_v20 = vld [vmem:[%s1924_s23 + $0xc0] sm:$0xff]   ;;  %v1698_v22 = vld [vmem:[%s1924_s23 + $0xc8] sm:$0xff]  }
  0x19   : > { %300 = vst.msk [vmem:[#allocation2 + $0xc0] sm:$0xff] %vm275_vm1, %v1735_v2  ;;  %301 = vst.msk [vmem:[#allocation2 + $0xc8] sm:$0xff] %vm275_vm1, %v1735_v2  ;;  %1591 = vmatmul.mubr.msk.bf16.gmra.mxu0 %vm629_vm2, %v1685_v9  ;;  %v1699_v23 = vld [vmem:[%s1924_s23 + $0x50] sm:$0xff]   ;;  %v1701_v25 = vld [vmem:[%s1924_s23 + $0x58] sm:$0xff]  }
  0x1a   : > { %302 = vst.msk [vmem:[#allocation2 + $0xd0] sm:$0xff] %vm275_vm1, %v1735_v2  ;;  %303 = vst.msk [vmem:[#allocation2 + $0xd8] sm:$0xff] %vm275_vm1, %v1735_v2  ;;  %1623 = vmatmul.mubr.msk.bf16.gmra.mxu1 %vm629_vm2, %v1686_v10  ;;  %1594 = vmatprep.mubr.msk.bf16.mxu0 %vm629_vm2, %v1687_v11  ;;  %v1700_v24 = vld [vmem:[%s1924_s23 + $0xd0] sm:$0xff]   ;;  %v1702_v26 = vld [vmem:[%s1924_s23 + $0xd8] sm:$0xff]  }
  0x1b   : > { %304 = vst.msk [vmem:[#allocation2 + $0xe0] sm:$0xff] %vm275_vm1, %v1735_v2  ;;  %305 = vst.msk [vmem:[#allocation2 + $0xe8] sm:$0xff] %vm275_vm1, %v1735_v2  ;;  %1626 = vmatprep.mubr.msk.bf16.mxu1 %vm629_vm2, %v1688_v12  ;;  %v1703_v27 = vld [vmem:[%s1924_s23 + $0x60] sm:$0xff]   ;;  %v1705_v29 = vld [vmem:[%s1924_s23 + $0x68] sm:$0xff]  }
  0x1c   : > { %306 = vst.msk [vmem:[#allocation2 + $0xf0] sm:$0xff] %vm275_vm1, %v1735_v2  ;;  %307 = vst.msk [vmem:[#allocation2 + $0xf8] sm:$0xff] %vm275_vm1, %v1735_v2  ;;  %v1704_v28 = vld [vmem:[%s1924_s23 + $0xe0] sm:$0xff]   ;;  %v1706_v30 = vld [vmem:[%s1924_s23 + $0xe8] sm:$0xff]  }
  0x1d   : > { %308 = vst.msk [vmem:[#allocation2 + $0x100] sm:$0xff] %vm275_vm1, %v1735_v2  ;;  %309 = vst.msk [vmem:[#allocation2 + $0x108] sm:$0xff] %vm275_vm1, %v1735_v2  ;;  %v1707_v31 = vld [vmem:[%s1924_s23 + $0x70] sm:$0xff]   ;;  %v1709_v33 = vld [vmem:[%s1924_s23 + $0x78] sm:$0xff]  }
  0x1e   : > { %310 = vst.msk [vmem:[#allocation2 + $0x110] sm:$0xff] %vm275_vm1, %v1735_v2  ;;  %311 = vst.msk [vmem:[#allocation2 + $0x118] sm:$0xff] %vm275_vm1, %v1735_v2  ;;  %v1708_v32 = vld [vmem:[%s1924_s23 + $0xf0] sm:$0xff]   ;;  %v1710_v34 = vld [vmem:[%s1924_s23 + $0xf8] sm:$0xff]  }
  0x1f   : > { %312 = vst.msk [vmem:[#allocation2 + $0x120] sm:$0xff] %vm275_vm1, %v1735_v2  ;;  %313 = vst.msk [vmem:[#allocation2 + $0x128] sm:$0xff] %vm275_vm1, %v1735_v2  ;;  %v342_v35 = vld [vmem:[#allocation2 + $0x10] sm:$0xff]  ;;  %v340_v38 = vld [vmem:[#allocation2] sm:$0xff] }
  0x20   : > { %314 = vst.msk [vmem:[#allocation2 + $0x130] sm:$0xff] %vm275_vm1, %v1735_v2  ;;  %315 = vst.msk [vmem:[#allocation2 + $0x138] sm:$0xff] %vm275_vm1, %v1735_v2  ;;  %v343_v44 = vld [vmem:[#allocation2 + $0x18] sm:$0xff]  ;;  %v341_v50 = vld [vmem:[#allocation2 + $0x8] sm:$0xff] }
  0x21   : > { %316 = vst.msk [vmem:[#allocation2 + $0x140] sm:$0xff] %vm275_vm1, %v1735_v2  ;;  %317 = vst.msk [vmem:[#allocation2 + $0x148] sm:$0xff] %vm275_vm1, %v1735_v2  ;;  %1595 = vmatmul.mubr.msk.bf16.gmra.mxu0 %vm629_vm2, %v1689_v13  ;;  %v346_v56 = vld [vmem:[#allocation2 + $0x30] sm:$0xff]  ;;  %v344_v63 = vld [vmem:[#allocation2 + $0x20] sm:$0xff] }
  0x22   : > { %318 = vst.msk [vmem:[#allocation2 + $0x150] sm:$0xff] %vm275_vm1, %v1735_v2  ;;  %319 = vst.msk [vmem:[#allocation2 + $0x158] sm:$0xff] %vm275_vm1, %v1735_v2  ;;  %1627 = vmatmul.mubr.msk.bf16.gmra.mxu1 %vm629_vm2, %v1690_v14  ;;  %1598 = vmatprep.mubr.msk.bf16.mxu0 %vm629_vm2, %v1691_v15  ;;  %v347_v6 = vld [vmem:[#allocation2 + $0x38] sm:$0xff] }
  0x23   : > { %320 = vst.msk [vmem:[#allocation2 + $0x160] sm:$0xff] %vm275_vm1, %v1735_v2  ;;  %321 = vst.msk [vmem:[#allocation2 + $0x168] sm:$0xff] %vm275_vm1, %v1735_v2  ;;  %1630 = vmatprep.mubr.msk.bf16.mxu1 %vm629_vm2, %v1692_v16  ;;  %v345_v16 = vld [vmem:[#allocation2 + $0x28] sm:$0xff] }
  0x24   : > { %322 = vst.msk [vmem:[#allocation2 + $0x170] sm:$0xff] %vm275_vm1, %v1735_v2  ;;  %323 = vst.msk [vmem:[#allocation2 + $0x178] sm:$0xff] %vm275_vm1, %v1735_v2  ;;  %v372_v41 = vld [vmem:[#allocation2 + $0x100] sm:$0xff]  ;;  %v373_v53 = vld [vmem:[#allocation2 + $0x108] sm:$0xff] }
  0x25   : > { %324 = vst.msk [vmem:[#allocation2 + $0x180] sm:$0xff] %vm275_vm1, %v1735_v2  ;;  %325 = vst.msk [vmem:[#allocation2 + $0x188] sm:$0xff] %vm275_vm1, %v1735_v2  ;;  %v374_v36 = vld [vmem:[#allocation2 + $0x110] sm:$0xff]  ;;  %v375_v47 = vld [vmem:[#allocation2 + $0x118] sm:$0xff] }
  0x26   : > { %326 = vst.msk [vmem:[#allocation2 + $0x190] sm:$0xff] %vm275_vm1, %v1735_v2  ;;  %327 = vst.msk [vmem:[#allocation2 + $0x198] sm:$0xff] %vm275_vm1, %v1735_v2 }
  0x27   : > { %328 = vst.msk [vmem:[#allocation2 + $0x1a0] sm:$0xff] %vm275_vm1, %v1735_v2  ;;  %329 = vst.msk [vmem:[#allocation2 + $0x1a8] sm:$0xff] %vm275_vm1, %v1735_v2  ;;  %v378_v59 = vld [vmem:[#allocation2 + $0x130] sm:$0xff]  ;;  %v379_v11 = vld [vmem:[#allocation2 + $0x138] sm:$0xff] }
  0x28   : > { %330 = vst.msk [vmem:[#allocation2 + $0x1b0] sm:$0xff] %vm275_vm1, %v1735_v2  ;;  %331 = vst.msk [vmem:[#allocation2 + $0x1b8] sm:$0xff] %vm275_vm1, %v1735_v2 }
  0x29   : > { %332 = vst.msk [vmem:[#allocation2 + $0x1c0] sm:$0xff] %vm275_vm1, %v1735_v2  ;;  %333 = vst.msk [vmem:[#allocation2 + $0x1c8] sm:$0xff] %vm275_vm1, %v1735_v2  ;;  %1599 = vmatmul.mubr.msk.bf16.gmra.mxu0 %vm629_vm2, %v1693_v17 }
  0x2a   : > { %334 = vst.msk [vmem:[#allocation2 + $0x1d0] sm:$0xff] %vm275_vm1, %v1735_v2  ;;  %335 = vst.msk [vmem:[#allocation2 + $0x1d8] sm:$0xff] %vm275_vm1, %v1735_v2  ;;  %1631 = vmatmul.mubr.msk.bf16.gmra.mxu1 %vm629_vm2, %v1694_v18  ;;  %1602 = vmatprep.mubr.msk.bf16.mxu0 %vm629_vm2, %v1695_v19 }
  0x2b   : > { %336 = vst.msk [vmem:[#allocation2 + $0x1e0] sm:$0xff] %vm275_vm1, %v1735_v2  ;;  %337 = vst.msk [vmem:[#allocation2 + $0x1e8] sm:$0xff] %vm275_vm1, %v1735_v2  ;;  %1634 = vmatprep.mubr.msk.bf16.mxu1 %vm629_vm2, %v1696_v20 }
  0x2c   : > { %338 = vst.msk [vmem:[#allocation2 + $0x1f0] sm:$0xff] %vm275_vm1, %v1735_v2  ;;  %339 = vst.msk [vmem:[#allocation2 + $0x1f8] sm:$0xff] %vm275_vm1, %v1735_v2  ;;  %v376_v2 = vld [vmem:[#allocation2 + $0x120] sm:$0xff] }
  0x31   : > { %1603 = vmatmul.mubr.msk.bf16.gmra.mxu0 %vm629_vm2, %v1697_v21  ;;  %v377_v21 = vld [vmem:[#allocation2 + $0x128] sm:$0xff] }
  0x32   : > { %1635 = vmatmul.mubr.msk.bf16.gmra.mxu1 %vm629_vm2, %v1698_v22  ;;  %1606 = vmatprep.mubr.msk.bf16.mxu0 %vm629_vm2, %v1699_v23 }
  0x33   : > { %1638 = vmatprep.mubr.msk.bf16.mxu1 %vm629_vm2, %v1700_v24 }
  0x39   : > { %1607 = vmatmul.mubr.msk.bf16.gmra.mxu0 %vm629_vm2, %v1701_v25 }
  0x3a   : > { %1639 = vmatmul.mubr.msk.bf16.gmra.mxu1 %vm629_vm2, %v1702_v26  ;;  %1610 = vmatprep.mubr.msk.bf16.mxu0 %vm629_vm2, %v1703_v27  ;;  %v350_v26 = vld [vmem:[#allocation2 + $0x50] sm:$0xff] }
  0x3b   : > { %1642 = vmatprep.mubr.msk.bf16.mxu1 %vm629_vm2, %v1704_v28 }
  0x41   : > { %1611 = vmatmul.mubr.msk.bf16.gmra.mxu0 %vm629_vm2, %v1705_v29 }
  0x42   : > { %1643 = vmatmul.mubr.msk.bf16.gmra.mxu1 %vm629_vm2, %v1706_v30  ;;  %1614 = vmatprep.mubr.msk.bf16.mxu0 %vm629_vm2, %v1707_v31  ;;  %v382_v31 = vld [vmem:[#allocation2 + $0x150] sm:$0xff] }
  0x43   : > { %1646 = vmatprep.mubr.msk.bf16.mxu1 %vm629_vm2, %v1708_v32 }
  0x49   : > { %1615 = vmatmul.mubr.msk.bf16.gmra.mxu0 %vm629_vm2, %v1709_v33 }
  0x4a   : > { %1647 = vmatmul.mubr.msk.bf16.gmra.mxu1 %vm629_vm2, %v1710_v34 }
  0xd1   : > { %v1588_v37 = vpop.f32.mrf.mxu0 }
  0xd2   : > { %v1021_v39 = vadd.f32 %v1588_v37, %v342_v35  ;;  %v1620_v40 = vpop.f32.mrf.mxu1 }
  0xd3   : > { %v1053_v42 = vadd.f32 %v1620_v40, %v374_v36  ;;  %v764_v43 = vpop.f32.mrf.mxu0  ;;  %v348_v36 = vld [vmem:[#allocation2 + $0x40] sm:$0xff] }
  0xd4   : > { %1086 = vst.msk [vmem:[#allocation2 + $0x10] sm:$0xff] %vm275_vm1, %v1021_v39  ;;  %v1019_v45 = vadd.f32 %v764_v43, %v340_v38  ;;  %v892_v46 = vpop.f32.mrf.mxu1 }
  0xd5   : > { %1118 = vst.msk [vmem:[#allocation2 + $0x110] sm:$0xff] %vm275_vm1, %v1053_v42  ;;  %v1051_v48 = vadd.f32 %v892_v46, %v372_v41  ;;  %v1589_v49 = vpop.f32.mrf.mxu0  ;;  %v380_v41 = vld [vmem:[#allocation2 + $0x140] sm:$0xff]  ;;  %v351_v46 = vld [vmem:[#allocation2 + $0x58] sm:$0xff] }
  0xd6   : > { %1084 = vst.msk [vmem:[#allocation2] sm:$0xff] %vm275_vm1, %v1019_v45  ;;  %v1022_v51 = vadd.f32 %v1589_v49, %v343_v44  ;;  %v1621_v52 = vpop.f32.mrf.mxu1 }
  0xd7   : > { %1116 = vst.msk [vmem:[#allocation2 + $0x100] sm:$0xff] %vm275_vm1, %v1051_v48  ;;  %v1054_v54 = vadd.f32 %v1621_v52, %v375_v47  ;;  %v767_v55 = vpop.f32.mrf.mxu0 }
  0xd8   : > { %1087 = vst.msk [vmem:[#allocation2 + $0x18] sm:$0xff] %vm275_vm1, %v1022_v51  ;;  %v1020_v57 = vadd.f32 %v767_v55, %v341_v50  ;;  %v895_v58 = vpop.f32.mrf.mxu1  ;;  %v383_v51 = vld [vmem:[#allocation2 + $0x158] sm:$0xff] }
  0xd9   : > { %1119 = vst.msk [vmem:[#allocation2 + $0x118] sm:$0xff] %vm275_vm1, %v1054_v54  ;;  %v1052_v61 = vadd.f32 %v895_v58, %v373_v53  ;;  %v1592_v62 = vpop.f32.mrf.mxu0 }
  0xda   : > { %1085 = vst.msk [vmem:[#allocation2 + $0x8] sm:$0xff] %vm275_vm1, %v1020_v57  ;;  %v1025_v0 = vadd.f32 %v1592_v62, %v346_v56  ;;  %v1624_v1 = vpop.f32.mrf.mxu1  ;;  %v349_v56 = vld [vmem:[#allocation2 + $0x48] sm:$0xff] }
  0xdb   : > { %v1153_v3 = vld [vmem:[#allocation2 + $0x10] sm:$0xff]  ;;  %1117 = vst.msk [vmem:[#allocation2 + $0x108] sm:$0xff] %vm275_vm1, %v1052_v61  ;;  %v1057_v4 = vadd.f32 %v1624_v1, %v378_v59  ;;  %v780_v5 = vpop.f32.mrf.mxu0  ;;  %v381_v62 = vld [vmem:[#allocation2 + $0x148] sm:$0xff] }
  0xdc   : > { %v1224_v7 = vadd.f32 %v1999_v60, %v1153_v3  ;;  %v1185_v8 = vld [vmem:[#allocation2 + $0x110] sm:$0xff]  ;;  %1090 = vst.msk [vmem:[#allocation2 + $0x30] sm:$0xff] %vm275_vm1, %v1025_v0  ;;  %v1023_v9 = vadd.f32 %v780_v5, %v344_v63  ;;  %v908_v10 = vpop.f32.mrf.mxu1 }
  0xdd   : > { %v1256_v12 = vadd.f32 %v1999_v60, %v1185_v8  ;;  %v1151_v13 = vld [vmem:[#allocation2] sm:$0xff]  ;;  %1122 = vst.msk [vmem:[#allocation2 + $0x130] sm:$0xff] %vm275_vm1, %v1057_v4  ;;  %v1055_v14 = vadd.f32 %v908_v10, %v376_v2  ;;  %v1593_v15 = vpop.f32.mrf.mxu0  ;;  %v354_v3 = vld [vmem:[#allocation2 + $0x70] sm:$0xff] }
  0xde   : > { %1288 = vst.msk [vmem:[%s2006_s29 + $0x10] sm:$0xff] %vm275_vm1, %v1224_v7  ;;  %v1222_v17 = vadd.f32 %v1999_v60, %v1151_v13  ;;  %v1183_v18 = vld [vmem:[#allocation2 + $0x100] sm:$0xff]  ;;  %1088 = vst.msk [vmem:[#allocation2 + $0x20] sm:$0xff] %vm275_vm1, %v1023_v9  ;;  %v1026_v19 = vadd.f32 %v1593_v15, %v347_v6  ;;  %v1625_v20 = vpop.f32.mrf.mxu1  ;;  %v386_v8 = vld [vmem:[#allocation2 + $0x170] sm:$0xff] }
  0xdf   : > { %1320 = vst.msk [vmem:[%s2006_s29 + $0x110] sm:$0xff] %vm275_vm1, %v1256_v12  ;;  %v1254_v22 = vadd.f32 %v1999_v60, %v1183_v18  ;;  %v1154_v23 = vld [vmem:[#allocation2 + $0x18] sm:$0xff]  ;;  %1120 = vst.msk [vmem:[#allocation2 + $0x120] sm:$0xff] %vm275_vm1, %v1055_v14  ;;  %v1058_v24 = vadd.f32 %v1625_v20, %v379_v11  ;;  %v783_v25 = vpop.f32.mrf.mxu0  ;;  %v352_v13 = vld [vmem:[#allocation2 + $0x60] sm:$0xff] }
  0xe0   : > { %1286 = vst.msk [vmem:[%s2006_s29] sm:$0xff] %vm275_vm1, %v1222_v17  ;;  %v1225_v27 = vadd.f32 %v1999_v60, %v1154_v23  ;;  %v1186_v28 = vld [vmem:[#allocation2 + $0x118] sm:$0xff]  ;;  %1091 = vst.msk [vmem:[#allocation2 + $0x38] sm:$0xff] %vm275_vm1, %v1026_v19  ;;  %v1024_v29 = vadd.f32 %v783_v25, %v345_v16  ;;  %v911_v30 = vpop.f32.mrf.mxu1  ;;  %v384_v18 = vld [vmem:[#allocation2 + $0x160] sm:$0xff] }
  0xe1   : > { %1318 = vst.msk [vmem:[%s2006_s29 + $0x100] sm:$0xff] %vm275_vm1, %v1254_v22  ;;  %v1257_v32 = vadd.f32 %v1999_v60, %v1186_v28  ;;  %v1152_v33 = vld [vmem:[#allocation2 + $0x8] sm:$0xff]  ;;  %1123 = vst.msk [vmem:[#allocation2 + $0x138] sm:$0xff] %vm275_vm1, %v1058_v24  ;;  %v1056_v34 = vadd.f32 %v911_v30, %v377_v21  ;;  %v1596_v35 = vpop.f32.mrf.mxu0  ;;  %v355_v23 = vld [vmem:[#allocation2 + $0x78] sm:$0xff] }
  0xe2   : > { %1289 = vst.msk [vmem:[%s2006_s29 + $0x18] sm:$0xff] %vm275_vm1, %v1225_v27  ;;  %v1223_v37 = vadd.f32 %v1999_v60, %v1152_v33  ;;  %v1184_v38 = vld [vmem:[#allocation2 + $0x108] sm:$0xff]  ;;  %1089 = vst.msk [vmem:[#allocation2 + $0x28] sm:$0xff] %vm275_vm1, %v1024_v29  ;;  %v1029_v39 = vadd.f32 %v1596_v35, %v350_v26  ;;  %v1628_v40 = vpop.f32.mrf.mxu1  ;;  %v387_v28 = vld [vmem:[#allocation2 + $0x178] sm:$0xff] }
  0xe3   : > { %1321 = vst.msk [vmem:[%s2006_s29 + $0x118] sm:$0xff] %vm275_vm1, %v1257_v32  ;;  %v1255_v42 = vadd.f32 %v1999_v60, %v1184_v38  ;;  %v1157_v43 = vld [vmem:[#allocation2 + $0x30] sm:$0xff]  ;;  %1121 = vst.msk [vmem:[#allocation2 + $0x128] sm:$0xff] %vm275_vm1, %v1056_v34  ;;  %v1061_v44 = vadd.f32 %v1628_v40, %v382_v31  ;;  %v796_v45 = vpop.f32.mrf.mxu0  ;;  %v353_v33 = vld [vmem:[#allocation2 + $0x68] sm:$0xff] }
  0xe4   : > { %1287 = vst.msk [vmem:[%s2006_s29 + $0x8] sm:$0xff] %vm275_vm1, %v1223_v37  ;;  %v1228_v47 = vadd.f32 %v1999_v60, %v1157_v43  ;;  %v1189_v48 = vld [vmem:[#allocation2 + $0x130] sm:$0xff]  ;;  %1094 = vst.msk [vmem:[#allocation2 + $0x50] sm:$0xff] %vm275_vm1, %v1029_v39  ;;  %v1027_v49 = vadd.f32 %v796_v45, %v348_v36  ;;  %v924_v50 = vpop.f32.mrf.mxu1  ;;  %v385_v38 = vld [vmem:[#allocation2 + $0x168] sm:$0xff] }
  0xe5   : > { %1319 = vst.msk [vmem:[%s2006_s29 + $0x108] sm:$0xff] %vm275_vm1, %v1255_v42  ;;  %v1260_v52 = vadd.f32 %v1999_v60, %v1189_v48  ;;  %v1155_v53 = vld [vmem:[#allocation2 + $0x20] sm:$0xff]  ;;  %1126 = vst.msk [vmem:[#allocation2 + $0x150] sm:$0xff] %vm275_vm1, %v1061_v44  ;;  %v1059_v54 = vadd.f32 %v924_v50, %v380_v41  ;;  %v1597_v55 = vpop.f32.mrf.mxu0  ;;  %v358_v43 = vld [vmem:[#allocation2 + $0x90] sm:$0xff] }
  0xe6   : > { %1292 = vst.msk [vmem:[%s2006_s29 + $0x30] sm:$0xff] %vm275_vm1, %v1228_v47  ;;  %v1226_v57 = vadd.f32 %v1999_v60, %v1155_v53  ;;  %v1187_v58 = vld [vmem:[#allocation2 + $0x120] sm:$0xff]  ;;  %1092 = vst.msk [vmem:[#allocation2 + $0x40] sm:$0xff] %vm275_vm1, %v1027_v49  ;;  %v1030_v59 = vadd.f32 %v1597_v55, %v351_v46  ;;  %v1629_v61 = vpop.f32.mrf.mxu1  ;;  %v390_v48 = vld [vmem:[#allocation2 + $0x190] sm:$0xff] }
  0xe7   : > { %1324 = vst.msk [vmem:[%s2006_s29 + $0x130] sm:$0xff] %vm275_vm1, %v1260_v52  ;;  %v1258_v63 = vadd.f32 %v1999_v60, %v1187_v58  ;;  %v1158_v0 = vld [vmem:[#allocation2 + $0x38] sm:$0xff]  ;;  %1124 = vst.msk [vmem:[#allocation2 + $0x140] sm:$0xff] %vm275_vm1, %v1059_v54  ;;  %v1062_v1 = vadd.f32 %v1629_v61, %v383_v51  ;;  %v799_v2 = vpop.f32.mrf.mxu0  ;;  %v356_v53 = vld [vmem:[#allocation2 + $0x80] sm:$0xff] }
  0xe8   : > { %1290 = vst.msk [vmem:[%s2006_s29 + $0x20] sm:$0xff] %vm275_vm1, %v1226_v57  ;;  %v1229_v4 = vadd.f32 %v1999_v60, %v1158_v0  ;;  %v1190_v5 = vld [vmem:[#allocation2 + $0x138] sm:$0xff]  ;;  %1095 = vst.msk [vmem:[#allocation2 + $0x58] sm:$0xff] %vm275_vm1, %v1030_v59  ;;  %v1028_v6 = vadd.f32 %v799_v2, %v349_v56  ;;  %v927_v7 = vpop.f32.mrf.mxu1  ;;  %v388_v58 = vld [vmem:[#allocation2 + $0x180] sm:$0xff] }
  0xe9   : > { %1322 = vst.msk [vmem:[%s2006_s29 + $0x120] sm:$0xff] %vm275_vm1, %v1258_v63  ;;  %v1261_v9 = vadd.f32 %v1999_v60, %v1190_v5  ;;  %v1156_v10 = vld [vmem:[#allocation2 + $0x28] sm:$0xff]  ;;  %1127 = vst.msk [vmem:[#allocation2 + $0x158] sm:$0xff] %vm275_vm1, %v1062_v1  ;;  %v1060_v11 = vadd.f32 %v927_v7, %v381_v62  ;;  %v1600_v12 = vpop.f32.mrf.mxu0  ;;  %v359_v0 = vld [vmem:[#allocation2 + $0x98] sm:$0xff] }
  0xea   : > { %1293 = vst.msk [vmem:[%s2006_s29 + $0x38] sm:$0xff] %vm275_vm1, %v1229_v4  ;;  %v1227_v14 = vadd.f32 %v1999_v60, %v1156_v10  ;;  %v1188_v15 = vld [vmem:[#allocation2 + $0x128] sm:$0xff]  ;;  %1093 = vst.msk [vmem:[#allocation2 + $0x48] sm:$0xff] %vm275_vm1, %v1028_v6  ;;  %v1033_v16 = vadd.f32 %v1600_v12, %v354_v3  ;;  %v1632_v17 = vpop.f32.mrf.mxu1  ;;  %v391_v5 = vld [vmem:[#allocation2 + $0x198] sm:$0xff] }
  0xeb   : > { %1325 = vst.msk [vmem:[%s2006_s29 + $0x138] sm:$0xff] %vm275_vm1, %v1261_v9  ;;  %v1259_v19 = vadd.f32 %v1999_v60, %v1188_v15  ;;  %v1161_v20 = vld [vmem:[#allocation2 + $0x50] sm:$0xff]  ;;  %1125 = vst.msk [vmem:[#allocation2 + $0x148] sm:$0xff] %vm275_vm1, %v1060_v11  ;;  %v1065_v21 = vadd.f32 %v1632_v17, %v386_v8  ;;  %v812_v22 = vpop.f32.mrf.mxu0  ;;  %v357_v10 = vld [vmem:[#allocation2 + $0x88] sm:$0xff] }
  0xec   : > { %1291 = vst.msk [vmem:[%s2006_s29 + $0x28] sm:$0xff] %vm275_vm1, %v1227_v14  ;;  %v1232_v24 = vadd.f32 %v1999_v60, %v1161_v20  ;;  %v1193_v25 = vld [vmem:[#allocation2 + $0x150] sm:$0xff]  ;;  %1098 = vst.msk [vmem:[#allocation2 + $0x70] sm:$0xff] %vm275_vm1, %v1033_v16  ;;  %v1031_v26 = vadd.f32 %v812_v22, %v352_v13  ;;  %v940_v27 = vpop.f32.mrf.mxu1  ;;  %v389_v15 = vld [vmem:[#allocation2 + $0x188] sm:$0xff] }
  0xed   : > { %1323 = vst.msk [vmem:[%s2006_s29 + $0x128] sm:$0xff] %vm275_vm1, %v1259_v19  ;;  %v1264_v29 = vadd.f32 %v1999_v60, %v1193_v25  ;;  %v1159_v30 = vld [vmem:[#allocation2 + $0x40] sm:$0xff]  ;;  %1130 = vst.msk [vmem:[#allocation2 + $0x170] sm:$0xff] %vm275_vm1, %v1065_v21  ;;  %v1063_v31 = vadd.f32 %v940_v27, %v384_v18  ;;  %v1601_v32 = vpop.f32.mrf.mxu0  ;;  %v362_v20 = vld [vmem:[#allocation2 + $0xb0] sm:$0xff] }
  0xee   : > { %1296 = vst.msk [vmem:[%s2006_s29 + $0x50] sm:$0xff] %vm275_vm1, %v1232_v24  ;;  %v1230_v34 = vadd.f32 %v1999_v60, %v1159_v30  ;;  %v1191_v35 = vld [vmem:[#allocation2 + $0x140] sm:$0xff]  ;;  %1096 = vst.msk [vmem:[#allocation2 + $0x60] sm:$0xff] %vm275_vm1, %v1031_v26  ;;  %v1034_v36 = vadd.f32 %v1601_v32, %v355_v23  ;;  %v1633_v37 = vpop.f32.mrf.mxu1  ;;  %v394_v25 = vld [vmem:[#allocation2 + $0x1b0] sm:$0xff] }
  0xef   : > { %1328 = vst.msk [vmem:[%s2006_s29 + $0x150] sm:$0xff] %vm275_vm1, %v1264_v29  ;;  %v1262_v39 = vadd.f32 %v1999_v60, %v1191_v35  ;;  %v1162_v40 = vld [vmem:[#allocation2 + $0x58] sm:$0xff]  ;;  %1128 = vst.msk [vmem:[#allocation2 + $0x160] sm:$0xff] %vm275_vm1, %v1063_v31  ;;  %v1066_v41 = vadd.f32 %v1633_v37, %v387_v28  ;;  %v815_v42 = vpop.f32.mrf.mxu0  ;;  %v360_v30 = vld [vmem:[#allocation2 + $0xa0] sm:$0xff] }
  0xf0   : > { %1294 = vst.msk [vmem:[%s2006_s29 + $0x40] sm:$0xff] %vm275_vm1, %v1230_v34  ;;  %v1233_v44 = vadd.f32 %v1999_v60, %v1162_v40  ;;  %v1194_v45 = vld [vmem:[#allocation2 + $0x158] sm:$0xff]  ;;  %1099 = vst.msk [vmem:[#allocation2 + $0x78] sm:$0xff] %vm275_vm1, %v1034_v36  ;;  %v1032_v46 = vadd.f32 %v815_v42, %v353_v33  ;;  %v943_v47 = vpop.f32.mrf.mxu1  ;;  %v392_v35 = vld [vmem:[#allocation2 + $0x1a0] sm:$0xff] }
  0xf1   : > { %1326 = vst.msk [vmem:[%s2006_s29 + $0x140] sm:$0xff] %vm275_vm1, %v1262_v39  ;;  %v1265_v49 = vadd.f32 %v1999_v60, %v1194_v45  ;;  %v1160_v50 = vld [vmem:[#allocation2 + $0x48] sm:$0xff]  ;;  %1131 = vst.msk [vmem:[#allocation2 + $0x178] sm:$0xff] %vm275_vm1, %v1066_v41  ;;  %v1064_v51 = vadd.f32 %v943_v47, %v385_v38  ;;  %v1604_v52 = vpop.f32.mrf.mxu0  ;;  %v363_v40 = vld [vmem:[#allocation2 + $0xb8] sm:$0xff] }
  0xf2   : > { %1297 = vst.msk [vmem:[%s2006_s29 + $0x58] sm:$0xff] %vm275_vm1, %v1233_v44  ;;  %v1231_v54 = vadd.f32 %v1999_v60, %v1160_v50  ;;  %v1192_v55 = vld [vmem:[#allocation2 + $0x148] sm:$0xff]  ;;  %1097 = vst.msk [vmem:[#allocation2 + $0x68] sm:$0xff] %vm275_vm1, %v1032_v46  ;;  %v1037_v56 = vadd.f32 %v1604_v52, %v358_v43  ;;  %v1636_v57 = vpop.f32.mrf.mxu1  ;;  %v395_v45 = vld [vmem:[#allocation2 + $0x1b8] sm:$0xff] }
  0xf3   : > { %1329 = vst.msk [vmem:[%s2006_s29 + $0x158] sm:$0xff] %vm275_vm1, %v1265_v49  ;;  %v1263_v59 = vadd.f32 %v1999_v60, %v1192_v55  ;;  %v1165_v61 = vld [vmem:[#allocation2 + $0x70] sm:$0xff]  ;;  %1129 = vst.msk [vmem:[#allocation2 + $0x168] sm:$0xff] %vm275_vm1, %v1064_v51  ;;  %v1069_v62 = vadd.f32 %v1636_v57, %v390_v48  ;;  %v828_v63 = vpop.f32.mrf.mxu0  ;;  %v361_v50 = vld [vmem:[#allocation2 + $0xa8] sm:$0xff] }
  0xf4   : > { %1295 = vst.msk [vmem:[%s2006_s29 + $0x48] sm:$0xff] %vm275_vm1, %v1231_v54  ;;  %v1236_v1 = vadd.f32 %v1999_v60, %v1165_v61  ;;  %v1197_v2 = vld [vmem:[#allocation2 + $0x170] sm:$0xff]  ;;  %1102 = vst.msk [vmem:[#allocation2 + $0x90] sm:$0xff] %vm275_vm1, %v1037_v56  ;;  %v1035_v3 = vadd.f32 %v828_v63, %v356_v53  ;;  %v956_v4 = vpop.f32.mrf.mxu1  ;;  %v393_v55 = vld [vmem:[#allocation2 + $0x1a8] sm:$0xff] }
  0xf5   : > { %1327 = vst.msk [vmem:[%s2006_s29 + $0x148] sm:$0xff] %vm275_vm1, %v1263_v59  ;;  %v1268_v6 = vadd.f32 %v1999_v60, %v1197_v2  ;;  %v1163_v7 = vld [vmem:[#allocation2 + $0x60] sm:$0xff]  ;;  %1134 = vst.msk [vmem:[#allocation2 + $0x190] sm:$0xff] %vm275_vm1, %v1069_v62  ;;  %v1067_v8 = vadd.f32 %v956_v4, %v388_v58  ;;  %v1605_v9 = vpop.f32.mrf.mxu0  ;;  %v366_v61 = vld [vmem:[#allocation2 + $0xd0] sm:$0xff] }
  0xf6   : > { %1300 = vst.msk [vmem:[%s2006_s29 + $0x70] sm:$0xff] %vm275_vm1, %v1236_v1  ;;  %v1234_v11 = vadd.f32 %v1999_v60, %v1163_v7  ;;  %v1195_v12 = vld [vmem:[#allocation2 + $0x160] sm:$0xff]  ;;  %1100 = vst.msk [vmem:[#allocation2 + $0x80] sm:$0xff] %vm275_vm1, %v1035_v3  ;;  %v1038_v13 = vadd.f32 %v1605_v9, %v359_v0  ;;  %v1637_v14 = vpop.f32.mrf.mxu1  ;;  %v398_v2 = vld [vmem:[#allocation2 + $0x1d0] sm:$0xff] }
  0xf7   : > { %1332 = vst.msk [vmem:[%s2006_s29 + $0x170] sm:$0xff] %vm275_vm1, %v1268_v6  ;;  %v1266_v16 = vadd.f32 %v1999_v60, %v1195_v12  ;;  %v1166_v17 = vld [vmem:[#allocation2 + $0x78] sm:$0xff]  ;;  %1132 = vst.msk [vmem:[#allocation2 + $0x180] sm:$0xff] %vm275_vm1, %v1067_v8  ;;  %v1070_v18 = vadd.f32 %v1637_v14, %v391_v5  ;;  %v831_v19 = vpop.f32.mrf.mxu0  ;;  %v364_v7 = vld [vmem:[#allocation2 + $0xc0] sm:$0xff] }
  0xf8   : > { %1298 = vst.msk [vmem:[%s2006_s29 + $0x60] sm:$0xff] %vm275_vm1, %v1234_v11  ;;  %v1237_v21 = vadd.f32 %v1999_v60, %v1166_v17  ;;  %v1198_v22 = vld [vmem:[#allocation2 + $0x178] sm:$0xff]  ;;  %1103 = vst.msk [vmem:[#allocation2 + $0x98] sm:$0xff] %vm275_vm1, %v1038_v13  ;;  %v1036_v23 = vadd.f32 %v831_v19, %v357_v10  ;;  %v959_v24 = vpop.f32.mrf.mxu1  ;;  %v396_v12 = vld [vmem:[#allocation2 + $0x1c0] sm:$0xff] }
  0xf9   : > { %1330 = vst.msk [vmem:[%s2006_s29 + $0x160] sm:$0xff] %vm275_vm1, %v1266_v16  ;;  %v1269_v26 = vadd.f32 %v1999_v60, %v1198_v22  ;;  %v1164_v27 = vld [vmem:[#allocation2 + $0x68] sm:$0xff]  ;;  %1135 = vst.msk [vmem:[#allocation2 + $0x198] sm:$0xff] %vm275_vm1, %v1070_v18  ;;  %v1068_v28 = vadd.f32 %v959_v24, %v389_v15  ;;  %v1608_v29 = vpop.f32.mrf.mxu0  ;;  %v367_v17 = vld [vmem:[#allocation2 + $0xd8] sm:$0xff] }
  0xfa   : > { %1301 = vst.msk [vmem:[%s2006_s29 + $0x78] sm:$0xff] %vm275_vm1, %v1237_v21  ;;  %v1235_v31 = vadd.f32 %v1999_v60, %v1164_v27  ;;  %v1196_v32 = vld [vmem:[#allocation2 + $0x168] sm:$0xff]  ;;  %1101 = vst.msk [vmem:[#allocation2 + $0x88] sm:$0xff] %vm275_vm1, %v1036_v23  ;;  %v1041_v33 = vadd.f32 %v1608_v29, %v362_v20  ;;  %v1640_v34 = vpop.f32.mrf.mxu1  ;;  %v399_v22 = vld [vmem:[#allocation2 + $0x1d8] sm:$0xff] }
  0xfb   : > { %1333 = vst.msk [vmem:[%s2006_s29 + $0x178] sm:$0xff] %vm275_vm1, %v1269_v26  ;;  %v1267_v36 = vadd.f32 %v1999_v60, %v1196_v32  ;;  %v1169_v37 = vld [vmem:[#allocation2 + $0x90] sm:$0xff]  ;;  %1133 = vst.msk [vmem:[#allocation2 + $0x188] sm:$0xff] %vm275_vm1, %v1068_v28  ;;  %v1073_v38 = vadd.f32 %v1640_v34, %v394_v25  ;;  %v844_v39 = vpop.f32.mrf.mxu0  ;;  %v365_v27 = vld [vmem:[#allocation2 + $0xc8] sm:$0xff] }
  0xfc   : > { %1299 = vst.msk [vmem:[%s2006_s29 + $0x68] sm:$0xff] %vm275_vm1, %v1235_v31  ;;  %v1240_v41 = vadd.f32 %v1999_v60, %v1169_v37  ;;  %v1201_v42 = vld [vmem:[#allocation2 + $0x190] sm:$0xff]  ;;  %1106 = vst.msk [vmem:[#allocation2 + $0xb0] sm:$0xff] %vm275_vm1, %v1041_v33  ;;  %v1039_v43 = vadd.f32 %v844_v39, %v360_v30  ;;  %v972_v44 = vpop.f32.mrf.mxu1  ;;  %v397_v32 = vld [vmem:[#allocation2 + $0x1c8] sm:$0xff] }
  0xfd   : > { %1331 = vst.msk [vmem:[%s2006_s29 + $0x168] sm:$0xff] %vm275_vm1, %v1267_v36  ;;  %v1272_v46 = vadd.f32 %v1999_v60, %v1201_v42  ;;  %v1167_v47 = vld [vmem:[#allocation2 + $0x80] sm:$0xff]  ;;  %1138 = vst.msk [vmem:[#allocation2 + $0x1b0] sm:$0xff] %vm275_vm1, %v1073_v38  ;;  %v1071_v48 = vadd.f32 %v972_v44, %v392_v35  ;;  %v1609_v49 = vpop.f32.mrf.mxu0  ;;  %v370_v37 = vld [vmem:[#allocation2 + $0xf0] sm:$0xff] }
  0xfe   : > { %1304 = vst.msk [vmem:[%s2006_s29 + $0x90] sm:$0xff] %vm275_vm1, %v1240_v41  ;;  %v1238_v51 = vadd.f32 %v1999_v60, %v1167_v47  ;;  %v1199_v52 = vld [vmem:[#allocation2 + $0x180] sm:$0xff]  ;;  %1104 = vst.msk [vmem:[#allocation2 + $0xa0] sm:$0xff] %vm275_vm1, %v1039_v43  ;;  %v1042_v53 = vadd.f32 %v1609_v49, %v363_v40  ;;  %v1641_v54 = vpop.f32.mrf.mxu1  ;;  %v402_v42 = vld [vmem:[#allocation2 + $0x1f0] sm:$0xff] }
  0xff   : > { %1336 = vst.msk [vmem:[%s2006_s29 + $0x190] sm:$0xff] %vm275_vm1, %v1272_v46  ;;  %v1270_v56 = vadd.f32 %v1999_v60, %v1199_v52  ;;  %v1170_v57 = vld [vmem:[#allocation2 + $0x98] sm:$0xff]  ;;  %1136 = vst.msk [vmem:[#allocation2 + $0x1a0] sm:$0xff] %vm275_vm1, %v1071_v48  ;;  %v1074_v58 = vadd.f32 %v1641_v54, %v395_v45  ;;  %v847_v59 = vpop.f32.mrf.mxu0  ;;  %v368_v47 = vld [vmem:[#allocation2 + $0xe0] sm:$0xff] }
 0x100   : > { %1302 = vst.msk [vmem:[%s2006_s29 + $0x80] sm:$0xff] %vm275_vm1, %v1238_v51  ;;  %v1241_v62 = vadd.f32 %v1999_v60, %v1170_v57  ;;  %v1202_v63 = vld [vmem:[#allocation2 + $0x198] sm:$0xff]  ;;  %1107 = vst.msk [vmem:[#allocation2 + $0xb8] sm:$0xff] %vm275_vm1, %v1042_v53  ;;  %v1040_v0 = vadd.f32 %v847_v59, %v361_v50  ;;  %v975_v1 = vpop.f32.mrf.mxu1  ;;  %v400_v52 = vld [vmem:[#allocation2 + $0x1e0] sm:$0xff] }
 0x101   : > { %1334 = vst.msk [vmem:[%s2006_s29 + $0x180] sm:$0xff] %vm275_vm1, %v1270_v56  ;;  %v1273_v3 = vadd.f32 %v1999_v60, %v1202_v63  ;;  %v1168_v4 = vld [vmem:[#allocation2 + $0x88] sm:$0xff]  ;;  %1139 = vst.msk [vmem:[#allocation2 + $0x1b8] sm:$0xff] %vm275_vm1, %v1074_v58  ;;  %v1072_v5 = vadd.f32 %v975_v1, %v393_v55  ;;  %v1612_v6 = vpop.f32.mrf.mxu0  ;;  %v371_v57 = vld [vmem:[#allocation2 + $0xf8] sm:$0xff] }
 0x102   : > { %1305 = vst.msk [vmem:[%s2006_s29 + $0x98] sm:$0xff] %vm275_vm1, %v1241_v62  ;;  %v1239_v8 = vadd.f32 %v1999_v60, %v1168_v4  ;;  %v1200_v9 = vld [vmem:[#allocation2 + $0x188] sm:$0xff]  ;;  %1105 = vst.msk [vmem:[#allocation2 + $0xa8] sm:$0xff] %vm275_vm1, %v1040_v0  ;;  %v1045_v10 = vadd.f32 %v1612_v6, %v366_v61  ;;  %v1644_v11 = vpop.f32.mrf.mxu1  ;;  %v403_v63 = vld [vmem:[#allocation2 + $0x1f8] sm:$0xff] }
 0x103   : > { %1337 = vst.msk [vmem:[%s2006_s29 + $0x198] sm:$0xff] %vm275_vm1, %v1273_v3  ;;  %v1271_v13 = vadd.f32 %v1999_v60, %v1200_v9  ;;  %v1173_v14 = vld [vmem:[#allocation2 + $0xb0] sm:$0xff]  ;;  %1137 = vst.msk [vmem:[#allocation2 + $0x1a8] sm:$0xff] %vm275_vm1, %v1072_v5  ;;  %v1077_v15 = vadd.f32 %v1644_v11, %v398_v2  ;;  %v860_v16 = vpop.f32.mrf.mxu0  ;;  %v369_v4 = vld [vmem:[#allocation2 + $0xe8] sm:$0xff] }
 0x104   : > { %1303 = vst.msk [vmem:[%s2006_s29 + $0x88] sm:$0xff] %vm275_vm1, %v1239_v8  ;;  %v1244_v18 = vadd.f32 %v1999_v60, %v1173_v14  ;;  %v1205_v19 = vld [vmem:[#allocation2 + $0x1b0] sm:$0xff]  ;;  %1110 = vst.msk [vmem:[#allocation2 + $0xd0] sm:$0xff] %vm275_vm1, %v1045_v10  ;;  %v1043_v20 = vadd.f32 %v860_v16, %v364_v7  ;;  %v988_v21 = vpop.f32.mrf.mxu1  ;;  %v401_v9 = vld [vmem:[#allocation2 + $0x1e8] sm:$0xff] }
 0x105   : > { %1335 = vst.msk [vmem:[%s2006_s29 + $0x188] sm:$0xff] %vm275_vm1, %v1271_v13  ;;  %v1276_v23 = vadd.f32 %v1999_v60, %v1205_v19  ;;  %v1171_v24 = vld [vmem:[#allocation2 + $0xa0] sm:$0xff]  ;;  %1142 = vst.msk [vmem:[#allocation2 + $0x1d0] sm:$0xff] %vm275_vm1, %v1077_v15  ;;  %v1075_v25 = vadd.f32 %v988_v21, %v396_v12  ;;  %v1613_v26 = vpop.f32.mrf.mxu0 }
 0x106   : > { %1308 = vst.msk [vmem:[%s2006_s29 + $0xb0] sm:$0xff] %vm275_vm1, %v1244_v18  ;;  %v1242_v28 = vadd.f32 %v1999_v60, %v1171_v24  ;;  %v1203_v29 = vld [vmem:[#allocation2 + $0x1a0] sm:$0xff]  ;;  %1108 = vst.msk [vmem:[#allocation2 + $0xc0] sm:$0xff] %vm275_vm1, %v1043_v20  ;;  %v1046_v30 = vadd.f32 %v1613_v26, %v367_v17  ;;  %v1645_v31 = vpop.f32.mrf.mxu1 }
 0x107   : > { %1340 = vst.msk [vmem:[%s2006_s29 + $0x1b0] sm:$0xff] %vm275_vm1, %v1276_v23  ;;  %v1274_v33 = vadd.f32 %v1999_v60, %v1203_v29  ;;  %v1174_v34 = vld [vmem:[#allocation2 + $0xb8] sm:$0xff]  ;;  %1140 = vst.msk [vmem:[#allocation2 + $0x1c0] sm:$0xff] %vm275_vm1, %v1075_v25  ;;  %v1078_v35 = vadd.f32 %v1645_v31, %v399_v22  ;;  %v863_v36 = vpop.f32.mrf.mxu0 }
 0x108   : > { %1306 = vst.msk [vmem:[%s2006_s29 + $0xa0] sm:$0xff] %vm275_vm1, %v1242_v28  ;;  %v1245_v38 = vadd.f32 %v1999_v60, %v1174_v34  ;;  %v1206_v39 = vld [vmem:[#allocation2 + $0x1b8] sm:$0xff]  ;;  %1111 = vst.msk [vmem:[#allocation2 + $0xd8] sm:$0xff] %vm275_vm1, %v1046_v30  ;;  %v1044_v40 = vadd.f32 %v863_v36, %v365_v27  ;;  %v991_v41 = vpop.f32.mrf.mxu1 }
 0x109   : > { %1338 = vst.msk [vmem:[%s2006_s29 + $0x1a0] sm:$0xff] %vm275_vm1, %v1274_v33  ;;  %v1277_v43 = vadd.f32 %v1999_v60, %v1206_v39  ;;  %v1172_v44 = vld [vmem:[#allocation2 + $0xa8] sm:$0xff]  ;;  %1143 = vst.msk [vmem:[#allocation2 + $0x1d8] sm:$0xff] %vm275_vm1, %v1078_v35  ;;  %v1076_v45 = vadd.f32 %v991_v41, %v397_v32  ;;  %v1616_v46 = vpop.f32.mrf.mxu0 }
 0x10a   : > { %1309 = vst.msk [vmem:[%s2006_s29 + $0xb8] sm:$0xff] %vm275_vm1, %v1245_v38  ;;  %v1243_v48 = vadd.f32 %v1999_v60, %v1172_v44  ;;  %v1204_v49 = vld [vmem:[#allocation2 + $0x1a8] sm:$0xff]  ;;  %1109 = vst.msk [vmem:[#allocation2 + $0xc8] sm:$0xff] %vm275_vm1, %v1044_v40  ;;  %v1049_v50 = vadd.f32 %v1616_v46, %v370_v37  ;;  %v1648_v51 = vpop.f32.mrf.mxu1 }
 0x10b   : > { %1341 = vst.msk [vmem:[%s2006_s29 + $0x1b8] sm:$0xff] %vm275_vm1, %v1277_v43  ;;  %v1275_v53 = vadd.f32 %v1999_v60, %v1204_v49  ;;  %v1177_v54 = vld [vmem:[#allocation2 + $0xd0] sm:$0xff]  ;;  %1141 = vst.msk [vmem:[#allocation2 + $0x1c8] sm:$0xff] %vm275_vm1, %v1076_v45  ;;  %v1081_v55 = vadd.f32 %v1648_v51, %v402_v42  ;;  %v876_v56 = vpop.f32.mrf.mxu0 }
 0x10c   : > { %1307 = vst.msk [vmem:[%s2006_s29 + $0xa8] sm:$0xff] %vm275_vm1, %v1243_v48  ;;  %v1248_v58 = vadd.f32 %v1999_v60, %v1177_v54  ;;  %v1209_v59 = vld [vmem:[#allocation2 + $0x1d0] sm:$0xff]  ;;  %1114 = vst.msk [vmem:[#allocation2 + $0xf0] sm:$0xff] %vm275_vm1, %v1049_v50  ;;  %v1047_v61 = vadd.f32 %v876_v56, %v368_v47  ;;  %v1004_v62 = vpop.f32.mrf.mxu1 }
 0x10d   : > { %1339 = vst.msk [vmem:[%s2006_s29 + $0x1a8] sm:$0xff] %vm275_vm1, %v1275_v53  ;;  %v1280_v0 = vadd.f32 %v1999_v60, %v1209_v59  ;;  %v1175_v1 = vld [vmem:[#allocation2 + $0xc0] sm:$0xff]  ;;  %1146 = vst.msk [vmem:[#allocation2 + $0x1f0] sm:$0xff] %vm275_vm1, %v1081_v55  ;;  %v1079_v2 = vadd.f32 %v1004_v62, %v400_v52  ;;  %v1617_v3 = vpop.f32.mrf.mxu0 }
 0x10e   : > { %1312 = vst.msk [vmem:[%s2006_s29 + $0xd0] sm:$0xff] %vm275_vm1, %v1248_v58  ;;  %v1246_v5 = vadd.f32 %v1999_v60, %v1175_v1  ;;  %v1207_v6 = vld [vmem:[#allocation2 + $0x1c0] sm:$0xff]  ;;  %1112 = vst.msk [vmem:[#allocation2 + $0xe0] sm:$0xff] %vm275_vm1, %v1047_v61  ;;  %v1050_v7 = vadd.f32 %v1617_v3, %v371_v57  ;;  %v1649_v8 = vpop.f32.mrf.mxu1 }
 0x10f   : > { %1344 = vst.msk [vmem:[%s2006_s29 + $0x1d0] sm:$0xff] %vm275_vm1, %v1280_v0  ;;  %v1278_v10 = vadd.f32 %v1999_v60, %v1207_v6  ;;  %v1178_v11 = vld [vmem:[#allocation2 + $0xd8] sm:$0xff]  ;;  %1144 = vst.msk [vmem:[#allocation2 + $0x1e0] sm:$0xff] %vm275_vm1, %v1079_v2  ;;  %v1082_v12 = vadd.f32 %v1649_v8, %v403_v63  ;;  %v879_v13 = vpop.f32.mrf.mxu0 }
 0x110   : > { %1310 = vst.msk [vmem:[%s2006_s29 + $0xc0] sm:$0xff] %vm275_vm1, %v1246_v5  ;;  %v1249_v14 = vadd.f32 %v1999_v60, %v1178_v11  ;;  %v1210_v15 = vld [vmem:[#allocation2 + $0x1d8] sm:$0xff]  ;;  %1115 = vst.msk [vmem:[#allocation2 + $0xf8] sm:$0xff] %vm275_vm1, %v1050_v7  ;;  %v1048_v16 = vadd.f32 %v879_v13, %v369_v4  ;;  %v1007_v17 = vpop.f32.mrf.mxu1 }
 0x111   : > { %1342 = vst.msk [vmem:[%s2006_s29 + $0x1c0] sm:$0xff] %vm275_vm1, %v1278_v10  ;;  %v1281_v18 = vadd.f32 %v1999_v60, %v1210_v15  ;;  %v1176_v19 = vld [vmem:[#allocation2 + $0xc8] sm:$0xff]  ;;  %1147 = vst.msk [vmem:[#allocation2 + $0x1f8] sm:$0xff] %vm275_vm1, %v1082_v12  ;;  %v1080_v20 = vadd.f32 %v1007_v17, %v401_v9 }
 0x112   : > { %1313 = vst.msk [vmem:[%s2006_s29 + $0xd8] sm:$0xff] %vm275_vm1, %v1249_v14  ;;  %v1247_v21 = vadd.f32 %v1999_v60, %v1176_v19  ;;  %v1208_v22 = vld [vmem:[#allocation2 + $0x1c8] sm:$0xff]  ;;  %1113 = vst.msk [vmem:[#allocation2 + $0xe8] sm:$0xff] %vm275_vm1, %v1048_v16 }
 0x113   : > { %1345 = vst.msk [vmem:[%s2006_s29 + $0x1d8] sm:$0xff] %vm275_vm1, %v1281_v18  ;;  %v1279_v23 = vadd.f32 %v1999_v60, %v1208_v22  ;;  %v1181_v24 = vld [vmem:[#allocation2 + $0xf0] sm:$0xff]  ;;  %1145 = vst.msk [vmem:[#allocation2 + $0x1e8] sm:$0xff] %vm275_vm1, %v1080_v20 }
 0x114   : > { %1311 = vst.msk [vmem:[%s2006_s29 + $0xc8] sm:$0xff] %vm275_vm1, %v1247_v21  ;;  %v1252_v25 = vadd.f32 %v1999_v60, %v1181_v24  ;;  %v1213_v26 = vld [vmem:[#allocation2 + $0x1f0] sm:$0xff] }
 0x115   : > { %1343 = vst.msk [vmem:[%s2006_s29 + $0x1c8] sm:$0xff] %vm275_vm1, %v1279_v23  ;;  %v1284_v27 = vadd.f32 %v1999_v60, %v1213_v26  ;;  %v1179_v28 = vld [vmem:[#allocation2 + $0xe0] sm:$0xff] }
 0x116   : > { %1316 = vst.msk [vmem:[%s2006_s29 + $0xf0] sm:$0xff] %vm275_vm1, %v1252_v25  ;;  %v1250_v29 = vadd.f32 %v1999_v60, %v1179_v28  ;;  %v1211_v30 = vld [vmem:[#allocation2 + $0x1e0] sm:$0xff] }
 0x117   : > { %1348 = vst.msk [vmem:[%s2006_s29 + $0x1f0] sm:$0xff] %vm275_vm1, %v1284_v27  ;;  %v1282_v31 = vadd.f32 %v1999_v60, %v1211_v30  ;;  %v1182_v32 = vld [vmem:[#allocation2 + $0xf8] sm:$0xff] }
 0x118   : > { %1314 = vst.msk [vmem:[%s2006_s29 + $0xe0] sm:$0xff] %vm275_vm1, %v1250_v29  ;;  %v1253_v33 = vadd.f32 %v1999_v60, %v1182_v32  ;;  %v1214_v34 = vld [vmem:[#allocation2 + $0x1f8] sm:$0xff] }
 0x119   : > { %1346 = vst.msk [vmem:[%s2006_s29 + $0x1e0] sm:$0xff] %vm275_vm1, %v1282_v31  ;;  %v1285_v35 = vadd.f32 %v1999_v60, %v1214_v34  ;;  %v1180_v36 = vld [vmem:[#allocation2 + $0xe8] sm:$0xff] }
 0x11a   : > { %1317 = vst.msk [vmem:[%s2006_s29 + $0xf8] sm:$0xff] %vm275_vm1, %v1253_v33  ;;  %v1251_v37 = vadd.f32 %v1999_v60, %v1180_v36  ;;  %v1212_v38 = vld [vmem:[#allocation2 + $0x1e8] sm:$0xff] }
 0x11b   : > { %1349 = vst.msk [vmem:[%s2006_s29 + $0x1f8] sm:$0xff] %vm275_vm1, %v1285_v35  ;;  %v1283_v39 = vadd.f32 %v1999_v60, %v1212_v38 }
 0x11c   : > { %1315 = vst.msk [vmem:[%s2006_s29 + $0xe8] sm:$0xff] %vm275_vm1, %v1251_v37 }
 0x11d   : > { %1347 = vst.msk [vmem:[%s2006_s29 + $0x1e8] sm:$0xff] %vm275_vm1, %v1283_v39 }
 0x11e PF: > { %s13_s14 = sadd.s32 1, %s1733_s14   ;;  %s2271_s12 = smov %s1729_s13 }
 0x11f   : > { %p10_p5 = scmp.ge.s32.totalorder %s13_s14, 4   ;;  %s2272_s13 = smov %s2274_s15 }
 0x121   :  { %12 = sbr.rel (!%p10_p5) target bundleno = 2 (0x2), region = 76 }

</bundles_post_ra>
